<compile_context>
chip_gen: v7x
topology: tpu7x:2x2x1
jax: 0.10.0
libtpu: 0.0.40
codegen_flags: <defaults>
</compile_context>

<pallas_src>
import functools

import jax
import jax.numpy as jnp
from jax.experimental import pallas as pl
from jax.experimental.pallas import tpu as pltpu

_LANE = 128      # lane width: channel dims are padded to a multiple of this
_COL_PAD = 16    # halo column offset; multiple of 16 -> aligned stores for f32 & bf16


def _round_up(x, m):
    return (x + m - 1) // m * m


# ---------------------------------------------------------------------------
# Fused ResBlock kernel (one grid step == one image)
# ---------------------------------------------------------------------------
def _resblock_kernel(x_ref, w1_ref, s1_ref, b1_ref, w2_ref, s2_ref, b2_ref,
                     *rest, stride, has_downsample):
    if has_downsample:
        (wd_ref, sd_ref, bd_ref,
         o_ref, xpad_ref, mid_ref, acc1_ref, acc2_ref) = rest
    else:
        (o_ref, xpad_ref, mid_ref, acc1_ref) = rest

    H, W, Cin = x_ref.shape[1], x_ref.shape[2], x_ref.shape[3]     # padded chans
    Ho, Wo, Cout = o_ref.shape[1], o_ref.shape[2], o_ref.shape[3]  # padded chans
    cdtype = x_ref.dtype
    M = Ho * Wo

    # Zero the halo buffers (borders must read as conv padding), then stage the
    # input tile at a sublane-aligned column offset so the store is unmasked.
    xpad_ref[...] = jnp.zeros_like(xpad_ref)
    mid_ref[...] = jnp.zeros_like(mid_ref)
    xpad_ref[1:H + 1, _COL_PAD:_COL_PAD + W, :] = x_ref[0]

    def tap(src_ref, dy, dx, s, n_out_h, n_out_w):
        # 3x3 tap (dy, dx) of a padded buffer whose image origin is
        # (row=1, col=_COL_PAD); returns a lane-contiguous (rows, C) slab.
        r0 = dy
        c0 = _COL_PAD - 1 + dx
        if s == 1:
            p = src_ref[r0:r0 + n_out_h, c0:c0 + n_out_w, :]
        else:  # stride > 1: sublane-strided read (correct, unoptimized)
            p = src_ref[r0:r0 + (n_out_h - 1) * s + 1:s,
                        c0:c0 + (n_out_w - 1) * s + 1:s, :]
        return p.reshape(n_out_h * n_out_w, src_ref.shape[-1])

    # ---- conv1 (+ optional downsample conv): share each tap load ----------
    acc1_ref[...] = jnp.zeros_like(acc1_ref)
    if has_downsample:
        acc2_ref[...] = jnp.zeros_like(acc2_ref)
    for dy in range(3):
        for dx in range(3):
            p = tap(xpad_ref, dy, dx, stride, Ho, Wo)
            k = (dy * 3 + dx) * Cin
            acc1_ref[...] += jnp.dot(p, w1_ref[k:k + Cin, :],
                                     preferred_element_type=jnp.float32)
            if has_downsample:
                acc2_ref[...] += jnp.dot(p, wd_ref[k:k + Cin, :],
                                         preferred_element_type=jnp.float32)

    # BN + ReLU in f32, then park the intermediate in VMEM (compute dtype).
    y1 = jnp.maximum(acc1_ref[...] * s1_ref[...] + b1_ref[...], 0.0)
    mid_ref[1:Ho + 1, _COL_PAD:_COL_PAD + Wo, :] = (
        y1.astype(cdtype).reshape(Ho, Wo, Cout))

    # ---- conv2 (stride 1) over the VMEM-resident intermediate -------------
    acc1_ref[...] = jnp.zeros_like(acc1_ref)
    for dy in range(3):
        for dx in range(3):
            p = tap(mid_ref, dy, dx, 1, Ho, Wo)
            k = (dy * 3 + dx) * Cout
            acc1_ref[...] += jnp.dot(p, w2_ref[k:k + Cout, :],
                                     preferred_element_type=jnp.float32)

    main = acc1_ref[...] * s2_ref[...] + b2_ref[...]
    if has_downsample:
        res = acc2_ref[...] * sd_ref[...] + bd_ref[...]
    else:
        res = x_ref[0].reshape(M, Cin).astype(jnp.float32)

    out = jnp.maximum(main + res, 0.0)
    o_ref[0] = out.reshape(Ho, Wo, Cout).astype(o_ref.dtype)


# ---------------------------------------------------------------------------
# Parameter folding / packing (done once, outside the hot path)
# ---------------------------------------------------------------------------
def _fold_bn(gamma, beta, mean, var, eps=1e-5):
    scale = gamma / jnp.sqrt(var + eps)
    return scale, beta - mean * scale


def pack_params(raw, *, compute_dtype=jnp.float32):
    """Fold BN into per-channel scale/bias, lane-pad channels, flatten conv
    weights (OIHW) into tap-major (9*Cin_p, Cout_p) matrices."""
    def pack_w(w_oihw, cin_p, cout_p):
        w = jnp.transpose(w_oihw, (2, 3, 1, 0))           # OIHW -> HWIO
        kh, kw, ci, co = w.shape
        w = jnp.pad(w, ((0, 0), (0, 0), (0, cin_p - ci), (0, cout_p - co)))
        return w.reshape(kh * kw * cin_p, cout_p).astype(compute_dtype)

    def pack_sb(bn_params, cout_p):
        s, b = _fold_bn(*bn_params)
        s = jnp.pad(s, (0, cout_p - s.shape[0])).reshape(1, cout_p)
        b = jnp.pad(b, (0, cout_p - b.shape[0])).reshape(1, cout_p)
        return s.astype(jnp.float32), b.astype(jnp.float32)

    cout, cin = raw["conv1"].shape[0], raw["conv1"].shape[1]
    cin_p, cout_p = _round_up(cin, _LANE), _round_up(cout, _LANE)
    p = {"cin": cin, "cout": cout, "cin_p": cin_p, "cout_p": cout_p,
         "compute_dtype": compute_dtype}
    p["w1"] = pack_w(raw["conv1"], cin_p, cout_p)
    p["s1"], p["b1"] = pack_sb(raw["bn1"], cout_p)
    p["w2"] = pack_w(raw["conv2"], cout_p, cout_p)
    p["s2"], p["b2"] = pack_sb(raw["bn2"], cout_p)
    if "convd" in raw:
        p["wd"] = pack_w(raw["convd"], cin_p, cout_p)
        p["sd"], p["bd"] = pack_sb(raw["bnd"], cout_p)
    return p


# ---------------------------------------------------------------------------
# Forward wrapper (NCHW in / NCHW out, PyTorch semantics)
# ---------------------------------------------------------------------------
def resblock_forward(x_nchw, p, *, stride=1):
    has_ds = "wd" in p
    N, Cin, H, W = x_nchw.shape
    Cout = p["cout"]
    cin_p, cout_p = p["cin_p"], p["cout_p"]
    cdtype = p["compute_dtype"]
    if not has_ds:
        assert stride == 1 and Cin == Cout, (
            "identity residual requires stride=1 and in_channel == out_channel")
    Ho = (H + 2 - 3) // stride + 1
    Wo = (W + 2 - 3) // stride + 1

    x = jnp.transpose(x_nchw, (0, 2, 3, 1))               # NCHW -> NHWC
    if cin_p != Cin:
        x = jnp.pad(x, ((0, 0), (0, 0), (0, 0), (0, cin_p - Cin)))
    x = x.astype(cdtype)

    def full(shape):
        zeros = (0,) * len(shape)
        return pl.BlockSpec(shape, lambda n, _z=zeros: _z)  # resident, DMA'd once

    in_specs = [pl.BlockSpec((1, H, W, cin_p), lambda n: (n, 0, 0, 0)),
                full(p["w1"].shape), full(p["s1"].shape), full(p["b1"].shape),
                full(p["w2"].shape), full(p["s2"].shape), full(p["b2"].shape)]
    args = [x, p["w1"], p["s1"], p["b1"], p["w2"], p["s2"], p["b2"]]
    if has_ds:
        in_specs += [full(p["wd"].shape), full(p["sd"].shape), full(p["bd"].shape)]
        args += [p["wd"], p["sd"], p["bd"]]

    scratch = [pltpu.VMEM((H + 2, W + 2 * _COL_PAD, cin_p), cdtype),     # halo'd x
               pltpu.VMEM((Ho + 2, Wo + 2 * _COL_PAD, cout_p), cdtype),  # halo'd mid
               pltpu.VMEM((Ho * Wo, cout_p), jnp.float32)]               # conv acc
    if has_ds:
        scratch.append(pltpu.VMEM((Ho * Wo, cout_p), jnp.float32))       # residual acc

    flops_m = 2 * N * Ho * Wo * 9 * cout_p
    flops = flops_m * cin_p + flops_m * cout_p + (flops_m * cin_p if has_ds else 0)
    bytes_accessed = int(
        x.size * x.dtype.itemsize
        + sum(p[k].size * p[k].dtype.itemsize for k in
              (("w1", "s1", "b1", "w2", "s2", "b2") +
               (("wd", "sd", "bd") if has_ds else ())))
        + N * Ho * Wo * cout_p * jnp.dtype(x_nchw.dtype).itemsize)

    out = pl.pallas_call(
        functools.partial(_resblock_kernel, stride=stride, has_downsample=has_ds),
        out_shape=jax.ShapeDtypeStruct((N, Ho, Wo, cout_p), x_nchw.dtype),
        grid=(N,),
        in_specs=in_specs,
        out_specs=pl.BlockSpec((1, Ho, Wo, cout_p), lambda n: (n, 0, 0, 0)),
        scratch_shapes=scratch,
        compiler_params=pltpu.CompilerParams(
            dimension_semantics=("parallel",),          # shard batch across TCs
            vmem_limit_bytes=48 * 1024 * 1024),         # safe on v5e/v6e/v7x
        cost_estimate=pl.CostEstimate(flops=flops, transcendentals=0,
                                      bytes_accessed=bytes_accessed),
    )(*args)

    out = out[..., :Cout]                                # drop lane padding
    return jnp.transpose(out, (0, 3, 1, 2))              # NHWC -> NCHW


# ---------------------------------------------------------------------------
# Deterministic parameters + pure-JAX reference
# ---------------------------------------------------------------------------
def make_raw_params(key, in_channel, out_channel, *, downsample):
    ks = jax.random.split(key, 6)

    def bn(k, c):
        kg, kb, km, kv = jax.random.split(k, 4)
        return (1.0 + 0.1 * jax.random.normal(kg, (c,), jnp.float32),
                0.1 * jax.random.normal(kb, (c,), jnp.float32),
                0.1 * jax.random.normal(km, (c,), jnp.float32),
                1.0 + 0.1 * jax.random.uniform(kv, (c,), jnp.float32))

    raw = {"conv1": 0.1 * jax.random.normal(ks[0], (out_channel, in_channel, 3, 3),
                                            jnp.float32),
           "bn1": bn(ks[1], out_channel),
           "conv2": 0.1 * jax.random.normal(ks[2], (out_channel, out_channel, 3, 3),
                                            jnp.float32),
           "bn2": bn(ks[3], out_channel)}
    if downsample:
        raw["convd"] = 0.1 * jax.random.normal(ks[4], (out_channel, in_channel, 3, 3),
                                               jnp.float32)
        raw["bnd"] = bn(ks[5], out_channel)
    return raw


def reference_forward(x_nchw, raw, *, stride=1):
    hi = jax.lax.Precision.HIGHEST
    x = jnp.transpose(x_nchw, (0, 2, 3, 1))

    def conv_bn(h, w_oihw, bn_params, s):
        gamma, beta, mean, var = bn_params
        w = jnp.transpose(w_oihw, (2, 3, 1, 0))
        y = jax.lax.conv_general_dilated(
            h, w, window_strides=(s, s), padding=((1, 1), (1, 1)),
            dimension_numbers=("NHWC", "HWIO", "NHWC"), precision=hi)
        sc = gamma / jnp.sqrt(var + 1e-5)
        return y * sc + (beta - mean * sc)

    out = jnp.maximum(conv_bn(x, raw["conv1"], raw["bn1"], stride), 0.0)
    main = conv_bn(out, raw["conv2"], raw["bn2"], 1)
    res = conv_bn(x, raw["convd"], raw["bnd"], stride) if "convd" in raw else x
    out = jnp.maximum(main + res, 0.0)
    return jnp.transpose(out, (0, 3, 1, 2))


# ---------------------------------------------------------------------------
if __name__ == "__main__":
    key = jax.random.PRNGKey(0)
    k1, k2, k3, k4 = jax.random.split(key, 4)
    N, H, W = 2, 16, 16

    # Case 1: channel-changing block (in=4 -> out=16) with conv3x3+BN downsample.
    Cin, Cout, stride = 4, 16, 1
    x = jax.random.normal(k1, (N, Cin, H, W), jnp.float32)
    raw = make_raw_params(k2, Cin, Cout, downsample=True)
    p = pack_params(raw, compute_dtype=jnp.float32)
    out = jax.block_until_ready(resblock_forward(x, p, stride=stride))
    ref = jax.block_until_ready(reference_forward(x, raw, stride=stride))
    assert out.shape == (N, Cout, H, W), out.shape
    assert bool(jnp.allclose(out, ref, atol=3e-2, rtol=3e-2)), "case1 mismatch"

    # Case 2: identity-residual block (in == out, stride 1) with bf16 MXU operands.
    Cio = 16
    x2 = jax.random.normal(k3, (N, Cio, H, W), jnp.float32)
    raw2 = make_raw_params(k4, Cio, Cio, downsample=False)
    p2 = pack_params(raw2, compute_dtype=jnp.bfloat16)
    out2 = jax.block_until_ready(resblock_forward(x2, p2, stride=1))
    ref2 = jax.block_until_ready(reference_forward(x2, raw2, stride=1))
    assert out2.shape == (N, Cio, H, W), out2.shape
    assert bool(jnp.allclose(out2, ref2, atol=1e-1, rtol=1e-1)), "case2 mismatch"

    print("KERNEL_OK")
</pallas_src>

<mosaic_0001>
module attributes {stable_mosaic.version = 11 : i64} {
  func.func @_resblock_kernel(%arg0: i32, %arg1: memref<1x16x16x128xf32, #tpu.memory_space<vmem>>, %arg2: memref<1152x128xf32, #tpu.memory_space<vmem>>, %arg3: memref<1x128xf32, #tpu.memory_space<vmem>>, %arg4: memref<1x128xf32, #tpu.memory_space<vmem>>, %arg5: memref<1152x128xf32, #tpu.memory_space<vmem>>, %arg6: memref<1x128xf32, #tpu.memory_space<vmem>>, %arg7: memref<1x128xf32, #tpu.memory_space<vmem>>, %arg8: memref<1152x128xf32, #tpu.memory_space<vmem>>, %arg9: memref<1x128xf32, #tpu.memory_space<vmem>>, %arg10: memref<1x128xf32, #tpu.memory_space<vmem>>, %arg11: memref<1x16x16x128xf32, #tpu.memory_space<vmem>>, %arg12: memref<18x48x128xf32, #tpu.memory_space<vmem>>, %arg13: memref<18x48x128xf32, #tpu.memory_space<vmem>>, %arg14: memref<256x128xf32, #tpu.memory_space<vmem>>, %arg15: memref<256x128xf32, #tpu.memory_space<vmem>>) attributes {dimension_semantics = [#tpu.dimension_semantics<parallel>], iteration_bounds = array<i64: 2>, scalar_prefetch = 0 : i64, scratch_operands = 4 : i64, tpu.core_type = #tpu.core_type<tc>, window_params = [{transform_indices = @transform_0, window_bounds = array<i64: 1, 16, 16, 128>}, {pipeline_mode = #tpu.pipeline_mode<synchronous>, transform_indices = @transform_1, window_bounds = array<i64: 1152, 128>}, {pipeline_mode = #tpu.pipeline_mode<synchronous>, transform_indices = @transform_2, window_bounds = array<i64: 1, 128>}, {pipeline_mode = #tpu.pipeline_mode<synchronous>, transform_indices = @transform_3, window_bounds = array<i64: 1, 128>}, {pipeline_mode = #tpu.pipeline_mode<synchronous>, transform_indices = @transform_4, window_bounds = array<i64: 1152, 128>}, {pipeline_mode = #tpu.pipeline_mode<synchronous>, transform_indices = @transform_5, window_bounds = array<i64: 1, 128>}, {pipeline_mode = #tpu.pipeline_mode<synchronous>, transform_indices = @transform_6, window_bounds = array<i64: 1, 128>}, {pipeline_mode = #tpu.pipeline_mode<synchronous>, transform_indices = @transform_7, window_bounds = array<i64: 1152, 128>}, {pipeline_mode = #tpu.pipeline_mode<synchronous>, transform_indices = @transform_8, window_bounds = array<i64: 1, 128>}, {pipeline_mode = #tpu.pipeline_mode<synchronous>, transform_indices = @transform_9, window_bounds = array<i64: 1, 128>}, {transform_indices = @transform_10, window_bounds = array<i64: 1, 16, 16, 128>}]} {
    %cst = arith.constant 0.000000e+00 : f32
    %0 = vector.broadcast %cst : f32 to vector<18x48x128xf32>
    %c0 = arith.constant 0 : index
    %c0_0 = arith.constant 0 : index
    %c0_1 = arith.constant 0 : index
    %1 = vector.load %arg12[%c0, %c0_0, %c0_1] : memref<18x48x128xf32, #tpu.memory_space<vmem>>, vector<18x48x128xf32>
    tpu.vector_store %arg12[%c0, %c0_0, %c0_1], %0 {strides = array<i32>} : memref<18x48x128xf32, #tpu.memory_space<vmem>>, vector<18x48x128xf32>,
    %cst_2 = arith.constant 0.000000e+00 : f32
    %2 = vector.broadcast %cst_2 : f32 to vector<18x48x128xf32>
    %c0_3 = arith.constant 0 : index
    %c0_4 = arith.constant 0 : index
    %c0_5 = arith.constant 0 : index
    %3 = vector.load %arg13[%c0_3, %c0_4, %c0_5] : memref<18x48x128xf32, #tpu.memory_space<vmem>>, vector<18x48x128xf32>
    tpu.vector_store %arg13[%c0_3, %c0_4, %c0_5], %2 {strides = array<i32>} : memref<18x48x128xf32, #tpu.memory_space<vmem>>, vector<18x48x128xf32>,
    %c0_6 = arith.constant 0 : index
    %c0_7 = arith.constant 0 : index
    %c0_8 = arith.constant 0 : index
    %c0_9 = arith.constant 0 : index
    %4 = vector.load %arg1[%c0_6, %c0_7, %c0_8, %c0_9] : memref<1x16x16x128xf32, #tpu.memory_space<vmem>>, vector<1x16x16x128xf32>
    %5 = vector.shape_cast %4 : vector<1x16x16x128xf32> to vector<16x16x128xf32>
    %c1 = arith.constant 1 : index
    %c16 = arith.constant 16 : index
    %c0_10 = arith.constant 0 : index
    %6 = vector.load %arg12[%c1, %c16, %c0_10] : memref<18x48x128xf32, #tpu.memory_space<vmem>>, vector<16x16x128xf32>
    tpu.vector_store %arg12[%c1, %c16, %c0_10], %5 {strides = array<i32>} : memref<18x48x128xf32, #tpu.memory_space<vmem>>, vector<16x16x128xf32>,
    %cst_11 = arith.constant 0.000000e+00 : f32
    %7 = vector.broadcast %cst_11 : f32 to vector<256x128xf32>
    %c0_12 = arith.constant 0 : index
    %c0_13 = arith.constant 0 : index
    %8 = vector.load %arg14[%c0_12, %c0_13] : memref<256x128xf32, #tpu.memory_space<vmem>>, vector<256x128xf32>
    tpu.vector_store %arg14[%c0_12, %c0_13], %7 {strides = array<i32>} : memref<256x128xf32, #tpu.memory_space<vmem>>, vector<256x128xf32>,
    %cst_14 = arith.constant 0.000000e+00 : f32
    %9 = vector.broadcast %cst_14 : f32 to vector<256x128xf32>
    %c0_15 = arith.constant 0 : index
    %c0_16 = arith.constant 0 : index
    %10 = vector.load %arg15[%c0_15, %c0_16] : memref<256x128xf32, #tpu.memory_space<vmem>>, vector<256x128xf32>
    tpu.vector_store %arg15[%c0_15, %c0_16], %9 {strides = array<i32>} : memref<256x128xf32, #tpu.memory_space<vmem>>, vector<256x128xf32>,
    %c0_17 = arith.constant 0 : index
    %c15 = arith.constant 15 : index
    %c0_18 = arith.constant 0 : index
    %11 = vector.load %arg12[%c0_17, %c15, %c0_18] : memref<18x48x128xf32, #tpu.memory_space<vmem>>, vector<16x16x128xf32>
    %12 = vector.shape_cast %11 : vector<16x16x128xf32> to vector<256x128xf32>
    %c0_19 = arith.constant 0 : index
    %c0_20 = arith.constant 0 : index
    %13 = vector.load %arg14[%c0_19, %c0_20] : memref<256x128xf32, #tpu.memory_space<vmem>>, vector<256x128xf32>
    %c0_21 = arith.constant 0 : index
    %c0_22 = arith.constant 0 : index
    %14 = vector.load %arg2[%c0_21, %c0_22] : memref<1152x128xf32, #tpu.memory_space<vmem>>, vector<128x128xf32>
    %cst_23 = arith.constant dense<0.000000e+00> : vector<256x128xf32>
    %15 = tpu.matmul %12, %14, %cst_23 {dimension_numbers = #tpu.dot_dimension_numbers<[1], [0], [0], [1], [0, 0, 1, 1], [], []>} : vector<256x128xf32>, vector<128x128xf32>, vector<256x128xf32> -> vector<256x128xf32>
    %16 = arith.addf %13, %15 : vector<256x128xf32>
    %c0_24 = arith.constant 0 : index
    %c0_25 = arith.constant 0 : index
    %17 = vector.load %arg14[%c0_24, %c0_25] : memref<256x128xf32, #tpu.memory_space<vmem>>, vector<256x128xf32>
    tpu.vector_store %arg14[%c0_24, %c0_25], %16 {strides = array<i32>} : memref<256x128xf32, #tpu.memory_space<vmem>>, vector<256x128xf32>,
    %c0_26 = arith.constant 0 : index
    %c0_27 = arith.constant 0 : index
    %18 = vector.load %arg15[%c0_26, %c0_27] : memref<256x128xf32, #tpu.memory_space<vmem>>, vector<256x128xf32>
    %c0_28 = arith.constant 0 : index
    %c0_29 = arith.constant 0 : index
    %19 = vector.load %arg8[%c0_28, %c0_29] : memref<1152x128xf32, #tpu.memory_space<vmem>>, vector<128x128xf32>
    %cst_30 = arith.constant dense<0.000000e+00> : vector<256x128xf32>
    %20 = tpu.matmul %12, %19, %cst_30 {dimension_numbers = #tpu.dot_dimension_numbers<[1], [0], [0], [1], [0, 0, 1, 1], [], []>} : vector<256x128xf32>, vector<128x128xf32>, vector<256x128xf32> -> vector<256x128xf32>
    %21 = arith.addf %18, %20 : vector<256x128xf32>
    %c0_31 = arith.constant 0 : index
    %c0_32 = arith.constant 0 : index
    %22 = vector.load %arg15[%c0_31, %c0_32] : memref<256x128xf32, #tpu.memory_space<vmem>>, vector<256x128xf32>
    tpu.vector_store %arg15[%c0_31, %c0_32], %21 {strides = array<i32>} : memref<256x128xf32, #tpu.memory_space<vmem>>, vector<256x128xf32>,
    %c0_33 = arith.constant 0 : index
    %c16_34 = arith.constant 16 : index
    %c0_35 = arith.constant 0 : index
    %23 = vector.load %arg12[%c0_33, %c16_34, %c0_35] : memref<18x48x128xf32, #tpu.memory_space<vmem>>, vector<16x16x128xf32>
    %24 = vector.shape_cast %23 : vector<16x16x128xf32> to vector<256x128xf32>
    %c0_36 = arith.constant 0 : index
    %c0_37 = arith.constant 0 : index
    %25 = vector.load %arg14[%c0_36, %c0_37] : memref<256x128xf32, #tpu.memory_space<vmem>>, vector<256x128xf32>
    %c128 = arith.constant 128 : index
    %c0_38 = arith.constant 0 : index
    %26 = vector.load %arg2[%c128, %c0_38] : memref<1152x128xf32, #tpu.memory_space<vmem>>, vector<128x128xf32>
    %cst_39 = arith.constant dense<0.000000e+00> : vector<256x128xf32>
    %27 = tpu.matmul %24, %26, %cst_39 {dimension_numbers = #tpu.dot_dimension_numbers<[1], [0], [0], [1], [0, 0, 1, 1], [], []>} : vector<256x128xf32>, vector<128x128xf32>, vector<256x128xf32> -> vector<256x128xf32>
    %28 = arith.addf %25, %27 : vector<256x128xf32>
    %c0_40 = arith.constant 0 : index
    %c0_41 = arith.constant 0 : index
    %29 = vector.load %arg14[%c0_40, %c0_41] : memref<256x128xf32, #tpu.memory_space<vmem>>, vector<256x128xf32>
    tpu.vector_store %arg14[%c0_40, %c0_41], %28 {strides = array<i32>} : memref<256x128xf32, #tpu.memory_space<vmem>>, vector<256x128xf32>,
    %c0_42 = arith.constant 0 : index
    %c0_43 = arith.constant 0 : index
    %30 = vector.load %arg15[%c0_42, %c0_43] : memref<256x128xf32, #tpu.memory_space<vmem>>, vector<256x128xf32>
    %c128_44 = arith.constant 128 : index
    %c0_45 = arith.constant 0 : index
    %31 = vector.load %arg8[%c128_44, %c0_45] : memref<1152x128xf32, #tpu.memory_space<vmem>>, vector<128x128xf32>
    %cst_46 = arith.constant dense<0.000000e+00> : vector<256x128xf32>
    %32 = tpu.matmul %24, %31, %cst_46 {dimension_numbers = #tpu.dot_dimension_numbers<[1], [0], [0], [1], [0, 0, 1, 1], [], []>} : vector<256x128xf32>, vector<128x128xf32>, vector<256x128xf32> -> vector<256x128xf32>
    %33 = arith.addf %30, %32 : vector<256x128xf32>
    %c0_47 = arith.constant 0 : index
    %c0_48 = arith.constant 0 : index
    %34 = vector.load %arg15[%c0_47, %c0_48] : memref<256x128xf32, #tpu.memory_space<vmem>>, vector<256x128xf32>
    tpu.vector_store %arg15[%c0_47, %c0_48], %33 {strides = array<i32>} : memref<256x128xf32, #tpu.memory_space<vmem>>, vector<256x128xf32>,
    %c0_49 = arith.constant 0 : index
    %c17 = arith.constant 17 : index
    %c0_50 = arith.constant 0 : index
    %35 = vector.load %arg12[%c0_49, %c17, %c0_50] : memref<18x48x128xf32, #tpu.memory_space<vmem>>, vector<16x16x128xf32>
    %36 = vector.shape_cast %35 : vector<16x16x128xf32> to vector<256x128xf32>
    %c0_51 = arith.constant 0 : index
    %c0_52 = arith.constant 0 : index
    %37 = vector.load %arg14[%c0_51, %c0_52] : memref<256x128xf32, #tpu.memory_space<vmem>>, vector<256x128xf32>
    %c256 = arith.constant 256 : index
    %c0_53 = arith.constant 0 : index
    %38 = vector.load %arg2[%c256, %c0_53] : memref<1152x128xf32, #tpu.memory_space<vmem>>, vector<128x128xf32>
    %cst_54 = arith.constant dense<0.000000e+00> : vector<256x128xf32>
    %39 = tpu.matmul %36, %38, %cst_54 {dimension_numbers = #tpu.dot_dimension_numbers<[1], [0], [0], [1], [0, 0, 1, 1], [], []>} : vector<256x128xf32>, vector<128x128xf32>, vector<256x128xf32> -> vector<256x128xf32>
    %40 = arith.addf %37, %39 : vector<256x128xf32>
    %c0_55 = arith.constant 0 : index
    %c0_56 = arith.constant 0 : index
    %41 = vector.load %arg14[%c0_55, %c0_56] : memref<256x128xf32, #tpu.memory_space<vmem>>, vector<256x128xf32>
    tpu.vector_store %arg14[%c0_55, %c0_56], %40 {strides = array<i32>} : memref<256x128xf32, #tpu.memory_space<vmem>>, vector<256x128xf32>,
    %c0_57 = arith.constant 0 : index
    %c0_58 = arith.constant 0 : index
    %42 = vector.load %arg15[%c0_57, %c0_58] : memref<256x128xf32, #tpu.memory_space<vmem>>, vector<256x128xf32>
    %c256_59 = arith.constant 256 : index
    %c0_60 = arith.constant 0 : index
    %43 = vector.load %arg8[%c256_59, %c0_60] : memref<1152x128xf32, #tpu.memory_space<vmem>>, vector<128x128xf32>
    %cst_61 = arith.constant dense<0.000000e+00> : vector<256x128xf32>
    %44 = tpu.matmul %36, %43, %cst_61 {dimension_numbers = #tpu.dot_dimension_numbers<[1], [0], [0], [1], [0, 0, 1, 1], [], []>} : vector<256x128xf32>, vector<128x128xf32>, vector<256x128xf32> -> vector<256x128xf32>
    %45 = arith.addf %42, %44 : vector<256x128xf32>
    %c0_62 = arith.constant 0 : index
    %c0_63 = arith.constant 0 : index
    %46 = vector.load %arg15[%c0_62, %c0_63] : memref<256x128xf32, #tpu.memory_space<vmem>>, vector<256x128xf32>
    tpu.vector_store %arg15[%c0_62, %c0_63], %45 {strides = array<i32>} : memref<256x128xf32, #tpu.memory_space<vmem>>, vector<256x128xf32>,
    %c1_64 = arith.constant 1 : index
    %c15_65 = arith.constant 15 : index
    %c0_66 = arith.constant 0 : index
    %47 = vector.load %arg12[%c1_64, %c15_65, %c0_66] : memref<18x48x128xf32, #tpu.memory_space<vmem>>, vector<16x16x128xf32>
    %48 = vector.shape_cast %47 : vector<16x16x128xf32> to vector<256x128xf32>
    %c0_67 = arith.constant 0 : index
    %c0_68 = arith.constant 0 : index
    %49 = vector.load %arg14[%c0_67, %c0_68] : memref<256x128xf32, #tpu.memory_space<vmem>>, vector<256x128xf32>
    %c384 = arith.constant 384 : index
    %c0_69 = arith.constant 0 : index
    %50 = vector.load %arg2[%c384, %c0_69] : memref<1152x128xf32, #tpu.memory_space<vmem>>, vector<128x128xf32>
    %cst_70 = arith.constant dense<0.000000e+00> : vector<256x128xf32>
    %51 = tpu.matmul %48, %50, %cst_70 {dimension_numbers = #tpu.dot_dimension_numbers<[1], [0], [0], [1], [0, 0, 1, 1], [], []>} : vector<256x128xf32>, vector<128x128xf32>, vector<256x128xf32> -> vector<256x128xf32>
    %52 = arith.addf %49, %51 : vector<256x128xf32>
    %c0_71 = arith.constant 0 : index
    %c0_72 = arith.constant 0 : index
    %53 = vector.load %arg14[%c0_71, %c0_72] : memref<256x128xf32, #tpu.memory_space<vmem>>, vector<256x128xf32>
    tpu.vector_store %arg14[%c0_71, %c0_72], %52 {strides = array<i32>} : memref<256x128xf32, #tpu.memory_space<vmem>>, vector<256x128xf32>,
    %c0_73 = arith.constant 0 : index
    %c0_74 = arith.constant 0 : index
    %54 = vector.load %arg15[%c0_73, %c0_74] : memref<256x128xf32, #tpu.memory_space<vmem>>, vector<256x128xf32>
    %c384_75 = arith.constant 384 : index
    %c0_76 = arith.constant 0 : index
    %55 = vector.load %arg8[%c384_75, %c0_76] : memref<1152x128xf32, #tpu.memory_space<vmem>>, vector<128x128xf32>
    %cst_77 = arith.constant dense<0.000000e+00> : vector<256x128xf32>
    %56 = tpu.matmul %48, %55, %cst_77 {dimension_numbers = #tpu.dot_dimension_numbers<[1], [0], [0], [1], [0, 0, 1, 1], [], []>} : vector<256x128xf32>, vector<128x128xf32>, vector<256x128xf32> -> vector<256x128xf32>
    %57 = arith.addf %54, %56 : vector<256x128xf32>
    %c0_78 = arith.constant 0 : index
    %c0_79 = arith.constant 0 : index
    %58 = vector.load %arg15[%c0_78, %c0_79] : memref<256x128xf32, #tpu.memory_space<vmem>>, vector<256x128xf32>
    tpu.vector_store %arg15[%c0_78, %c0_79], %57 {strides = array<i32>} : memref<256x128xf32, #tpu.memory_space<vmem>>, vector<256x128xf32>,
    %c1_80 = arith.constant 1 : index
    %c16_81 = arith.constant 16 : index
    %c0_82 = arith.constant 0 : index
    %59 = vector.load %arg12[%c1_80, %c16_81, %c0_82] : memref<18x48x128xf32, #tpu.memory_space<vmem>>, vector<16x16x128xf32>
    %60 = vector.shape_cast %59 : vector<16x16x128xf32> to vector<256x128xf32>
    %c0_83 = arith.constant 0 : index
    %c0_84 = arith.constant 0 : index
    %61 = vector.load %arg14[%c0_83, %c0_84] : memref<256x128xf32, #tpu.memory_space<vmem>>, vector<256x128xf32>
    %c512 = arith.constant 512 : index
    %c0_85 = arith.constant 0 : index
    %62 = vector.load %arg2[%c512, %c0_85] : memref<1152x128xf32, #tpu.memory_space<vmem>>, vector<128x128xf32>
    %cst_86 = arith.constant dense<0.000000e+00> : vector<256x128xf32>
    %63 = tpu.matmul %60, %62, %cst_86 {dimension_numbers = #tpu.dot_dimension_numbers<[1], [0], [0], [1], [0, 0, 1, 1], [], []>} : vector<256x128xf32>, vector<128x128xf32>, vector<256x128xf32> -> vector<256x128xf32>
    %64 = arith.addf %61, %63 : vector<256x128xf32>
    %c0_87 = arith.constant 0 : index
    %c0_88 = arith.constant 0 : index
    %65 = vector.load %arg14[%c0_87, %c0_88] : memref<256x128xf32, #tpu.memory_space<vmem>>, vector<256x128xf32>
    tpu.vector_store %arg14[%c0_87, %c0_88], %64 {strides = array<i32>} : memref<256x128xf32, #tpu.memory_space<vmem>>, vector<256x128xf32>,
    %c0_89 = arith.constant 0 : index
    %c0_90 = arith.constant 0 : index
    %66 = vector.load %arg15[%c0_89, %c0_90] : memref<256x128xf32, #tpu.memory_space<vmem>>, vector<256x128xf32>
    %c512_91 = arith.constant 512 : index
    %c0_92 = arith.constant 0 : index
    %67 = vector.load %arg8[%c512_91, %c0_92] : memref<1152x128xf32, #tpu.memory_space<vmem>>, vector<128x128xf32>
    %cst_93 = arith.constant dense<0.000000e+00> : vector<256x128xf32>
    %68 = tpu.matmul %60, %67, %cst_93 {dimension_numbers = #tpu.dot_dimension_numbers<[1], [0], [0], [1], [0, 0, 1, 1], [], []>} : vector<256x128xf32>, vector<128x128xf32>, vector<256x128xf32> -> vector<256x128xf32>
    %69 = arith.addf %66, %68 : vector<256x128xf32>
    %c0_94 = arith.constant 0 : index
    %c0_95 = arith.constant 0 : index
    %70 = vector.load %arg15[%c0_94, %c0_95] : memref<256x128xf32, #tpu.memory_space<vmem>>, vector<256x128xf32>
    tpu.vector_store %arg15[%c0_94, %c0_95], %69 {strides = array<i32>} : memref<256x128xf32, #tpu.memory_space<vmem>>, vector<256x128xf32>,
    %c1_96 = arith.constant 1 : index
    %c17_97 = arith.constant 17 : index
    %c0_98 = arith.constant 0 : index
    %71 = vector.load %arg12[%c1_96, %c17_97, %c0_98] : memref<18x48x128xf32, #tpu.memory_space<vmem>>, vector<16x16x128xf32>
    %72 = vector.shape_cast %71 : vector<16x16x128xf32> to vector<256x128xf32>
    %c0_99 = arith.constant 0 : index
    %c0_100 = arith.constant 0 : index
    %73 = vector.load %arg14[%c0_99, %c0_100] : memref<256x128xf32, #tpu.memory_space<vmem>>, vector<256x128xf32>
    %c640 = arith.constant 640 : index
    %c0_101 = arith.constant 0 : index
    %74 = vector.load %arg2[%c640, %c0_101] : memref<1152x128xf32, #tpu.memory_space<vmem>>, vector<128x128xf32>
    %cst_102 = arith.constant dense<0.000000e+00> : vector<256x128xf32>
    %75 = tpu.matmul %72, %74, %cst_102 {dimension_numbers = #tpu.dot_dimension_numbers<[1], [0], [0], [1], [0, 0, 1, 1], [], []>} : vector<256x128xf32>, vector<128x128xf32>, vector<256x128xf32> -> vector<256x128xf32>
    %76 = arith.addf %73, %75 : vector<256x128xf32>
    %c0_103 = arith.constant 0 : index
    %c0_104 = arith.constant 0 : index
    %77 = vector.load %arg14[%c0_103, %c0_104] : memref<256x128xf32, #tpu.memory_space<vmem>>, vector<256x128xf32>
    tpu.vector_store %arg14[%c0_103, %c0_104], %76 {strides = array<i32>} : memref<256x128xf32, #tpu.memory_space<vmem>>, vector<256x128xf32>,
    %c0_105 = arith.constant 0 : index
    %c0_106 = arith.constant 0 : index
    %78 = vector.load %arg15[%c0_105, %c0_106] : memref<256x128xf32, #tpu.memory_space<vmem>>, vector<256x128xf32>
    %c640_107 = arith.constant 640 : index
    %c0_108 = arith.constant 0 : index
    %79 = vector.load %arg8[%c640_107, %c0_108] : memref<1152x128xf32, #tpu.memory_space<vmem>>, vector<128x128xf32>
    %cst_109 = arith.constant dense<0.000000e+00> : vector<256x128xf32>
    %80 = tpu.matmul %72, %79, %cst_109 {dimension_numbers = #tpu.dot_dimension_numbers<[1], [0], [0], [1], [0, 0, 1, 1], [], []>} : vector<256x128xf32>, vector<128x128xf32>, vector<256x128xf32> -> vector<256x128xf32>
    %81 = arith.addf %78, %80 : vector<256x128xf32>
    %c0_110 = arith.constant 0 : index
    %c0_111 = arith.constant 0 : index
    %82 = vector.load %arg15[%c0_110, %c0_111] : memref<256x128xf32, #tpu.memory_space<vmem>>, vector<256x128xf32>
    tpu.vector_store %arg15[%c0_110, %c0_111], %81 {strides = array<i32>} : memref<256x128xf32, #tpu.memory_space<vmem>>, vector<256x128xf32>,
    %c2 = arith.constant 2 : index
    %c15_112 = arith.constant 15 : index
    %c0_113 = arith.constant 0 : index
    %83 = vector.load %arg12[%c2, %c15_112, %c0_113] : memref<18x48x128xf32, #tpu.memory_space<vmem>>, vector<16x16x128xf32>
    %84 = vector.shape_cast %83 : vector<16x16x128xf32> to vector<256x128xf32>
    %c0_114 = arith.constant 0 : index
    %c0_115 = arith.constant 0 : index
    %85 = vector.load %arg14[%c0_114, %c0_115] : memref<256x128xf32, #tpu.memory_space<vmem>>, vector<256x128xf32>
    %c768 = arith.constant 768 : index
    %c0_116 = arith.constant 0 : index
    %86 = vector.load %arg2[%c768, %c0_116] : memref<1152x128xf32, #tpu.memory_space<vmem>>, vector<128x128xf32>
    %cst_117 = arith.constant dense<0.000000e+00> : vector<256x128xf32>
    %87 = tpu.matmul %84, %86, %cst_117 {dimension_numbers = #tpu.dot_dimension_numbers<[1], [0], [0], [1], [0, 0, 1, 1], [], []>} : vector<256x128xf32>, vector<128x128xf32>, vector<256x128xf32> -> vector<256x128xf32>
    %88 = arith.addf %85, %87 : vector<256x128xf32>
    %c0_118 = arith.constant 0 : index
    %c0_119 = arith.constant 0 : index
    %89 = vector.load %arg14[%c0_118, %c0_119] : memref<256x128xf32, #tpu.memory_space<vmem>>, vector<256x128xf32>
    tpu.vector_store %arg14[%c0_118, %c0_119], %88 {strides = array<i32>} : memref<256x128xf32, #tpu.memory_space<vmem>>, vector<256x128xf32>,
    %c0_120 = arith.constant 0 : index
    %c0_121 = arith.constant 0 : index
    %90 = vector.load %arg15[%c0_120, %c0_121] : memref<256x128xf32, #tpu.memory_space<vmem>>, vector<256x128xf32>
    %c768_122 = arith.constant 768 : index
    %c0_123 = arith.constant 0 : index
    %91 = vector.load %arg8[%c768_122, %c0_123] : memref<1152x128xf32, #tpu.memory_space<vmem>>, vector<128x128xf32>
    %cst_124 = arith.constant dense<0.000000e+00> : vector<256x128xf32>
    %92 = tpu.matmul %84, %91, %cst_124 {dimension_numbers = #tpu.dot_dimension_numbers<[1], [0], [0], [1], [0, 0, 1, 1], [], []>} : vector<256x128xf32>, vector<128x128xf32>, vector<256x128xf32> -> vector<256x128xf32>
    %93 = arith.addf %90, %92 : vector<256x128xf32>
    %c0_125 = arith.constant 0 : index
    %c0_126 = arith.constant 0 : index
    %94 = vector.load %arg15[%c0_125, %c0_126] : memref<256x128xf32, #tpu.memory_space<vmem>>, vector<256x128xf32>
    tpu.vector_store %arg15[%c0_125, %c0_126], %93 {strides = array<i32>} : memref<256x128xf32, #tpu.memory_space<vmem>>, vector<256x128xf32>,
    %c2_127 = arith.constant 2 : index
    %c16_128 = arith.constant 16 : index
    %c0_129 = arith.constant 0 : index
    %95 = vector.load %arg12[%c2_127, %c16_128, %c0_129] : memref<18x48x128xf32, #tpu.memory_space<vmem>>, vector<16x16x128xf32>
    %96 = vector.shape_cast %95 : vector<16x16x128xf32> to vector<256x128xf32>
    %c0_130 = arith.constant 0 : index
    %c0_131 = arith.constant 0 : index
    %97 = vector.load %arg14[%c0_130, %c0_131] : memref<256x128xf32, #tpu.memory_space<vmem>>, vector<256x128xf32>
    %c896 = arith.constant 896 : index
    %c0_132 = arith.constant 0 : index
    %98 = vector.load %arg2[%c896, %c0_132] : memref<1152x128xf32, #tpu.memory_space<vmem>>, vector<128x128xf32>
    %cst_133 = arith.constant dense<0.000000e+00> : vector<256x128xf32>
    %99 = tpu.matmul %96, %98, %cst_133 {dimension_numbers = #tpu.dot_dimension_numbers<[1], [0], [0], [1], [0, 0, 1, 1], [], []>} : vector<256x128xf32>, vector<128x128xf32>, vector<256x128xf32> -> vector<256x128xf32>
    %100 = arith.addf %97, %99 : vector<256x128xf32>
    %c0_134 = arith.constant 0 : index
    %c0_135 = arith.constant 0 : index
    %101 = vector.load %arg14[%c0_134, %c0_135] : memref<256x128xf32, #tpu.memory_space<vmem>>, vector<256x128xf32>
    tpu.vector_store %arg14[%c0_134, %c0_135], %100 {strides = array<i32>} : memref<256x128xf32, #tpu.memory_space<vmem>>, vector<256x128xf32>,
    %c0_136 = arith.constant 0 : index
    %c0_137 = arith.constant 0 : index
    %102 = vector.load %arg15[%c0_136, %c0_137] : memref<256x128xf32, #tpu.memory_space<vmem>>, vector<256x128xf32>
    %c896_138 = arith.constant 896 : index
    %c0_139 = arith.constant 0 : index
    %103 = vector.load %arg8[%c896_138, %c0_139] : memref<1152x128xf32, #tpu.memory_space<vmem>>, vector<128x128xf32>
    %cst_140 = arith.constant dense<0.000000e+00> : vector<256x128xf32>
    %104 = tpu.matmul %96, %103, %cst_140 {dimension_numbers = #tpu.dot_dimension_numbers<[1], [0], [0], [1], [0, 0, 1, 1], [], []>} : vector<256x128xf32>, vector<128x128xf32>, vector<256x128xf32> -> vector<256x128xf32>
    %105 = arith.addf %102, %104 : vector<256x128xf32>
    %c0_141 = arith.constant 0 : index
    %c0_142 = arith.constant 0 : index
    %106 = vector.load %arg15[%c0_141, %c0_142] : memref<256x128xf32, #tpu.memory_space<vmem>>, vector<256x128xf32>
    tpu.vector_store %arg15[%c0_141, %c0_142], %105 {strides = array<i32>} : memref<256x128xf32, #tpu.memory_space<vmem>>, vector<256x128xf32>,
    %c2_143 = arith.constant 2 : index
    %c17_144 = arith.constant 17 : index
    %c0_145 = arith.constant 0 : index
    %107 = vector.load %arg12[%c2_143, %c17_144, %c0_145] : memref<18x48x128xf32, #tpu.memory_space<vmem>>, vector<16x16x128xf32>
    %108 = vector.shape_cast %107 : vector<16x16x128xf32> to vector<256x128xf32>
    %c0_146 = arith.constant 0 : index
    %c0_147 = arith.constant 0 : index
    %109 = vector.load %arg14[%c0_146, %c0_147] : memref<256x128xf32, #tpu.memory_space<vmem>>, vector<256x128xf32>
    %c1024 = arith.constant 1024 : index
    %c0_148 = arith.constant 0 : index
    %110 = vector.load %arg2[%c1024, %c0_148] : memref<1152x128xf32, #tpu.memory_space<vmem>>, vector<128x128xf32>
    %cst_149 = arith.constant dense<0.000000e+00> : vector<256x128xf32>
    %111 = tpu.matmul %108, %110, %cst_149 {dimension_numbers = #tpu.dot_dimension_numbers<[1], [0], [0], [1], [0, 0, 1, 1], [], []>} : vector<256x128xf32>, vector<128x128xf32>, vector<256x128xf32> -> vector<256x128xf32>
    %112 = arith.addf %109, %111 : vector<256x128xf32>
    %c0_150 = arith.constant 0 : index
    %c0_151 = arith.constant 0 : index
    %113 = vector.load %arg14[%c0_150, %c0_151] : memref<256x128xf32, #tpu.memory_space<vmem>>, vector<256x128xf32>
    tpu.vector_store %arg14[%c0_150, %c0_151], %112 {strides = array<i32>} : memref<256x128xf32, #tpu.memory_space<vmem>>, vector<256x128xf32>,
    %c0_152 = arith.constant 0 : index
    %c0_153 = arith.constant 0 : index
    %114 = vector.load %arg15[%c0_152, %c0_153] : memref<256x128xf32, #tpu.memory_space<vmem>>, vector<256x128xf32>
    %c1024_154 = arith.constant 1024 : index
    %c0_155 = arith.constant 0 : index
    %115 = vector.load %arg8[%c1024_154, %c0_155] : memref<1152x128xf32, #tpu.memory_space<vmem>>, vector<128x128xf32>
    %cst_156 = arith.constant dense<0.000000e+00> : vector<256x128xf32>
    %116 = tpu.matmul %108, %115, %cst_156 {dimension_numbers = #tpu.dot_dimension_numbers<[1], [0], [0], [1], [0, 0, 1, 1], [], []>} : vector<256x128xf32>, vector<128x128xf32>, vector<256x128xf32> -> vector<256x128xf32>
    %117 = arith.addf %114, %116 : vector<256x128xf32>
    %c0_157 = arith.constant 0 : index
    %c0_158 = arith.constant 0 : index
    %118 = vector.load %arg15[%c0_157, %c0_158] : memref<256x128xf32, #tpu.memory_space<vmem>>, vector<256x128xf32>
    tpu.vector_store %arg15[%c0_157, %c0_158], %117 {strides = array<i32>} : memref<256x128xf32, #tpu.memory_space<vmem>>, vector<256x128xf32>,
    %c0_159 = arith.constant 0 : index
    %c0_160 = arith.constant 0 : index
    %119 = vector.load %arg14[%c0_159, %c0_160] : memref<256x128xf32, #tpu.memory_space<vmem>>, vector<256x128xf32>
    %c0_161 = arith.constant 0 : index
    %c0_162 = arith.constant 0 : index
    %120 = vector.load %arg3[%c0_161, %c0_162] : memref<1x128xf32, #tpu.memory_space<vmem>>, vector<1x128xf32>
    %121 = vector.broadcast %120 : vector<1x128xf32> to vector<256x128xf32>
    %122 = arith.mulf %119, %121 : vector<256x128xf32>
    %c0_163 = arith.constant 0 : index
    %c0_164 = arith.constant 0 : index
    %123 = vector.load %arg4[%c0_163, %c0_164] : memref<1x128xf32, #tpu.memory_space<vmem>>, vector<1x128xf32>
    %124 = vector.broadcast %123 : vector<1x128xf32> to vector<256x128xf32>
    %125 = arith.addf %122, %124 : vector<256x128xf32>
    %cst_165 = arith.constant 0.000000e+00 : f32
    %126 = vector.broadcast %cst_165 : f32 to vector<256x128xf32>
    %127 = arith.maximumf %125, %126 : vector<256x128xf32>
    %128 = vector.shape_cast %127 : vector<256x128xf32> to vector<16x16x128xf32>
    %c1_166 = arith.constant 1 : index
    %c16_167 = arith.constant 16 : index
    %c0_168 = arith.constant 0 : index
    %129 = vector.load %arg13[%c1_166, %c16_167, %c0_168] : memref<18x48x128xf32, #tpu.memory_space<vmem>>, vector<16x16x128xf32>
    tpu.vector_store %arg13[%c1_166, %c16_167, %c0_168], %128 {strides = array<i32>} : memref<18x48x128xf32, #tpu.memory_space<vmem>>, vector<16x16x128xf32>,
    %cst_169 = arith.constant 0.000000e+00 : f32
    %130 = vector.broadcast %cst_169 : f32 to vector<256x128xf32>
    %c0_170 = arith.constant 0 : index
    %c0_171 = arith.constant 0 : index
    %131 = vector.load %arg14[%c0_170, %c0_171] : memref<256x128xf32, #tpu.memory_space<vmem>>, vector<256x128xf32>
    tpu.vector_store %arg14[%c0_170, %c0_171], %130 {strides = array<i32>} : memref<256x128xf32, #tpu.memory_space<vmem>>, vector<256x128xf32>,
    %c0_172 = arith.constant 0 : index
    %c15_173 = arith.constant 15 : index
    %c0_174 = arith.constant 0 : index
    %132 = vector.load %arg13[%c0_172, %c15_173, %c0_174] : memref<18x48x128xf32, #tpu.memory_space<vmem>>, vector<16x16x128xf32>
    %133 = vector.shape_cast %132 : vector<16x16x128xf32> to vector<256x128xf32>
    %c0_175 = arith.constant 0 : index
    %c0_176 = arith.constant 0 : index
    %134 = vector.load %arg14[%c0_175, %c0_176] : memref<256x128xf32, #tpu.memory_space<vmem>>, vector<256x128xf32>
    %c0_177 = arith.constant 0 : index
    %c0_178 = arith.constant 0 : index
    %135 = vector.load %arg5[%c0_177, %c0_178] : memref<1152x128xf32, #tpu.memory_space<vmem>>, vector<128x128xf32>
    %cst_179 = arith.constant dense<0.000000e+00> : vector<256x128xf32>
    %136 = tpu.matmul %133, %135, %cst_179 {dimension_numbers = #tpu.dot_dimension_numbers<[1], [0], [0], [1], [0, 0, 1, 1], [], []>} : vector<256x128xf32>, vector<128x128xf32>, vector<256x128xf32> -> vector<256x128xf32>
    %137 = arith.addf %134, %136 : vector<256x128xf32>
    %c0_180 = arith.constant 0 : index
    %c0_181 = arith.constant 0 : index
    %138 = vector.load %arg14[%c0_180, %c0_181] : memref<256x128xf32, #tpu.memory_space<vmem>>, vector<256x128xf32>
    tpu.vector_store %arg14[%c0_180, %c0_181], %137 {strides = array<i32>} : memref<256x128xf32, #tpu.memory_space<vmem>>, vector<256x128xf32>,
    %c0_182 = arith.constant 0 : index
    %c16_183 = arith.constant 16 : index
    %c0_184 = arith.constant 0 : index
    %139 = vector.load %arg13[%c0_182, %c16_183, %c0_184] : memref<18x48x128xf32, #tpu.memory_space<vmem>>, vector<16x16x128xf32>
    %140 = vector.shape_cast %139 : vector<16x16x128xf32> to vector<256x128xf32>
    %c0_185 = arith.constant 0 : index
    %c0_186 = arith.constant 0 : index
    %141 = vector.load %arg14[%c0_185, %c0_186] : memref<256x128xf32, #tpu.memory_space<vmem>>, vector<256x128xf32>
    %c128_187 = arith.constant 128 : index
    %c0_188 = arith.constant 0 : index
    %142 = vector.load %arg5[%c128_187, %c0_188] : memref<1152x128xf32, #tpu.memory_space<vmem>>, vector<128x128xf32>
    %cst_189 = arith.constant dense<0.000000e+00> : vector<256x128xf32>
    %143 = tpu.matmul %140, %142, %cst_189 {dimension_numbers = #tpu.dot_dimension_numbers<[1], [0], [0], [1], [0, 0, 1, 1], [], []>} : vector<256x128xf32>, vector<128x128xf32>, vector<256x128xf32> -> vector<256x128xf32>
    %144 = arith.addf %141, %143 : vector<256x128xf32>
    %c0_190 = arith.constant 0 : index
    %c0_191 = arith.constant 0 : index
    %145 = vector.load %arg14[%c0_190, %c0_191] : memref<256x128xf32, #tpu.memory_space<vmem>>, vector<256x128xf32>
    tpu.vector_store %arg14[%c0_190, %c0_191], %144 {strides = array<i32>} : memref<256x128xf32, #tpu.memory_space<vmem>>, vector<256x128xf32>,
    %c0_192 = arith.constant 0 : index
    %c17_193 = arith.constant 17 : index
    %c0_194 = arith.constant 0 : index
    %146 = vector.load %arg13[%c0_192, %c17_193, %c0_194] : memref<18x48x128xf32, #tpu.memory_space<vmem>>, vector<16x16x128xf32>
    %147 = vector.shape_cast %146 : vector<16x16x128xf32> to vector<256x128xf32>
    %c0_195 = arith.constant 0 : index
    %c0_196 = arith.constant 0 : index
    %148 = vector.load %arg14[%c0_195, %c0_196] : memref<256x128xf32, #tpu.memory_space<vmem>>, vector<256x128xf32>
    %c256_197 = arith.constant 256 : index
    %c0_198 = arith.constant 0 : index
    %149 = vector.load %arg5[%c256_197, %c0_198] : memref<1152x128xf32, #tpu.memory_space<vmem>>, vector<128x128xf32>
    %cst_199 = arith.constant dense<0.000000e+00> : vector<256x128xf32>
    %150 = tpu.matmul %147, %149, %cst_199 {dimension_numbers = #tpu.dot_dimension_numbers<[1], [0], [0], [1], [0, 0, 1, 1], [], []>} : vector<256x128xf32>, vector<128x128xf32>, vector<256x128xf32> -> vector<256x128xf32>
    %151 = arith.addf %148, %150 : vector<256x128xf32>
    %c0_200 = arith.constant 0 : index
    %c0_201 = arith.constant 0 : index
    %152 = vector.load %arg14[%c0_200, %c0_201] : memref<256x128xf32, #tpu.memory_space<vmem>>, vector<256x128xf32>
    tpu.vector_store %arg14[%c0_200, %c0_201], %151 {strides = array<i32>} : memref<256x128xf32, #tpu.memory_space<vmem>>, vector<256x128xf32>,
    %c1_202 = arith.constant 1 : index
    %c15_203 = arith.constant 15 : index
    %c0_204 = arith.constant 0 : index
    %153 = vector.load %arg13[%c1_202, %c15_203, %c0_204] : memref<18x48x128xf32, #tpu.memory_space<vmem>>, vector<16x16x128xf32>
    %154 = vector.shape_cast %153 : vector<16x16x128xf32> to vector<256x128xf32>
    %c0_205 = arith.constant 0 : index
    %c0_206 = arith.constant 0 : index
    %155 = vector.load %arg14[%c0_205, %c0_206] : memref<256x128xf32, #tpu.memory_space<vmem>>, vector<256x128xf32>
    %c384_207 = arith.constant 384 : index
    %c0_208 = arith.constant 0 : index
    %156 = vector.load %arg5[%c384_207, %c0_208] : memref<1152x128xf32, #tpu.memory_space<vmem>>, vector<128x128xf32>
    %cst_209 = arith.constant dense<0.000000e+00> : vector<256x128xf32>
    %157 = tpu.matmul %154, %156, %cst_209 {dimension_numbers = #tpu.dot_dimension_numbers<[1], [0], [0], [1], [0, 0, 1, 1], [], []>} : vector<256x128xf32>, vector<128x128xf32>, vector<256x128xf32> -> vector<256x128xf32>
    %158 = arith.addf %155, %157 : vector<256x128xf32>
    %c0_210 = arith.constant 0 : index
    %c0_211 = arith.constant 0 : index
    %159 = vector.load %arg14[%c0_210, %c0_211] : memref<256x128xf32, #tpu.memory_space<vmem>>, vector<256x128xf32>
    tpu.vector_store %arg14[%c0_210, %c0_211], %158 {strides = array<i32>} : memref<256x128xf32, #tpu.memory_space<vmem>>, vector<256x128xf32>,
    %c1_212 = arith.constant 1 : index
    %c16_213 = arith.constant 16 : index
    %c0_214 = arith.constant 0 : index
    %160 = vector.load %arg13[%c1_212, %c16_213, %c0_214] : memref<18x48x128xf32, #tpu.memory_space<vmem>>, vector<16x16x128xf32>
    %161 = vector.shape_cast %160 : vector<16x16x128xf32> to vector<256x128xf32>
    %c0_215 = arith.constant 0 : index
    %c0_216 = arith.constant 0 : index
    %162 = vector.load %arg14[%c0_215, %c0_216] : memref<256x128xf32, #tpu.memory_space<vmem>>, vector<256x128xf32>
    %c512_217 = arith.constant 512 : index
    %c0_218 = arith.constant 0 : index
    %163 = vector.load %arg5[%c512_217, %c0_218] : memref<1152x128xf32, #tpu.memory_space<vmem>>, vector<128x128xf32>
    %cst_219 = arith.constant dense<0.000000e+00> : vector<256x128xf32>
    %164 = tpu.matmul %161, %163, %cst_219 {dimension_numbers = #tpu.dot_dimension_numbers<[1], [0], [0], [1], [0, 0, 1, 1], [], []>} : vector<256x128xf32>, vector<128x128xf32>, vector<256x128xf32> -> vector<256x128xf32>
    %165 = arith.addf %162, %164 : vector<256x128xf32>
    %c0_220 = arith.constant 0 : index
    %c0_221 = arith.constant 0 : index
    %166 = vector.load %arg14[%c0_220, %c0_221] : memref<256x128xf32, #tpu.memory_space<vmem>>, vector<256x128xf32>
    tpu.vector_store %arg14[%c0_220, %c0_221], %165 {strides = array<i32>} : memref<256x128xf32, #tpu.memory_space<vmem>>, vector<256x128xf32>,
    %c1_222 = arith.constant 1 : index
    %c17_223 = arith.constant 17 : index
    %c0_224 = arith.constant 0 : index
    %167 = vector.load %arg13[%c1_222, %c17_223, %c0_224] : memref<18x48x128xf32, #tpu.memory_space<vmem>>, vector<16x16x128xf32>
    %168 = vector.shape_cast %167 : vector<16x16x128xf32> to vector<256x128xf32>
    %c0_225 = arith.constant 0 : index
    %c0_226 = arith.constant 0 : index
    %169 = vector.load %arg14[%c0_225, %c0_226] : memref<256x128xf32, #tpu.memory_space<vmem>>, vector<256x128xf32>
    %c640_227 = arith.constant 640 : index
    %c0_228 = arith.constant 0 : index
    %170 = vector.load %arg5[%c640_227, %c0_228] : memref<1152x128xf32, #tpu.memory_space<vmem>>, vector<128x128xf32>
    %cst_229 = arith.constant dense<0.000000e+00> : vector<256x128xf32>
    %171 = tpu.matmul %168, %170, %cst_229 {dimension_numbers = #tpu.dot_dimension_numbers<[1], [0], [0], [1], [0, 0, 1, 1], [], []>} : vector<256x128xf32>, vector<128x128xf32>, vector<256x128xf32> -> vector<256x128xf32>
    %172 = arith.addf %169, %171 : vector<256x128xf32>
    %c0_230 = arith.constant 0 : index
    %c0_231 = arith.constant 0 : index
    %173 = vector.load %arg14[%c0_230, %c0_231] : memref<256x128xf32, #tpu.memory_space<vmem>>, vector<256x128xf32>
    tpu.vector_store %arg14[%c0_230, %c0_231], %172 {strides = array<i32>} : memref<256x128xf32, #tpu.memory_space<vmem>>, vector<256x128xf32>,
    %c2_232 = arith.constant 2 : index
    %c15_233 = arith.constant 15 : index
    %c0_234 = arith.constant 0 : index
    %174 = vector.load %arg13[%c2_232, %c15_233, %c0_234] : memref<18x48x128xf32, #tpu.memory_space<vmem>>, vector<16x16x128xf32>
    %175 = vector.shape_cast %174 : vector<16x16x128xf32> to vector<256x128xf32>
    %c0_235 = arith.constant 0 : index
    %c0_236 = arith.constant 0 : index
    %176 = vector.load %arg14[%c0_235, %c0_236] : memref<256x128xf32, #tpu.memory_space<vmem>>, vector<256x128xf32>
    %c768_237 = arith.constant 768 : index
    %c0_238 = arith.constant 0 : index
    %177 = vector.load %arg5[%c768_237, %c0_238] : memref<1152x128xf32, #tpu.memory_space<vmem>>, vector<128x128xf32>
    %cst_239 = arith.constant dense<0.000000e+00> : vector<256x128xf32>
    %178 = tpu.matmul %175, %177, %cst_239 {dimension_numbers = #tpu.dot_dimension_numbers<[1], [0], [0], [1], [0, 0, 1, 1], [], []>} : vector<256x128xf32>, vector<128x128xf32>, vector<256x128xf32> -> vector<256x128xf32>
    %179 = arith.addf %176, %178 : vector<256x128xf32>
    %c0_240 = arith.constant 0 : index
    %c0_241 = arith.constant 0 : index
    %180 = vector.load %arg14[%c0_240, %c0_241] : memref<256x128xf32, #tpu.memory_space<vmem>>, vector<256x128xf32>
    tpu.vector_store %arg14[%c0_240, %c0_241], %179 {strides = array<i32>} : memref<256x128xf32, #tpu.memory_space<vmem>>, vector<256x128xf32>,
    %c2_242 = arith.constant 2 : index
    %c16_243 = arith.constant 16 : index
    %c0_244 = arith.constant 0 : index
    %181 = vector.load %arg13[%c2_242, %c16_243, %c0_244] : memref<18x48x128xf32, #tpu.memory_space<vmem>>, vector<16x16x128xf32>
    %182 = vector.shape_cast %181 : vector<16x16x128xf32> to vector<256x128xf32>
    %c0_245 = arith.constant 0 : index
    %c0_246 = arith.constant 0 : index
    %183 = vector.load %arg14[%c0_245, %c0_246] : memref<256x128xf32, #tpu.memory_space<vmem>>, vector<256x128xf32>
    %c896_247 = arith.constant 896 : index
    %c0_248 = arith.constant 0 : index
    %184 = vector.load %arg5[%c896_247, %c0_248] : memref<1152x128xf32, #tpu.memory_space<vmem>>, vector<128x128xf32>
    %cst_249 = arith.constant dense<0.000000e+00> : vector<256x128xf32>
    %185 = tpu.matmul %182, %184, %cst_249 {dimension_numbers = #tpu.dot_dimension_numbers<[1], [0], [0], [1], [0, 0, 1, 1], [], []>} : vector<256x128xf32>, vector<128x128xf32>, vector<256x128xf32> -> vector<256x128xf32>
    %186 = arith.addf %183, %185 : vector<256x128xf32>
    %c0_250 = arith.constant 0 : index
    %c0_251 = arith.constant 0 : index
    %187 = vector.load %arg14[%c0_250, %c0_251] : memref<256x128xf32, #tpu.memory_space<vmem>>, vector<256x128xf32>
    tpu.vector_store %arg14[%c0_250, %c0_251], %186 {strides = array<i32>} : memref<256x128xf32, #tpu.memory_space<vmem>>, vector<256x128xf32>,
    %c2_252 = arith.constant 2 : index
    %c17_253 = arith.constant 17 : index
    %c0_254 = arith.constant 0 : index
    %188 = vector.load %arg13[%c2_252, %c17_253, %c0_254] : memref<18x48x128xf32, #tpu.memory_space<vmem>>, vector<16x16x128xf32>
    %189 = vector.shape_cast %188 : vector<16x16x128xf32> to vector<256x128xf32>
    %c0_255 = arith.constant 0 : index
    %c0_256 = arith.constant 0 : index
    %190 = vector.load %arg14[%c0_255, %c0_256] : memref<256x128xf32, #tpu.memory_space<vmem>>, vector<256x128xf32>
    %c1024_257 = arith.constant 1024 : index
    %c0_258 = arith.constant 0 : index
    %191 = vector.load %arg5[%c1024_257, %c0_258] : memref<1152x128xf32, #tpu.memory_space<vmem>>, vector<128x128xf32>
    %cst_259 = arith.constant dense<0.000000e+00> : vector<256x128xf32>
    %192 = tpu.matmul %189, %191, %cst_259 {dimension_numbers = #tpu.dot_dimension_numbers<[1], [0], [0], [1], [0, 0, 1, 1], [], []>} : vector<256x128xf32>, vector<128x128xf32>, vector<256x128xf32> -> vector<256x128xf32>
    %193 = arith.addf %190, %192 : vector<256x128xf32>
    %c0_260 = arith.constant 0 : index
    %c0_261 = arith.constant 0 : index
    %194 = vector.load %arg14[%c0_260, %c0_261] : memref<256x128xf32, #tpu.memory_space<vmem>>, vector<256x128xf32>
    tpu.vector_store %arg14[%c0_260, %c0_261], %193 {strides = array<i32>} : memref<256x128xf32, #tpu.memory_space<vmem>>, vector<256x128xf32>,
    %c0_262 = arith.constant 0 : index
    %c0_263 = arith.constant 0 : index
    %195 = vector.load %arg14[%c0_262, %c0_263] : memref<256x128xf32, #tpu.memory_space<vmem>>, vector<256x128xf32>
    %c0_264 = arith.constant 0 : index
    %c0_265 = arith.constant 0 : index
    %196 = vector.load %arg6[%c0_264, %c0_265] : memref<1x128xf32, #tpu.memory_space<vmem>>, vector<1x128xf32>
    %197 = vector.broadcast %196 : vector<1x128xf32> to vector<256x128xf32>
    %198 = arith.mulf %195, %197 : vector<256x128xf32>
    %c0_266 = arith.constant 0 : index
    %c0_267 = arith.constant 0 : index
    %199 = vector.load %arg7[%c0_266, %c0_267] : memref<1x128xf32, #tpu.memory_space<vmem>>, vector<1x128xf32>
    %200 = vector.broadcast %199 : vector<1x128xf32> to vector<256x128xf32>
    %201 = arith.addf %198, %200 : vector<256x128xf32>
    %c0_268 = arith.constant 0 : index
    %c0_269 = arith.constant 0 : index
    %202 = vector.load %arg15[%c0_268, %c0_269] : memref<256x128xf32, #tpu.memory_space<vmem>>, vector<256x128xf32>
    %c0_270 = arith.constant 0 : index
    %c0_271 = arith.constant 0 : index
    %203 = vector.load %arg9[%c0_270, %c0_271] : memref<1x128xf32, #tpu.memory_space<vmem>>, vector<1x128xf32>
    %204 = vector.broadcast %203 : vector<1x128xf32> to vector<256x128xf32>
    %205 = arith.mulf %202, %204 : vector<256x128xf32>
    %c0_272 = arith.constant 0 : index
    %c0_273 = arith.constant 0 : index
    %206 = vector.load %arg10[%c0_272, %c0_273] : memref<1x128xf32, #tpu.memory_space<vmem>>, vector<1x128xf32>
    %207 = vector.broadcast %206 : vector<1x128xf32> to vector<256x128xf32>
    %208 = arith.addf %205, %207 : vector<256x128xf32>
    %209 = arith.addf %201, %208 : vector<256x128xf32>
    %cst_274 = arith.constant 0.000000e+00 : f32
    %210 = vector.broadcast %cst_274 : f32 to vector<256x128xf32>
    %211 = arith.maximumf %209, %210 : vector<256x128xf32>
    %212 = vector.shape_cast %211 : vector<256x128xf32> to vector<16x16x128xf32>
    %c0_275 = arith.constant 0 : index
    %c0_276 = arith.constant 0 : index
    %c0_277 = arith.constant 0 : index
    %c0_278 = arith.constant 0 : index
    %213 = vector.load %arg11[%c0_275, %c0_276, %c0_277, %c0_278] : memref<1x16x16x128xf32, #tpu.memory_space<vmem>>, vector<1x16x16x128xf32>
    %214 = vector.shape_cast %213 : vector<1x16x16x128xf32> to vector<16x16x128xf32>
    %215 = vector.shape_cast %212 : vector<16x16x128xf32> to vector<1x16x16x128xf32>
    tpu.vector_store %arg11[%c0_275, %c0_276, %c0_277, %c0_278], %215 {strides = array<i32>} : memref<1x16x16x128xf32, #tpu.memory_space<vmem>>, vector<1x16x16x128xf32>,
    return
  }
  func.func @transform_0(%arg0: i32) -> (i32, i32, i32, i32) {
    %c0_i32 = arith.constant 0 : i32
    %c0_i32_0 = arith.constant 0 : i32
    %c0_i32_1 = arith.constant 0 : i32
    %c0_i32_2 = arith.constant 0 : i32
    return %arg0, %c0_i32, %c0_i32_0, %c0_i32_1 : i32, i32, i32, i32
  }
  func.func @transform_1(%arg0: i32) -> (i32, i32) {
    %c0_i32 = arith.constant 0 : i32
    %c0_i32_0 = arith.constant 0 : i32
    %c0_i32_1 = arith.constant 0 : i32
    return %c0_i32, %c0_i32_0 : i32, i32
  }
  func.func @transform_2(%arg0: i32) -> (i32, i32) {
    %c0_i32 = arith.constant 0 : i32
    %c0_i32_0 = arith.constant 0 : i32
    %c0_i32_1 = arith.constant 0 : i32
    return %c0_i32, %c0_i32_0 : i32, i32
  }
  func.func @transform_3(%arg0: i32) -> (i32, i32) {
    %c0_i32 = arith.constant 0 : i32
    %c0_i32_0 = arith.constant 0 : i32
    %c0_i32_1 = arith.constant 0 : i32
    return %c0_i32, %c0_i32_0 : i32, i32
  }
  func.func @transform_4(%arg0: i32) -> (i32, i32) {
    %c0_i32 = arith.constant 0 : i32
    %c0_i32_0 = arith.constant 0 : i32
    %c0_i32_1 = arith.constant 0 : i32
    return %c0_i32, %c0_i32_0 : i32, i32
  }
  func.func @transform_5(%arg0: i32) -> (i32, i32) {
    %c0_i32 = arith.constant 0 : i32
    %c0_i32_0 = arith.constant 0 : i32
    %c0_i32_1 = arith.constant 0 : i32
    return %c0_i32, %c0_i32_0 : i32, i32
  }
  func.func @transform_6(%arg0: i32) -> (i32, i32) {
    %c0_i32 = arith.constant 0 : i32
    %c0_i32_0 = arith.constant 0 : i32
    %c0_i32_1 = arith.constant 0 : i32
    return %c0_i32, %c0_i32_0 : i32, i32
  }
  func.func @transform_7(%arg0: i32) -> (i32, i32) {
    %c0_i32 = arith.constant 0 : i32
    %c0_i32_0 = arith.constant 0 : i32
    %c0_i32_1 = arith.constant 0 : i32
    return %c0_i32, %c0_i32_0 : i32, i32
  }
  func.func @transform_8(%arg0: i32) -> (i32, i32) {
    %c0_i32 = arith.constant 0 : i32
    %c0_i32_0 = arith.constant 0 : i32
    %c0_i32_1 = arith.constant 0 : i32
    return %c0_i32, %c0_i32_0 : i32, i32
  }
  func.func @transform_9(%arg0: i32) -> (i32, i32) {
    %c0_i32 = arith.constant 0 : i32
    %c0_i32_0 = arith.constant 0 : i32
    %c0_i32_1 = arith.constant 0 : i32
    return %c0_i32, %c0_i32_0 : i32, i32
  }
  func.func @transform_10(%arg0: i32) -> (i32, i32, i32, i32) {
    %c0_i32 = arith.constant 0 : i32
    %c0_i32_0 = arith.constant 0 : i32
    %c0_i32_1 = arith.constant 0 : i32
    %c0_i32_2 = arith.constant 0 : i32
    return %arg0, %c0_i32, %c0_i32_0, %c0_i32_1 : i32, i32, i32, i32
  }
}

</mosaic_0001>

<bundles_post_ra>
// kernel: tpu_custom_call.1
= control target key start
LH: loop header
LB: loop body
LE: loop exit
PB: predicated region body
PF: predicated region fallthrough
CT: control target
= control target key end

     0   :  { %s18940_s0 = inlined_call_operand.hbm [shape: f32[2,16,16,128], index: 0, kind: input, shape index: {}]   ;;  %s18941_s1 = inlined_call_operand.hbm [shape: f32[1152,128], index: 1, kind: input, shape index: {}]   ;;  %s18942_s2 = inlined_call_operand.vmem [shape: f32[1,128], index: 2, kind: input, shape index: {}]   ;;  %s18943_s3 = inlined_call_operand.vmem [shape: f32[1,128], index: 3, kind: input, shape index: {}]   ;;  %s18944_s4 = inlined_call_operand.hbm [shape: f32[1152,128], index: 4, kind: input, shape index: {}]   ;;  %s18945_s5 = inlined_call_operand.vmem [shape: f32[1,128], index: 5, kind: input, shape index: {}]   ;;  %s18946_s6 = inlined_call_operand.vmem [shape: f32[1,128], index: 6, kind: input, shape index: {}]   ;;  %s18947_s7 = inlined_call_operand.hbm [shape: f32[1152,128], index: 7, kind: input, shape index: {}]   ;;  %s18948_s8 = inlined_call_operand.vmem [shape: f32[1,128], index: 8, kind: input, shape index: {}]   ;;  %s18949_s9 = inlined_call_operand.vmem [shape: f32[1,128], index: 9, kind: input, shape index: {}]   ;;  %s18950_s10 = inlined_call_operand.hbm [shape: f32[2,16,16,128], index: 10, kind: output, shape index: {}]  }
   0x1   :  { %19002 = sst [smem:[#allocation52_spill]] %s18946_s6 }
   0x2   :  { %19003 = sst [smem:[#allocation53_spill]] %s18950_s10 }
   0x3   :  { %15 = vsyncpa [#allocation7], 0 }
   0x4   :  { %17 = vsyncpa [#allocation7 + $0x1], 0 }
   0x5   :  { %18 = vsyncpa [#allocation10], 0 }
   0x6   :  { %19 = vsyncpa [#allocation13], 0 }
   0x7   :  { %20 = vsyncpa [#allocation8], 0 }
   0x8   :  { %22 = vsyncpa [#allocation8 + $0x1], 0  ;;  %s16736_s13 = smov 0   ;;  %s16738_s14 = smov 0  }
   0x9   :  { %s16740_s15 = smov 0   ;;  %s16742_s16 = smov 0  }
   0xa LB: > { %19004 = sst [smem:[#allocation19_spill]] %s16657_s13  ;;  %s16757_s17 = sadd.s32 4294967295, %s16669_s16   ;;  %s16669_s16 = sphi %s16742_s16, %s19113_s16   ;;  %s16665_s15 = sphi %s16740_s15, %s19112_s15   ;;  %s16661_s14 = sphi %s16738_s14, %s19111_s14   ;;  %s16657_s13 = sphi %s16736_s13, %s19110_s13  }
   0xb   : > { %s11083_s18 = sadd.s32 4294967294, %s16669_s16   ;;  %p48_p0 = scmp.ne.s32.totalorder %s16661_s14, %s16657_s13 }
   0xc   : > { %p18951_p1 = scmp.eq.s32.totalorder %s16757_s17, 0  ;;  %p267_p3 = scmp.eq.s32.totalorder %s11083_s18, 1 }
   0xd   : > { %p11084_p5 = scmp.ge.s32.totalorder %s16669_s16, 1  ;;  %p274_p7 = scmp.lt.s32.totalorder %s16669_s16, 3 }
   0xe   : > { %p16766_p4 = por %p18951_p1, %p48_p0  ;;  %p16771_p6 = por %p267_p3, %p48_p0 }
   0xf   : > { %p16776_p8 = pnand %p11084_p5, %p274_p7  ;;  %s16671_s22 = smov [#allocation9]  }
  0x10   : > { %s19005_s19 = scalar_select %p16766_p4, 1, 0 }
  0x11   : > { %s19006_s20 = scalar_select %p16771_p6, 1, 0 }
  0x12   : > { %s19008_s21 = scalar_select %p16776_p8, 1, 0 }
  0x13   : > { %19007 = sst [smem:[#allocation20_spill]] %s19006_s20  ;;  %s286_s23 = sshll.u32 %s16671_s22, 4  ;;  %s16780_s23 = int_to_ptr.vmem [resolvable:$true] %s286_s23 }
  0x14   : > { %p16231_p9 = pneg %p16776_p8  ;;  %s16672_s25 = smov [#allocation11]  }
  0x15   : > { %s305_s26 = sshll.u32 %s16672_s25, 4  ;;  %s16673_s27 = smov [#allocation12]   ;;  %s16791_s26 = int_to_ptr.vmem [resolvable:$true] %s305_s26 }
  0x16   : > { %p16787_p11 = pnand %p16231_p9, %p18951_p1  ;;  %s16793_s28 = sshll.u32 %s16673_s27, 4  ;;  %s325_s28 = int_to_ptr.vmem [resolvable:$true] %s16793_s28 }
  0x17   : > { %s16481_s11 = scalar_lea.hbm %s18941_s1, 18432 }
  0x18   : > { %p16482_p12 = scmp.ne.s32.totalorder %s18941_s1, %s16481_s11  ;;  %p16803_p13 = pneg %p16787_p11 }
  0x19   : > { %p16488_p5 = scmp.lt.u32.totalorder %s16481_s11, %s18941_s1 }
  0x1a   : > { %p16484_p0 = pnand %p16803_p13, %p16482_p12 }
  0x1c   : > { %p16485_p3 = pneg %p16484_p0 }
  0x1e   : > { %p16490_p7 = pnand %p16488_p5, %p16485_p3 }
  0x20   : > { %16493 = shalt.err (!%p16490_p7)
}
  0x21   : > { %s16494_s29 = scalar_lea.vmem %s16780_s23, 18432  ;;  %p16502_p2 = scmp.lt.s32.totalorder %s16780_s23, %s16780_s23 }
  0x22   : > { %p16495_p9 = scmp.ne.s32.totalorder %s16780_s23, %s16494_s29  ;;  %p16503_p6 = scmp.lt.s32.totalorder %s16494_s29, %s16494_s29 }
  0x24   : > { %p16497_p10 = pnand %p16495_p9, %p16803_p13  ;;  %p16504_p12 = por %p16503_p6, %p16502_p2 }
  0x26   : > { %p16498_p1 = pneg %p16497_p10 }
  0x28   : > { %p16505_p0 = pnand %p16504_p12, %p16498_p1 }
  0x2a   : > { %16508 = shalt.err (!%p16505_p0)
}
  0x2b   : > { %s16674_s30 = smov 128   ;;  %s16675_s11 = smov 8  }
  0x2c   : > { %16234 = dma.hbm_to_vmem [thread:$0]  (!%p16787_p11), %s18941_s1, 18432, %s16780_s23, [#allocation10], %s16674_s30, %s16674_s30, %s16675_s11  }
  0x2d   : > { %s16509_s29 = scalar_lea.hbm %s18944_s4, 18432 }
  0x2e   : > { %p16510_p1 = scmp.ne.s32.totalorder %s18944_s4, %s16509_s29  ;;  %p16516_p10 = scmp.lt.u32.totalorder %s16509_s29, %s18944_s4 }
  0x30   : > { %p16512_p2 = pnand %p16510_p1, %p16803_p13 }
  0x32   : > { %p16513_p6 = pneg %p16512_p2 }
  0x34   : > { %p16518_p3 = pnand %p16516_p10, %p16513_p6 }
  0x36   : > { %16521 = shalt.err (!%p16518_p3)
}
  0x37   : > { %s16522_s23 = scalar_lea.vmem %s16791_s26, 18432  ;;  %p16530_p12 = scmp.lt.s32.totalorder %s16791_s26, %s16791_s26 }
  0x38   : > { %p16523_p5 = scmp.ne.s32.totalorder %s16791_s26, %s16522_s23  ;;  %p16531_p0 = scmp.lt.s32.totalorder %s16522_s23, %s16522_s23 }
  0x3a   : > { %p16525_p7 = pnand %p16523_p5, %p16803_p13  ;;  %p16532_p1 = por %p16531_p0, %p16530_p12 }
  0x3c   : > { %p16526_p9 = pneg %p16525_p7 }
  0x3e   : > { %p16533_p2 = pnand %p16532_p1, %p16526_p9 }
  0x40   : > { %16536 = shalt.err (!%p16533_p2)
}
  0x41   : > { %16237 = dma.hbm_to_vmem [thread:$0]  (!%p16787_p11), %s18944_s4, 18432, %s16791_s26, [#allocation10], %s16674_s30, %s16674_s30, %s16675_s11  }
  0x42   : > { %s16537_s12 = scalar_lea.hbm %s18947_s7, 18432 }
  0x43   : > { %p16538_p6 = scmp.ne.s32.totalorder %s18947_s7, %s16537_s12  ;;  %p16544_p5 = scmp.lt.u32.totalorder %s16537_s12, %s18947_s7 }
  0x45   : > { %p16540_p10 = pnand %p16538_p6, %p16803_p13 }
  0x47   : > { %p16541_p3 = pneg %p16540_p10 }
  0x49   : > { %p16546_p7 = pnand %p16544_p5, %p16541_p3 }
  0x4b   : > { %16549 = shalt.err (!%p16546_p7)
}
  0x4c   : > { %s16550_s23 = scalar_lea.vmem %s325_s28, 18432  ;;  %p16558_p1 = scmp.lt.s32.totalorder %s325_s28, %s325_s28 }
  0x4d   : > { %p16551_p9 = scmp.ne.s32.totalorder %s325_s28, %s16550_s23  ;;  %p16559_p2 = scmp.lt.s32.totalorder %s16550_s23, %s16550_s23 }
  0x4f   : > { %p16553_p12 = pnand %p16551_p9, %p16803_p13  ;;  %p16560_p4 = por %p16559_p2, %p16558_p1 }
  0x51   : > { %p16554_p0 = pneg %p16553_p12 }
  0x53   : > { %p16561_p8 = pnand %p16560_p4, %p16554_p0 }
  0x55   : > { %16564 = shalt.err (!%p16561_p8)
}
  0x56   : > { %16240 = dma.hbm_to_vmem [thread:$0]  (!%p16787_p11), %s18947_s7, 18432, %s325_s28, [#allocation13], %s16674_s30, %s16674_s30, %s16675_s11  }
  0x57   : > { %s16876_s22 = sadd.s32 1, %s16669_s16   ;;  %s35_s10 = sadd.s32 1, %s16665_s15 }
  0x58   : > { %s32_s24 = ssub.s32 %s16669_s16, %s16876_s22  ;;  %p42_p8 = scmp.ne.s32.totalorder %s16665_s15, %s16661_s14 }
  0x59   : > { %p33_p4 = scmp.eq.s32.totalorder %s32_s24, 0  ;;  %p43_p13 = scmp.eq.s32.totalorder %s16669_s16, 0 }
  0x5a   : > { %p16252_p6 = scmp.lt.s32.totalorder %s16669_s16, 2  ;;  %p19011_p3 = scmp.eq.s32.totalorder %s16757_s17, 1 }
  0x5b   : > { %s16886_s13 = scalar_select %p33_p4, %s16665_s15, %s35_s10  }
  0x5c   : > { %p44_p10 = por %p43_p13, %p42_p8  ;;  %p16890_p5 = por %p19011_p3, %p42_p8 }
  0x5d   : > { %s344_s12 = sand.u32 1, %s16665_s15   ;;  %s11109_s18 = sshll.u32 %s16669_s16, 12 }
  0x5e   : > { %s11089_s28 = sshll.u32 %s344_s12, 8  ;;  %s16899_s29 = scalar_lea.hbm %s18940_s0, %s11109_s18 }
  0x5f   : > { %s348_s23 = scalar_lea.vmem [#allocation6], %s11089_s28  ;;  %p16901_p11 = pnand %p16252_p6, %p44_p10 }
  0x60   : > { %s355_s26 = sshll.u32 %s348_s23, 4  ;;  %s16907_s24 = scalar_lea.sflag [#allocation7], %s344_s12  ;;  %s16905_s26 = int_to_ptr.vmem [resolvable:$true] %s355_s26 }
  0x61   : > { %s16565_s10 = scalar_lea.hbm %s16899_s29, 4096  ;;  %p16567_p9 = pneg %p16901_p11 }
  0x62   : > { %p16566_p7 = scmp.ne.s32.totalorder %s16899_s29, %s16565_s10  ;;  %s16570_s25 = scalar_lea.hbm %s18940_s0, 8192 }
  0x63   : > { %p16571_p1 = scmp.lt.u32.totalorder %s16899_s29, %s18940_s0  ;;  %p16572_p2 = scmp.lt.u32.totalorder %s16570_s25, %s16565_s10 }
  0x64   : > { %p16568_p12 = pnand %p16567_p9, %p16566_p7  ;;  %p16574_p8 = scmp.lt.u32.totalorder %s16565_s10, %s16899_s29 }
  0x65   : > { %p16573_p4 = por %p16572_p2, %p16571_p1 }
  0x66   : > { %p16569_p0 = pneg %p16568_p12 }
  0x67   : > { %p16575_p13 = por %p16574_p8, %p16573_p4 }
  0x69   : > { %p16576_p6 = pnand %p16575_p13, %p16569_p0 }
  0x6b   : > { %16579 = shalt.err (!%p16576_p6)
}
  0x6c   : > { %s16580_s12 = scalar_lea.vmem %s16905_s26, 4096  ;;  %s16676_s18 = smov [#allocation6]  }
  0x6d   : > { %p16581_p10 = scmp.ne.s32.totalorder %s16905_s26, %s16580_s12  ;;  %s16585_s28 = sshll.u32 %s16676_s18, 4  ;;  %s16586_s28 = int_to_ptr.vmem [resolvable:$false] %s16585_s28 }
  0x6e   : > { %s16587_s27 = scalar_lea.vmem %s16586_s28, 8192  ;;  %p16588_p12 = scmp.lt.s32.totalorder %s16905_s26, %s16586_s28 }
  0x6f   : > { %p16583_p3 = pnand %p16581_p10, %p16567_p9  ;;  %p16589_p1 = scmp.lt.s32.totalorder %s16587_s27, %s16580_s12 }
  0x71   : > { %p16584_p7 = pneg %p16583_p3  ;;  %p16590_p2 = por %p16589_p1, %p16588_p12 }
  0x73   : > { %p16591_p4 = pnand %p16590_p2, %p16584_p7 }
  0x75   : > { %16594 = shalt.err (!%p16591_p4)
}
  0x76   : > { %16244 = dma.hbm_to_vmem [thread:$0]  (!%p16901_p11), %s16899_s29, 4096, %s16905_s26, %s16907_s24, %s16674_s30, %s16674_s30, %s16675_s11  }
  0x77   : > { %p19014_p9 = scmp.ne.s32.totalorder %s19008_s21, 0 }
  0x79   : > { %367 = sbr.rel (%p19014_p9) target bundleno = 1699 (0x6a3), region = 60 }
  0x80   : > { %s16941_s10 = sand.u32 1, %s16661_s14   ;;  %p19015_p0 = scmp.ne.s32.totalorder %s19005_s19, 0 }
  0x81   : > { %s11093_s25 = sshll.u32 %s16941_s10, 8  ;;  %s370_s23 = scalar_lea.sflag [#allocation7], %s16941_s10 }
  0x82   : > { %s16947_s6 = scalar_lea.vmem [#allocation6], %s11093_s25 }
  0x83   : > { %16640 = dma.done.wait (%p19015_p0), %s370_s23, 4096  }
  0x84   : > { %16642 = vsyncadd (%p19015_p0), %s370_s23, 4294963200  ;;  %p19016_p11 = scmp.eq.s32.totalorder %s16757_s17, 0 }
  0x86   : > { %16644 = dma.done.wait (%p19016_p11), [#allocation10], 36864   ;;  %p19017_p8 = pmov %p19016_p11 }
  0x88   : > { %16646 = vsyncadd (%p19017_p8), [#allocation10], 4294930432  ;;  %p19018_p13 = pmov %p19017_p8 }
  0x89   : > { %p19019_p6 = pmov %p19017_p8 }
  0x8a   : > { %16648 = dma.done.wait (%p19018_p13), [#allocation13], 18432  }
  0x8b   : > { %16650 = vsyncadd (%p19019_p6), [#allocation13], 4294948864  ;;  %v16677_v0 = vmov 0.0   ;;  %v831_v1 = vld [vmem:[#allocation9] sm:$0xff]  ;;  %v832_v2 = vld [vmem:[#allocation9 + $0x8] sm:$0xff]  ;;  %s18719_s19 = scalar_lea.vmem [#allocation14], %s11093_s25 }
  0x8c   : > { %422 = vst [vmem:[#allocation2] sm:$0xff] %v16677_v0  ;;  %423 = vst [vmem:[#allocation2 + $0x8] sm:$0xff] %v16677_v0  ;;  %v833_v3 = vld [vmem:[#allocation9 + $0x10] sm:$0xff]  ;;  %v14567_v4 = vpack.c.bf16 %v832_v2, %v831_v1  ;;  %v834_v5 = vld [vmem:[#allocation9 + $0x18] sm:$0xff]  ;;  %s11110_s25 = sshll.u32 %s16757_s17, 12  ;;  %s10981_s21 = sshll.u32 %s18719_s19, 4  ;;  %s18894_s21 = int_to_ptr.vmem [resolvable:$true] %s10981_s21 }
  0x8d   : > { %424 = vst [vmem:[#allocation2 + $0x10] sm:$0xff] %v16677_v0  ;;  %425 = vst [vmem:[#allocation2 + $0x18] sm:$0xff] %v16677_v0  ;;  %v14571_v6 = vpack.c.bf16 %v834_v5, %v833_v3  ;;  %v835_v7 = vld [vmem:[#allocation9 + $0x20] sm:$0xff]  ;;  %v836_v8 = vld [vmem:[#allocation9 + $0x28] sm:$0xff]  ;;  %s19104_s29 = sld [smem:[#allocation53_spill]]  ;;  %s10968_s17 = scalar_lea.sflag [#allocation8], %s16941_s10 }
  0x8e   : > { %426 = vst [vmem:[#allocation2 + $0x20] sm:$0xff] %v16677_v0  ;;  %429 = vst [vmem:[#allocation2 + $0x38] sm:$0xff] %v16677_v0  ;;  %14568 = vmatprep.subr.bf16.mxu1 %v14567_v4  ;;  %v14575_v9 = vpack.c.bf16 %v836_v8, %v835_v7  ;;  %v837_v11 = vld [vmem:[#allocation9 + $0x30] sm:$0xff]  ;;  %v838_v12 = vld [vmem:[#allocation9 + $0x38] sm:$0xff]  ;;  %s16595_s24 = scalar_lea.vmem %s18894_s21, 4096  ;;  %s16678_s12 = smov [#allocation14]  }
  0x8f   : > { %432 = vst [vmem:[#allocation2 + $0x50] sm:$0xff] %v16677_v0  ;;  %435 = vst [vmem:[#allocation2 + $0x68] sm:$0xff] %v16677_v0  ;;  %14570 = vmatpush3.bf16.msra.mxu1 %v14567_v4  ;;  %v3655_v13 = vld [vmem:[#allocation9 + $0x200] sm:$0xff]  ;;  %v3656_v14 = vld [vmem:[#allocation9 + $0x208] sm:$0xff]  ;;  %v14579_v21 = vpack.c.bf16 %v838_v12, %v837_v11  ;;  %p16596_p10 = scmp.ne.s32.totalorder %s18894_s21, %s16595_s24  ;;  %s16599_s18 = sshll.u32 %s16678_s12, 4  ;;  %s16600_s18 = int_to_ptr.vmem [resolvable:$false] %s16599_s18 }
  0x90   : > { %438 = vst [vmem:[#allocation2 + $0x80] sm:$0xff] %v16677_v0  ;;  %441 = vst [vmem:[#allocation2 + $0x98] sm:$0xff] %v16677_v0  ;;  %14572 = vmatprep.subr.bf16.mxu1 %v14571_v6  ;;  %v638_v15 = vld [vmem:[%s16947_s6] sm:$0xff]  ;;  %v17047_v16 = vld [vmem:[%s16947_s6 + $0x8] sm:$0xff]  ;;  %v17049_v17 = vpack.c.bf16 %v3656_v14, %v3655_v13  ;;  %s16601_s28 = scalar_lea.vmem %s16600_s18, 8192  ;;  %p16602_p12 = scmp.lt.s32.totalorder %s18894_s21, %s16600_s18 }
  0x91   : > { %444 = vst [vmem:[#allocation2 + $0xb0] sm:$0xff] %v16677_v0  ;;  %447 = vst [vmem:[#allocation2 + $0xc8] sm:$0xff] %v16677_v0  ;;  %v3657_v18 = vld [vmem:[#allocation9 + $0x210] sm:$0xff]  ;;  %v3658_v19 = vld [vmem:[#allocation9 + $0x218] sm:$0xff]  ;;  %13079 = vmatprep.mubr.f32.mxu0 %v638_v15  ;;  %p16597_p3 = pnand %p16596_p10, %p16890_p5  ;;  %p16603_p1 = scmp.lt.s32.totalorder %s16601_s28, %s16595_s24 }
  0x92   : > { %450 = vst [vmem:[#allocation2 + $0xe0] sm:$0xff] %v16677_v0  ;;  %453 = vst [vmem:[#allocation2 + $0xf8] sm:$0xff] %v16677_v0  ;;  %v17053_v20 = vld [vmem:[%s16947_s6 + $0x10] sm:$0xff]  ;;  %v839_v22 = vld [vmem:[#allocation9 + $0x40] sm:$0xff]  ;;  %v17055_v24 = vpack.c.bf16 %v3658_v19, %v3657_v18  ;;  %14824 = vmatprep.subr.bf16.mxu0 %v17049_v17 }
  0x93   : > { %456 = vst [vmem:[#allocation2 + $0x110] sm:$0xff] %v16677_v0  ;;  %459 = vst [vmem:[#allocation2 + $0x128] sm:$0xff] %v16677_v0  ;;  %14574 = vmatpush3.bf16.msra.mxu1 %v14571_v6  ;;  %v840_v23 = vld [vmem:[#allocation9 + $0x48] sm:$0xff]  ;;  %v17059_v25 = vld [vmem:[%s16947_s6 + $0x18] sm:$0xff]  ;;  %14826 = vmatpush3.bf16.msra.mxu0 %v17049_v17  ;;  %s18892_s26 = scalar_lea.hbm %s19104_s29, %s11110_s25  ;;  %p16598_p7 = pneg %p16597_p3 }
  0x94   : > { %462 = vst [vmem:[#allocation2 + $0x140] sm:$0xff] %v16677_v0  ;;  %465 = vst [vmem:[#allocation2 + $0x158] sm:$0xff] %v16677_v0  ;;  %v17042_v10 = vld [vmem:[#allocation2 + $0xf] sm:$0xff]  ;;  %14576 = vmatprep.subr.bf16.mxu1 %v14575_v9  ;;  %v3659_v26 = vld [vmem:[#allocation9 + $0x220] sm:$0xff]  ;;  %14828 = vmatprep.subr.bf16.mxu0 %v17055_v24  ;;  %v14583_v33 = vpack.c.bf16 %v840_v23, %v839_v22  ;;  %p16604_p2 = por %p16603_p1, %p16602_p12 }
  0x95   : > { %468 = vst [vmem:[#allocation2 + $0x170] sm:$0xff] %v16677_v0  ;;  %471 = vst [vmem:[#allocation2 + $0x188] sm:$0xff] %v16677_v0  ;;  %12439 = vmatprep.mubr.f32.mxu1 %v17042_v10  ;;  %v3660_v27 = vld [vmem:[#allocation9 + $0x228] sm:$0xff]  ;;  %v17064_v28 = vld [vmem:[%s16947_s6 + $0x20] sm:$0xff] }
  0x96   : > { %474 = vst [vmem:[#allocation2 + $0x1a0] sm:$0xff] %v16677_v0  ;;  %477 = vst [vmem:[#allocation2 + $0x1b8] sm:$0xff] %v16677_v0  ;;  %v17069_v29 = vld [vmem:[%s16947_s6 + $0x28] sm:$0xff]  ;;  %v17072_v30 = vpack.c.bf16 %v3660_v27, %v3659_v26  ;;  %v17076_v31 = vld [vmem:[%s16947_s6 + $0x30] sm:$0xff]  ;;  %p16605_p4 = pnand %p16604_p2, %p16598_p7 }
  0x97   : > { %480 = vst [vmem:[#allocation2 + $0x1d0] sm:$0xff] %v16677_v0  ;;  %483 = vst [vmem:[#allocation2 + $0x1e8] sm:$0xff] %v16677_v0  ;;  %14578 = vmatpush3.bf16.msra.mxu1 %v14575_v9  ;;  %v17079_v32 = vld [vmem:[%s16947_s6 + $0x38] sm:$0xff]  ;;  %v841_v34 = vld [vmem:[#allocation9 + $0x50] sm:$0xff]  ;;  %14830 = vmatpush3.bf16.msra.mxu0 %v17055_v24 }
  0x98   : > { %486 = vst [vmem:[#allocation2 + $0x200] sm:$0xff] %v16677_v0  ;;  %489 = vst [vmem:[#allocation2 + $0x218] sm:$0xff] %v16677_v0  ;;  %14580 = vmatprep.subr.bf16.mxu1 %v14579_v21  ;;  %v3661_v35 = vld [vmem:[#allocation9 + $0x230] sm:$0xff]  ;;  %v3662_v36 = vld [vmem:[#allocation9 + $0x238] sm:$0xff]  ;;  %14832 = vmatprep.subr.bf16.mxu0 %v17072_v30 }
  0x99   : > { %492 = vst [vmem:[#allocation2 + $0x230] sm:$0xff] %v16677_v0  ;;  %495 = vst [vmem:[#allocation2 + $0x248] sm:$0xff] %v16677_v0  ;;  %v842_v37 = vld [vmem:[#allocation9 + $0x58] sm:$0xff]  ;;  %v17084_v38 = vld [vmem:[%s16947_s6 + $0x40] sm:$0xff]  ;;  %v17093_v40 = vpack.c.bf16 %v3662_v36, %v3661_v35 }
  0x9a   : > { %498 = vst [vmem:[#allocation2 + $0x260] sm:$0xff] %v16677_v0  ;;  %501 = vst [vmem:[#allocation2 + $0x278] sm:$0xff] %v16677_v0  ;;  %v17087_v39 = vld [vmem:[%s16947_s6 + $0x48] sm:$0xff]  ;;  %v17096_v41 = vld [vmem:[%s16947_s6 + $0x50] sm:$0xff]  ;;  %v14587_v43 = vpack.c.bf16 %v842_v37, %v841_v34 }
  0x9b   : > { %504 = vst [vmem:[#allocation2 + $0x290] sm:$0xff] %v16677_v0  ;;  %507 = vst [vmem:[#allocation2 + $0x2a8] sm:$0xff] %v16677_v0  ;;  %14582 = vmatpush3.bf16.msra.mxu1 %v14579_v21  ;;  %v17099_v42 = vld [vmem:[%s16947_s6 + $0x58] sm:$0xff]  ;;  %v3663_v44 = vld [vmem:[#allocation9 + $0x240] sm:$0xff]  ;;  %14834 = vmatpush3.bf16.msra.mxu0 %v17072_v30 }
  0x9c   : > { %510 = vst [vmem:[#allocation2 + $0x2c0] sm:$0xff] %v16677_v0  ;;  %513 = vst [vmem:[#allocation2 + $0x2d8] sm:$0xff] %v16677_v0  ;;  %14584 = vmatprep.subr.bf16.mxu1 %v14583_v33  ;;  %v3664_v45 = vld [vmem:[#allocation9 + $0x248] sm:$0xff]  ;;  %v843_v46 = vld [vmem:[#allocation9 + $0x60] sm:$0xff]  ;;  %14836 = vmatprep.subr.bf16.mxu0 %v17093_v40 }
  0x9d   : > { %516 = vst [vmem:[#allocation2 + $0x2f0] sm:$0xff] %v16677_v0  ;;  %519 = vst [vmem:[#allocation2 + $0x308] sm:$0xff] %v16677_v0  ;;  %v844_v47 = vld [vmem:[#allocation9 + $0x68] sm:$0xff]  ;;  %v17105_v48 = vld [vmem:[%s16947_s6 + $0x60] sm:$0xff]  ;;  %v17111_v50 = vpack.c.bf16 %v3664_v45, %v3663_v44 }
  0x9e   : > { %522 = vst [vmem:[#allocation2 + $0x320] sm:$0xff] %v16677_v0  ;;  %525 = vst [vmem:[#allocation2 + $0x338] sm:$0xff] %v16677_v0  ;;  %v17108_v49 = vld [vmem:[%s16947_s6 + $0x68] sm:$0xff]  ;;  %v3665_v51 = vld [vmem:[#allocation9 + $0x250] sm:$0xff]  ;;  %v14591_v52 = vpack.c.bf16 %v844_v47, %v843_v46 }
  0x9f   : > { %526 = vst [vmem:[#allocation2 + $0x340] sm:$0xff] %v16677_v0  ;;  %527 = vst [vmem:[#allocation2 + $0x348] sm:$0xff] %v16677_v0  ;;  %14586 = vmatpush3.bf16.msra.mxu1 %v14583_v33  ;;  %v3666_v53 = vld [vmem:[#allocation9 + $0x258] sm:$0xff]  ;;  %v17116_v54 = vld [vmem:[%s16947_s6 + $0x70] sm:$0xff]  ;;  %14838 = vmatpush3.bf16.msra.mxu0 %v17093_v40 }
  0xa0   : > { %528 = vst [vmem:[#allocation2 + $0x350] sm:$0xff] %v16677_v0  ;;  %531 = vst [vmem:[#allocation3 + $0x8] sm:$0xff] %v16677_v0  ;;  %14588 = vmatprep.subr.bf16.mxu1 %v14587_v43  ;;  %v17119_v55 = vld [vmem:[%s16947_s6 + $0x78] sm:$0xff]  ;;  %v845_v56 = vld [vmem:[#allocation9 + $0x70] sm:$0xff]  ;;  %14840 = vmatprep.subr.bf16.mxu0 %v17111_v50  ;;  %v17125_v59 = vpack.c.bf16 %v3666_v53, %v3665_v51 }
  0xa1   : > { %532 = vst [vmem:[#allocation3 + $0x10] sm:$0xff] %v16677_v0  ;;  %533 = vst [vmem:[#allocation3 + $0x18] sm:$0xff] %v16677_v0  ;;  %v846_v57 = vld [vmem:[#allocation9 + $0x78] sm:$0xff]  ;;  %v1168_v58 = vld [vmem:[#allocation12] sm:$0xff] }
  0xa2   : > { %534 = vst [vmem:[#allocation3 + $0x20] sm:$0xff] %v16677_v0  ;;  %537 = vst [vmem:[#allocation3 + $0x38] sm:$0xff] %v16677_v0  ;;  %v654_v60 = vld [vmem:[%s16947_s6 + $0x80] sm:$0xff]  ;;  %v14595_v61 = vpack.c.bf16 %v846_v57, %v845_v56  ;;  %v3668_v63 = vld [vmem:[#allocation9 + $0x268] sm:$0xff] }
  0xa3   : > { %540 = vst [vmem:[#allocation3 + $0x50] sm:$0xff] %v16677_v0  ;;  %543 = vst [vmem:[#allocation3 + $0x68] sm:$0xff] %v16677_v0  ;;  %14590 = vmatpush3.bf16.msra.mxu1 %v14587_v43  ;;  %v3667_v62 = vld [vmem:[#allocation9 + $0x260] sm:$0xff]  ;;  %v1169_v1 = vld [vmem:[#allocation12 + $0x8] sm:$0xff]  ;;  %14842 = vmatpush3.bf16.msra.mxu0 %v17111_v50 }
  0xa4   : > { %546 = vst [vmem:[#allocation3 + $0x80] sm:$0xff] %v16677_v0  ;;  %549 = vst [vmem:[#allocation3 + $0x98] sm:$0xff] %v16677_v0  ;;  %14592 = vmatprep.subr.bf16.mxu1 %v14591_v52  ;;  %v656_v2 = vld [vmem:[%s16947_s6 + $0x90] sm:$0xff]  ;;  %v657_v3 = vld [vmem:[%s16947_s6 + $0x98] sm:$0xff]  ;;  %14844 = vmatprep.subr.bf16.mxu0 %v17125_v59  ;;  %v17133_v4 = vpack.c.bf16 %v3668_v63, %v3667_v62  ;;  %v14599_v6 = vpack.c.bf16 %v1169_v1, %v1168_v58 }
  0xa5   : > { %552 = vst [vmem:[#allocation3 + $0xb0] sm:$0xff] %v16677_v0  ;;  %555 = vst [vmem:[#allocation3 + $0xc8] sm:$0xff] %v16677_v0  ;;  %v658_v5 = vld [vmem:[%s16947_s6 + $0xa0] sm:$0xff]  ;;  %v1170_v7 = vld [vmem:[#allocation12 + $0x10] sm:$0xff] }
  0xa6   : > { %558 = vst [vmem:[#allocation3 + $0xe0] sm:$0xff] %v16677_v0  ;;  %561 = vst [vmem:[#allocation3 + $0xf8] sm:$0xff] %v16677_v0  ;;  %v1171_v8 = vld [vmem:[#allocation12 + $0x18] sm:$0xff]  ;;  %v659_v9 = vld [vmem:[%s16947_s6 + $0xa8] sm:$0xff] }
  0xa7   : > { %564 = vst [vmem:[#allocation3 + $0x110] sm:$0xff] %v16677_v0  ;;  %567 = vst [vmem:[#allocation3 + $0x128] sm:$0xff] %v16677_v0  ;;  %14594 = vmatpush3.bf16.msra.mxu1 %v14591_v52  ;;  %v3669_v11 = vld [vmem:[#allocation9 + $0x270] sm:$0xff]  ;;  %v3670_v12 = vld [vmem:[#allocation9 + $0x278] sm:$0xff]  ;;  %14846 = vmatpush3.bf16.msra.mxu0 %v17125_v59  ;;  %v14603_v21 = vpack.c.bf16 %v1171_v8, %v1170_v7 }
  0xa8   : > { %570 = vst [vmem:[#allocation3 + $0x140] sm:$0xff] %v16677_v0  ;;  %573 = vst [vmem:[#allocation3 + $0x158] sm:$0xff] %v16677_v0  ;;  %14596 = vmatprep.subr.bf16.mxu1 %v14595_v61  ;;  %v660_v13 = vld [vmem:[%s16947_s6 + $0xb0] sm:$0xff]  ;;  %v661_v14 = vld [vmem:[%s16947_s6 + $0xb8] sm:$0xff]  ;;  %14848 = vmatprep.subr.bf16.mxu0 %v17133_v4  ;;  %v17145_v22 = vpack.c.bf16 %v3670_v12, %v3669_v11 }
  0xa9   : > { %576 = vst [vmem:[#allocation3 + $0x170] sm:$0xff] %v16677_v0  ;;  %579 = vst [vmem:[#allocation3 + $0x188] sm:$0xff] %v16677_v0  ;;  %v1172_v18 = vld [vmem:[#allocation12 + $0x20] sm:$0xff]  ;;  %v663_v26 = vld [vmem:[%s16947_s6 + $0xc8] sm:$0xff] }
  0xaa   : > { %582 = vst [vmem:[#allocation3 + $0x1a0] sm:$0xff] %v16677_v0  ;;  %585 = vst [vmem:[#allocation3 + $0x1b8] sm:$0xff] %v16677_v0  ;;  %v662_v23 = vld [vmem:[%s16947_s6 + $0xc0] sm:$0xff]  ;;  %v1173_v27 = vld [vmem:[#allocation12 + $0x28] sm:$0xff] }
  0xab   : > { %588 = vst [vmem:[#allocation3 + $0x1d0] sm:$0xff] %v16677_v0  ;;  %591 = vst [vmem:[#allocation3 + $0x1e8] sm:$0xff] %v16677_v0  ;;  %14598 = vmatpush3.bf16.msra.mxu1 %v14595_v61  ;;  %v4361_v33 = vld [vmem:[#allocation9 + $0x280] sm:$0xff]  ;;  %v4362_v34 = vld [vmem:[#allocation9 + $0x288] sm:$0xff]  ;;  %14850 = vmatpush3.bf16.msra.mxu0 %v17133_v4  ;;  %v14607_v44 = vpack.c.bf16 %v1173_v27, %v1172_v18 }
  0xac   : > { %594 = vst [vmem:[#allocation3 + $0x200] sm:$0xff] %v16677_v0  ;;  %597 = vst [vmem:[#allocation3 + $0x218] sm:$0xff] %v16677_v0  ;;  %14600 = vmatprep.subr.bf16.mxu1 %v14599_v6  ;;  %v664_v35 = vld [vmem:[%s16947_s6 + $0xd0] sm:$0xff]  ;;  %v665_v36 = vld [vmem:[%s16947_s6 + $0xd8] sm:$0xff]  ;;  %14852 = vmatprep.subr.bf16.mxu0 %v17145_v22  ;;  %v14887_v46 = vpack.c.bf16 %v4362_v34, %v4361_v33 }
  0xad   : > { %600 = vst [vmem:[#allocation3 + $0x230] sm:$0xff] %v16677_v0  ;;  %603 = vst [vmem:[#allocation3 + $0x248] sm:$0xff] %v16677_v0  ;;  %v1174_v45 = vld [vmem:[#allocation12 + $0x30] sm:$0xff]  ;;  %v1175_v47 = vld [vmem:[#allocation12 + $0x38] sm:$0xff] }
  0xae   : > { %606 = vst [vmem:[#allocation3 + $0x260] sm:$0xff] %v16677_v0  ;;  %609 = vst [vmem:[#allocation3 + $0x278] sm:$0xff] %v16677_v0  ;;  %v666_v51 = vld [vmem:[%s16947_s6 + $0xe0] sm:$0xff]  ;;  %v667_v52 = vld [vmem:[%s16947_s6 + $0xe8] sm:$0xff] }
  0xaf   : > { %612 = vst [vmem:[#allocation3 + $0x290] sm:$0xff] %v16677_v0  ;;  %615 = vst [vmem:[#allocation3 + $0x2a8] sm:$0xff] %v16677_v0  ;;  %14854 = vmatpush3.bf16.msra.mxu0 %v17145_v22  ;;  %v4363_v53 = vld [vmem:[#allocation9 + $0x290] sm:$0xff]  ;;  %v4364_v56 = vld [vmem:[#allocation9 + $0x298] sm:$0xff] }
  0xb0   : > { %618 = vst [vmem:[#allocation3 + $0x2c0] sm:$0xff] %v16677_v0  ;;  %621 = vst [vmem:[#allocation3 + $0x2d8] sm:$0xff] %v16677_v0  ;;  %14888 = vmatprep.subr.bf16.mxu0 %v14887_v46  ;;  %v1176_v61 = vld [vmem:[#allocation12 + $0x40] sm:$0xff]  ;;  %v1177_v62 = vld [vmem:[#allocation12 + $0x48] sm:$0xff]  ;;  %v14891_v63 = vpack.c.bf16 %v4364_v56, %v4363_v53 }
  0xb1   : > { %624 = vst [vmem:[#allocation3 + $0x2f0] sm:$0xff] %v16677_v0  ;;  %627 = vst [vmem:[#allocation3 + $0x308] sm:$0xff] %v16677_v0  ;;  %v4366_v1 = vld [vmem:[#allocation9 + $0x2a8] sm:$0xff]  ;;  %v4367_v8 = vld [vmem:[#allocation9 + $0x2b0] sm:$0xff] }
  0xb2   : > { %630 = vst [vmem:[#allocation3 + $0x320] sm:$0xff] %v16677_v0  ;;  %633 = vst [vmem:[#allocation3 + $0x338] sm:$0xff] %v16677_v0  ;;  %13080 = vmatmul.mubr.f32.vlgmr.msra.gmra.mrb[0].mxu0 %v17047_v16  ;;  %v4369_v18 = vld [vmem:[#allocation9 + $0x2c0] sm:$0xff]  ;;  %v4371_v27 = vld [vmem:[#allocation9 + $0x2d0] sm:$0xff] }
  0xb3   : > { %634 = vst [vmem:[#allocation3 + $0x340] sm:$0xff] %v16677_v0  ;;  %635 = vst [vmem:[#allocation3 + $0x348] sm:$0xff] %v16677_v0  ;;  %14890 = vmatpush3.bf16.msra.mxu0 %v14887_v46  ;;  %13082 = vmatprep.mubr.f32.mxu0 %v17053_v20  ;;  %v4372_v33 = vld [vmem:[#allocation9 + $0x2d8] sm:$0xff]  ;;  %v1182_v34 = vld [vmem:[#allocation12 + $0x70] sm:$0xff] }
  0xb4   : > { %636 = vst [vmem:[#allocation3 + $0x350] sm:$0xff] %v16677_v0  ;;  %671 = vst [vmem:[#allocation2 + $0x40] sm:$0xff] %v638_v15  ;;  %v655_v0 = vld [vmem:[%s16947_s6 + $0x88] sm:$0xff]  ;;  %v17140_v15 = vld [vmem:[#allocation2 + $0x17] sm:$0xff]  ;;  %14892 = vmatprep.subr.bf16.mxu0 %v14891_v63 }
  0xb5   : > { %672 = vst [vmem:[#allocation2 + $0x48] sm:$0xff] %v17047_v16  ;;  %673 = vst [vmem:[#allocation2 + $0x70] sm:$0xff] %v17053_v20  ;;  %12440 = vmatmul.mubr.f32.vlgmr.msra.gmra.mrb[0].mxu1 %v17140_v15  ;;  %v1178_v16 = vld [vmem:[#allocation12 + $0x50] sm:$0xff]  ;;  %v4374_v46 = vld [vmem:[#allocation9 + $0x2e8] sm:$0xff] }
  0xb6   : > { %674 = vst [vmem:[#allocation2 + $0x78] sm:$0xff] %v17059_v25  ;;  %675 = vst [vmem:[#allocation2 + $0xa0] sm:$0xff] %v17064_v28  ;;  %14602 = vmatpush3.bf16.msra.mxu1 %v14599_v6  ;;  %13083 = vmatmul.mubr.f32.gmra.mrb[2].mxu0 %v17059_v25  ;;  %v1179_v6 = vld [vmem:[#allocation12 + $0x58] sm:$0xff]  ;;  %v4375_v53 = vld [vmem:[#allocation9 + $0x2f0] sm:$0xff] }
  0xb7   : > { %676 = vst [vmem:[#allocation2 + $0xa8] sm:$0xff] %v17069_v29  ;;  %677 = vst [vmem:[#allocation2 + $0xd0] sm:$0xff] %v17076_v31  ;;  %14604 = vmatprep.subr.bf16.mxu1 %v14603_v21  ;;  %14894 = vmatpush3.bf16.msra.mxu0 %v14891_v63  ;;  %v14619_v20 = vpack.c.bf16 %v1179_v6, %v1178_v16  ;;  %v4376_v56 = vld [vmem:[#allocation9 + $0x2f8] sm:$0xff] }
  0xb8   : > { %678 = vst [vmem:[#allocation2 + $0xd8] sm:$0xff] %v17079_v32  ;;  %679 = vst [vmem:[#allocation2 + $0x100] sm:$0xff] %v17084_v38  ;;  %13085 = vmatprep.mubr.f32.mxu0 %v17064_v28 }
  0xb9   : > { %680 = vst [vmem:[#allocation2 + $0x108] sm:$0xff] %v17087_v39  ;;  %681 = vst [vmem:[#allocation2 + $0x130] sm:$0xff] %v17096_v41 }
  0xba   : > { %682 = vst [vmem:[#allocation2 + $0x138] sm:$0xff] %v17099_v42  ;;  %683 = vst [vmem:[#allocation2 + $0x160] sm:$0xff] %v17105_v48  ;;  %14606 = vmatpush3.bf16.msra.mxu1 %v14603_v21  ;;  %13086 = vmatmul.mubr.f32.gmra.mrb[4].mxu0 %v17069_v29  ;;  %v4370_v21 = vld [vmem:[#allocation9 + $0x2c8] sm:$0xff] }
  0xbb   : > { %684 = vst [vmem:[#allocation2 + $0x168] sm:$0xff] %v17108_v49  ;;  %685 = vst [vmem:[#allocation2 + $0x190] sm:$0xff] %v17116_v54  ;;  %v17143_v19 = vld [vmem:[#allocation2 + $0x3f] sm:$0xff]  ;;  %14608 = vmatprep.subr.bf16.mxu1 %v14607_v44  ;;  %13088 = vmatprep.mubr.f32.mxu0 %v17076_v31  ;;  %v14903_v29 = vpack.c.bf16 %v4370_v21, %v4369_v18  ;;  %v14907_v31 = vpack.c.bf16 %v4372_v33, %v4371_v27  ;;  %v5074_v27 = vld [vmem:[#allocation9 + $0x330] sm:$0xff] }
  0xbc   : > { %686 = vst [vmem:[#allocation2 + $0x198] sm:$0xff] %v17119_v55  ;;  %687 = vst [vmem:[#allocation2 + $0x1c0] sm:$0xff] %v654_v60  ;;  %12442 = vmatprep.mubr.f32.mxu1 %v17143_v19  ;;  %v17154_v37 = vld [vmem:[#allocation2 + $0x47] sm:$0xff]  ;;  %v17156_v43 = vld [vmem:[#allocation2 + $0x6f] sm:$0xff]  ;;  %v14611_v60 = vpack.c.bf16 %v1175_v47, %v1174_v45 }
  0xbd   : > { %688 = vst [vmem:[#allocation2 + $0x1c8] sm:$0xff] %v655_v0  ;;  %689 = vst [vmem:[#allocation2 + $0x1f0] sm:$0xff] %v656_v2  ;;  %12443 = vmatmul.mubr.f32.gmra.mrb[2].mxu1 %v17154_v37  ;;  %v17164_v57 = vld [vmem:[#allocation2 + $0x77] sm:$0xff]  ;;  %v17166_v58 = vld [vmem:[#allocation2 + $0x9f] sm:$0xff] }
  0xbe   : > { %690 = vst [vmem:[#allocation2 + $0x1f8] sm:$0xff] %v657_v3  ;;  %691 = vst [vmem:[#allocation2 + $0x220] sm:$0xff] %v658_v5  ;;  %12445 = vmatprep.mubr.f32.mxu1 %v17156_v43  ;;  %v4365_v0 = vld [vmem:[#allocation9 + $0x2a0] sm:$0xff]  ;;  %14610 = vmatpush3.bf16.msra.mxu1 %v14607_v44  ;;  %v17173_v3 = vld [vmem:[#allocation2 + $0xcf] sm:$0xff]  ;;  %v14615_v5 = vpack.c.bf16 %v1177_v62, %v1176_v61 }
  0xbf   : > { %692 = vst [vmem:[#allocation2 + $0x228] sm:$0xff] %v659_v9  ;;  %693 = vst [vmem:[#allocation2 + $0x250] sm:$0xff] %v660_v13  ;;  %v17171_v2 = vld [vmem:[#allocation2 + $0xa7] sm:$0xff]  ;;  %14612 = vmatprep.subr.bf16.mxu1 %v14611_v60  ;;  %v14895_v7 = vpack.c.bf16 %v4366_v1, %v4365_v0  ;;  %v4368_v9 = vld [vmem:[#allocation9 + $0x2b8] sm:$0xff]  ;;  %13089 = vmatmul.mubr.f32.gmra.mrb[6].mxu0 %v17079_v32 }
  0xc0   : > { %694 = vst [vmem:[#allocation2 + $0x258] sm:$0xff] %v661_v14  ;;  %695 = vst [vmem:[#allocation2 + $0x280] sm:$0xff] %v662_v23  ;;  %v17179_v11 = vld [vmem:[#allocation2 + $0xd7] sm:$0xff]  ;;  %v17181_v12 = vld [vmem:[#allocation2 + $0xff] sm:$0xff]  ;;  %v14899_v25 = vpack.c.bf16 %v4368_v9, %v4367_v8  ;;  %13091 = vmatprep.mubr.f32.mxu0 %v17084_v38 }
  0xc1   : > { %696 = vst [vmem:[#allocation2 + $0x288] sm:$0xff] %v663_v26  ;;  %697 = vst [vmem:[#allocation2 + $0x2b0] sm:$0xff] %v664_v35  ;;  %12446 = vmatmul.mubr.f32.gmra.mrb[4].mxu1 %v17164_v57  ;;  %14896 = vmatprep.subr.bf16.mxu0 %v14895_v7  ;;  %v1180_v13 = vld [vmem:[#allocation12 + $0x60] sm:$0xff]  ;;  %v1181_v14 = vld [vmem:[#allocation12 + $0x68] sm:$0xff] }
  0xc2   : > { %698 = vst [vmem:[#allocation2 + $0x2b8] sm:$0xff] %v665_v36  ;;  %699 = vst [vmem:[#allocation2 + $0x2e0] sm:$0xff] %v666_v51  ;;  %12448 = vmatprep.mubr.f32.mxu1 %v17166_v58  ;;  %14614 = vmatpush3.bf16.msra.mxu1 %v14611_v60  ;;  %v17187_v23 = vld [vmem:[#allocation2 + $0x107] sm:$0xff]  ;;  %v17189_v26 = vld [vmem:[#allocation2 + $0x12f] sm:$0xff]  ;;  %v14623_v28 = vpack.c.bf16 %v1181_v14, %v1180_v13 }
  0xc3   : > { %700 = vst [vmem:[#allocation2 + $0x2e8] sm:$0xff] %v667_v52  ;;  %14616 = vmatprep.subr.bf16.mxu1 %v14615_v5  ;;  %14898 = vmatpush3.bf16.msra.mxu0 %v14895_v7  ;;  %v1183_v35 = vld [vmem:[#allocation12 + $0x78] sm:$0xff]  ;;  %v4373_v45 = vld [vmem:[#allocation9 + $0x2e0] sm:$0xff]  ;;  %v1538_v51 = vld [vmem:[#allocation9 + $0x88] sm:$0xff] }
  0xc4   : > { %14900 = vmatprep.subr.bf16.mxu0 %v14899_v25  ;;  %v17195_v36 = vld [vmem:[#allocation2 + $0x137] sm:$0xff]  ;;  %v17197_v44 = vld [vmem:[#allocation2 + $0x15f] sm:$0xff]  ;;  %13092 = vmatmul.mubr.f32.gmra.mrb[8].mxu0 %v17087_v39  ;;  %v14627_v32 = vpack.c.bf16 %v1183_v35, %v1182_v34  ;;  %v17203_v52 = vld [vmem:[#allocation2 + $0x167] sm:$0xff]  ;;  %v14911_v39 = vpack.c.bf16 %v4374_v46, %v4373_v45 }
  0xc5   : > { %12449 = vmatmul.mubr.f32.gmra.mrb[6].mxu1 %v17171_v2  ;;  %v1537_v47 = vld [vmem:[#allocation9 + $0x80] sm:$0xff]  ;;  %v17205_v38 = vld [vmem:[#allocation2 + $0x18f] sm:$0xff]  ;;  %13094 = vmatprep.mubr.f32.mxu0 %v17096_v41  ;;  %v669_v62 = vld [vmem:[%s16947_s6 + $0xf8] sm:$0xff] }
  0xc6   : > { %12451 = vmatprep.mubr.f32.mxu1 %v17173_v3  ;;  %14618 = vmatpush3.bf16.msra.mxu1 %v14615_v5  ;;  %v17209_v60 = vpack.c.bf16 %v1538_v51, %v1537_v47  ;;  %v668_v61 = vld [vmem:[%s16947_s6 + $0xf0] sm:$0xff]  ;;  %702 = vst [vmem:[#allocation2 + $0x318] sm:$0xff] %v669_v62  ;;  %v17218_v41 = vld [vmem:[#allocation2 + $0x1bf] sm:$0xff]  ;;  %v5069_v1 = vld [vmem:[#allocation9 + $0x308] sm:$0xff]  ;;  %s19098_s6 = sld [smem:[#allocation52_spill]] }
  0xc7   : > { %14620 = vmatprep.subr.bf16.mxu1 %v14619_v20  ;;  %14902 = vmatpush3.bf16.msra.mxu0 %v14899_v25  ;;  %701 = vst [vmem:[#allocation2 + $0x310] sm:$0xff] %v668_v61  ;;  %v17215_v63 = vld [vmem:[#allocation2 + $0x197] sm:$0xff]  ;;  %v5068_v0 = vld [vmem:[#allocation9 + $0x300] sm:$0xff]  ;;  %v4298_v8 = vld [vmem:[#allocation2 + $0x49] sm:$0xff] }
  0xc8   : > { %14904 = vmatprep.subr.bf16.mxu0 %v14903_v29  ;;  %13095 = vmatmul.mubr.f32.gmra.mrb[10].mxu0 %v17099_v42  ;;  %v14915_v42 = vpack.c.bf16 %v4376_v56, %v4375_v53  ;;  %v17224_v5 = vld [vmem:[#allocation2 + $0x1c7] sm:$0xff]  ;;  %v14951_v6 = vpack.c.bf16 %v5069_v1, %v5068_v0  ;;  %v5071_v7 = vld [vmem:[#allocation9 + $0x318] sm:$0xff]  ;;  %v17252_v56 = vld [vmem:[#allocation2 + $0x2af] sm:$0xff] }
  0xc9   : > { %12452 = vmatmul.mubr.f32.gmra.mrb[8].mxu1 %v17179_v11  ;;  %13097 = vmatprep.mubr.f32.mxu0 %v17105_v48  ;;  %v17227_v48 = vld [vmem:[#allocation2 + $0x1ef] sm:$0xff]  ;;  %v4297_v16 = vld [vmem:[#allocation2 + $0x41] sm:$0xff]  ;;  %v17232_v9 = vld [vmem:[#allocation2 + $0x1f7] sm:$0xff] }
  0xca   : > { %12454 = vmatprep.mubr.f32.mxu1 %v17181_v12  ;;  %14622 = vmatpush3.bf16.msra.mxu1 %v14619_v20  ;;  %v4299_v20 = vld [vmem:[#allocation2 + $0x71] sm:$0xff]  ;;  %v5072_v13 = vld [vmem:[#allocation9 + $0x320] sm:$0xff]  ;;  %v5073_v14 = vld [vmem:[#allocation9 + $0x328] sm:$0xff] }
  0xcb   : > { %14624 = vmatprep.subr.bf16.mxu1 %v14623_v28  ;;  %14906 = vmatpush3.bf16.msra.mxu0 %v14903_v29  ;;  %v17238_v18 = vld [vmem:[#allocation2 + $0x227] sm:$0xff]  ;;  %v14959_v29 = vpack.c.bf16 %v5073_v14, %v5072_v13  ;;  %v5075_v33 = vld [vmem:[#allocation9 + $0x338] sm:$0xff]  ;;  %v5078_v62 = vld [vmem:[#allocation9 + $0x350] sm:$0xff] }
  0xcc   : > { %14908 = vmatprep.subr.bf16.mxu0 %v14907_v31  ;;  %13098 = vmatmul.mubr.f32.gmra.mrb[12].mxu0 %v17108_v49  ;;  %v5070_v49 = vld [vmem:[#allocation9 + $0x310] sm:$0xff]  ;;  %v4301_v21 = vld [vmem:[#allocation2 + $0xa1] sm:$0xff]  ;;  %v14963_v45 = vpack.c.bf16 %v5075_v33, %v5074_v27  ;;  %v4304_v51 = vld [vmem:[#allocation2 + $0xd9] sm:$0xff] }
  0xcd   : > { %12455 = vmatmul.mubr.f32.gmra.mrb[10].mxu1 %v17187_v23  ;;  %13100 = vmatprep.mubr.f32.mxu0 %v17116_v54  ;;  %v17234_v54 = vld [vmem:[#allocation2 + $0x21f] sm:$0xff]  ;;  %v14955_v25 = vpack.c.bf16 %v5071_v7, %v5070_v49  ;;  %v4302_v34 = vld [vmem:[#allocation2 + $0xa9] sm:$0xff]  ;;  %v17244_v35 = vld [vmem:[#allocation2 + $0x257] sm:$0xff] }
  0xce   : > { %12457 = vmatprep.mubr.f32.mxu1 %v17189_v26  ;;  %14626 = vmatpush3.bf16.msra.mxu1 %v14623_v28  ;;  %v17240_v28 = vld [vmem:[#allocation2 + $0x24f] sm:$0xff]  ;;  %v5076_v46 = vld [vmem:[#allocation9 + $0x340] sm:$0xff]  ;;  %v17256_v1 = vld [vmem:[#allocation2 + $0x2b7] sm:$0xff] }
  0xcf   : > { %14628 = vmatprep.subr.bf16.mxu1 %v14627_v32  ;;  %14910 = vmatpush3.bf16.msra.mxu0 %v14907_v31  ;;  %v4303_v31 = vld [vmem:[#allocation2 + $0xd1] sm:$0xff]  ;;  %v5077_v47 = vld [vmem:[#allocation9 + $0x348] sm:$0xff]  ;;  %v5080_v7 = vld [vmem:[#allocation9 + $0x360] sm:$0xff] }
  0xd0   : > { %14912 = vmatprep.subr.bf16.mxu0 %v14911_v39  ;;  %13101 = vmatmul.mubr.f32.gmra.mrb[14].mxu0 %v17119_v55  ;;  %v4300_v55 = vld [vmem:[#allocation2 + $0x79] sm:$0xff]  ;;  %v4305_v53 = vld [vmem:[#allocation2 + $0x101] sm:$0xff]  ;;  %v14967_v61 = vpack.c.bf16 %v5077_v47, %v5076_v46  ;;  %v4306_v0 = vld [vmem:[#allocation2 + $0x109] sm:$0xff] }
  0xd1   : > { %12458 = vmatmul.mubr.f32.gmra.mrb[12].mxu1 %v17195_v36  ;;  %13239 = vmatprep.mubr.f32.mxu0 %v4297_v16  ;;  %v4307_v16 = vld [vmem:[#allocation2 + $0x131] sm:$0xff]  ;;  %v4309_v13 = vld [vmem:[#allocation2 + $0x161] sm:$0xff] }
  0xd2   : > { %12460 = vmatprep.mubr.f32.mxu1 %v17197_v44  ;;  %14630 = vmatpush3.bf16.msra.mxu1 %v14627_v32  ;;  %v17246_v32 = vld [vmem:[#allocation2 + $0x27f] sm:$0xff]  ;;  %v5082_v27 = vld [vmem:[#allocation9 + $0x370] sm:$0xff]  ;;  %v1542_v46 = vld [vmem:[#allocation9 + $0xa8] sm:$0xff] }
  0xd3   : > { %14632 = vmatprep.subr.bf16.mxu1 %v17209_v60  ;;  %14914 = vmatpush3.bf16.msra.mxu0 %v14911_v39  ;;  %v17250_v39 = vld [vmem:[#allocation2 + $0x287] sm:$0xff]  ;;  %v5083_v33 = vld [vmem:[#allocation9 + $0x378] sm:$0xff] }
  0xd4   : > { %14916 = vmatprep.subr.bf16.mxu0 %v14915_v42  ;;  %v14979_v47 = vpack.c.bf16 %v5083_v33, %v5082_v27  ;;  %v1549_v27 = vld [vmem:[#allocation9 + $0xe0] sm:$0xff]  ;;  %v1550_v33 = vld [vmem:[#allocation9 + $0xe8] sm:$0xff] }
  0xd5   : > { %12461 = vmatmul.mubr.f32.gmra.mrb[14].mxu1 %v17203_v52 }
  0xd6   : > { %12463 = vmatprep.mubr.f32.mxu1 %v17205_v38 }
  0xd7   : > { %14918 = vmatpush3.bf16.msra.mxu0 %v14915_v42  ;;  %v5079_v42 = vld [vmem:[#allocation9 + $0x358] sm:$0xff] }
  0xd8   : > { %14952 = vmatprep.subr.bf16.mxu0 %v14951_v6  ;;  %v14971_v49 = vpack.c.bf16 %v5079_v42, %v5078_v62  ;;  %v4313_v62 = vld [vmem:[#allocation2 + $0x1c1] sm:$0xff]  ;;  %v1543_v42 = vld [vmem:[#allocation9 + $0xb0] sm:$0xff] }
  0xd9   : > { %12464 = vmatmul.mubr.f32.gmra.mrb[16].mxu1 %v17215_v63 }
  0xda   : > { %12466 = vmatprep.mubr.f32.mxu1 %v17218_v41  ;;  %13240 = vmatmul.mubr.f32.vlgmr.msra.gmra.mrb[0].mxu0 %v4298_v8  ;;  %v5081_v8 = vld [vmem:[#allocation9 + $0x368] sm:$0xff] }
  0xdb   : > { %13242 = vmatprep.mubr.f32.mxu0 %v4299_v20  ;;  %14954 = vmatpush3.bf16.msra.mxu0 %v14951_v6  ;;  %v17258_v6 = vld [vmem:[#allocation2 + $0x2df] sm:$0xff]  ;;  %v14975_v14 = vpack.c.bf16 %v5081_v8, %v5080_v7  ;;  %v1546_v7 = vld [vmem:[#allocation9 + $0xc8] sm:$0xff] }
  0xdc   : > { %14956 = vmatprep.subr.bf16.mxu0 %v14955_v25  ;;  %v4308_v20 = vld [vmem:[#allocation2 + $0x139] sm:$0xff] }
  0xdd   : > { %12467 = vmatmul.mubr.f32.gmra.mrb[18].mxu1 %v17224_v5  ;;  %v4316_v8 = vld [vmem:[#allocation2 + $0x1f9] sm:$0xff] }
  0xde   : > { %12469 = vmatprep.mubr.f32.mxu1 %v17227_v48  ;;  %13243 = vmatmul.mubr.f32.gmra.mrb[2].mxu0 %v4300_v55  ;;  %v1539_v55 = vld [vmem:[#allocation9 + $0x90] sm:$0xff] }
  0xdf   : > { %13245 = vmatprep.mubr.f32.mxu0 %v4301_v21  ;;  %14958 = vmatpush3.bf16.msra.mxu0 %v14955_v25  ;;  %v17262_v25 = vld [vmem:[#allocation2 + $0x2e7] sm:$0xff]  ;;  %v1540_v21 = vld [vmem:[#allocation9 + $0x98] sm:$0xff] }
  0xe0   : > { %14960 = vmatprep.subr.bf16.mxu0 %v14959_v29 }
  0xe1   : > { %12470 = vmatmul.mubr.f32.gmra.mrb[20].mxu1 %v17232_v9 }
  0xe2   : > { %12472 = vmatprep.mubr.f32.mxu1 %v17234_v54  ;;  %13246 = vmatmul.mubr.f32.gmra.mrb[4].mxu0 %v4302_v34  ;;  %v4311_v34 = vld [vmem:[#allocation2 + $0x191] sm:$0xff] }
  0xe3   : > { %13248 = vmatprep.mubr.f32.mxu0 %v4303_v31  ;;  %14962 = vmatpush3.bf16.msra.mxu0 %v14959_v29  ;;  %v4310_v29 = vld [vmem:[#allocation2 + $0x169] sm:$0xff]  ;;  %v14635_v31 = vpack.c.bf16 %v1540_v21, %v1539_v55  ;;  %v4319_v21 = vld [vmem:[#allocation2 + $0x251] sm:$0xff] }
  0xe4   : > { %14964 = vmatprep.subr.bf16.mxu0 %v14963_v45  ;;  %v4318_v55 = vld [vmem:[#allocation2 + $0x229] sm:$0xff] }
  0xe5   : > { %12473 = vmatmul.mubr.f32.gmra.mrb[22].mxu1 %v17238_v18 }
  0xe6   : > { %12475 = vmatprep.mubr.f32.mxu1 %v17240_v28  ;;  %13249 = vmatmul.mubr.f32.gmra.mrb[6].mxu0 %v4304_v51  ;;  %v4312_v51 = vld [vmem:[#allocation2 + $0x199] sm:$0xff] }
  0xe7   : > { %13251 = vmatprep.mubr.f32.mxu0 %v4305_v53  ;;  %14966 = vmatpush3.bf16.msra.mxu0 %v14963_v45  ;;  %v1541_v45 = vld [vmem:[#allocation9 + $0xa0] sm:$0xff] }
  0xe8   : > { %14968 = vmatprep.subr.bf16.mxu0 %v14967_v61  ;;  %v5774_v53 = vld [vmem:[#allocation9 + $0x380] sm:$0xff] }
  0xe9   : > { %12476 = vmatmul.mubr.f32.gmra.mrb[24].mxu1 %v17244_v35 }
  0xea   : > { %12478 = vmatprep.mubr.f32.mxu1 %v17246_v32  ;;  %13252 = vmatmul.mubr.f32.gmra.mrb[8].mxu0 %v4306_v0  ;;  %v1544_v0 = vld [vmem:[#allocation9 + $0xb8] sm:$0xff] }
  0xeb   : > { %13254 = vmatprep.mubr.f32.mxu0 %v4307_v16  ;;  %14970 = vmatpush3.bf16.msra.mxu0 %v14967_v61  ;;  %v5775_v61 = vld [vmem:[#allocation9 + $0x388] sm:$0xff] }
  0xec   : > { %14972 = vmatprep.subr.bf16.mxu0 %v14971_v49  ;;  %v17269_v16 = vpack.c.bf16 %v5775_v61, %v5774_v53  ;;  %v4323_v53 = vld [vmem:[#allocation2 + $0x2b1] sm:$0xff] }
  0xed   : > { %12479 = vmatmul.mubr.f32.gmra.mrb[26].mxu1 %v17250_v39 }
  0xee   : > { %12481 = vmatprep.mubr.f32.mxu1 %v17252_v56  ;;  %13255 = vmatmul.mubr.f32.gmra.mrb[10].mxu0 %v4308_v20 }
  0xef   : > { %13257 = vmatprep.mubr.f32.mxu0 %v4309_v13  ;;  %14974 = vmatpush3.bf16.msra.mxu0 %v14971_v49  ;;  %v1545_v49 = vld [vmem:[#allocation9 + $0xc0] sm:$0xff]  ;;  %v1547_v13 = vld [vmem:[#allocation9 + $0xd0] sm:$0xff] }
  0xf0   : > { %14976 = vmatprep.subr.bf16.mxu0 %v14975_v14  ;;  %v14647_v20 = vpack.c.bf16 %v1546_v7, %v1545_v49  ;;  %v4328_v49 = vld [vmem:[#allocation2 + $0x319] sm:$0xff]  ;;  %v5776_v7 = vld [vmem:[#allocation9 + $0x390] sm:$0xff] }
  0xf1   : > { %12482 = vmatmul.mubr.f32.gmra.mrb[28].mxu1 %v17256_v1 }
  0xf2   : > { %12484 = vmatprep.mubr.f32.mxu1 %v17258_v6  ;;  %13258 = vmatmul.mubr.f32.gmra.mrb[12].mxu0 %v4310_v29 }
  0xf3   : > { %13260 = vmatprep.mubr.f32.mxu0 %v4311_v34  ;;  %14978 = vmatpush3.bf16.msra.mxu0 %v14975_v14  ;;  %v1548_v14 = vld [vmem:[#allocation9 + $0xd8] sm:$0xff] }
  0xf4   : > { %14980 = vmatprep.subr.bf16.mxu0 %v14979_v47  ;;  %v14651_v29 = vpack.c.bf16 %v1548_v14, %v1547_v13  ;;  %v4320_v34 = vld [vmem:[#allocation2 + $0x259] sm:$0xff]  ;;  %v5779_v13 = vld [vmem:[#allocation9 + $0x3a8] sm:$0xff] }
  0xf5   : > { %12485 = vmatmul.mubr.f32.gmra.mrb[30].mxu1 %v17262_v25 }
  0xf6   : > { %12519 = vmatprep.mubr.f32.mxu1 %v17042_v10  ;;  %v14639_v10 = vpack.c.bf16 %v1542_v46, %v1541_v45  ;;  %13261 = vmatmul.mubr.f32.gmra.mrb[14].mxu0 %v4312_v51  ;;  %v14655_v45 = vpack.c.bf16 %v1550_v33, %v1549_v27  ;;  %v1551_v46 = vld [vmem:[#allocation9 + $0xf0] sm:$0xff]  ;;  %v5789_v33 = vld [vmem:[#allocation9 + $0x3f8] sm:$0xff] }
  0xf7   : > { %13263 = vmatprep.mubr.f32.mxu0 %v4313_v62  ;;  %14982 = vmatpush3.bf16.msra.mxu0 %v14979_v47  ;;  %v1552_v47 = vld [vmem:[#allocation9 + $0xf8] sm:$0xff]  ;;  %v4322_v51 = vld [vmem:[#allocation2 + $0x289] sm:$0xff]  ;;  %v1874_v62 = vld [vmem:[#allocation12 + $0x80] sm:$0xff] }
  0xf8   : > { %15016 = vmatprep.subr.bf16.mxu0 %v17269_v16  ;;  %v14659_v61 = vpack.c.bf16 %v1552_v47, %v1551_v46  ;;  %v1876_v27 = vld [vmem:[#allocation12 + $0x90] sm:$0xff]  ;;  %v17325_v47 = vld [vmem:[#allocation2 + $0x40] sm:$0xff] }
  0xf9   : > { %12520 = vmatmul.mubr.f32.vlgmr.msra.gmra.mrb[32].mxu1 %v17140_v15  ;;  %v4314_v15 = vld [vmem:[#allocation2 + $0x1c9] sm:$0xff] }
  0xfa   : > { %14634 = vmatpush3.bf16.msra.mxu1 %v17209_v60  ;;  %12522 = vmatprep.mubr.f32.mxu1 %v17143_v19  ;;  %v4315_v60 = vld [vmem:[#allocation2 + $0x1f1] sm:$0xff]  ;;  %v14643_v19 = vpack.c.bf16 %v1544_v0, %v1543_v42  ;;  %v4324_v42 = vld [vmem:[#allocation2 + $0x2b9] sm:$0xff]  ;;  %v4325_v0 = vld [vmem:[#allocation2 + $0x2e1] sm:$0xff] }
  0xfb   : > { %14636 = vmatprep.subr.bf16.mxu1 %v14635_v31  ;;  %13264 = vmatmul.mubr.f32.gmra.mrb[16].mxu0 %v4314_v15 }
  0xfc   : > { %13266 = vmatprep.mubr.f32.mxu0 %v4315_v60  ;;  %v4326_v60 = vld [vmem:[#allocation2 + $0x2e9] sm:$0xff] }
  0xfd   : > { %12523 = vmatmul.mubr.f32.gmra.mrb[34].mxu1 %v17154_v37  ;;  %v4317_v37 = vld [vmem:[#allocation2 + $0x221] sm:$0xff] }
  0xfe   : > { %12525 = vmatprep.mubr.f32.mxu1 %v17156_v43  ;;  %14638 = vmatpush3.bf16.msra.mxu1 %v14635_v31  ;;  %v4321_v31 = vld [vmem:[#allocation2 + $0x281] sm:$0xff] }
  0xff   : > { %14640 = vmatprep.subr.bf16.mxu1 %v14639_v10  ;;  %13267 = vmatmul.mubr.f32.gmra.mrb[18].mxu0 %v4316_v8  ;;  %v5777_v8 = vld [vmem:[#allocation9 + $0x398] sm:$0xff] }
 0x100   : > { %13269 = vmatprep.mubr.f32.mxu0 %v4317_v37  ;;  %v15019_v37 = vpack.c.bf16 %v5777_v8, %v5776_v7  ;;  %v1886_v7 = vld [vmem:[#allocation12 + $0xe0] sm:$0xff]  ;;  %v1887_v8 = vld [vmem:[#allocation12 + $0xe8] sm:$0xff] }
 0x101   : > { %12526 = vmatmul.mubr.f32.gmra.mrb[36].mxu1 %v17164_v57 }
 0x102   : > { %12528 = vmatprep.mubr.f32.mxu1 %v17166_v58  ;;  %14642 = vmatpush3.bf16.msra.mxu1 %v14639_v10  ;;  %v1875_v10 = vld [vmem:[#allocation12 + $0x88] sm:$0xff] }
 0x103   : > { %14644 = vmatprep.subr.bf16.mxu1 %v14643_v19  ;;  %13270 = vmatmul.mubr.f32.gmra.mrb[20].mxu0 %v4318_v55  ;;  %v17284_v15 = vpack.c.bf16 %v1875_v10, %v1874_v62  ;;  %v5781_v55 = vld [vmem:[#allocation9 + $0x3b8] sm:$0xff]  ;;  %v17331_v62 = vld [vmem:[#allocation2 + $0x48] sm:$0xff] }
 0x104   : > { %13272 = vmatprep.mubr.f32.mxu0 %v4319_v21  ;;  %v5783_v21 = vld [vmem:[#allocation9 + $0x3c8] sm:$0xff] }
 0x105   : > { %12529 = vmatmul.mubr.f32.gmra.mrb[38].mxu1 %v17171_v2 }
 0x106   : > { %12531 = vmatprep.mubr.f32.mxu1 %v17173_v3  ;;  %14646 = vmatpush3.bf16.msra.mxu1 %v14643_v19  ;;  %v4327_v19 = vld [vmem:[#allocation2 + $0x311] sm:$0xff] }
 0x107   : > { %14648 = vmatprep.subr.bf16.mxu1 %v14647_v20  ;;  %13273 = vmatmul.mubr.f32.gmra.mrb[22].mxu0 %v4320_v34  ;;  %v17318_v34 = vld [vmem:[#allocation2] sm:$0xff] }
 0x108   : > { %13275 = vmatprep.mubr.f32.mxu0 %v4321_v31  ;;  %v1878_v31 = vld [vmem:[#allocation12 + $0xa0] sm:$0xff] }
 0x109   : > { %12532 = vmatmul.mubr.f32.gmra.mrb[40].mxu1 %v17179_v11 }
 0x10a   : > { %12534 = vmatprep.mubr.f32.mxu1 %v17181_v12  ;;  %14650 = vmatpush3.bf16.msra.mxu1 %v14647_v20  ;;  %v5778_v20 = vld [vmem:[#allocation9 + $0x3a0] sm:$0xff] }
 0x10b   : > { %14652 = vmatprep.subr.bf16.mxu1 %v14651_v29  ;;  %13276 = vmatmul.mubr.f32.gmra.mrb[24].mxu0 %v4322_v51  ;;  %v15023_v14 = vpack.c.bf16 %v5779_v13, %v5778_v20  ;;  %v1888_v20 = vld [vmem:[#allocation12 + $0xf0] sm:$0xff]  ;;  %v1889_v13 = vld [vmem:[#allocation12 + $0xf8] sm:$0xff] }
 0x10c   : > { %13278 = vmatprep.mubr.f32.mxu0 %v4323_v53  ;;  %v1880_v53 = vld [vmem:[#allocation12 + $0xb0] sm:$0xff] }
 0x10d   : > { %12535 = vmatmul.mubr.f32.gmra.mrb[42].mxu1 %v17187_v23 }
 0x10e   : > { %12537 = vmatprep.mubr.f32.mxu1 %v17189_v26  ;;  %14654 = vmatpush3.bf16.msra.mxu1 %v14651_v29  ;;  %v5787_v29 = vld [vmem:[#allocation9 + $0x3e8] sm:$0xff] }
 0x10f   : > { %14656 = vmatprep.subr.bf16.mxu1 %v14655_v45  ;;  %13279 = vmatmul.mubr.f32.gmra.mrb[26].mxu0 %v4324_v42  ;;  %v1882_v42 = vld [vmem:[#allocation12 + $0xc0] sm:$0xff] }
 0x110   : > { %13281 = vmatprep.mubr.f32.mxu0 %v4325_v0  ;;  %v1883_v0 = vld [vmem:[#allocation12 + $0xc8] sm:$0xff] }
 0x111   : > { %12538 = vmatmul.mubr.f32.gmra.mrb[44].mxu1 %v17195_v36 }
 0x112   : > { %12540 = vmatprep.mubr.f32.mxu1 %v17197_v44  ;;  %14658 = vmatpush3.bf16.msra.mxu1 %v14655_v45  ;;  %v1879_v45 = vld [vmem:[#allocation12 + $0xa8] sm:$0xff] }
 0x113   : > { %14660 = vmatprep.subr.bf16.mxu1 %v14659_v61  ;;  %13282 = vmatmul.mubr.f32.gmra.mrb[28].mxu0 %v4326_v60  ;;  %v14671_v51 = vpack.c.bf16 %v1879_v45, %v1878_v31  ;;  %v1884_v60 = vld [vmem:[#allocation12 + $0xd0] sm:$0xff]  ;;  %v6485_v31 = vld [vmem:[#allocation9 + $0x428] sm:$0xff]  ;;  %v17401_v45 = vld [vmem:[#allocation2 + $0x1f8] sm:$0xff] }
 0x114   : > { %13284 = vmatprep.mubr.f32.mxu0 %v4327_v19  ;;  %v1885_v19 = vld [vmem:[#allocation12 + $0xd8] sm:$0xff] }
 0x115   : > { %12541 = vmatmul.mubr.f32.gmra.mrb[46].mxu1 %v17203_v52 }
 0x116   : > { %12543 = vmatprep.mubr.f32.mxu1 %v17205_v38  ;;  %14662 = vmatpush3.bf16.msra.mxu1 %v14659_v61  ;;  %v1881_v61 = vld [vmem:[#allocation12 + $0xb8] sm:$0xff] }
 0x117   : > { %14664 = vmatprep.subr.bf16.mxu1 %v17284_v15  ;;  %13285 = vmatmul.mubr.f32.gmra.mrb[30].mxu0 %v4328_v49  ;;  %v14675_v10 = vpack.c.bf16 %v1881_v61, %v1880_v53  ;;  %v17352_v49 = vld [vmem:[#allocation2 + $0xd0] sm:$0xff]  ;;  %v6487_v61 = vld [vmem:[#allocation9 + $0x438] sm:$0xff] }
 0x118   : > { %13399 = vmatprep.mubr.f32.mxu0 %v17156_v43  ;;  %v5780_v43 = vld [vmem:[#allocation9 + $0x3b0] sm:$0xff] }
 0x119   : > { %12544 = vmatmul.mubr.f32.gmra.mrb[48].mxu1 %v17215_v63  ;;  %v6486_v53 = vld [vmem:[#allocation9 + $0x430] sm:$0xff] }
 0x11a   : > { %12546 = vmatprep.mubr.f32.mxu1 %v17218_v41 }
 0x11b   : > { %13400 = vmatmul.mubr.f32.vlgmr.msra.gmra.mrb[0].mxu0 %v17164_v57  ;;  %v15027_v57 = vpack.c.bf16 %v5781_v55, %v5780_v43  ;;  %v2243_v43 = vld [vmem:[#allocation9 + $0x100] sm:$0xff]  ;;  %v2244_v55 = vld [vmem:[#allocation9 + $0x108] sm:$0xff] }
 0x11c   : > { %13402 = vmatprep.mubr.f32.mxu0 %v17166_v58  ;;  %15018 = vmatpush3.bf16.msra.mxu0 %v17269_v16  ;;  %v5782_v58 = vld [vmem:[#allocation9 + $0x3c0] sm:$0xff]  ;;  %v5785_v16 = vld [vmem:[#allocation9 + $0x3d8] sm:$0xff] }
 0x11d   : > { %12547 = vmatmul.mubr.f32.gmra.mrb[50].mxu1 %v17224_v5  ;;  %15020 = vmatprep.subr.bf16.mxu0 %v15019_v37 }
 0x11e   : > { %12549 = vmatprep.mubr.f32.mxu1 %v17227_v48 }
 0x11f   : > { %13403 = vmatmul.mubr.f32.gmra.mrb[2].mxu0 %v17171_v2  ;;  %v15031_v2 = vpack.c.bf16 %v5783_v21, %v5782_v58  ;;  %v17379_v58 = vpack.c.bf16 %v2244_v55, %v2243_v43  ;;  %v5033_v21 = vld [vmem:[#allocation2 + $0x317] sm:$0xff]  ;;  %v17420_v43 = vld [vmem:[#allocation2 + $0x288] sm:$0xff] }
 0x120   : > { %13405 = vmatprep.mubr.f32.mxu0 %v17173_v3  ;;  %15022 = vmatpush3.bf16.msra.mxu0 %v15019_v37  ;;  %v5784_v3 = vld [vmem:[#allocation9 + $0x3d0] sm:$0xff]  ;;  %v17360_v37 = vld [vmem:[#allocation2 + $0x100] sm:$0xff]  ;;  %v5719_v55 = vld [vmem:[#allocation2 + $0x138] sm:$0xff] }
 0x121   : > { %12550 = vmatmul.mubr.f32.gmra.mrb[52].mxu1 %v17232_v9  ;;  %15024 = vmatprep.subr.bf16.mxu0 %v15023_v14 }
 0x122   : > { %12552 = vmatprep.mubr.f32.mxu1 %v17234_v54 }
 0x123   : > { %13406 = vmatmul.mubr.f32.gmra.mrb[4].mxu0 %v17179_v11  ;;  %v15035_v11 = vpack.c.bf16 %v5785_v16, %v5784_v3  ;;  %v17389_v3 = vld [vmem:[#allocation2 + $0x198] sm:$0xff]  ;;  %v17392_v16 = vld [vmem:[#allocation2 + $0x1c0] sm:$0xff] }
 0x124   : > { %13408 = vmatprep.mubr.f32.mxu0 %v17181_v12  ;;  %15026 = vmatpush3.bf16.msra.mxu0 %v15023_v14  ;;  %v5786_v12 = vld [vmem:[#allocation9 + $0x3e0] sm:$0xff]  ;;  %v17368_v14 = vld [vmem:[#allocation2 + $0x130] sm:$0xff] }
 0x125   : > { %12553 = vmatmul.mubr.f32.gmra.mrb[54].mxu1 %v17238_v18  ;;  %15028 = vmatprep.subr.bf16.mxu0 %v15027_v57 }
 0x126   : > { %12555 = vmatprep.mubr.f32.mxu1 %v17240_v28 }
 0x127   : > { %13409 = vmatmul.mubr.f32.gmra.mrb[6].mxu0 %v17187_v23  ;;  %v15039_v23 = vpack.c.bf16 %v5787_v29, %v5786_v12  ;;  %v6482_v12 = vld [vmem:[#allocation9 + $0x410] sm:$0xff]  ;;  %v6483_v29 = vld [vmem:[#allocation9 + $0x418] sm:$0xff] }
 0x128   : > { %13411 = vmatprep.mubr.f32.mxu0 %v17189_v26  ;;  %15030 = vmatpush3.bf16.msra.mxu0 %v15027_v57  ;;  %v1877_v26 = vld [vmem:[#allocation12 + $0x98] sm:$0xff]  ;;  %v17376_v57 = vld [vmem:[#allocation2 + $0x160] sm:$0xff] }
 0x129   : > { %12556 = vmatmul.mubr.f32.gmra.mrb[56].mxu1 %v17244_v35  ;;  %15032 = vmatprep.subr.bf16.mxu0 %v15031_v2 }
 0x12a   : > { %12558 = vmatprep.mubr.f32.mxu1 %v17246_v32 }
 0x12b   : > { %13412 = vmatmul.mubr.f32.gmra.mrb[8].mxu0 %v17195_v36  ;;  %v5788_v36 = vld [vmem:[#allocation9 + $0x3f0] sm:$0xff] }
 0x12c   : > { %13414 = vmatprep.mubr.f32.mxu0 %v17197_v44  ;;  %15034 = vmatpush3.bf16.msra.mxu0 %v15031_v2  ;;  %v14667_v44 = vpack.c.bf16 %v1877_v26, %v1876_v27  ;;  %v15043_v46 = vpack.c.bf16 %v5789_v33, %v5788_v36  ;;  %v17385_v2 = vld [vmem:[#allocation2 + $0x190] sm:$0xff]  ;;  %v5711_v27 = vld [vmem:[#allocation2 + $0x78] sm:$0xff]  ;;  %v5712_v36 = vld [vmem:[#allocation2 + $0xa0] sm:$0xff]  ;;  %v15083_v33 = vpack.c.bf16 %v6483_v29, %v6482_v12 }
 0x12d   : > { %12559 = vmatmul.mubr.f32.gmra.mrb[58].mxu1 %v17250_v39  ;;  %15036 = vmatprep.subr.bf16.mxu0 %v15035_v11  ;;  %v17398_v26 = vld [vmem:[#allocation2 + $0x1f0] sm:$0xff]  ;;  %v17426_v12 = vld [vmem:[#allocation2 + $0x2b8] sm:$0xff]  ;;  %v5721_v29 = vld [vmem:[#allocation2 + $0x168] sm:$0xff] }
 0x12e   : > { %12561 = vmatprep.mubr.f32.mxu1 %v17252_v56 }
 0x12f   : > { %13415 = vmatmul.mubr.f32.gmra.mrb[10].mxu0 %v17203_v52  ;;  %v6480_v52 = vld [vmem:[#allocation9 + $0x400] sm:$0xff] }
 0x130   : > { %13417 = vmatprep.mubr.f32.mxu0 %v17205_v38  ;;  %15038 = vmatpush3.bf16.msra.mxu0 %v15035_v11  ;;  %v6481_v38 = vld [vmem:[#allocation9 + $0x408] sm:$0xff]  ;;  %v5710_v11 = vld [vmem:[#allocation2 + $0x70] sm:$0xff] }
 0x131   : > { %12562 = vmatmul.mubr.f32.gmra.mrb[60].mxu1 %v17256_v1  ;;  %15040 = vmatprep.subr.bf16.mxu0 %v15039_v23 }
 0x132   : > { %12564 = vmatprep.mubr.f32.mxu1 %v17258_v6 }
 0x133   : > { %13418 = vmatmul.mubr.f32.gmra.mrb[12].mxu0 %v17215_v63  ;;  %v17329_v63 = vpack.c.bf16 %v6481_v38, %v6480_v52  ;;  %v17404_v52 = vld [vmem:[#allocation2 + $0x220] sm:$0xff]  ;;  %v5714_v38 = vld [vmem:[#allocation2 + $0xd0] sm:$0xff] }
 0x134   : > { %13420 = vmatprep.mubr.f32.mxu0 %v17218_v41  ;;  %15042 = vmatpush3.bf16.msra.mxu0 %v15039_v23  ;;  %v17335_v41 = vld [vmem:[#allocation2 + $0x70] sm:$0xff]  ;;  %v17395_v23 = vld [vmem:[#allocation2 + $0x1c8] sm:$0xff] }
 0x135   : > { %12565 = vmatmul.mubr.f32.gmra.mrb[62].mxu1 %v17262_v25  ;;  %15044 = vmatprep.subr.bf16.mxu0 %v15043_v46 }
 0x136   : > { %12599 = vmatprep.mubr.f32.mxu1 %v17318_v34 }
 0x137   : > { %13421 = vmatmul.mubr.f32.gmra.mrb[14].mxu0 %v17224_v5  ;;  %v17340_v5 = vld [vmem:[#allocation2 + $0x78] sm:$0xff] }
 0x138   : > { %13423 = vmatprep.mubr.f32.mxu0 %v17227_v48  ;;  %15046 = vmatpush3.bf16.msra.mxu0 %v15043_v46  ;;  %v17344_v48 = vld [vmem:[#allocation2 + $0xa0] sm:$0xff]  ;;  %v5713_v46 = vld [vmem:[#allocation2 + $0xa8] sm:$0xff] }
 0x139   : > { %12600 = vmatmul.mubr.f32.vlgmr.msra.gmra.mrb[0].mxu1 %v17318_v34  ;;  %15080 = vmatprep.subr.bf16.mxu0 %v17329_v63 }
 0x13a   : > { %14666 = vmatpush3.bf16.msra.mxu1 %v17284_v15  ;;  %12602 = vmatprep.mubr.f32.mxu1 %v17325_v47  ;;  %v14679_v15 = vpack.c.bf16 %v1883_v0, %v1882_v42  ;;  %v5715_v42 = vld [vmem:[#allocation2 + $0xd8] sm:$0xff]  ;;  %v17411_v0 = vld [vmem:[#allocation2 + $0x250] sm:$0xff] }
 0x13b   : > { %14668 = vmatprep.subr.bf16.mxu1 %v14667_v44  ;;  %13424 = vmatmul.mubr.f32.gmra.mrb[16].mxu0 %v17232_v9  ;;  %v17348_v9 = vld [vmem:[#allocation2 + $0xa8] sm:$0xff] }
 0x13c   : > { %13426 = vmatprep.mubr.f32.mxu0 %v17234_v54  ;;  %v14683_v54 = vpack.c.bf16 %v1885_v19, %v1884_v60  ;;  %v15091_v60 = vpack.c.bf16 %v6487_v61, %v6486_v53  ;;  %v6489_v19 = vld [vmem:[#allocation9 + $0x448] sm:$0xff]  ;;  %v6495_v53 = vld [vmem:[#allocation9 + $0x478] sm:$0xff]  ;;  %v5724_v61 = vld [vmem:[#allocation2 + $0x1c0] sm:$0xff] }
 0x13d   : > { %12603 = vmatmul.mubr.f32.gmra.mrb[2].mxu1 %v17331_v62 }
 0x13e   : > { %12605 = vmatprep.mubr.f32.mxu1 %v17335_v41  ;;  %14670 = vmatpush3.bf16.msra.mxu1 %v14667_v44  ;;  %v6484_v44 = vld [vmem:[#allocation9 + $0x420] sm:$0xff] }
 0x13f   : > { %14672 = vmatprep.subr.bf16.mxu1 %v14671_v51  ;;  %13427 = vmatmul.mubr.f32.gmra.mrb[18].mxu0 %v17238_v18  ;;  %v17356_v18 = vld [vmem:[#allocation2 + $0xd8] sm:$0xff] }
 0x140   : > { %13429 = vmatprep.mubr.f32.mxu0 %v17240_v28  ;;  %v14687_v28 = vpack.c.bf16 %v1887_v8, %v1886_v7  ;;  %v5717_v7 = vld [vmem:[#allocation2 + $0x108] sm:$0xff]  ;;  %v17417_v8 = vld [vmem:[#allocation2 + $0x280] sm:$0xff] }
 0x141   : > { %12606 = vmatmul.mubr.f32.gmra.mrb[4].mxu1 %v17340_v5 }
 0x142   : > { %12608 = vmatprep.mubr.f32.mxu1 %v17344_v48  ;;  %14674 = vmatpush3.bf16.msra.mxu1 %v14671_v51  ;;  %v15087_v51 = vpack.c.bf16 %v6485_v31, %v6484_v44  ;;  %v2245_v44 = vld [vmem:[#allocation9 + $0x110] sm:$0xff]  ;;  %v2246_v31 = vld [vmem:[#allocation9 + $0x118] sm:$0xff] }
 0x143   : > { %14676 = vmatprep.subr.bf16.mxu1 %v14675_v10  ;;  %13430 = vmatmul.mubr.f32.gmra.mrb[20].mxu0 %v17244_v35  ;;  %v17364_v35 = vld [vmem:[#allocation2 + $0x108] sm:$0xff] }
 0x144   : > { %13432 = vmatprep.mubr.f32.mxu0 %v17246_v32  ;;  %v14691_v32 = vpack.c.bf16 %v1889_v13, %v1888_v20  ;;  %v6490_v13 = vld [vmem:[#allocation9 + $0x450] sm:$0xff] }
 0x145   : > { %12609 = vmatmul.mubr.f32.gmra.mrb[6].mxu1 %v17348_v9 }
 0x146   : > { %12611 = vmatprep.mubr.f32.mxu1 %v17352_v49  ;;  %14678 = vmatpush3.bf16.msra.mxu1 %v14675_v10  ;;  %v17408_v10 = vld [vmem:[#allocation2 + $0x228] sm:$0xff] }
 0x147   : > { %14680 = vmatprep.subr.bf16.mxu1 %v14679_v15  ;;  %13433 = vmatmul.mubr.f32.gmra.mrb[22].mxu0 %v17250_v39  ;;  %v17372_v39 = vld [vmem:[#allocation2 + $0x138] sm:$0xff] }
 0x148   : > { %13435 = vmatprep.mubr.f32.mxu0 %v17252_v56  ;;  %v5032_v56 = vld [vmem:[#allocation2 + $0x30f] sm:$0xff] }
 0x149   : > { %12612 = vmatmul.mubr.f32.gmra.mrb[8].mxu1 %v17356_v18 }
 0x14a   : > { %12614 = vmatprep.mubr.f32.mxu1 %v17360_v37  ;;  %14682 = vmatpush3.bf16.msra.mxu1 %v14679_v15  ;;  %v5716_v15 = vld [vmem:[#allocation2 + $0x100] sm:$0xff] }
 0x14b   : > { %14684 = vmatprep.subr.bf16.mxu1 %v14683_v54  ;;  %13436 = vmatmul.mubr.f32.gmra.mrb[24].mxu0 %v17256_v1  ;;  %v17382_v1 = vld [vmem:[#allocation2 + $0x168] sm:$0xff] }
 0x14c   : > { %13438 = vmatprep.mubr.f32.mxu0 %v17258_v6  ;;  %v5034_v6 = vld [vmem:[#allocation2 + $0x33f] sm:$0xff] }
 0x14d   : > { %12615 = vmatmul.mubr.f32.gmra.mrb[10].mxu1 %v17364_v35 }
 0x14e   : > { %12617 = vmatprep.mubr.f32.mxu1 %v17368_v14  ;;  %14686 = vmatpush3.bf16.msra.mxu1 %v14683_v54  ;;  %v17414_v54 = vld [vmem:[#allocation2 + $0x258] sm:$0xff] }
 0x14f   : > { %14688 = vmatprep.subr.bf16.mxu1 %v14687_v28  ;;  %13439 = vmatmul.mubr.f32.gmra.mrb[26].mxu0 %v17262_v25  ;;  %v5035_v25 = vld [vmem:[#allocation2 + $0x347] sm:$0xff] }
 0x150   : > { %13441 = vmatprep.mubr.f32.mxu0 %v5032_v56  ;;  %v17423_v56 = vld [vmem:[#allocation2 + $0x2b0] sm:$0xff] }
 0x151   : > { %12618 = vmatmul.mubr.f32.gmra.mrb[12].mxu1 %v17372_v39 }
 0x152   : > { %12620 = vmatprep.mubr.f32.mxu1 %v17376_v57  ;;  %14690 = vmatpush3.bf16.msra.mxu1 %v14687_v28  ;;  %v5718_v28 = vld [vmem:[#allocation2 + $0x130] sm:$0xff] }
 0x153   : > { %14692 = vmatprep.subr.bf16.mxu1 %v14691_v32  ;;  %13442 = vmatmul.mubr.f32.gmra.mrb[28].mxu0 %v5033_v21  ;;  %v5720_v21 = vld [vmem:[#allocation2 + $0x160] sm:$0xff] }
 0x154   : > { %13444 = vmatprep.mubr.f32.mxu0 %v5034_v6 }
 0x155   : > { %12621 = vmatmul.mubr.f32.gmra.mrb[14].mxu1 %v17382_v1 }
 0x156   : > { %12623 = vmatprep.mubr.f32.mxu1 %v17385_v2  ;;  %14694 = vmatpush3.bf16.msra.mxu1 %v14691_v32  ;;  %v6491_v32 = vld [vmem:[#allocation9 + $0x458] sm:$0xff] }
 0x157   : > { %14696 = vmatprep.subr.bf16.mxu1 %v17379_v58  ;;  %13445 = vmatmul.mubr.f32.gmra.mrb[30].mxu0 %v5035_v25  ;;  %v15099_v6 = vpack.c.bf16 %v6491_v32, %v6490_v13  ;;  %v6492_v25 = vld [vmem:[#allocation9 + $0x460] sm:$0xff]  ;;  %v2250_v13 = vld [vmem:[#allocation9 + $0x138] sm:$0xff] }
 0x158   : > { %13559 = vmatprep.mubr.f32.mxu0 %v5710_v11  ;;  %v6493_v11 = vld [vmem:[#allocation9 + $0x468] sm:$0xff]  ;;  %v5727_v32 = vld [vmem:[#allocation2 + $0x1f8] sm:$0xff] }
 0x159   : > { %12624 = vmatmul.mubr.f32.gmra.mrb[16].mxu1 %v17389_v3 }
 0x15a   : > { %12626 = vmatprep.mubr.f32.mxu1 %v17392_v16 }
 0x15b   : > { %13560 = vmatmul.mubr.f32.vlgmr.msra.gmra.mrb[0].mxu0 %v5711_v27  ;;  %v17429_v27 = vld [vmem:[#allocation2 + $0x2e0] sm:$0xff] }
 0x15c   : > { %13562 = vmatprep.mubr.f32.mxu0 %v5712_v36  ;;  %15082 = vmatpush3.bf16.msra.mxu0 %v17329_v63  ;;  %v6488_v63 = vld [vmem:[#allocation9 + $0x440] sm:$0xff]  ;;  %v5722_v36 = vld [vmem:[#allocation2 + $0x190] sm:$0xff] }
 0x15d   : > { %12627 = vmatmul.mubr.f32.gmra.mrb[18].mxu1 %v17395_v23  ;;  %15084 = vmatprep.subr.bf16.mxu0 %v15083_v33  ;;  %v15095_v20 = vpack.c.bf16 %v6489_v19, %v6488_v63  ;;  %v5725_v19 = vld [vmem:[#allocation2 + $0x1c8] sm:$0xff] }
 0x15e   : > { %12629 = vmatprep.mubr.f32.mxu1 %v17398_v26 }
 0x15f   : > { %13563 = vmatmul.mubr.f32.gmra.mrb[2].mxu0 %v5713_v46  ;;  %v17432_v46 = vld [vmem:[#allocation2 + $0x2e8] sm:$0xff] }
 0x160   : > { %13565 = vmatprep.mubr.f32.mxu0 %v5714_v38  ;;  %15086 = vmatpush3.bf16.msra.mxu0 %v15083_v33  ;;  %v15103_v33 = vpack.c.bf16 %v6493_v11, %v6492_v25  ;;  %v5723_v38 = vld [vmem:[#allocation2 + $0x198] sm:$0xff] }
 0x161   : > { %12630 = vmatmul.mubr.f32.gmra.mrb[20].mxu1 %v17401_v45  ;;  %15088 = vmatprep.subr.bf16.mxu0 %v15087_v51  ;;  %v2254_v11 = vld [vmem:[#allocation9 + $0x158] sm:$0xff] }
 0x162   : > { %12632 = vmatprep.mubr.f32.mxu1 %v17404_v52 }
 0x163   : > { %13566 = vmatmul.mubr.f32.gmra.mrb[4].mxu0 %v5715_v42  ;;  %v14699_v42 = vpack.c.bf16 %v2246_v31, %v2245_v44  ;;  %v5733_v44 = vld [vmem:[#allocation2 + $0x288] sm:$0xff]  ;;  %v5734_v31 = vld [vmem:[#allocation2 + $0x2b0] sm:$0xff] }
 0x164   : > { %13568 = vmatprep.mubr.f32.mxu0 %v5716_v15  ;;  %15090 = vmatpush3.bf16.msra.mxu0 %v15087_v51  ;;  %v6494_v51 = vld [vmem:[#allocation9 + $0x470] sm:$0xff]  ;;  %v2247_v15 = vld [vmem:[#allocation9 + $0x120] sm:$0xff] }
 0x165   : > { %12633 = vmatmul.mubr.f32.gmra.mrb[22].mxu1 %v17408_v10  ;;  %15092 = vmatprep.subr.bf16.mxu0 %v15091_v60  ;;  %v15107_v63 = vpack.c.bf16 %v6495_v53, %v6494_v51  ;;  %v5735_v51 = vld [vmem:[#allocation2 + $0x2b8] sm:$0xff]  ;;  %v5736_v53 = vld [vmem:[#allocation2 + $0x2e0] sm:$0xff] }
 0x166   : > { %12635 = vmatprep.mubr.f32.mxu1 %v17411_v0 }
 0x167   : > { %13569 = vmatmul.mubr.f32.gmra.mrb[6].mxu0 %v5717_v7  ;;  %v5726_v7 = vld [vmem:[#allocation2 + $0x1f0] sm:$0xff] }
 0x168   : > { %13571 = vmatprep.mubr.f32.mxu0 %v5718_v28  ;;  %15094 = vmatpush3.bf16.msra.mxu0 %v15091_v60  ;;  %v2248_v60 = vld [vmem:[#allocation9 + $0x128] sm:$0xff] }
 0x169   : > { %12636 = vmatmul.mubr.f32.gmra.mrb[24].mxu1 %v17414_v54  ;;  %15096 = vmatprep.subr.bf16.mxu0 %v15095_v20  ;;  %v14703_v28 = vpack.c.bf16 %v2248_v60, %v2247_v15  ;;  %v16329_v15 = vld [vmem:[#allocation2 + $0x318] sm:$0xff]  ;;  %v17519_v60 = vld [vmem:[#allocation2 + $0x1c1] sm:$0xff] }
 0x16a   : > { %12638 = vmatprep.mubr.f32.mxu1 %v17417_v8 }
 0x16b   : > { %13572 = vmatmul.mubr.f32.gmra.mrb[8].mxu0 %v5719_v55  ;;  %v5728_v55 = vld [vmem:[#allocation2 + $0x220] sm:$0xff] }
 0x16c   : > { %13574 = vmatprep.mubr.f32.mxu0 %v5720_v21  ;;  %15098 = vmatpush3.bf16.msra.mxu0 %v15095_v20  ;;  %v2249_v20 = vld [vmem:[#allocation9 + $0x130] sm:$0xff]  ;;  %v2252_v21 = vld [vmem:[#allocation9 + $0x148] sm:$0xff] }
 0x16d   : > { %12639 = vmatmul.mubr.f32.gmra.mrb[26].mxu1 %v17420_v43  ;;  %15100 = vmatprep.subr.bf16.mxu0 %v15099_v6 }
 0x16e   : > { %12641 = vmatprep.mubr.f32.mxu1 %v17423_v56 }
 0x16f   : > { %13575 = vmatmul.mubr.f32.gmra.mrb[10].mxu0 %v5721_v29  ;;  %v5731_v29 = vld [vmem:[#allocation2 + $0x258] sm:$0xff] }
 0x170   : > { %13577 = vmatprep.mubr.f32.mxu0 %v5722_v36  ;;  %15102 = vmatpush3.bf16.msra.mxu0 %v15099_v6  ;;  %v5729_v6 = vld [vmem:[#allocation2 + $0x228] sm:$0xff]  ;;  %v5732_v36 = vld [vmem:[#allocation2 + $0x280] sm:$0xff] }
 0x171   : > { %12642 = vmatmul.mubr.f32.gmra.mrb[28].mxu1 %v17426_v12  ;;  %15104 = vmatprep.subr.bf16.mxu0 %v15103_v33 }
 0x172   : > { %12644 = vmatprep.mubr.f32.mxu1 %v17429_v27 }
 0x173   : > { %13578 = vmatmul.mubr.f32.gmra.mrb[12].mxu0 %v5723_v38  ;;  %v2257_v38 = vld [vmem:[#allocation9 + $0x170] sm:$0xff] }
 0x174   : > { %13580 = vmatprep.mubr.f32.mxu0 %v5724_v61  ;;  %15106 = vmatpush3.bf16.msra.mxu0 %v15103_v33  ;;  %v2255_v33 = vld [vmem:[#allocation9 + $0x160] sm:$0xff] }
 0x175   : > { %12645 = vmatmul.mubr.f32.gmra.mrb[30].mxu1 %v17432_v46  ;;  %15108 = vmatprep.subr.bf16.mxu0 %v15107_v63  ;;  %v2580_v61 = vld [vmem:[#allocation12 + $0x100] sm:$0xff] }
 0x176   : > { %12679 = vmatprep.mubr.f32.mxu1 %v17318_v34 }
 0x177   : > { %13581 = vmatmul.mubr.f32.gmra.mrb[14].mxu0 %v5725_v19  ;;  %v2584_v19 = vld [vmem:[#allocation12 + $0x120] sm:$0xff] }
 0x178   : > { %13583 = vmatprep.mubr.f32.mxu0 %v5726_v7  ;;  %15110 = vmatpush3.bf16.msra.mxu0 %v15107_v63  ;;  %v2585_v7 = vld [vmem:[#allocation12 + $0x128] sm:$0xff] }
 0x179   : > { %12680 = vmatmul.mubr.f32.vlgmr.msra.gmra.mrb[32].mxu1 %v17318_v34 }
 0x17a   : > { %14698 = vmatpush3.bf16.msra.mxu1 %v17379_v58  ;;  %12682 = vmatprep.mubr.f32.mxu1 %v17325_v47  ;;  %v14707_v58 = vpack.c.bf16 %v2250_v13, %v2249_v20  ;;  %v2251_v47 = vld [vmem:[#allocation9 + $0x140] sm:$0xff]  ;;  %v14735_v20 = vpack.c.bf16 %v2585_v7, %v2584_v19  ;;  %v2586_v13 = vld [vmem:[#allocation12 + $0x130] sm:$0xff] }
 0x17b   : > { %14700 = vmatprep.subr.bf16.mxu1 %v14699_v42  ;;  %13584 = vmatmul.mubr.f32.gmra.mrb[16].mxu0 %v5727_v32  ;;  %v14711_v25 = vpack.c.bf16 %v2252_v21, %v2251_v47  ;;  %v2587_v32 = vld [vmem:[#allocation12 + $0x138] sm:$0xff]  ;;  %v2588_v21 = vld [vmem:[#allocation12 + $0x140] sm:$0xff]  ;;  %v6447_v19 = vld [vmem:[#allocation2 + $0x349] sm:$0xff] }
 0x17c   : > { %13586 = vmatprep.mubr.f32.mxu0 %v5728_v55  ;;  %v17533_v55 = vld [vmem:[#allocation2 + $0x1f1] sm:$0xff]  ;;  %v17538_v47 = vld [vmem:[#allocation2 + $0x1f9] sm:$0xff] }
 0x17d   : > { %12683 = vmatmul.mubr.f32.gmra.mrb[34].mxu1 %v17331_v62  ;;  %v5730_v62 = vld [vmem:[#allocation2 + $0x250] sm:$0xff] }
 0x17e   : > { %12685 = vmatprep.mubr.f32.mxu1 %v17335_v41  ;;  %14702 = vmatpush3.bf16.msra.mxu1 %v14699_v42  ;;  %v2253_v41 = vld [vmem:[#allocation9 + $0x150] sm:$0xff]  ;;  %v5737_v42 = vld [vmem:[#allocation2 + $0x2e8] sm:$0xff] }
 0x17f   : > { %14704 = vmatprep.subr.bf16.mxu1 %v14703_v28  ;;  %13587 = vmatmul.mubr.f32.gmra.mrb[18].mxu0 %v5729_v6  ;;  %v2589_v6 = vld [vmem:[#allocation12 + $0x148] sm:$0xff]  ;;  %v2951_v7 = vld [vmem:[#allocation9 + $0x190] sm:$0xff] }
 0x180   : > { %13589 = vmatprep.mubr.f32.mxu0 %v5730_v62  ;;  %v17540_v62 = vld [vmem:[#allocation2 + $0x221] sm:$0xff] }
 0x181   : > { %12686 = vmatmul.mubr.f32.gmra.mrb[36].mxu1 %v17340_v5  ;;  %v14715_v5 = vpack.c.bf16 %v2254_v11, %v2253_v41  ;;  %v17546_v41 = vld [vmem:[#allocation2 + $0x229] sm:$0xff] }
 0x182   : > { %12688 = vmatprep.mubr.f32.mxu1 %v17344_v48  ;;  %14706 = vmatpush3.bf16.msra.mxu1 %v14703_v28  ;;  %v2256_v48 = vld [vmem:[#allocation9 + $0x168] sm:$0xff]  ;;  %v2590_v11 = vld [vmem:[#allocation12 + $0x150] sm:$0xff] }
 0x183   : > { %14708 = vmatprep.subr.bf16.mxu1 %v14707_v58  ;;  %13590 = vmatmul.mubr.f32.gmra.mrb[20].mxu0 %v5731_v29  ;;  %v17530_v28 = vld [vmem:[#allocation2 + $0x49] sm:$0xff]  ;;  %v2591_v29 = vld [vmem:[#allocation12 + $0x158] sm:$0xff] }
 0x184   : > { %13592 = vmatprep.mubr.f32.mxu0 %v5732_v36  ;;  %v17548_v36 = vld [vmem:[#allocation2 + $0x251] sm:$0xff] }
 0x185   : > { %12689 = vmatmul.mubr.f32.gmra.mrb[38].mxu1 %v17348_v9  ;;  %v14719_v9 = vpack.c.bf16 %v2256_v48, %v2255_v33  ;;  %v17554_v33 = vld [vmem:[#allocation2 + $0x259] sm:$0xff] }
 0x186   : > { %12691 = vmatprep.mubr.f32.mxu1 %v17352_v49  ;;  %14710 = vmatpush3.bf16.msra.mxu1 %v14707_v58  ;;  %v2258_v49 = vld [vmem:[#allocation9 + $0x178] sm:$0xff]  ;;  %v14739_v58 = vpack.c.bf16 %v2587_v32, %v2586_v13  ;;  %v2592_v48 = vld [vmem:[#allocation12 + $0x160] sm:$0xff] }
 0x187   : > { %14712 = vmatprep.subr.bf16.mxu1 %v14711_v25  ;;  %13593 = vmatmul.mubr.f32.gmra.mrb[22].mxu0 %v5733_v44  ;;  %v2593_v44 = vld [vmem:[#allocation12 + $0x168] sm:$0xff]  ;;  %v2953_v32 = vld [vmem:[#allocation9 + $0x1a0] sm:$0xff] }
 0x188   : > { %13595 = vmatprep.mubr.f32.mxu0 %v5734_v31  ;;  %v17556_v31 = vld [vmem:[#allocation2 + $0x281] sm:$0xff] }
 0x189   : > { %12692 = vmatmul.mubr.f32.gmra.mrb[40].mxu1 %v17356_v18  ;;  %v14723_v18 = vpack.c.bf16 %v2258_v49, %v2257_v38  ;;  %v17562_v38 = vld [vmem:[#allocation2 + $0x289] sm:$0xff]  ;;  %v17564_v49 = vld [vmem:[#allocation2 + $0x2b1] sm:$0xff] }
 0x18a   : > { %12694 = vmatprep.mubr.f32.mxu1 %v17360_v37  ;;  %14714 = vmatpush3.bf16.msra.mxu1 %v14711_v25  ;;  %v2581_v37 = vld [vmem:[#allocation12 + $0x108] sm:$0xff]  ;;  %v14743_v25 = vpack.c.bf16 %v2589_v6, %v2588_v21  ;;  %v2955_v6 = vld [vmem:[#allocation9 + $0x1b0] sm:$0xff] }
 0x18b   : > { %14716 = vmatprep.subr.bf16.mxu1 %v14715_v5  ;;  %13596 = vmatmul.mubr.f32.gmra.mrb[24].mxu0 %v5735_v51  ;;  %v2594_v51 = vld [vmem:[#allocation12 + $0x170] sm:$0xff] }
 0x18c   : > { %13598 = vmatprep.mubr.f32.mxu0 %v5736_v53  ;;  %v2595_v53 = vld [vmem:[#allocation12 + $0x178] sm:$0xff] }
 0x18d   : > { %12695 = vmatmul.mubr.f32.gmra.mrb[42].mxu1 %v17364_v35  ;;  %v17451_v35 = vpack.c.bf16 %v2581_v37, %v2580_v61  ;;  %v14755_v61 = vpack.c.bf16 %v2595_v53, %v2594_v51  ;;  %v17572_v37 = vld [vmem:[#allocation2 + $0x2e1] sm:$0xff] }
 0x18e   : > { %12697 = vmatprep.mubr.f32.mxu1 %v17368_v14  ;;  %14718 = vmatpush3.bf16.msra.mxu1 %v14715_v5  ;;  %v16328_v14 = vld [vmem:[#allocation2 + $0x310] sm:$0xff]  ;;  %v14747_v5 = vpack.c.bf16 %v2591_v29, %v2590_v11  ;;  %v2958_v29 = vld [vmem:[#allocation9 + $0x1c8] sm:$0xff]  ;;  %v17653_v51 = vld [vmem:[#allocation2 + $0xff] sm:$0xff] }
 0x18f   : > { %14720 = vmatprep.subr.bf16.mxu1 %v14719_v9  ;;  %13599 = vmatmul.mubr.f32.gmra.mrb[26].mxu0 %v5737_v42  ;;  %v2949_v42 = vld [vmem:[#allocation9 + $0x180] sm:$0xff] }
 0x190   : > { %13601 = vmatprep.mubr.f32.mxu0 %v16328_v14  ;;  %v6444_v14 = vld [vmem:[#allocation2 + $0x311] sm:$0xff] }
 0x191   : > { %12698 = vmatmul.mubr.f32.gmra.mrb[44].mxu1 %v17372_v39  ;;  %v17459_v39 = vld [vmem:[#allocation2 + $0x71] sm:$0xff] }
 0x192   : > { %12700 = vmatprep.mubr.f32.mxu1 %v17376_v57  ;;  %14722 = vmatpush3.bf16.msra.mxu1 %v14719_v9  ;;  %v17464_v57 = vld [vmem:[#allocation2 + $0x79] sm:$0xff]  ;;  %v14751_v9 = vpack.c.bf16 %v2593_v44, %v2592_v48  ;;  %v2962_v48 = vld [vmem:[#allocation9 + $0x1e8] sm:$0xff] }
 0x193   : > { %14724 = vmatprep.subr.bf16.mxu1 %v14723_v18  ;;  %13602 = vmatmul.mubr.f32.gmra.mrb[28].mxu0 %v16329_v15  ;;  %v17578_v15 = vld [vmem:[#allocation2 + $0x2e9] sm:$0xff]  ;;  %v2964_v44 = vld [vmem:[#allocation9 + $0x1f8] sm:$0xff] }
 0x194   : > { %13604 = vmatprep.mubr.f32.mxu0 %v17318_v34 }
 0x195   : > { %12701 = vmatmul.mubr.f32.gmra.mrb[46].mxu1 %v17382_v1  ;;  %v17467_v1 = vld [vmem:[#allocation2 + $0xa1] sm:$0xff] }
 0x196   : > { %12703 = vmatprep.mubr.f32.mxu1 %v17385_v2  ;;  %14726 = vmatpush3.bf16.msra.mxu1 %v14723_v18  ;;  %v17472_v2 = vld [vmem:[#allocation2 + $0xa9] sm:$0xff]  ;;  %v17570_v18 = vld [vmem:[#allocation2 + $0x2b9] sm:$0xff] }
 0x197   : > { %14728 = vmatprep.subr.bf16.mxu1 %v17451_v35  ;;  %13605 = vmatmul.mubr.f32.gmra.mrb[30].mxu0 %v17318_v34  ;;  %v17475_v34 = vld [vmem:[#allocation2 + $0xd1] sm:$0xff] }
 0x198   : > { %13719 = vmatprep.mubr.f32.mxu0 %v17459_v39 }
 0x199   : > { %12704 = vmatmul.mubr.f32.gmra.mrb[48].mxu1 %v17389_v3  ;;  %v17480_v3 = vld [vmem:[#allocation2 + $0xd9] sm:$0xff] }
 0x19a   : > { %12706 = vmatprep.mubr.f32.mxu1 %v17392_v16  ;;  %v17483_v16 = vld [vmem:[#allocation2 + $0x101] sm:$0xff] }
 0x19b   : > { %13720 = vmatmul.mubr.f32.vlgmr.msra.gmra.mrb[0].mxu0 %v17464_v57 }
 0x19c   : > { %13722 = vmatprep.mubr.f32.mxu0 %v17467_v1 }
 0x19d   : > { %12707 = vmatmul.mubr.f32.gmra.mrb[50].mxu1 %v17395_v23  ;;  %v17488_v23 = vld [vmem:[#allocation2 + $0x109] sm:$0xff] }
 0x19e   : > { %12709 = vmatprep.mubr.f32.mxu1 %v17398_v26  ;;  %v17491_v26 = vld [vmem:[#allocation2 + $0x131] sm:$0xff] }
 0x19f   : > { %13723 = vmatmul.mubr.f32.gmra.mrb[2].mxu0 %v17472_v2 }
 0x1a0   : > { %13725 = vmatprep.mubr.f32.mxu0 %v17475_v34 }
 0x1a1   : > { %12710 = vmatmul.mubr.f32.gmra.mrb[52].mxu1 %v17401_v45  ;;  %v17496_v45 = vld [vmem:[#allocation2 + $0x139] sm:$0xff] }
 0x1a2   : > { %12712 = vmatprep.mubr.f32.mxu1 %v17404_v52  ;;  %v17499_v52 = vld [vmem:[#allocation2 + $0x161] sm:$0xff] }
 0x1a3   : > { %13726 = vmatmul.mubr.f32.gmra.mrb[4].mxu0 %v17480_v3 }
 0x1a4   : > { %13728 = vmatprep.mubr.f32.mxu0 %v17483_v16 }
 0x1a5   : > { %12713 = vmatmul.mubr.f32.gmra.mrb[54].mxu1 %v17408_v10  ;;  %v17504_v10 = vld [vmem:[#allocation2 + $0x169] sm:$0xff] }
 0x1a6   : > { %12715 = vmatprep.mubr.f32.mxu1 %v17411_v0  ;;  %v17507_v0 = vld [vmem:[#allocation2 + $0x191] sm:$0xff] }
 0x1a7   : > { %13729 = vmatmul.mubr.f32.gmra.mrb[6].mxu0 %v17488_v23 }
 0x1a8   : > { %13731 = vmatprep.mubr.f32.mxu0 %v17491_v26 }
 0x1a9   : > { %12716 = vmatmul.mubr.f32.gmra.mrb[56].mxu1 %v17414_v54  ;;  %v17509_v54 = vld [vmem:[#allocation2 + $0x11] sm:$0xff] }
 0x1aa   : > { %12718 = vmatprep.mubr.f32.mxu1 %v17417_v8  ;;  %v2582_v8 = vld [vmem:[#allocation12 + $0x110] sm:$0xff] }
 0x1ab   : > { %13732 = vmatmul.mubr.f32.gmra.mrb[8].mxu0 %v17496_v45 }
 0x1ac   : > { %13734 = vmatprep.mubr.f32.mxu0 %v17499_v52 }
 0x1ad   : > { %12719 = vmatmul.mubr.f32.gmra.mrb[58].mxu1 %v17420_v43  ;;  %v2583_v43 = vld [vmem:[#allocation12 + $0x118] sm:$0xff] }
 0x1ae   : > { %12721 = vmatprep.mubr.f32.mxu1 %v17423_v56  ;;  %v17514_v56 = vld [vmem:[#allocation2 + $0x199] sm:$0xff]  ;;  %v14731_v63 = vpack.c.bf16 %v2583_v43, %v2582_v8 }
 0x1af   : > { %13735 = vmatmul.mubr.f32.gmra.mrb[10].mxu0 %v17504_v10  ;;  %v6445_v43 = vld [vmem:[#allocation2 + $0x319] sm:$0xff] }
 0x1b0   : > { %13737 = vmatprep.mubr.f32.mxu0 %v17507_v0 }
 0x1b1   : > { %12722 = vmatmul.mubr.f32.gmra.mrb[60].mxu1 %v17426_v12  ;;  %v17517_v12 = vld [vmem:[#allocation2 + $0x19] sm:$0xff] }
 0x1b2   : > { %12724 = vmatprep.mubr.f32.mxu1 %v17429_v27  ;;  %v17521_v27 = vld [vmem:[#allocation2 + $0x41] sm:$0xff] }
 0x1b3   : > { %13738 = vmatmul.mubr.f32.gmra.mrb[12].mxu0 %v17514_v56 }
 0x1b4   : > { %13740 = vmatprep.mubr.f32.mxu0 %v17519_v60 }
 0x1b5   : > { %12725 = vmatmul.mubr.f32.gmra.mrb[62].mxu1 %v17432_v46  ;;  %v17526_v46 = vld [vmem:[#allocation2 + $0x1c9] sm:$0xff] }
 0x1b6   : > { %12759 = vmatprep.mubr.f32.mxu1 %v17509_v54 }
 0x1b7   : > { %13741 = vmatmul.mubr.f32.gmra.mrb[14].mxu0 %v17526_v46 }
 0x1b8   : > { %13743 = vmatprep.mubr.f32.mxu0 %v17533_v55 }
 0x1b9   : > { %12760 = vmatmul.mubr.f32.vlgmr.msra.gmra.mrb[0].mxu1 %v17517_v12 }
 0x1ba   : > { %14730 = vmatpush3.bf16.msra.mxu1 %v17451_v35  ;;  %12762 = vmatprep.mubr.f32.mxu1 %v17521_v27  ;;  %v2950_v35 = vld [vmem:[#allocation9 + $0x188] sm:$0xff] }
 0x1bb   : > { %14732 = vmatprep.subr.bf16.mxu1 %v14731_v63  ;;  %13744 = vmatmul.mubr.f32.gmra.mrb[16].mxu0 %v17538_v47  ;;  %v14759_v8 = vpack.c.bf16 %v2950_v35, %v2949_v42  ;;  %v17659_v42 = vld [vmem:[#allocation2 + $0x12f] sm:$0xff] }
 0x1bc   : > { %13746 = vmatprep.mubr.f32.mxu0 %v17540_v62 }
 0x1bd   : > { %12763 = vmatmul.mubr.f32.gmra.mrb[2].mxu1 %v17530_v28 }
 0x1be   : > { %12765 = vmatprep.mubr.f32.mxu1 %v17459_v39  ;;  %14734 = vmatpush3.bf16.msra.mxu1 %v14731_v63  ;;  %v6446_v63 = vld [vmem:[#allocation2 + $0x341] sm:$0xff] }
 0x1bf   : > { %14736 = vmatprep.subr.bf16.mxu1 %v14735_v20  ;;  %13747 = vmatmul.mubr.f32.gmra.mrb[18].mxu0 %v17546_v41 }
 0x1c0   : > { %13749 = vmatprep.mubr.f32.mxu0 %v17548_v36 }
 0x1c1   : > { %12766 = vmatmul.mubr.f32.gmra.mrb[4].mxu1 %v17464_v57 }
 0x1c2   : > { %12768 = vmatprep.mubr.f32.mxu1 %v17467_v1  ;;  %14738 = vmatpush3.bf16.msra.mxu1 %v14735_v20  ;;  %v2952_v20 = vld [vmem:[#allocation9 + $0x198] sm:$0xff] }
 0x1c3   : > { %14740 = vmatprep.subr.bf16.mxu1 %v14739_v58  ;;  %13750 = vmatmul.mubr.f32.gmra.mrb[20].mxu0 %v17554_v33  ;;  %v14763_v13 = vpack.c.bf16 %v2952_v20, %v2951_v7  ;;  %v3301_v7 = vld [vmem:[#allocation12 + $0x1f8] sm:$0xff]  ;;  %v17669_v20 = vld [vmem:[#allocation2 + $0x167] sm:$0xff] }
 0x1c4   : > { %13752 = vmatprep.mubr.f32.mxu0 %v17556_v31 }
 0x1c5   : > { %12769 = vmatmul.mubr.f32.gmra.mrb[6].mxu1 %v17472_v2 }
 0x1c6   : > { %12771 = vmatprep.mubr.f32.mxu1 %v17475_v34  ;;  %14742 = vmatpush3.bf16.msra.mxu1 %v14739_v58  ;;  %v2954_v58 = vld [vmem:[#allocation9 + $0x1a8] sm:$0xff] }
 0x1c7   : > { %14744 = vmatprep.subr.bf16.mxu1 %v14743_v25  ;;  %13753 = vmatmul.mubr.f32.gmra.mrb[22].mxu0 %v17562_v38  ;;  %v14767_v21 = vpack.c.bf16 %v2954_v58, %v2953_v32  ;;  %v17675_v58 = vld [vmem:[#allocation2 + $0x197] sm:$0xff] }
 0x1c8   : > { %13755 = vmatprep.mubr.f32.mxu0 %v17564_v49 }
 0x1c9   : > { %12772 = vmatmul.mubr.f32.gmra.mrb[8].mxu1 %v17480_v3 }
 0x1ca   : > { %12774 = vmatprep.mubr.f32.mxu1 %v17483_v16  ;;  %14746 = vmatpush3.bf16.msra.mxu1 %v14743_v25  ;;  %v2956_v25 = vld [vmem:[#allocation9 + $0x1b8] sm:$0xff] }
 0x1cb   : > { %14748 = vmatprep.subr.bf16.mxu1 %v14747_v5  ;;  %13756 = vmatmul.mubr.f32.gmra.mrb[24].mxu0 %v17570_v18  ;;  %v14771_v11 = vpack.c.bf16 %v2956_v25, %v2955_v6  ;;  %v17681_v6 = vld [vmem:[#allocation2 + $0x1c7] sm:$0xff]  ;;  %v17683_v25 = vld [vmem:[#allocation2 + $0x1ef] sm:$0xff] }
 0x1cc   : > { %13758 = vmatprep.mubr.f32.mxu0 %v17572_v37 }
 0x1cd   : > { %12775 = vmatmul.mubr.f32.gmra.mrb[10].mxu1 %v17488_v23 }
 0x1ce   : > { %12777 = vmatprep.mubr.f32.mxu1 %v17491_v26  ;;  %14750 = vmatpush3.bf16.msra.mxu1 %v14747_v5  ;;  %v2960_v5 = vld [vmem:[#allocation9 + $0x1d8] sm:$0xff] }
 0x1cf   : > { %14752 = vmatprep.subr.bf16.mxu1 %v14751_v9  ;;  %13759 = vmatmul.mubr.f32.gmra.mrb[26].mxu0 %v17578_v15 }
 0x1d0   : > { %13761 = vmatprep.mubr.f32.mxu0 %v6444_v14  ;;  %v3298_v14 = vld [vmem:[#allocation12 + $0x1e0] sm:$0xff] }
 0x1d1   : > { %12778 = vmatmul.mubr.f32.gmra.mrb[12].mxu1 %v17496_v45 }
 0x1d2   : > { %12780 = vmatprep.mubr.f32.mxu1 %v17499_v52  ;;  %14754 = vmatpush3.bf16.msra.mxu1 %v14751_v9  ;;  %v3287_v9 = vld [vmem:[#allocation12 + $0x188] sm:$0xff] }
 0x1d3   : > { %14756 = vmatprep.subr.bf16.mxu1 %v14755_v61  ;;  %13762 = vmatmul.mubr.f32.gmra.mrb[28].mxu0 %v6445_v43  ;;  %v17665_v43 = vld [vmem:[#allocation2 + $0x15f] sm:$0xff] }
 0x1d4   : > { %13764 = vmatprep.mubr.f32.mxu0 %v6446_v63 }
 0x1d5   : > { %12781 = vmatmul.mubr.f32.gmra.mrb[14].mxu1 %v17504_v10 }
 0x1d6   : > { %12783 = vmatprep.mubr.f32.mxu1 %v17507_v0  ;;  %14758 = vmatpush3.bf16.msra.mxu1 %v14755_v61  ;;  %v3297_v61 = vld [vmem:[#allocation12 + $0x1d8] sm:$0xff] }
 0x1d7   : > { %14760 = vmatprep.subr.bf16.mxu1 %v14759_v8  ;;  %13765 = vmatmul.mubr.f32.gmra.mrb[30].mxu0 %v6447_v19  ;;  %v3300_v19 = vld [vmem:[#allocation12 + $0x1f0] sm:$0xff] }
 0x1d8   : > { %v14819_v32 = vpack.c.bf16 %v3301_v7, %v3300_v19  ;;  %v7406_v19 = vld [vmem:[#allocation11 + $0x68] sm:$0xff] }
 0x1d9   : > { %12784 = vmatmul.mubr.f32.gmra.mrb[16].mxu1 %v17514_v56 }
 0x1da   : > { %12786 = vmatprep.mubr.f32.mxu1 %v17519_v60 }
 0x1dd   : > { %12787 = vmatmul.mubr.f32.gmra.mrb[18].mxu1 %v17526_v46 }
 0x1de   : > { %12789 = vmatprep.mubr.f32.mxu1 %v17533_v55 }
 0x1e1   : > { %12790 = vmatmul.mubr.f32.gmra.mrb[20].mxu1 %v17538_v47 }
 0x1e2   : > { %12792 = vmatprep.mubr.f32.mxu1 %v17540_v62 }
 0x1e5   : > { %12793 = vmatmul.mubr.f32.gmra.mrb[22].mxu1 %v17546_v41 }
 0x1e6   : > { %12795 = vmatprep.mubr.f32.mxu1 %v17548_v36 }
 0x1e9   : > { %12796 = vmatmul.mubr.f32.gmra.mrb[24].mxu1 %v17554_v33 }
 0x1ea   : > { %12798 = vmatprep.mubr.f32.mxu1 %v17556_v31 }
 0x1ed   : > { %12799 = vmatmul.mubr.f32.gmra.mrb[26].mxu1 %v17562_v38 }
 0x1ee   : > { %12801 = vmatprep.mubr.f32.mxu1 %v17564_v49 }
 0x1f1   : > { %12802 = vmatmul.mubr.f32.gmra.mrb[28].mxu1 %v17570_v18 }
 0x1f2   : > { %12804 = vmatprep.mubr.f32.mxu1 %v17572_v37 }
 0x1f5   : > { %12805 = vmatmul.mubr.f32.gmra.mrb[30].mxu1 %v17578_v15 }
 0x1f6   : > { %12839 = vmatprep.mubr.f32.mxu1 %v17509_v54  ;;  %v2957_v54 = vld [vmem:[#allocation9 + $0x1c0] sm:$0xff] }
 0x1f9   : > { %12840 = vmatmul.mubr.f32.vlgmr.msra.gmra.mrb[32].mxu1 %v17517_v12  ;;  %v14775_v12 = vpack.c.bf16 %v2958_v29, %v2957_v54  ;;  %v17690_v54 = vld [vmem:[#allocation2 + $0x21f] sm:$0xff]  ;;  %v17694_v29 = vld [vmem:[#allocation2 + $0x227] sm:$0xff] }
 0x1fa   : > { %14762 = vmatpush3.bf16.msra.mxu1 %v14759_v8  ;;  %12842 = vmatprep.mubr.f32.mxu1 %v17521_v27  ;;  %v2959_v27 = vld [vmem:[#allocation9 + $0x1d0] sm:$0xff] }
 0x1fb   : > { %14764 = vmatprep.subr.bf16.mxu1 %v14763_v13  ;;  %v17663_v8 = vld [vmem:[#allocation2 + $0x137] sm:$0xff] }
 0x1fd   : > { %12843 = vmatmul.mubr.f32.gmra.mrb[34].mxu1 %v17530_v28  ;;  %v2961_v28 = vld [vmem:[#allocation9 + $0x1e0] sm:$0xff] }
 0x1fe   : > { %12845 = vmatprep.mubr.f32.mxu1 %v17459_v39  ;;  %14766 = vmatpush3.bf16.msra.mxu1 %v14763_v13  ;;  %v14779_v39 = vpack.c.bf16 %v2960_v5, %v2959_v27  ;;  %v17671_v13 = vld [vmem:[#allocation2 + $0x18f] sm:$0xff]  ;;  %v17700_v27 = vld [vmem:[#allocation2 + $0x257] sm:$0xff]  ;;  %v17702_v5 = vld [vmem:[#allocation2 + $0x27f] sm:$0xff] }
 0x1ff   : > { %14768 = vmatprep.subr.bf16.mxu1 %v14767_v21 }
 0x201   : > { %12846 = vmatmul.mubr.f32.gmra.mrb[36].mxu1 %v17464_v57  ;;  %v14783_v57 = vpack.c.bf16 %v2962_v48, %v2961_v28  ;;  %v17708_v28 = vld [vmem:[#allocation2 + $0x2af] sm:$0xff]  ;;  %v17712_v48 = vld [vmem:[#allocation2 + $0x2b7] sm:$0xff] }
 0x202   : > { %12848 = vmatprep.mubr.f32.mxu1 %v17467_v1  ;;  %14770 = vmatpush3.bf16.msra.mxu1 %v14767_v21  ;;  %v2963_v1 = vld [vmem:[#allocation9 + $0x1f0] sm:$0xff]  ;;  %v17677_v21 = vld [vmem:[#allocation2 + $0x1bf] sm:$0xff] }
 0x203   : > { %14772 = vmatprep.subr.bf16.mxu1 %v14771_v11 }
 0x205   : > { %12849 = vmatmul.mubr.f32.gmra.mrb[38].mxu1 %v17472_v2  ;;  %v14787_v2 = vpack.c.bf16 %v2964_v44, %v2963_v1  ;;  %v17718_v1 = vld [vmem:[#allocation2 + $0x2e7] sm:$0xff]  ;;  %v17720_v44 = vld [vmem:[#allocation2 + $0x30f] sm:$0xff] }
 0x206   : > { %12851 = vmatprep.mubr.f32.mxu1 %v17475_v34  ;;  %14774 = vmatpush3.bf16.msra.mxu1 %v14771_v11  ;;  %v3286_v34 = vld [vmem:[#allocation12 + $0x180] sm:$0xff]  ;;  %v17688_v11 = vld [vmem:[#allocation2 + $0x1f7] sm:$0xff] }
 0x207   : > { %14776 = vmatprep.subr.bf16.mxu1 %v14775_v12 }
 0x209   : > { %12852 = vmatmul.mubr.f32.gmra.mrb[40].mxu1 %v17480_v3  ;;  %v14791_v3 = vpack.c.bf16 %v3287_v9, %v3286_v34 }
 0x20a   : > { %12854 = vmatprep.mubr.f32.mxu1 %v17483_v16  ;;  %14778 = vmatpush3.bf16.msra.mxu1 %v14775_v12  ;;  %v17629_v16 = vld [vmem:[#allocation2 + $0x3f] sm:$0xff]  ;;  %v17696_v12 = vld [vmem:[#allocation2 + $0x24f] sm:$0xff] }
 0x20b   : > { %14780 = vmatprep.subr.bf16.mxu1 %v14779_v39 }
 0x20d   : > { %12855 = vmatmul.mubr.f32.gmra.mrb[42].mxu1 %v17488_v23  ;;  %v3288_v23 = vld [vmem:[#allocation12 + $0x190] sm:$0xff] }
 0x20e   : > { %12857 = vmatprep.mubr.f32.mxu1 %v17491_v26  ;;  %14782 = vmatpush3.bf16.msra.mxu1 %v14779_v39  ;;  %v3289_v26 = vld [vmem:[#allocation12 + $0x198] sm:$0xff]  ;;  %v17706_v39 = vld [vmem:[#allocation2 + $0x287] sm:$0xff] }
 0x20f   : > { %14784 = vmatprep.subr.bf16.mxu1 %v14783_v57 }
 0x211   : > { %12858 = vmatmul.mubr.f32.gmra.mrb[44].mxu1 %v17496_v45  ;;  %v17633_v45 = vld [vmem:[#allocation2 + $0x47] sm:$0xff] }
 0x212   : > { %12860 = vmatprep.mubr.f32.mxu1 %v17499_v52  ;;  %14786 = vmatpush3.bf16.msra.mxu1 %v14783_v57  ;;  %v17635_v52 = vld [vmem:[#allocation2 + $0x6f] sm:$0xff]  ;;  %v17714_v57 = vld [vmem:[#allocation2 + $0x2df] sm:$0xff] }
 0x213   : > { %14788 = vmatprep.subr.bf16.mxu1 %v14787_v2 }
 0x215   : > { %12861 = vmatmul.mubr.f32.gmra.mrb[46].mxu1 %v17504_v10  ;;  %v14795_v10 = vpack.c.bf16 %v3289_v26, %v3288_v23  ;;  %v7393_v26 = vld [vmem:[#allocation11] sm:$0xff] }
 0x216   : > { %12863 = vmatprep.mubr.f32.mxu1 %v17507_v0  ;;  %14790 = vmatpush3.bf16.msra.mxu1 %v14787_v2  ;;  %v3290_v0 = vld [vmem:[#allocation12 + $0x1a0] sm:$0xff]  ;;  %v17724_v2 = vld [vmem:[#allocation2 + $0x317] sm:$0xff] }
 0x217   : > { %14792 = vmatprep.subr.bf16.mxu1 %v14791_v3 }
 0x219   : > { %12864 = vmatmul.mubr.f32.gmra.mrb[48].mxu1 %v17514_v56  ;;  %v3291_v56 = vld [vmem:[#allocation12 + $0x1a8] sm:$0xff] }
 0x21a   : > { %12866 = vmatprep.mubr.f32.mxu1 %v17519_v60  ;;  %v17639_v60 = vld [vmem:[#allocation2 + $0x77] sm:$0xff] }
 0x21d   : > { %12867 = vmatmul.mubr.f32.gmra.mrb[50].mxu1 %v17526_v46  ;;  %v17641_v46 = vld [vmem:[#allocation2 + $0x9f] sm:$0xff] }
 0x21e   : > { %12869 = vmatprep.mubr.f32.mxu1 %v17533_v55  ;;  %v14799_v55 = vpack.c.bf16 %v3291_v56, %v3290_v0 }
 0x221   : > { %12870 = vmatmul.mubr.f32.gmra.mrb[52].mxu1 %v17538_v47  ;;  %v3292_v47 = vld [vmem:[#allocation12 + $0x1b0] sm:$0xff] }
 0x222   : > { %12872 = vmatprep.mubr.f32.mxu1 %v17540_v62  ;;  %v3293_v62 = vld [vmem:[#allocation12 + $0x1b8] sm:$0xff] }
 0x225   : > { %12873 = vmatmul.mubr.f32.gmra.mrb[54].mxu1 %v17546_v41  ;;  %v17645_v41 = vld [vmem:[#allocation2 + $0xa7] sm:$0xff] }
 0x226   : > { %12875 = vmatprep.mubr.f32.mxu1 %v17548_v36  ;;  %v17647_v36 = vld [vmem:[#allocation2 + $0xcf] sm:$0xff] }
 0x229   : > { %12876 = vmatmul.mubr.f32.gmra.mrb[56].mxu1 %v17554_v33  ;;  %v14803_v33 = vpack.c.bf16 %v3293_v62, %v3292_v47  ;;  %v7396_v47 = vld [vmem:[#allocation11 + $0x18] sm:$0xff] }
 0x22a   : > { %12878 = vmatprep.mubr.f32.mxu1 %v17556_v31  ;;  %v3294_v31 = vld [vmem:[#allocation12 + $0x1c0] sm:$0xff] }
 0x22d   : > { %12879 = vmatmul.mubr.f32.gmra.mrb[58].mxu1 %v17562_v38  ;;  %v3295_v38 = vld [vmem:[#allocation12 + $0x1c8] sm:$0xff] }
 0x22e   : > { %12881 = vmatprep.mubr.f32.mxu1 %v17564_v49  ;;  %v17651_v49 = vld [vmem:[#allocation2 + $0xd7] sm:$0xff]  ;;  %v14807_v53 = vpack.c.bf16 %v3295_v38, %v3294_v31 }
 0x22f   : > { %v7400_v38 = vld [vmem:[#allocation11 + $0x38] sm:$0xff] }
 0x231   : > { %12882 = vmatmul.mubr.f32.gmra.mrb[60].mxu1 %v17570_v18  ;;  %v3296_v18 = vld [vmem:[#allocation12 + $0x1d0] sm:$0xff] }
 0x232   : > { %12884 = vmatprep.mubr.f32.mxu1 %v17572_v37  ;;  %v17657_v37 = vld [vmem:[#allocation2 + $0x107] sm:$0xff]  ;;  %v14811_v35 = vpack.c.bf16 %v3297_v61, %v3296_v18 }
 0x233   : > { %v7402_v18 = vld [vmem:[#allocation11 + $0x48] sm:$0xff] }
 0x235   : > { %12885 = vmatmul.mubr.f32.gmra.mrb[62].mxu1 %v17578_v15  ;;  %v3299_v15 = vld [vmem:[#allocation12 + $0x1e8] sm:$0xff] }
 0x236   : > { %12919 = vmatprep.mubr.f32.mxu1 %v17629_v16  ;;  %v14815_v63 = vpack.c.bf16 %v3299_v15, %v3298_v14  ;;  %v3993_v15 = vld [vmem:[#allocation12 + $0x208] sm:$0xff] }
 0x239   : > { %12920 = vmatmul.mubr.f32.vlgmr.msra.gmra.mrb[0].mxu1 %v17633_v45 }
 0x23a   : > { %14794 = vmatpush3.bf16.msra.mxu1 %v14791_v3  ;;  %12922 = vmatprep.mubr.f32.mxu1 %v17635_v52 }
 0x23b   : > { %14796 = vmatprep.subr.bf16.mxu1 %v14795_v10 }
 0x23d   : > { %12923 = vmatmul.mubr.f32.gmra.mrb[2].mxu1 %v17639_v60 }
 0x23e   : > { %12925 = vmatprep.mubr.f32.mxu1 %v17641_v46  ;;  %14798 = vmatpush3.bf16.msra.mxu1 %v14795_v10  ;;  %v7394_v10 = vld [vmem:[#allocation11 + $0x8] sm:$0xff] }
 0x23f   : > { %14800 = vmatprep.subr.bf16.mxu1 %v14799_v55  ;;  %v15143_v0 = vpack.c.bf16 %v7394_v10, %v7393_v26  ;;  %v7408_v26 = vld [vmem:[#allocation11 + $0x78] sm:$0xff] }
 0x241   : > { %12926 = vmatmul.mubr.f32.gmra.mrb[4].mxu1 %v17645_v41  ;;  %15144 = vmatprep.subr.bf16.mxu0 %v15143_v0 }
 0x242   : > { %12928 = vmatprep.mubr.f32.mxu1 %v17647_v36  ;;  %14802 = vmatpush3.bf16.msra.mxu1 %v14799_v55 }
 0x243   : > { %14804 = vmatprep.subr.bf16.mxu1 %v14803_v33  ;;  %15146 = vmatpush3.bf16.msra.mxu0 %v15143_v0  ;;  %v7330_v0 = vld [vmem:[#allocation3 + $0x17] sm:$0xff] }
 0x245   : > { %12929 = vmatmul.mubr.f32.gmra.mrb[6].mxu1 %v17651_v49 }
 0x246   : > { %12931 = vmatprep.mubr.f32.mxu1 %v17653_v51  ;;  %14806 = vmatpush3.bf16.msra.mxu1 %v14803_v33  ;;  %v7398_v33 = vld [vmem:[#allocation11 + $0x28] sm:$0xff] }
 0x247   : > { %14808 = vmatprep.subr.bf16.mxu1 %v14807_v53 }
 0x249   : > { %12932 = vmatmul.mubr.f32.gmra.mrb[8].mxu1 %v17657_v37 }
 0x24a   : > { %12934 = vmatprep.mubr.f32.mxu1 %v17659_v42  ;;  %14810 = vmatpush3.bf16.msra.mxu1 %v14807_v53 }
 0x24b   : > { %14812 = vmatprep.subr.bf16.mxu1 %v14811_v35 }
 0x24d   : > { %12935 = vmatmul.mubr.f32.gmra.mrb[10].mxu1 %v17663_v8 }
 0x24e   : > { %12937 = vmatprep.mubr.f32.mxu1 %v17665_v43  ;;  %14814 = vmatpush3.bf16.msra.mxu1 %v14811_v35  ;;  %v7404_v35 = vld [vmem:[#allocation11 + $0x58] sm:$0xff] }
 0x24f   : > { %14816 = vmatprep.subr.bf16.mxu1 %v14815_v63 }
 0x251   : > { %12938 = vmatmul.mubr.f32.gmra.mrb[12].mxu1 %v17669_v20 }
 0x252   : > { %12940 = vmatprep.mubr.f32.mxu1 %v17671_v13  ;;  %14818 = vmatpush3.bf16.msra.mxu1 %v14815_v63  ;;  %v7405_v63 = vld [vmem:[#allocation11 + $0x60] sm:$0xff] }
 0x253   : > { %14820 = vmatprep.subr.bf16.mxu1 %v14819_v32 }
 0x255   : > { %12941 = vmatmul.mubr.f32.gmra.mrb[14].mxu1 %v17675_v58 }
 0x256   : > { %12943 = vmatprep.mubr.f32.mxu1 %v17677_v21  ;;  %14822 = vmatpush3.bf16.msra.mxu1 %v14819_v32  ;;  %v7407_v32 = vld [vmem:[#allocation11 + $0x70] sm:$0xff] }
 0x257   : > { %15431 = vmatprep.subr.bf16.mxu1 %v17049_v17  ;;  %v15171_v10 = vpack.c.bf16 %v7408_v26, %v7407_v32  ;;  %v17868_v32 = vld [vmem:[#allocation2 + $0x2b0] sm:$0xff] }
 0x259   : > { %12944 = vmatmul.mubr.f32.gmra.mrb[16].mxu1 %v17681_v6 }
 0x25a   : > { %12946 = vmatprep.mubr.f32.mxu1 %v17683_v25 }
 0x25d   : > { %12947 = vmatmul.mubr.f32.gmra.mrb[18].mxu1 %v17688_v11 }
 0x25e   : > { %12949 = vmatprep.mubr.f32.mxu1 %v17690_v54 }
 0x261   : > { %12950 = vmatmul.mubr.f32.gmra.mrb[20].mxu1 %v17694_v29 }
 0x262   : > { %12952 = vmatprep.mubr.f32.mxu1 %v17696_v12 }
 0x265   : > { %12953 = vmatmul.mubr.f32.gmra.mrb[22].mxu1 %v17700_v27 }
 0x266   : > { %12955 = vmatprep.mubr.f32.mxu1 %v17702_v5 }
 0x269   : > { %12956 = vmatmul.mubr.f32.gmra.mrb[24].mxu1 %v17706_v39 }
 0x26a   : > { %12958 = vmatprep.mubr.f32.mxu1 %v17708_v28 }
 0x26d   : > { %12959 = vmatmul.mubr.f32.gmra.mrb[26].mxu1 %v17712_v48 }
 0x26e   : > { %12961 = vmatprep.mubr.f32.mxu1 %v17714_v57  ;;  %v17726_v34 = vpop.f32.mrb[0].mxu0 }
 0x26f   : > { %v17728_v9 = vpop.f32.mrb[1].mxu0 }
 0x271   : > { %12962 = vmatmul.mubr.f32.gmra.mrb[28].mxu1 %v17718_v1 }
 0x272   : > { %12964 = vmatprep.mubr.f32.mxu1 %v17720_v44  ;;  %v17732_v3 = vpop.f32.mrb[2].mxu0 }
 0x273   : > { %v17734_v23 = vpop.f32.mrb[3].mxu0 }
 0x275   : > { %12965 = vmatmul.mubr.f32.gmra.mrb[30].mxu1 %v17724_v2 }
 0x276   : > { %12999 = vmatprep.mubr.f32.mxu1 %v17629_v16  ;;  %v17740_v56 = vpop.f32.mrb[4].mxu0  ;;  %v7395_v16 = vld [vmem:[#allocation11 + $0x10] sm:$0xff] }
 0x277   : > { %v17742_v55 = vpop.f32.mrb[5].mxu0  ;;  %v15147_v62 = vpack.c.bf16 %v7396_v47, %v7395_v16 }
 0x279   : > { %13000 = vmatmul.mubr.f32.vlgmr.msra.gmra.mrb[32].mxu1 %v17633_v45  ;;  %15148 = vmatprep.subr.bf16.mxu0 %v15147_v62 }
 0x27a   : > { %15439 = vmatpush3.bf16.msra.mxu1 %v17049_v17  ;;  %13002 = vmatprep.mubr.f32.mxu1 %v17635_v52  ;;  %v17748_v17 = vpop.f32.mrb[6].mxu0  ;;  %v7397_v52 = vld [vmem:[#allocation11 + $0x20] sm:$0xff] }
 0x27b   : > { %15432 = vmatprep.subr.bf16.mxu1 %v17055_v24  ;;  %v17750_v45 = vpop.f32.mrb[7].mxu0  ;;  %15150 = vmatpush3.bf16.msra.mxu0 %v15147_v62  ;;  %v15151_v31 = vpack.c.bf16 %v7398_v33, %v7397_v52  ;;  %v17841_v62 = vld [vmem:[#allocation2 + $0x1c8] sm:$0xff]  ;;  %v3996_v52 = vld [vmem:[#allocation12 + $0x220] sm:$0xff] }
 0x27c   : > { %v3997_v33 = vld [vmem:[#allocation12 + $0x228] sm:$0xff] }
 0x27d   : > { %13003 = vmatmul.mubr.f32.gmra.mrb[34].mxu1 %v17639_v60  ;;  %15152 = vmatprep.subr.bf16.mxu0 %v15151_v31 }
 0x27e   : > { %13005 = vmatprep.mubr.f32.mxu1 %v17641_v46  ;;  %15440 = vmatpush3.bf16.msra.mxu1 %v17055_v24  ;;  %v17756_v24 = vpop.f32.mrb[8].mxu0  ;;  %v7399_v46 = vld [vmem:[#allocation11 + $0x30] sm:$0xff] }
 0x27f   : > { %15433 = vmatprep.subr.bf16.mxu1 %v17072_v30  ;;  %v17758_v60 = vpop.f32.mrb[9].mxu0  ;;  %15154 = vmatpush3.bf16.msra.mxu0 %v15151_v31  ;;  %v15155_v53 = vpack.c.bf16 %v7400_v38, %v7399_v46  ;;  %v3998_v31 = vld [vmem:[#allocation12 + $0x230] sm:$0xff]  ;;  %v3999_v46 = vld [vmem:[#allocation12 + $0x238] sm:$0xff]  ;;  %v17853_v38 = vld [vmem:[#allocation2 + $0x228] sm:$0xff] }
 0x281   : > { %13006 = vmatmul.mubr.f32.gmra.mrb[36].mxu1 %v17645_v41  ;;  %15156 = vmatprep.subr.bf16.mxu0 %v15155_v53 }
 0x282   : > { %13008 = vmatprep.mubr.f32.mxu1 %v17647_v36  ;;  %15441 = vmatpush3.bf16.msra.mxu1 %v17072_v30  ;;  %v17764_v30 = vpop.f32.mrb[10].mxu0  ;;  %v7401_v36 = vld [vmem:[#allocation11 + $0x40] sm:$0xff] }
 0x283   : > { %15434 = vmatprep.subr.bf16.mxu1 %v17093_v40  ;;  %v17766_v41 = vpop.f32.mrb[11].mxu0  ;;  %15158 = vmatpush3.bf16.msra.mxu0 %v15155_v53  ;;  %v15159_v61 = vpack.c.bf16 %v7402_v18, %v7401_v36  ;;  %v17855_v53 = vld [vmem:[#allocation2 + $0x250] sm:$0xff]  ;;  %v14867_v36 = vpack.c.bf16 %v3999_v46, %v3998_v31  ;;  %v4000_v18 = vld [vmem:[#allocation12 + $0x240] sm:$0xff]  ;;  %v17883_v31 = vld [vmem:[#allocation2 + $0x318] sm:$0xff] }
 0x285   : > { %13009 = vmatmul.mubr.f32.gmra.mrb[38].mxu1 %v17651_v49  ;;  %15160 = vmatprep.subr.bf16.mxu0 %v15159_v61 }
 0x286   : > { %13011 = vmatprep.mubr.f32.mxu1 %v17653_v51  ;;  %15442 = vmatpush3.bf16.msra.mxu1 %v17093_v40  ;;  %v17772_v40 = vpop.f32.mrb[12].mxu0  ;;  %v7403_v51 = vld [vmem:[#allocation11 + $0x50] sm:$0xff] }
 0x287   : > { %15435 = vmatprep.subr.bf16.mxu1 %v17111_v50  ;;  %v17774_v49 = vpop.f32.mrb[13].mxu0  ;;  %15162 = vmatpush3.bf16.msra.mxu0 %v15159_v61  ;;  %v15163_v14 = vpack.c.bf16 %v7404_v35, %v7403_v51  ;;  %v4001_v61 = vld [vmem:[#allocation12 + $0x248] sm:$0xff]  ;;  %v4002_v35 = vld [vmem:[#allocation12 + $0x250] sm:$0xff] }
 0x288   : > { %v14871_v51 = vpack.c.bf16 %v4001_v61, %v4000_v18  ;;  %v4701_v18 = vld [vmem:[#allocation12 + $0x298] sm:$0xff]  ;;  %v16337_v61 = vld [vmem:[#allocation2 + $0x40] sm:$0xff] }
 0x289   : > { %13012 = vmatmul.mubr.f32.gmra.mrb[40].mxu1 %v17657_v37  ;;  %15164 = vmatprep.subr.bf16.mxu0 %v15163_v14 }
 0x28a   : > { %13014 = vmatprep.mubr.f32.mxu1 %v17659_v42  ;;  %15443 = vmatpush3.bf16.msra.mxu1 %v17111_v50  ;;  %v17779_v37 = vpop.f32.mrb[14].mxu0  ;;  %v3992_v50 = vld [vmem:[#allocation12 + $0x200] sm:$0xff] }
 0x28b   : > { %15436 = vmatprep.subr.bf16.mxu1 %v17125_v59  ;;  %v17782_v42 = vpop.f32.mrb[15].mxu0  ;;  %15166 = vmatpush3.bf16.msra.mxu0 %v15163_v14  ;;  %v4003_v14 = vld [vmem:[#allocation12 + $0x258] sm:$0xff] }
 0x28d   : > { %13015 = vmatmul.mubr.f32.gmra.mrb[42].mxu1 %v17663_v8  ;;  %v15167_v8 = vpack.c.bf16 %v7406_v19, %v7405_v63  ;;  %v14875_v63 = vpack.c.bf16 %v4003_v14, %v4002_v35  ;;  %v4004_v19 = vld [vmem:[#allocation12 + $0x260] sm:$0xff]  ;;  %v4703_v14 = vld [vmem:[#allocation12 + $0x2a8] sm:$0xff] }
 0x28e   : > { %13017 = vmatprep.mubr.f32.mxu1 %v17665_v43  ;;  %15444 = vmatpush3.bf16.msra.mxu1 %v17125_v59  ;;  %v14855_v59 = vpack.c.bf16 %v3993_v15, %v3992_v50  ;;  %v17788_v43 = vpop.f32.mrb[16].mxu0  ;;  %v17859_v50 = vld [vmem:[#allocation2 + $0x258] sm:$0xff]  ;;  %v17862_v15 = vld [vmem:[#allocation2 + $0x280] sm:$0xff] }
 0x28f   : > { %15437 = vmatprep.subr.bf16.mxu1 %v17133_v4  ;;  %15168 = vmatprep.subr.bf16.mxu0 %v15167_v8  ;;  %v17790_v7 = vpop.f32.mrb[17].mxu0  ;;  %v4702_v35 = vld [vmem:[#allocation12 + $0x2a0] sm:$0xff] }
 0x290   : > { %15170 = vmatpush3.bf16.msra.mxu0 %v15167_v8  ;;  %v4005_v8 = vld [vmem:[#allocation12 + $0x268] sm:$0xff] }
 0x291   : > { %13018 = vmatmul.mubr.f32.gmra.mrb[44].mxu1 %v17669_v20  ;;  %15172 = vmatprep.subr.bf16.mxu0 %v15171_v10  ;;  %v14879_v26 = vpack.c.bf16 %v4005_v8, %v4004_v19  ;;  %v16339_v19 = vld [vmem:[#allocation2 + $0x70] sm:$0xff]  ;;  %v14927_v8 = vpack.c.bf16 %v4703_v14, %v4702_v35  ;;  %v4709_v35 = vld [vmem:[#allocation12 + $0x2d8] sm:$0xff] }
 0x292   : > { %13020 = vmatprep.mubr.f32.mxu1 %v17671_v13  ;;  %15445 = vmatpush3.bf16.msra.mxu1 %v17133_v4  ;;  %v17795_v4 = vpop.f32.mrb[18].mxu0  ;;  %v7329_v13 = vld [vmem:[#allocation3 + $0xf] sm:$0xff]  ;;  %v16344_v14 = vld [vmem:[#allocation2 + $0xd8] sm:$0xff] }
 0x293   : > { %15438 = vmatprep.subr.bf16.mxu1 %v17145_v22  ;;  %v17797_v20 = vpop.f32.mrb[19].mxu0  ;;  %13879 = vmatprep.mubr.f32.mxu0 %v7329_v13  ;;  %v4007_v13 = vld [vmem:[#allocation12 + $0x278] sm:$0xff] }
 0x294   : > { %15174 = vmatpush3.bf16.msra.mxu0 %v15171_v10  ;;  %v4006_v10 = vld [vmem:[#allocation12 + $0x270] sm:$0xff] }
 0x295   : > { %13021 = vmatmul.mubr.f32.gmra.mrb[46].mxu1 %v17675_v58 }
 0x296   : > { %13023 = vmatprep.mubr.f32.mxu1 %v17677_v21  ;;  %15446 = vmatpush3.bf16.msra.mxu1 %v17145_v22  ;;  %v17801_v58 = vpop.f32.mrb[20].mxu0 }
 0x297   : > { %14856 = vmatprep.subr.bf16.mxu1 %v14855_v59  ;;  %13880 = vmatmul.mubr.f32.vlgmr.msra.gmra.mrb[32].mxu0 %v7330_v0  ;;  %v17803_v21 = vpop.f32.mrb[21].mxu0  ;;  %v17871_v0 = vld [vmem:[#allocation2 + $0x2b8] sm:$0xff] }
 0x299   : > { %13024 = vmatmul.mubr.f32.gmra.mrb[48].mxu1 %v17681_v6 }
 0x29a   : > { %13026 = vmatprep.mubr.f32.mxu1 %v17683_v25  ;;  %v17807_v22 = vpop.f32.mrb[22].mxu0 }
 0x29b   : > { %v17809_v16 = vpop.f32.mrb[23].mxu0 }
 0x29d   : > { %13027 = vmatmul.mubr.f32.gmra.mrb[50].mxu1 %v17688_v11 }
 0x29e   : > { %13029 = vmatprep.mubr.f32.mxu1 %v17690_v54  ;;  %v17813_v6 = vpop.f32.mrb[24].mxu0 }
 0x29f   : > { %v17815_v25 = vpop.f32.mrb[25].mxu0 }
 0x2a1   : > { %13030 = vmatmul.mubr.f32.gmra.mrb[52].mxu1 %v17694_v29 }
 0x2a2   : > { %13032 = vmatprep.mubr.f32.mxu1 %v17696_v12  ;;  %v17819_v47 = vpop.f32.mrb[26].mxu0 }
 0x2a3   : > { %v17821_v11 = vpop.f32.mrb[27].mxu0 }
 0x2a5   : > { %13033 = vmatmul.mubr.f32.gmra.mrb[54].mxu1 %v17700_v27 }
 0x2a6   : > { %13035 = vmatprep.mubr.f32.mxu1 %v17702_v5  ;;  %v17825_v54 = vpop.f32.mrb[28].mxu0  ;;  %v17837_v5 = vld [vmem:[#allocation2 + $0x1c0] sm:$0xff] }
 0x2a7   : > { %v17827_v29 = vpop.f32.mrb[29].mxu0 }
 0x2a9   : > { %13036 = vmatmul.mubr.f32.gmra.mrb[56].mxu1 %v17706_v39  ;;  %v3994_v39 = vld [vmem:[#allocation12 + $0x210] sm:$0xff] }
 0x2aa   : > { %13038 = vmatprep.mubr.f32.mxu1 %v17708_v28  ;;  %v17831_v12 = vpop.f32.mrb[30].mxu0  ;;  %v3995_v28 = vld [vmem:[#allocation12 + $0x218] sm:$0xff] }
 0x2ab   : > { %v17833_v27 = vpop.f32.mrb[31].mxu0 }
 0x2ad   : > { %13039 = vmatmul.mubr.f32.gmra.mrb[58].mxu1 %v17712_v48  ;;  %v17843_v48 = vld [vmem:[#allocation2 + $0x1f0] sm:$0xff] }
 0x2ae   : > { %13041 = vmatprep.mubr.f32.mxu1 %v17714_v57  ;;  %v14859_v57 = vpack.c.bf16 %v3995_v28, %v3994_v39  ;;  %v17874_v39 = vld [vmem:[#allocation2 + $0x2e0] sm:$0xff]  ;;  %v17877_v28 = vld [vmem:[#allocation2 + $0x310] sm:$0xff] }
 0x2b1   : > { %13042 = vmatmul.mubr.f32.gmra.mrb[60].mxu1 %v17718_v1  ;;  %v17847_v1 = vld [vmem:[#allocation2 + $0x1f8] sm:$0xff] }
 0x2b2   : > { %13044 = vmatprep.mubr.f32.mxu1 %v17720_v44  ;;  %v17849_v44 = vld [vmem:[#allocation2 + $0x220] sm:$0xff] }
 0x2b5   : > { %13045 = vmatmul.mubr.f32.gmra.mrb[62].mxu1 %v17724_v2  ;;  %v14863_v2 = vpack.c.bf16 %v3997_v33, %v3996_v52  ;;  %v4698_v52 = vld [vmem:[#allocation12 + $0x280] sm:$0xff]  ;;  %v4699_v33 = vld [vmem:[#allocation12 + $0x288] sm:$0xff] }
 0x2b6   : > { %13103 = vmatprep.mubr.f32.mxu1 %v17837_v5  ;;  %v14919_v46 = vpack.c.bf16 %v4699_v33, %v4698_v52  ;;  %v16341_v52 = vld [vmem:[#allocation2 + $0xa0] sm:$0xff] }
 0x2b7   : > { %v4706_v33 = vld [vmem:[#allocation12 + $0x2c0] sm:$0xff] }
 0x2b9   : > { %13104 = vmatmul.mubr.f32.vlgmr.msra.gmra.mrb[16].mxu1 %v17841_v62 }
 0x2ba   : > { %14858 = vmatpush3.bf16.msra.mxu1 %v14855_v59  ;;  %13106 = vmatprep.mubr.f32.mxu1 %v17843_v48  ;;  %v17865_v59 = vld [vmem:[#allocation2 + $0x288] sm:$0xff] }
 0x2bb   : > { %14860 = vmatprep.subr.bf16.mxu1 %v14859_v57 }
 0x2bd   : > { %13107 = vmatmul.mubr.f32.gmra.mrb[18].mxu1 %v17847_v1 }
 0x2be   : > { %14862 = vmatpush3.bf16.msra.mxu1 %v14859_v57  ;;  %13109 = vmatprep.mubr.f32.mxu1 %v17849_v44  ;;  %v14883_v57 = vpack.c.bf16 %v4007_v13, %v4006_v10  ;;  %v4705_v10 = vld [vmem:[#allocation12 + $0x2b8] sm:$0xff] }
 0x2bf   : > { %14864 = vmatprep.subr.bf16.mxu1 %v14863_v2  ;;  %v16340_v13 = vld [vmem:[#allocation2 + $0x78] sm:$0xff] }
 0x2c1   : > { %13110 = vmatmul.mubr.f32.gmra.mrb[20].mxu1 %v17853_v38 }
 0x2c2   : > { %14866 = vmatpush3.bf16.msra.mxu1 %v14863_v2  ;;  %13112 = vmatprep.mubr.f32.mxu1 %v17855_v53  ;;  %v17879_v2 = vld [vmem:[#allocation2 + $0x2e8] sm:$0xff] }
 0x2c3   : > { %14868 = vmatprep.subr.bf16.mxu1 %v14867_v36 }
 0x2c5   : > { %13113 = vmatmul.mubr.f32.gmra.mrb[22].mxu1 %v17859_v50 }
 0x2c6   : > { %14870 = vmatpush3.bf16.msra.mxu1 %v14867_v36  ;;  %13115 = vmatprep.mubr.f32.mxu1 %v17862_v15  ;;  %v4700_v36 = vld [vmem:[#allocation12 + $0x290] sm:$0xff] }
 0x2c7   : > { %14872 = vmatprep.subr.bf16.mxu1 %v14871_v51 }
 0x2c9   : > { %13116 = vmatmul.mubr.f32.gmra.mrb[24].mxu1 %v17865_v59 }
 0x2ca   : > { %14874 = vmatpush3.bf16.msra.mxu1 %v14871_v51  ;;  %13118 = vmatprep.mubr.f32.mxu1 %v17868_v32  ;;  %v14923_v51 = vpack.c.bf16 %v4701_v18, %v4700_v36  ;;  %v4707_v36 = vld [vmem:[#allocation12 + $0x2c8] sm:$0xff] }
 0x2cb   : > { %14876 = vmatprep.subr.bf16.mxu1 %v14875_v63  ;;  %v16342_v18 = vld [vmem:[#allocation2 + $0xa8] sm:$0xff] }
 0x2cd   : > { %13119 = vmatmul.mubr.f32.gmra.mrb[26].mxu1 %v17871_v0 }
 0x2ce   : > { %14878 = vmatpush3.bf16.msra.mxu1 %v14875_v63  ;;  %13121 = vmatprep.mubr.f32.mxu1 %v17874_v39  ;;  %v16338_v63 = vld [vmem:[#allocation2 + $0x48] sm:$0xff] }
 0x2cf   : > { %14880 = vmatprep.subr.bf16.mxu1 %v14879_v26 }
 0x2d1   : > { %13122 = vmatmul.mubr.f32.gmra.mrb[28].mxu1 %v17879_v2 }
 0x2d2   : > { %14882 = vmatpush3.bf16.msra.mxu1 %v14879_v26  ;;  %13124 = vmatprep.mubr.f32.mxu1 %v17877_v28  ;;  %v4704_v26 = vld [vmem:[#allocation12 + $0x2b0] sm:$0xff] }
 0x2d3   : > { %14884 = vmatprep.subr.bf16.mxu1 %v14883_v57 }
 0x2d5   : > { %13125 = vmatmul.mubr.f32.gmra.mrb[30].mxu1 %v17883_v31 }
 0x2d6   : > { %14886 = vmatpush3.bf16.msra.mxu1 %v14883_v57  ;;  %13159 = vmatprep.mubr.f32.mxu1 %v16337_v61  ;;  %v14931_v57 = vpack.c.bf16 %v4705_v10, %v4704_v26  ;;  %v16343_v61 = vld [vmem:[#allocation2 + $0xd0] sm:$0xff]  ;;  %v4711_v26 = vld [vmem:[#allocation12 + $0x2e8] sm:$0xff] }
 0x2d7   : > { %14920 = vmatprep.subr.bf16.mxu1 %v14919_v46  ;;  %v16346_v10 = vld [vmem:[#allocation2 + $0x108] sm:$0xff] }
 0x2d9   : > { %13160 = vmatmul.mubr.f32.vlgmr.msra.gmra.mrb[32].mxu1 %v16338_v63  ;;  %v4708_v63 = vld [vmem:[#allocation12 + $0x2d0] sm:$0xff] }
 0x2da   : > { %13162 = vmatprep.mubr.f32.mxu1 %v16339_v19  ;;  %14922 = vmatpush3.bf16.msra.mxu1 %v14919_v46  ;;  %v14935_v46 = vpack.c.bf16 %v4707_v36, %v4706_v33  ;;  %v16345_v19 = vld [vmem:[#allocation2 + $0x100] sm:$0xff]  ;;  %v4713_v33 = vld [vmem:[#allocation12 + $0x2f8] sm:$0xff] }
 0x2db   : > { %14924 = vmatprep.subr.bf16.mxu1 %v14923_v51  ;;  %v16348_v36 = vld [vmem:[#allocation2 + $0x138] sm:$0xff] }
 0x2dd   : > { %13163 = vmatmul.mubr.f32.gmra.mrb[34].mxu1 %v16340_v13  ;;  %v4710_v13 = vld [vmem:[#allocation12 + $0x2e0] sm:$0xff] }
 0x2de   : > { %13165 = vmatprep.mubr.f32.mxu1 %v16341_v52  ;;  %14926 = vmatpush3.bf16.msra.mxu1 %v14923_v51  ;;  %v14939_v51 = vpack.c.bf16 %v4709_v35, %v4708_v63  ;;  %v16347_v52 = vld [vmem:[#allocation2 + $0x130] sm:$0xff]  ;;  %v5406_v63 = vld [vmem:[#allocation12 + $0x308] sm:$0xff] }
 0x2df   : > { %14928 = vmatprep.subr.bf16.mxu1 %v14927_v8  ;;  %v16350_v35 = vld [vmem:[#allocation2 + $0x168] sm:$0xff] }
 0x2e1   : > { %13166 = vmatmul.mubr.f32.gmra.mrb[36].mxu1 %v16342_v18  ;;  %v4712_v18 = vld [vmem:[#allocation12 + $0x2f0] sm:$0xff] }
 0x2e2   : > { %13168 = vmatprep.mubr.f32.mxu1 %v16343_v61  ;;  %14930 = vmatpush3.bf16.msra.mxu1 %v14927_v8  ;;  %v14943_v8 = vpack.c.bf16 %v4711_v26, %v4710_v13  ;;  %v16349_v61 = vld [vmem:[#allocation2 + $0x160] sm:$0xff]  ;;  %v16352_v13 = vld [vmem:[#allocation2 + $0x198] sm:$0xff]  ;;  %v7763_v26 = vld [vmem:[#allocation11 + $0x88] sm:$0xff] }
 0x2e3   : > { %14932 = vmatprep.subr.bf16.mxu1 %v14931_v57 }
 0x2e5   : > { %13169 = vmatmul.mubr.f32.gmra.mrb[38].mxu1 %v16344_v14  ;;  %v5405_v14 = vld [vmem:[#allocation12 + $0x300] sm:$0xff] }
 0x2e6   : > { %13171 = vmatprep.mubr.f32.mxu1 %v16345_v19  ;;  %14934 = vmatpush3.bf16.msra.mxu1 %v14931_v57  ;;  %v14947_v57 = vpack.c.bf16 %v4713_v33, %v4712_v18  ;;  %v16351_v19 = vld [vmem:[#allocation2 + $0x190] sm:$0xff] }
 0x2e7   : > { %14936 = vmatprep.subr.bf16.mxu1 %v14935_v46 }
 0x2e9   : > { %13172 = vmatmul.mubr.f32.gmra.mrb[40].mxu1 %v16346_v10 }
 0x2ea   : > { %13174 = vmatprep.mubr.f32.mxu1 %v16347_v52  ;;  %14938 = vmatpush3.bf16.msra.mxu1 %v14935_v46  ;;  %v17886_v46 = vpack.c.bf16 %v5406_v63, %v5405_v14  ;;  %v7764_v52 = vld [vmem:[#allocation11 + $0x90] sm:$0xff] }
 0x2eb   : > { %14940 = vmatprep.subr.bf16.mxu1 %v14939_v51 }
 0x2ed   : > { %13175 = vmatmul.mubr.f32.gmra.mrb[42].mxu1 %v16348_v36 }
 0x2ee   : > { %13177 = vmatprep.mubr.f32.mxu1 %v16349_v61  ;;  %14942 = vmatpush3.bf16.msra.mxu1 %v14939_v51  ;;  %v7762_v51 = vld [vmem:[#allocation11 + $0x80] sm:$0xff] }
 0x2ef   : > { %14944 = vmatprep.subr.bf16.mxu1 %v14943_v8  ;;  %v15175_v10 = vpack.c.bf16 %v7763_v26, %v7762_v51  ;;  %v16353_v26 = vld [vmem:[#allocation2 + $0x41] sm:$0xff] }
 0x2f1   : > { %13178 = vmatmul.mubr.f32.gmra.mrb[44].mxu1 %v16350_v35  ;;  %15176 = vmatprep.subr.bf16.mxu0 %v15175_v10 }
 0x2f2   : > { %13180 = vmatprep.mubr.f32.mxu1 %v16351_v19  ;;  %14946 = vmatpush3.bf16.msra.mxu1 %v14943_v8  ;;  %v5407_v19 = vld [vmem:[#allocation12 + $0x310] sm:$0xff] }
 0x2f3   : > { %14948 = vmatprep.subr.bf16.mxu1 %v14947_v57  ;;  %15178 = vmatpush3.bf16.msra.mxu0 %v15175_v10 }
 0x2f5   : > { %13181 = vmatmul.mubr.f32.gmra.mrb[46].mxu1 %v16352_v13 }
 0x2f6   : > { %13183 = vmatprep.mubr.f32.mxu1 %v17837_v5  ;;  %14950 = vmatpush3.bf16.msra.mxu1 %v14947_v57  ;;  %v7765_v5 = vld [vmem:[#allocation11 + $0x98] sm:$0xff] }
 0x2f7   : > { %14984 = vmatprep.subr.bf16.mxu1 %v17886_v46  ;;  %v15179_v8 = vpack.c.bf16 %v7765_v5, %v7764_v52 }
 0x2f9   : > { %13184 = vmatmul.mubr.f32.gmra.mrb[48].mxu1 %v17841_v62  ;;  %15180 = vmatprep.subr.bf16.mxu0 %v15179_v8  ;;  %v7766_v62 = vld [vmem:[#allocation11 + $0xa0] sm:$0xff] }
 0x2fa   : > { %13186 = vmatprep.mubr.f32.mxu1 %v17843_v48  ;;  %15182 = vmatpush3.bf16.msra.mxu0 %v15179_v8  ;;  %v7767_v48 = vld [vmem:[#allocation11 + $0xa8] sm:$0xff] }
 0x2fd   : > { %13187 = vmatmul.mubr.f32.gmra.mrb[50].mxu1 %v17847_v1  ;;  %v15183_v1 = vpack.c.bf16 %v7767_v48, %v7766_v62 }
 0x2fe   : > { %13189 = vmatprep.mubr.f32.mxu1 %v17849_v44 }
 0x2ff   : > { %15184 = vmatprep.subr.bf16.mxu0 %v15183_v1 }
 0x300   : > { %15186 = vmatpush3.bf16.msra.mxu0 %v15183_v1  ;;  %v16354_v1 = vld [vmem:[#allocation2 + $0x49] sm:$0xff] }
 0x301   : > { %13190 = vmatmul.mubr.f32.gmra.mrb[52].mxu1 %v17853_v38  ;;  %v17903_v38 = vld [vmem:[%s18942_s2] ss:$0 sm:$0xff] }
 0x302   : > { %13192 = vmatprep.mubr.f32.mxu1 %v17855_v53 }
 0x305   : > { %13193 = vmatmul.mubr.f32.gmra.mrb[54].mxu1 %v17859_v50 }
 0x306   : > { %13195 = vmatprep.mubr.f32.mxu1 %v17862_v15  ;;  %v17910_v15 = vld [vmem:[%s18943_s3] ss:$0 sm:$0xff] }
 0x309   : > { %13196 = vmatmul.mubr.f32.gmra.mrb[56].mxu1 %v17865_v59 }
 0x30a   : > { %13198 = vmatprep.mubr.f32.mxu1 %v17868_v32 }
 0x30c   : > { %v12921_v44 = vpop.f32.mrb[0].mxu1 }
 0x30d   : > { %v15447_v53 = vadd.f32 %v17726_v34, %v12921_v44  ;;  %v3031_v50 = vpop.f32.mrb[1].mxu1  ;;  %13199 = vmatmul.mubr.f32.gmra.mrb[58].mxu1 %v17871_v0  ;;  %v5409_v44 = vld [vmem:[#allocation12 + $0x320] sm:$0xff] }
 0x30e   : > { %v15448_v59 = vadd.f32 %v17728_v9, %v3031_v50  ;;  %13201 = vmatprep.mubr.f32.mxu1 %v17874_v39 }
 0x30f   : > { %v7162_v32 = vmul.f32 %v15447_v53, %v17903_v38  ;;  %v5410_v53 = vld [vmem:[#allocation12 + $0x328] sm:$0xff] }
 0x310   : > { %v7161_v18 = vmul.f32 %v15448_v59, %v17903_v38  ;;  %v12924_v33 = vpop.f32.mrb[2].mxu1 }
 0x311   : > { %v7201_v34 = vadd.f32 %v17910_v15, %v7162_v32  ;;  %v15449_v36 = vadd.f32 %v17732_v3, %v12924_v33  ;;  %v3041_v0 = vpop.f32.mrb[3].mxu1  ;;  %13202 = vmatmul.mubr.f32.gmra.mrb[60].mxu1 %v17879_v2  ;;  %v5408_v3 = vld [vmem:[#allocation12 + $0x318] sm:$0xff] }
 0x312   : > { %v17920_v61 = vadd.f32 %v17910_v15, %v7161_v18  ;;  %v15450_v57 = vadd.f32 %v17734_v23, %v3041_v0  ;;  %13204 = vmatprep.mubr.f32.mxu1 %v17877_v28  ;;  %v14987_v5 = vpack.c.bf16 %v5408_v3, %v5407_v19  ;;  %v16355_v32 = vld [vmem:[#allocation2 + $0x71] sm:$0xff]  ;;  %v16356_v19 = vld [vmem:[#allocation2 + $0x79] sm:$0xff] }
 0x313   : > { %v7233_v9 = vmax.f32 %v7201_v34, 0.0  ;;  %v7164_v39 = vmul.f32 %v15449_v36, %v17903_v38  ;;  %v7768_v18 = vld [vmem:[#allocation11 + $0xb0] sm:$0xff]  ;;  %v7769_v33 = vld [vmem:[#allocation11 + $0xb8] sm:$0xff] }
 0x314   : > { %v7232_v14 = vmax.f32 %v17920_v61, 0.0  ;;  %v7163_v63 = vmul.f32 %v15450_v57, %v17903_v38  ;;  %v12927_v35 = vpop.f32.mrb[4].mxu1  ;;  %v15187_v36 = vpack.c.bf16 %v7769_v33, %v7768_v18  ;;  %v5414_v33 = vld [vmem:[#allocation12 + $0x348] sm:$0xff]  ;;  %v16439_v61 = vld [vmem:[#allocation2 + $0x258] sm:$0xff] }
 0x315   : > { %7266 = vst [vmem:[#allocation3 + $0x48] sm:$0xff] %v7233_v9  ;;  %v17928_v2 = vadd.f32 %v17910_v15, %v7164_v39  ;;  %v15451_v13 = vadd.f32 %v17740_v56, %v12927_v35  ;;  %v3051_v51 = vpop.f32.mrb[5].mxu1  ;;  %13205 = vmatmul.mubr.f32.gmra.mrb[62].mxu1 %v17883_v31  ;;  %v14991_v39 = vpack.c.bf16 %v5410_v53, %v5409_v44  ;;  %v5413_v44 = vld [vmem:[#allocation12 + $0x340] sm:$0xff] }
 0x316   : > { %7265 = vst [vmem:[#allocation3 + $0x40] sm:$0xff] %v7232_v14  ;;  %v17935_v23 = vadd.f32 %v17910_v15, %v7163_v63  ;;  %v15452_v28 = vadd.f32 %v17742_v55, %v3051_v51  ;;  %13319 = vmatprep.mubr.f32.mxu1 %v16353_v26  ;;  %v5411_v63 = vld [vmem:[#allocation12 + $0x330] sm:$0xff]  ;;  %v5412_v51 = vld [vmem:[#allocation12 + $0x338] sm:$0xff]  ;;  %15188 = vmatprep.subr.bf16.mxu0 %v15187_v36 }
 0x317   : > { %v7235_v10 = vmax.f32 %v17928_v2, 0.0  ;;  %v7166_v52 = vmul.f32 %v15451_v13, %v17903_v38  ;;  %15190 = vmatpush3.bf16.msra.mxu0 %v15187_v36  ;;  %v16443_v2 = vld [vmem:[#allocation2 + $0x2b8] sm:$0xff] }
 0x318   : > { %v7234_v56 = vmax.f32 %v17935_v23, 0.0  ;;  %v7165_v8 = vmul.f32 %v15452_v28, %v17903_v38  ;;  %v12930_v31 = vpop.f32.mrb[6].mxu1 }
 0x319   : > { %7268 = vst [vmem:[#allocation3 + $0x78] sm:$0xff] %v7235_v10  ;;  %v17945_v62 = vadd.f32 %v17910_v15, %v7166_v52  ;;  %v15453_v55 = vadd.f32 %v17748_v17, %v12930_v31  ;;  %v3061_v48 = vpop.f32.mrb[7].mxu1  ;;  %13320 = vmatmul.mubr.f32.vlgmr.msra.gmra.mrb[32].mxu1 %v16354_v1  ;;  %v16357_v52 = vld [vmem:[#allocation2 + $0xa1] sm:$0xff]  ;;  %v14995_v1 = vpack.c.bf16 %v5412_v51, %v5411_v63 }
 0x31a   : > { %7267 = vst [vmem:[#allocation3 + $0x70] sm:$0xff] %v7234_v56  ;;  %v17951_v50 = vadd.f32 %v17910_v15, %v7165_v8  ;;  %v15454_v59 = vadd.f32 %v17750_v45, %v3061_v48  ;;  %13322 = vmatprep.mubr.f32.mxu1 %v16355_v32  ;;  %14986 = vmatpush3.bf16.msra.mxu1 %v17886_v46  ;;  %v16358_v32 = vld [vmem:[#allocation2 + $0xa9] sm:$0xff] }
 0x31b   : > { %v7237_v17 = vmax.f32 %v17945_v62, 0.0  ;;  %v7168_v34 = vmul.f32 %v15453_v55, %v17903_v38  ;;  %14988 = vmatprep.subr.bf16.mxu1 %v14987_v5  ;;  %v7771_v63 = vld [vmem:[#allocation11 + $0xc8] sm:$0xff]  ;;  %v14999_v51 = vpack.c.bf16 %v5414_v33, %v5413_v44 }
 0x31c   : > { %v7236_v0 = vmax.f32 %v17951_v50, 0.0  ;;  %v7167_v57 = vmul.f32 %v15454_v59, %v17903_v38  ;;  %v12933_v9 = vpop.f32.mrb[8].mxu1  ;;  %v16444_v50 = vld [vmem:[#allocation2 + $0x2e0] sm:$0xff]  ;;  %v16445_v62 = vld [vmem:[#allocation2 + $0x2e8] sm:$0xff] }
 0x31d   : > { %7270 = vst [vmem:[#allocation3 + $0xa8] sm:$0xff] %v7237_v17  ;;  %v17962_v45 = vadd.f32 %v17910_v15, %v7168_v34  ;;  %v15455_v46 = vadd.f32 %v17756_v24, %v12933_v9  ;;  %v3071_v35 = vpop.f32.mrb[9].mxu1  ;;  %13323 = vmatmul.mubr.f32.gmra.mrb[34].mxu1 %v16356_v19  ;;  %v7331_v3 = vld [vmem:[#allocation3 + $0x3f] sm:$0xff]  ;;  %v7332_v13 = vld [vmem:[#allocation3 + $0x47] sm:$0xff] }
 0x31e   : > { %7269 = vst [vmem:[#allocation3 + $0xa0] sm:$0xff] %v7236_v0  ;;  %v17968_v28 = vadd.f32 %v17910_v15, %v7167_v57  ;;  %v15456_v26 = vadd.f32 %v17758_v60, %v3071_v35  ;;  %13882 = vmatprep.mubr.f32.mxu0 %v7331_v3  ;;  %13325 = vmatprep.mubr.f32.mxu1 %v16357_v52  ;;  %v16359_v57 = vld [vmem:[#allocation2 + $0xd1] sm:$0xff]  ;;  %v7770_v9 = vld [vmem:[#allocation11 + $0xc0] sm:$0xff] }
 0x31f   : > { %v7239_v24 = vmax.f32 %v17962_v45, 0.0  ;;  %v7170_v8 = vmul.f32 %v15455_v46, %v17903_v38  ;;  %13883 = vmatmul.mubr.f32.gmra.mrb[34].mxu0 %v7332_v13  ;;  %14990 = vmatpush3.bf16.msra.mxu1 %v14987_v5  ;;  %v15191_v35 = vpack.c.bf16 %v7771_v63, %v7770_v9  ;;  %v5417_v9 = vld [vmem:[#allocation12 + $0x360] sm:$0xff]  ;;  %v16447_v45 = vld [vmem:[#allocation2 + $0x318] sm:$0xff] }
 0x320   : > { %v7238_v31 = vmax.f32 %v17968_v28, 0.0  ;;  %v7169_v55 = vmul.f32 %v15456_v26, %v17903_v38  ;;  %v12936_v48 = vpop.f32.mrb[10].mxu1  ;;  %14992 = vmatprep.subr.bf16.mxu1 %v14991_v39  ;;  %v16446_v28 = vld [vmem:[#allocation2 + $0x310] sm:$0xff] }
 0x321   : > { %7272 = vst [vmem:[#allocation3 + $0xd8] sm:$0xff] %v7239_v24  ;;  %v17978_v60 = vadd.f32 %v17910_v15, %v7170_v8  ;;  %v15457_v53 = vadd.f32 %v17764_v30, %v12936_v48  ;;  %v3081_v59 = vpop.f32.mrb[11].mxu1  ;;  %13326 = vmatmul.mubr.f32.gmra.mrb[36].mxu1 %v16358_v32  ;;  %v7333_v5 = vld [vmem:[#allocation3 + $0x6f] sm:$0xff]  ;;  %v7334_v18 = vld [vmem:[#allocation3 + $0x77] sm:$0xff]  ;;  %15192 = vmatprep.subr.bf16.mxu0 %v15191_v35  ;;  %v16361_v32 = vld [vmem:[#allocation2 + $0x101] sm:$0xff] }
 0x322   : > { %7271 = vst [vmem:[#allocation3 + $0xd0] sm:$0xff] %v7238_v31  ;;  %v17984_v34 = vadd.f32 %v17910_v15, %v7169_v55  ;;  %v15458_v36 = vadd.f32 %v17766_v41, %v3081_v59  ;;  %13885 = vmatprep.mubr.f32.mxu0 %v7333_v5  ;;  %13328 = vmatprep.mubr.f32.mxu1 %v16359_v57  ;;  %v5415_v41 = vld [vmem:[#allocation12 + $0x350] sm:$0xff]  ;;  %v16360_v55 = vld [vmem:[#allocation2 + $0xd9] sm:$0xff] }
 0x323   : > { %v18975_v30 = vmax.f32 %v17978_v60, 0.0  ;;  %v7172_v46 = vmul.f32 %v15457_v53, %v17903_v38  ;;  %13886 = vmatmul.mubr.f32.gmra.mrb[36].mxu0 %v7334_v18  ;;  %14994 = vmatpush3.bf16.msra.mxu1 %v14991_v39  ;;  %v5416_v53 = vld [vmem:[#allocation12 + $0x358] sm:$0xff] }
 0x324   : > { %v7240_v19 = vmax.f32 %v17984_v34, 0.0  ;;  %v7171_v3 = vmul.f32 %v15458_v36, %v17903_v38  ;;  %v12939_v13 = vpop.f32.mrb[12].mxu1  ;;  %14996 = vmatprep.subr.bf16.mxu1 %v14995_v1  ;;  %v15003_v57 = vpack.c.bf16 %v5416_v53, %v5415_v41  ;;  %15194 = vmatpush3.bf16.msra.mxu0 %v15191_v35  ;;  %v8500_v34 = vld [vmem:[#allocation11 + $0x180] sm:$0xff] }
 0x325   : > { %7274 = vst [vmem:[#allocation3 + $0x108] sm:$0xff] %v18975_v30  ;;  %v17994_v26 = vadd.f32 %v17910_v15, %v7172_v46  ;;  %v15459_v52 = vadd.f32 %v17772_v40, %v12939_v13  ;;  %v3091_v8 = vpop.f32.mrb[13].mxu1  ;;  %13329 = vmatmul.mubr.f32.gmra.mrb[38].mxu1 %v16360_v55  ;;  %v7335_v39 = vld [vmem:[#allocation3 + $0x9f] sm:$0xff]  ;;  %v7336_v48 = vld [vmem:[#allocation3 + $0xa7] sm:$0xff]  ;;  %v7772_v55 = vld [vmem:[#allocation11 + $0xd0] sm:$0xff] }
 0x326   : > { %7273 = vst [vmem:[#allocation3 + $0x100] sm:$0xff] %v7240_v19  ;;  %v18000_v44 = vadd.f32 %v17910_v15, %v7171_v3  ;;  %v15460_v59 = vadd.f32 %v17774_v49, %v3091_v8  ;;  %13888 = vmatprep.mubr.f32.mxu0 %v7335_v39  ;;  %13331 = vmatprep.mubr.f32.mxu1 %v16361_v32  ;;  %v16362_v3 = vld [vmem:[#allocation2 + $0x109] sm:$0xff]  ;;  %v16363_v8 = vld [vmem:[#allocation2 + $0x131] sm:$0xff] }
 0x327   : > { %v18971_v40 = vmax.f32 %v17994_v26, 0.0  ;;  %v7174_v5 = vmul.f32 %v15459_v52, %v17903_v38  ;;  %13889 = vmatmul.mubr.f32.gmra.mrb[38].mxu0 %v7336_v48  ;;  %14998 = vmatpush3.bf16.msra.mxu1 %v14995_v1  ;;  %v5418_v52 = vld [vmem:[#allocation12 + $0x368] sm:$0xff]  ;;  %v7773_v39 = vld [vmem:[#allocation11 + $0xd8] sm:$0xff] }
 0x328   : > { %v18972_v18 = vmax.f32 %v18000_v44, 0.0  ;;  %v7173_v33 = vmul.f32 %v15460_v59, %v17903_v38  ;;  %v12942_v36 = vpop.f32.mrb[14].mxu1  ;;  %15000 = vmatprep.subr.bf16.mxu1 %v14999_v51  ;;  %v15195_v53 = vpack.c.bf16 %v7773_v39, %v7772_v55  ;;  %v7775_v55 = vld [vmem:[#allocation11 + $0xe8] sm:$0xff]  ;;  %v6832_v30 = vld [vmem:[#allocation12 + $0x478] sm:$0xff] }
 0x329   : > { %7276 = vst [vmem:[#allocation3 + $0x138] sm:$0xff] %v18971_v40  ;;  %v18010_v49 = vadd.f32 %v17910_v15, %v7174_v5  ;;  %v15461_v63 = vadd.f32 %v17779_v37, %v12942_v36  ;;  %v3101_v46 = vpop.f32.mrb[15].mxu1  ;;  %13332 = vmatmul.mubr.f32.gmra.mrb[40].mxu1 %v16362_v3  ;;  %v7337_v1 = vld [vmem:[#allocation3 + $0xcf] sm:$0xff]  ;;  %v7338_v13 = vld [vmem:[#allocation3 + $0xd7] sm:$0xff]  ;;  %v15007_v5 = vpack.c.bf16 %v5418_v52, %v5417_v9  ;;  %v16365_v9 = vld [vmem:[#allocation2 + $0x161] sm:$0xff] }
 0x32a   : > { %7275 = vst [vmem:[#allocation3 + $0x130] sm:$0xff] %v18972_v18  ;;  %v18016_v41 = vadd.f32 %v17910_v15, %v7173_v33  ;;  %v15462_v35 = vadd.f32 %v17782_v42, %v3101_v46  ;;  %13891 = vmatprep.mubr.f32.mxu0 %v7337_v1  ;;  %13334 = vmatprep.mubr.f32.mxu1 %v16363_v8  ;;  %v5419_v33 = vld [vmem:[#allocation12 + $0x370] sm:$0xff]  ;;  %v16364_v36 = vld [vmem:[#allocation2 + $0x139] sm:$0xff] }
 0x32b   : > { %v18967_v37 = vmax.f32 %v18010_v49, 0.0  ;;  %v7176_v48 = vmul.f32 %v15461_v63, %v17903_v38  ;;  %13892 = vmatmul.mubr.f32.gmra.mrb[40].mxu0 %v7338_v13  ;;  %15002 = vmatpush3.bf16.msra.mxu1 %v14999_v51  ;;  %v5420_v3 = vld [vmem:[#allocation12 + $0x378] sm:$0xff]  ;;  %v7774_v8 = vld [vmem:[#allocation11 + $0xe0] sm:$0xff]  ;;  %v16366_v39 = vld [vmem:[#allocation2 + $0x169] sm:$0xff] }
 0x32c   : > { %v18968_v59 = vmax.f32 %v18016_v41, 0.0  ;;  %v7175_v32 = vmul.f32 %v15462_v35, %v17903_v38  ;;  %15004 = vmatprep.subr.bf16.mxu1 %v15003_v57  ;;  %15196 = vmatprep.subr.bf16.mxu0 %v15195_v53  ;;  %v15011_v52 = vpack.c.bf16 %v5420_v3, %v5419_v33  ;;  %v6111_v35 = vld [vmem:[#allocation12 + $0x380] sm:$0xff]  ;;  %v7777_v33 = vld [vmem:[#allocation11 + $0xf8] sm:$0xff] }
 0x32d   : > { %7278 = vst [vmem:[#allocation3 + $0x168] sm:$0xff] %v18967_v37  ;;  %v18026_v42 = vadd.f32 %v17910_v15, %v7176_v48  ;;  %13335 = vmatmul.mubr.f32.gmra.mrb[42].mxu1 %v16364_v36  ;;  %v7339_v46 = vld [vmem:[#allocation3 + $0xff] sm:$0xff]  ;;  %v7340_v63 = vld [vmem:[#allocation3 + $0x107] sm:$0xff]  ;;  %15198 = vmatpush3.bf16.msra.mxu0 %v15195_v53  ;;  %v7776_v53 = vld [vmem:[#allocation11 + $0xf0] sm:$0xff] }
 0x32e   : > { %7277 = vst [vmem:[#allocation3 + $0x160] sm:$0xff] %v18968_v59  ;;  %v18031_v51 = vadd.f32 %v17910_v15, %v7175_v32  ;;  %13894 = vmatprep.mubr.f32.mxu0 %v7339_v46  ;;  %13337 = vmatprep.mubr.f32.mxu1 %v16365_v9  ;;  %v6112_v36 = vld [vmem:[#allocation12 + $0x388] sm:$0xff]  ;;  %v15199_v46 = vpack.c.bf16 %v7775_v55, %v7774_v8  ;;  %v16368_v9 = vld [vmem:[#allocation2 + $0x199] sm:$0xff]  ;;  %v6827_v37 = vld [vmem:[#allocation12 + $0x450] sm:$0xff] }
 0x32f   : > { %v18957_v1 = vmax.f32 %v18026_v42, 0.0  ;;  %13895 = vmatmul.mubr.f32.gmra.mrb[42].mxu0 %v7340_v63  ;;  %15006 = vmatpush3.bf16.msra.mxu1 %v15003_v57  ;;  %v16367_v57 = vld [vmem:[#allocation2 + $0x191] sm:$0xff]  ;;  %v18039_v63 = vpack.c.bf16 %v6112_v36, %v6111_v35  ;;  %v15203_v3 = vpack.c.bf16 %v7777_v33, %v7776_v53  ;;  %v16369_v8 = vld [vmem:[#allocation2 + $0x1c1] sm:$0xff]  ;;  %v16376_v33 = vld [vmem:[#allocation2 + $0x259] sm:$0xff] }
 0x330   : > { %v18964_v13 = vmax.f32 %v18031_v51, 0.0  ;;  %15008 = vmatprep.subr.bf16.mxu1 %v15007_v5  ;;  %15200 = vmatprep.subr.bf16.mxu0 %v15199_v46  ;;  %v8132_v36 = vld [vmem:[#allocation11 + $0x108] sm:$0xff]  ;;  %v16375_v53 = vld [vmem:[#allocation2 + $0x251] sm:$0xff]  ;;  %v6829_v40 = vld [vmem:[#allocation12 + $0x460] sm:$0xff] }
 0x331   : > { %7280 = vst [vmem:[#allocation3 + $0x198] sm:$0xff] %v18957_v1  ;;  %13338 = vmatmul.mubr.f32.gmra.mrb[44].mxu1 %v16366_v39  ;;  %v7341_v48 = vld [vmem:[#allocation3 + $0x12f] sm:$0xff]  ;;  %v7342_v32 = vld [vmem:[#allocation3 + $0x137] sm:$0xff]  ;;  %15202 = vmatpush3.bf16.msra.mxu0 %v15199_v46 }
 0x332   : > { %7279 = vst [vmem:[#allocation3 + $0x190] sm:$0xff] %v18964_v13  ;;  %13897 = vmatprep.mubr.f32.mxu0 %v7341_v48  ;;  %13340 = vmatprep.mubr.f32.mxu1 %v16367_v57  ;;  %v16371_v48 = vld [vmem:[#allocation2 + $0x1f1] sm:$0xff]  ;;  %v16372_v57 = vld [vmem:[#allocation2 + $0x1f9] sm:$0xff] }
 0x333   : > { %13898 = vmatmul.mubr.f32.gmra.mrb[44].mxu0 %v7342_v32  ;;  %15010 = vmatpush3.bf16.msra.mxu1 %v15007_v5  ;;  %v16370_v5 = vld [vmem:[#allocation2 + $0x1c9] sm:$0xff]  ;;  %v8131_v32 = vld [vmem:[#allocation11 + $0x100] sm:$0xff] }
 0x334   : > { %15012 = vmatprep.subr.bf16.mxu1 %v15011_v52  ;;  %15204 = vmatprep.subr.bf16.mxu0 %v15203_v3  ;;  %v18042_v46 = vpack.c.bf16 %v8132_v36, %v8131_v32  ;;  %v6114_v32 = vld [vmem:[#allocation12 + $0x398] sm:$0xff] }
 0x335   : > { %13341 = vmatmul.mubr.f32.gmra.mrb[46].mxu1 %v16368_v9  ;;  %v7343_v39 = vld [vmem:[#allocation3 + $0x15f] sm:$0xff]  ;;  %v7344_v1 = vld [vmem:[#allocation3 + $0x167] sm:$0xff]  ;;  %15206 = vmatpush3.bf16.msra.mxu0 %v15203_v3 }
 0x336   : > { %13900 = vmatprep.mubr.f32.mxu0 %v7343_v39  ;;  %13343 = vmatprep.mubr.f32.mxu1 %v16369_v8  ;;  %v16377_v3 = vld [vmem:[#allocation2 + $0x281] sm:$0xff]  ;;  %v16378_v9 = vld [vmem:[#allocation2 + $0x289] sm:$0xff]  ;;  %v16379_v39 = vld [vmem:[#allocation2 + $0x2b1] sm:$0xff] }
 0x337   : > { %13901 = vmatmul.mubr.f32.gmra.mrb[46].mxu0 %v7344_v1  ;;  %15014 = vmatpush3.bf16.msra.mxu1 %v15011_v52  ;;  %v16373_v1 = vld [vmem:[#allocation2 + $0x221] sm:$0xff]  ;;  %v16374_v52 = vld [vmem:[#allocation2 + $0x229] sm:$0xff]  ;;  %v16380_v8 = vld [vmem:[#allocation2 + $0x2b9] sm:$0xff] }
 0x338   : > { %15048 = vmatprep.subr.bf16.mxu1 %v18039_v63  ;;  %15208 = vmatprep.subr.bf16.mxu0 %v18042_v46  ;;  %v16384_v36 = vld [vmem:[#allocation2 + $0x319] sm:$0xff] }
 0x339   : > { %13344 = vmatmul.mubr.f32.gmra.mrb[48].mxu1 %v16370_v5  ;;  %v7345_v55 = vld [vmem:[#allocation3 + $0x18f] sm:$0xff]  ;;  %v7346_v35 = vld [vmem:[#allocation3 + $0x197] sm:$0xff]  ;;  %v16381_v5 = vld [vmem:[#allocation2 + $0x2e1] sm:$0xff] }
 0x33a   : > { %13903 = vmatprep.mubr.f32.mxu0 %v7345_v55  ;;  %13346 = vmatprep.mubr.f32.mxu1 %v16371_v48  ;;  %v16382_v55 = vld [vmem:[#allocation2 + $0x2e9] sm:$0xff] }
 0x33b   : > { %13904 = vmatmul.mubr.f32.gmra.mrb[48].mxu0 %v7346_v35  ;;  %v16383_v35 = vld [vmem:[#allocation2 + $0x311] sm:$0xff] }
 0x33c   : > { %v6113_v48 = vld [vmem:[#allocation12 + $0x390] sm:$0xff] }
 0x33d   : > { %13347 = vmatmul.mubr.f32.gmra.mrb[50].mxu1 %v16372_v57  ;;  %v16385_v57 = vld [vmem:[#allocation2 + $0x6f] sm:$0xff] }
 0x33e   : > { %13349 = vmatprep.mubr.f32.mxu1 %v16373_v1  ;;  %v15051_v1 = vpack.c.bf16 %v6114_v32, %v6113_v48  ;;  %v6119_v48 = vld [vmem:[#allocation12 + $0x3c0] sm:$0xff]  ;;  %v6120_v32 = vld [vmem:[#allocation12 + $0x3c8] sm:$0xff] }
 0x341   : > { %13350 = vmatmul.mubr.f32.gmra.mrb[52].mxu1 %v16374_v52  ;;  %v6115_v52 = vld [vmem:[#allocation12 + $0x3a0] sm:$0xff] }
 0x342   : > { %13352 = vmatprep.mubr.f32.mxu1 %v16375_v53  ;;  %v6116_v53 = vld [vmem:[#allocation12 + $0x3a8] sm:$0xff] }
 0x345   : > { %13353 = vmatmul.mubr.f32.gmra.mrb[54].mxu1 %v16376_v33  ;;  %v16386_v33 = vld [vmem:[#allocation2 + $0x77] sm:$0xff] }
 0x346   : > { %13355 = vmatprep.mubr.f32.mxu1 %v16377_v3  ;;  %v16387_v3 = vld [vmem:[#allocation2 + $0x9f] sm:$0xff] }
 0x349   : > { %13356 = vmatmul.mubr.f32.gmra.mrb[56].mxu1 %v16378_v9  ;;  %v15055_v9 = vpack.c.bf16 %v6116_v53, %v6115_v52  ;;  %v6122_v52 = vld [vmem:[#allocation12 + $0x3d8] sm:$0xff]  ;;  %v16392_v53 = vld [vmem:[#allocation2 + $0x107] sm:$0xff] }
 0x34a   : > { %13358 = vmatprep.mubr.f32.mxu1 %v16379_v39  ;;  %v6117_v39 = vld [vmem:[#allocation12 + $0x3b0] sm:$0xff] }
 0x34d   : > { %13359 = vmatmul.mubr.f32.gmra.mrb[58].mxu1 %v16380_v8  ;;  %v6118_v8 = vld [vmem:[#allocation12 + $0x3b8] sm:$0xff] }
 0x34e   : > { %13361 = vmatprep.mubr.f32.mxu1 %v16381_v5  ;;  %v16388_v5 = vld [vmem:[#allocation2 + $0xa7] sm:$0xff] }
 0x351   : > { %13362 = vmatmul.mubr.f32.gmra.mrb[60].mxu1 %v16382_v55  ;;  %v16389_v55 = vld [vmem:[#allocation2 + $0xcf] sm:$0xff] }
 0x352   : > { %13364 = vmatprep.mubr.f32.mxu1 %v16383_v35  ;;  %v15059_v35 = vpack.c.bf16 %v6118_v8, %v6117_v39  ;;  %v6124_v39 = vld [vmem:[#allocation12 + $0x3e8] sm:$0xff]  ;;  %v16394_v8 = vld [vmem:[#allocation2 + $0x137] sm:$0xff] }
 0x355   : > { %13365 = vmatmul.mubr.f32.gmra.mrb[62].mxu1 %v16384_v36  ;;  %v16390_v36 = vld [vmem:[#allocation2 + $0xd7] sm:$0xff] }
 0x356   : > { %13479 = vmatprep.mubr.f32.mxu1 %v16385_v57  ;;  %v16391_v57 = vld [vmem:[#allocation2 + $0xff] sm:$0xff] }
 0x359   : > { %13480 = vmatmul.mubr.f32.vlgmr.msra.gmra.mrb[32].mxu1 %v16386_v33  ;;  %v6121_v33 = vld [vmem:[#allocation12 + $0x3d0] sm:$0xff] }
 0x35a   : > { %13482 = vmatprep.mubr.f32.mxu1 %v16387_v3  ;;  %15050 = vmatpush3.bf16.msra.mxu1 %v18039_v63  ;;  %v15063_v63 = vpack.c.bf16 %v6120_v32, %v6119_v48  ;;  %v16393_v3 = vld [vmem:[#allocation2 + $0x12f] sm:$0xff]  ;;  %v6126_v48 = vld [vmem:[#allocation12 + $0x3f8] sm:$0xff]  ;;  %v16396_v32 = vld [vmem:[#allocation2 + $0x167] sm:$0xff] }
 0x35b   : > { %15052 = vmatprep.subr.bf16.mxu1 %v15051_v1 }
 0x35d   : > { %13483 = vmatmul.mubr.f32.gmra.mrb[34].mxu1 %v16388_v5  ;;  %v6123_v5 = vld [vmem:[#allocation12 + $0x3e0] sm:$0xff] }
 0x35e   : > { %13485 = vmatprep.mubr.f32.mxu1 %v16389_v55  ;;  %15054 = vmatpush3.bf16.msra.mxu1 %v15051_v1  ;;  %v15067_v1 = vpack.c.bf16 %v6122_v52, %v6121_v33  ;;  %v16395_v55 = vld [vmem:[#allocation2 + $0x15f] sm:$0xff]  ;;  %v6818_v33 = vld [vmem:[#allocation12 + $0x408] sm:$0xff]  ;;  %v16398_v52 = vld [vmem:[#allocation2 + $0x197] sm:$0xff] }
 0x35f   : > { %15056 = vmatprep.subr.bf16.mxu1 %v15055_v9 }
 0x361   : > { %13486 = vmatmul.mubr.f32.gmra.mrb[36].mxu1 %v16390_v36  ;;  %v6125_v36 = vld [vmem:[#allocation12 + $0x3f0] sm:$0xff] }
 0x362   : > { %13488 = vmatprep.mubr.f32.mxu1 %v16391_v57  ;;  %15058 = vmatpush3.bf16.msra.mxu1 %v15055_v9  ;;  %v15071_v9 = vpack.c.bf16 %v6124_v39, %v6123_v5  ;;  %v16397_v57 = vld [vmem:[#allocation2 + $0x18f] sm:$0xff]  ;;  %v16400_v5 = vld [vmem:[#allocation2 + $0x1c7] sm:$0xff] }
 0x363   : > { %15060 = vmatprep.subr.bf16.mxu1 %v15059_v35  ;;  %v16401_v39 = vld [vmem:[#allocation2 + $0x1ef] sm:$0xff] }
 0x365   : > { %13489 = vmatmul.mubr.f32.gmra.mrb[38].mxu1 %v16392_v53  ;;  %v6817_v53 = vld [vmem:[#allocation12 + $0x400] sm:$0xff] }
 0x366   : > { %13491 = vmatprep.mubr.f32.mxu1 %v16393_v3  ;;  %15062 = vmatpush3.bf16.msra.mxu1 %v15059_v35  ;;  %v15075_v35 = vpack.c.bf16 %v6126_v48, %v6125_v36  ;;  %v16399_v3 = vld [vmem:[#allocation2 + $0x1bf] sm:$0xff]  ;;  %v16405_v36 = vld [vmem:[#allocation2 + $0x24f] sm:$0xff]  ;;  %v16406_v48 = vld [vmem:[#allocation2 + $0x257] sm:$0xff] }
 0x367   : > { %15064 = vmatprep.subr.bf16.mxu1 %v15063_v63 }
 0x369   : > { %13492 = vmatmul.mubr.f32.gmra.mrb[40].mxu1 %v16394_v8  ;;  %v16403_v8 = vld [vmem:[#allocation2 + $0x21f] sm:$0xff] }
 0x36a   : > { %13494 = vmatprep.mubr.f32.mxu1 %v16395_v55  ;;  %15066 = vmatpush3.bf16.msra.mxu1 %v15063_v63  ;;  %v18046_v63 = vpack.c.bf16 %v6818_v33, %v6817_v53  ;;  %v16404_v55 = vld [vmem:[#allocation2 + $0x227] sm:$0xff]  ;;  %v16410_v53 = vld [vmem:[#allocation2 + $0x2b7] sm:$0xff] }
 0x36b   : > { %15068 = vmatprep.subr.bf16.mxu1 %v15067_v1 }
 0x36d   : > { %13495 = vmatmul.mubr.f32.gmra.mrb[42].mxu1 %v16396_v32  ;;  %v16408_v32 = vld [vmem:[#allocation2 + $0x287] sm:$0xff] }
 0x36e   : > { %13497 = vmatprep.mubr.f32.mxu1 %v16397_v57  ;;  %15070 = vmatpush3.bf16.msra.mxu1 %v15067_v1  ;;  %v16402_v1 = vld [vmem:[#allocation2 + $0x1f7] sm:$0xff]  ;;  %v16409_v57 = vld [vmem:[#allocation2 + $0x2af] sm:$0xff] }
 0x36f   : > { %15072 = vmatprep.subr.bf16.mxu1 %v15071_v9 }
 0x371   : > { %13498 = vmatmul.mubr.f32.gmra.mrb[44].mxu1 %v16398_v52 }
 0x372   : > { %13500 = vmatprep.mubr.f32.mxu1 %v16399_v3  ;;  %15074 = vmatpush3.bf16.msra.mxu1 %v15071_v9  ;;  %v16407_v9 = vld [vmem:[#allocation2 + $0x27f] sm:$0xff] }
 0x373   : > { %15076 = vmatprep.subr.bf16.mxu1 %v15075_v35 }
 0x375   : > { %13501 = vmatmul.mubr.f32.gmra.mrb[46].mxu1 %v16400_v5  ;;  %v16412_v5 = vld [vmem:[#allocation2 + $0x2e7] sm:$0xff] }
 0x376   : > { %13503 = vmatprep.mubr.f32.mxu1 %v16401_v39  ;;  %15078 = vmatpush3.bf16.msra.mxu1 %v15075_v35  ;;  %v16411_v35 = vld [vmem:[#allocation2 + $0x2df] sm:$0xff] }
 0x377   : > { %15112 = vmatprep.subr.bf16.mxu1 %v18046_v63 }
 0x379   : > { %13504 = vmatmul.mubr.f32.gmra.mrb[48].mxu1 %v16402_v1  ;;  %v16413_v1 = vld [vmem:[#allocation2 + $0x30f] sm:$0xff] }
 0x37a   : > { %13506 = vmatprep.mubr.f32.mxu1 %v16403_v8 }
 0x37d   : > { %13507 = vmatmul.mubr.f32.gmra.mrb[50].mxu1 %v16404_v55 }
 0x37e   : > { %13509 = vmatprep.mubr.f32.mxu1 %v16405_v36 }
 0x381   : > { %13510 = vmatmul.mubr.f32.gmra.mrb[52].mxu1 %v16406_v48 }
 0x382   : > { %13512 = vmatprep.mubr.f32.mxu1 %v16407_v9 }
 0x385   : > { %13513 = vmatmul.mubr.f32.gmra.mrb[54].mxu1 %v16408_v32 }
 0x386   : > { %13515 = vmatprep.mubr.f32.mxu1 %v16409_v57  ;;  %v16414_v57 = vld [vmem:[#allocation2 + $0x317] sm:$0xff] }
 0x389   : > { %13516 = vmatmul.mubr.f32.gmra.mrb[56].mxu1 %v16410_v53  ;;  %v16415_v53 = vld [vmem:[#allocation2 + $0x33f] sm:$0xff] }
 0x38a   : > { %13518 = vmatprep.mubr.f32.mxu1 %v16411_v35 }
 0x38c   : > { %v13105_v33 = vpop.f32.mrb[16].mxu1 }
 0x38d   : > { %v15463_v52 = vadd.f32 %v17788_v43, %v13105_v33  ;;  %v3817_v3 = vpop.f32.mrb[17].mxu1  ;;  %13519 = vmatmul.mubr.f32.gmra.mrb[58].mxu1 %v16412_v5 }
 0x38e   : > { %v15464_v39 = vadd.f32 %v17790_v7, %v3817_v3  ;;  %13521 = vmatprep.mubr.f32.mxu1 %v16413_v1 }
 0x38f   : > { %v7178_v8 = vmul.f32 %v15463_v52, %v17903_v38 }
 0x390   : > { %v7177_v55 = vmul.f32 %v15464_v39, %v17903_v38  ;;  %v13108_v36 = vpop.f32.mrb[18].mxu1  ;;  %v6820_v39 = vld [vmem:[#allocation12 + $0x418] sm:$0xff] }
 0x391   : > { %v18054_v48 = vadd.f32 %v17910_v15, %v7178_v8  ;;  %v15465_v9 = vadd.f32 %v17795_v4, %v13108_v36  ;;  %v3827_v32 = vpop.f32.mrb[19].mxu1  ;;  %13522 = vmatmul.mubr.f32.gmra.mrb[60].mxu1 %v16414_v57  ;;  %v6819_v4 = vld [vmem:[#allocation12 + $0x410] sm:$0xff] }
 0x392   : > { %v18058_v43 = vadd.f32 %v17910_v15, %v7177_v55  ;;  %v15466_v7 = vadd.f32 %v17797_v20, %v3827_v32  ;;  %13524 = vmatprep.mubr.f32.mxu1 %v16415_v53  ;;  %v16416_v55 = vld [vmem:[#allocation2 + $0x347] sm:$0xff]  ;;  %v16417_v32 = vld [vmem:[#allocation2 + $0x70] sm:$0xff]  ;;  %v15115_v53 = vpack.c.bf16 %v6820_v39, %v6819_v4 }
 0x393   : > { %v18958_v35 = vmax.f32 %v18054_v48, 0.0  ;;  %v7180_v33 = vmul.f32 %v15465_v9, %v17903_v38 }
 0x394   : > { %v18961_v52 = vmax.f32 %v18058_v43, 0.0  ;;  %v7179_v3 = vmul.f32 %v15466_v7, %v17903_v38  ;;  %v13111_v5 = vpop.f32.mrb[20].mxu1 }
 0x395   : > { %7282 = vst [vmem:[#allocation3 + $0x1c8] sm:$0xff] %v18958_v35  ;;  %v18068_v1 = vadd.f32 %v17910_v15, %v7180_v33  ;;  %v15467_v20 = vadd.f32 %v17801_v58, %v13111_v5  ;;  %v3837_v8 = vpop.f32.mrb[21].mxu1  ;;  %13525 = vmatmul.mubr.f32.gmra.mrb[62].mxu1 %v16416_v55  ;;  %v16418_v55 = vld [vmem:[#allocation2 + $0x78] sm:$0xff]  ;;  %v6822_v35 = vld [vmem:[#allocation12 + $0x428] sm:$0xff] }
 0x396   : > { %7281 = vst [vmem:[#allocation3 + $0x1c0] sm:$0xff] %v18961_v52  ;;  %v18074_v36 = vadd.f32 %v17910_v15, %v7179_v3  ;;  %v15468_v9 = vadd.f32 %v17803_v21, %v3837_v8  ;;  %13639 = vmatprep.mubr.f32.mxu1 %v16417_v32  ;;  %v6821_v32 = vld [vmem:[#allocation12 + $0x420] sm:$0xff]  ;;  %v6824_v52 = vld [vmem:[#allocation12 + $0x438] sm:$0xff] }
 0x397   : > { %v18959_v57 = vmax.f32 %v18068_v1, 0.0  ;;  %v7182_v7 = vmul.f32 %v15467_v20, %v17903_v38  ;;  %v16419_v20 = vld [vmem:[#allocation2 + $0xa0] sm:$0xff] }
 0x398   : > { %v18960_v58 = vmax.f32 %v18074_v36, 0.0  ;;  %v7181_v33 = vmul.f32 %v15468_v9, %v17903_v38  ;;  %v13114_v5 = vpop.f32.mrb[22].mxu1 }
 0x399   : > { %7284 = vst [vmem:[#allocation3 + $0x1f8] sm:$0xff] %v18959_v57  ;;  %v18084_v3 = vadd.f32 %v17910_v15, %v7182_v7  ;;  %v15469_v21 = vadd.f32 %v17807_v22, %v13114_v5  ;;  %v3847_v8 = vpop.f32.mrb[23].mxu1  ;;  %13640 = vmatmul.mubr.f32.vlgmr.msra.gmra.mrb[32].mxu1 %v16418_v55  ;;  %v15119_v57 = vpack.c.bf16 %v6822_v35, %v6821_v32 }
 0x39a   : > { %7283 = vst [vmem:[#allocation3 + $0x1f0] sm:$0xff] %v18960_v58  ;;  %v18090_v4 = vadd.f32 %v17910_v15, %v7181_v33  ;;  %v15470_v39 = vadd.f32 %v17809_v16, %v3847_v8  ;;  %13642 = vmatprep.mubr.f32.mxu1 %v16419_v20  ;;  %15114 = vmatpush3.bf16.msra.mxu1 %v18046_v63  ;;  %v6823_v58 = vld [vmem:[#allocation12 + $0x430] sm:$0xff]  ;;  %v16420_v8 = vld [vmem:[#allocation2 + $0xa8] sm:$0xff] }
 0x39b   : > { %v18962_v9 = vmax.f32 %v18084_v3, 0.0  ;;  %v7184_v22 = vmul.f32 %v15469_v21, %v17903_v38  ;;  %15116 = vmatprep.subr.bf16.mxu1 %v15115_v53 }
 0x39c   : > { %v18963_v7 = vmax.f32 %v18090_v4, 0.0  ;;  %v7183_v5 = vmul.f32 %v15470_v39, %v17903_v38  ;;  %v13117_v55 = vpop.f32.mrb[24].mxu1  ;;  %v16421_v39 = vld [vmem:[#allocation2 + $0xd0] sm:$0xff] }
 0x39d   : > { %7286 = vst [vmem:[#allocation3 + $0x228] sm:$0xff] %v18962_v9  ;;  %v18101_v16 = vadd.f32 %v17910_v15, %v7184_v22  ;;  %v15471_v63 = vadd.f32 %v17813_v6, %v13117_v55  ;;  %v3857_v33 = vpop.f32.mrb[25].mxu1  ;;  %13643 = vmatmul.mubr.f32.gmra.mrb[34].mxu1 %v16420_v8  ;;  %v18104_v21 = vld [vmem:[#allocation3 + $0x1bf] sm:$0xff]  ;;  %v18106_v20 = vld [vmem:[#allocation3 + $0x1c7] sm:$0xff] }
 0x39e   : > { %7285 = vst [vmem:[#allocation3 + $0x220] sm:$0xff] %v18963_v7  ;;  %v18111_v35 = vadd.f32 %v17910_v15, %v7183_v5  ;;  %v15472_v32 = vadd.f32 %v17815_v25, %v3857_v33  ;;  %13906 = vmatprep.mubr.f32.mxu0 %v18104_v21  ;;  %13645 = vmatprep.mubr.f32.mxu1 %v16421_v39  ;;  %v6825_v7 = vld [vmem:[#allocation12 + $0x440] sm:$0xff]  ;;  %v16422_v39 = vld [vmem:[#allocation2 + $0xd8] sm:$0xff] }
 0x39f   : > { %v18965_v6 = vmax.f32 %v18101_v16, 0.0  ;;  %v7186_v22 = vmul.f32 %v15471_v63, %v17903_v38  ;;  %13907 = vmatmul.mubr.f32.gmra.mrb[50].mxu0 %v18106_v20  ;;  %15118 = vmatpush3.bf16.msra.mxu1 %v15115_v53  ;;  %v15123_v5 = vpack.c.bf16 %v6824_v52, %v6823_v58 }
 0x3a0   : > { %v18966_v55 = vmax.f32 %v18111_v35, 0.0  ;;  %v7185_v8 = vmul.f32 %v15472_v32, %v17903_v38  ;;  %v13120_v9 = vpop.f32.mrb[26].mxu1  ;;  %15120 = vmatprep.subr.bf16.mxu1 %v15119_v57  ;;  %v6826_v32 = vld [vmem:[#allocation12 + $0x448] sm:$0xff] }
 0x3a1   : > { %7288 = vst [vmem:[#allocation3 + $0x258] sm:$0xff] %v18965_v6  ;;  %v18123_v25 = vadd.f32 %v17910_v15, %v7186_v22  ;;  %v15473_v33 = vadd.f32 %v17819_v47, %v13120_v9  ;;  %v3867_v63 = vpop.f32.mrb[27].mxu1  ;;  %13646 = vmatmul.mubr.f32.gmra.mrb[36].mxu1 %v16422_v39  ;;  %v18126_v53 = vld [vmem:[#allocation3 + $0x1ef] sm:$0xff]  ;;  %v18128_v13 = vld [vmem:[#allocation3 + $0x1f7] sm:$0xff]  ;;  %v16423_v22 = vld [vmem:[#allocation2 + $0x100] sm:$0xff] }
 0x3a2   : > { %7287 = vst [vmem:[#allocation3 + $0x250] sm:$0xff] %v18966_v55  ;;  %v18133_v52 = vadd.f32 %v17910_v15, %v7185_v8  ;;  %v15474_v58 = vadd.f32 %v17821_v11, %v3867_v63  ;;  %13909 = vmatprep.mubr.f32.mxu0 %v18126_v53  ;;  %13648 = vmatprep.mubr.f32.mxu1 %v16423_v22  ;;  %v16424_v22 = vld [vmem:[#allocation2 + $0x108] sm:$0xff] }
 0x3a3   : > { %v18969_v47 = vmax.f32 %v18123_v25, 0.0  ;;  %v7188_v9 = vmul.f32 %v15473_v33, %v17903_v38  ;;  %13910 = vmatmul.mubr.f32.gmra.mrb[52].mxu0 %v18128_v13  ;;  %15122 = vmatpush3.bf16.msra.mxu1 %v15119_v57  ;;  %v15127_v8 = vpack.c.bf16 %v6826_v32, %v6825_v7 }
 0x3a4   : > { %v18970_v39 = vmax.f32 %v18133_v52, 0.0  ;;  %v7187_v6 = vmul.f32 %v15474_v58, %v17903_v38  ;;  %v13123_v55 = vpop.f32.mrb[28].mxu1  ;;  %15124 = vmatprep.subr.bf16.mxu1 %v15123_v5  ;;  %v6828_v58 = vld [vmem:[#allocation12 + $0x458] sm:$0xff] }
 0x3a5   : > { %7290 = vst [vmem:[#allocation3 + $0x288] sm:$0xff] %v18969_v47  ;;  %v18145_v11 = vadd.f32 %v17910_v15, %v7188_v9  ;;  %v15475_v63 = vadd.f32 %v17825_v54, %v13123_v55  ;;  %v3877_v33 = vpop.f32.mrb[29].mxu1  ;;  %13649 = vmatmul.mubr.f32.gmra.mrb[38].mxu1 %v16424_v22  ;;  %v18148_v57 = vld [vmem:[#allocation3 + $0x21f] sm:$0xff]  ;;  %v18150_v59 = vld [vmem:[#allocation3 + $0x227] sm:$0xff]  ;;  %v16425_v9 = vld [vmem:[#allocation2 + $0x130] sm:$0xff] }
 0x3a6   : > { %7289 = vst [vmem:[#allocation3 + $0x280] sm:$0xff] %v18970_v39  ;;  %v18155_v7 = vadd.f32 %v17910_v15, %v7187_v6  ;;  %v15476_v32 = vadd.f32 %v17827_v29, %v3877_v33  ;;  %13912 = vmatprep.mubr.f32.mxu0 %v18148_v57  ;;  %13651 = vmatprep.mubr.f32.mxu1 %v16425_v9  ;;  %v16426_v9 = vld [vmem:[#allocation2 + $0x138] sm:$0xff] }
 0x3a7   : > { %v18973_v54 = vmax.f32 %v18145_v11, 0.0  ;;  %v7190_v55 = vmul.f32 %v15475_v63, %v17903_v38  ;;  %13913 = vmatmul.mubr.f32.gmra.mrb[54].mxu0 %v18150_v59  ;;  %15126 = vmatpush3.bf16.msra.mxu1 %v15123_v5  ;;  %v15131_v6 = vpack.c.bf16 %v6828_v58, %v6827_v37 }
 0x3a8   : > { %v18974_v22 = vmax.f32 %v18155_v7, 0.0  ;;  %v7189_v47 = vmul.f32 %v15476_v32, %v17903_v38  ;;  %v13126_v39 = vpop.f32.mrb[30].mxu1  ;;  %15128 = vmatprep.subr.bf16.mxu1 %v15127_v8  ;;  %v6830_v32 = vld [vmem:[#allocation12 + $0x468] sm:$0xff] }
 0x3a9   : > { %7292 = vst [vmem:[#allocation3 + $0x2b8] sm:$0xff] %v18973_v54  ;;  %v18167_v29 = vadd.f32 %v17910_v15, %v7190_v55  ;;  %v15477_v33 = vadd.f32 %v17831_v12, %v13126_v39  ;;  %v3887_v63 = vpop.f32.mrb[31].mxu1  ;;  %13652 = vmatmul.mubr.f32.gmra.mrb[40].mxu1 %v16426_v9  ;;  %v18170_v5 = vld [vmem:[#allocation3 + $0x24f] sm:$0xff]  ;;  %v18172_v18 = vld [vmem:[#allocation3 + $0x257] sm:$0xff]  ;;  %v16427_v55 = vld [vmem:[#allocation2 + $0x160] sm:$0xff] }
 0x3aa   : > { %7291 = vst [vmem:[#allocation3 + $0x2b0] sm:$0xff] %v18974_v22  ;;  %v18177_v37 = vadd.f32 %v17910_v15, %v7189_v47  ;;  %v15478_v58 = vadd.f32 %v17833_v27, %v3887_v63  ;;  %13915 = vmatprep.mubr.f32.mxu0 %v18170_v5  ;;  %13654 = vmatprep.mubr.f32.mxu1 %v16427_v55  ;;  %v6831_v22 = vld [vmem:[#allocation12 + $0x470] sm:$0xff]  ;;  %v16428_v63 = vld [vmem:[#allocation2 + $0x168] sm:$0xff] }
 0x3ab   : > { %v18976_v12 = vmax.f32 %v18167_v29, 0.0  ;;  %v7192_v39 = vmul.f32 %v15477_v33, %v17903_v38  ;;  %13916 = vmatmul.mubr.f32.gmra.mrb[56].mxu0 %v18172_v18  ;;  %15130 = vmatpush3.bf16.msra.mxu1 %v15127_v8  ;;  %v15135_v47 = vpack.c.bf16 %v6830_v32, %v6829_v40  ;;  %v16429_v40 = vld [vmem:[#allocation2 + $0x190] sm:$0xff] }
 0x3ac   : > { %v18977_v9 = vmax.f32 %v18177_v37, 0.0  ;;  %v7191_v54 = vmul.f32 %v15478_v58, %v17903_v38  ;;  %15132 = vmatprep.subr.bf16.mxu1 %v15131_v6  ;;  %v15139_v58 = vpack.c.bf16 %v6832_v30, %v6831_v22  ;;  %v16433_v22 = vld [vmem:[#allocation2 + $0x1f0] sm:$0xff] }
 0x3ad   : > { %7294 = vst [vmem:[#allocation3 + $0x2e8] sm:$0xff] %v18976_v12  ;;  %v7231_v27 = vadd.f32 %v17910_v15, %v7192_v39  ;;  %13655 = vmatmul.mubr.f32.gmra.mrb[42].mxu1 %v16428_v63  ;;  %v18189_v55 = vld [vmem:[#allocation3 + $0x27f] sm:$0xff]  ;;  %v18191_v33 = vld [vmem:[#allocation3 + $0x287] sm:$0xff] }
 0x3ae   : > { %7293 = vst [vmem:[#allocation3 + $0x2e0] sm:$0xff] %v18977_v9  ;;  %v7230_v38 = vadd.f32 %v17910_v15, %v7191_v54  ;;  %13918 = vmatprep.mubr.f32.mxu0 %v18189_v55  ;;  %13657 = vmatprep.mubr.f32.mxu1 %v16429_v40  ;;  %v16430_v39 = vld [vmem:[#allocation2 + $0x198] sm:$0xff]  ;;  %v16431_v15 = vld [vmem:[#allocation2 + $0x1c0] sm:$0xff]  ;;  %v16432_v54 = vld [vmem:[#allocation2 + $0x1c8] sm:$0xff] }
 0x3af   : > { %v7263_v8 = vmax.f32 %v7231_v27, 0.0  ;;  %13919 = vmatmul.mubr.f32.gmra.mrb[58].mxu0 %v18191_v33  ;;  %15134 = vmatpush3.bf16.msra.mxu1 %v15131_v6  ;;  %v8133_v27 = vld [vmem:[#allocation11 + $0x110] sm:$0xff]  ;;  %v18210_v40 = vld [vmem:[#allocation2] sm:$0xff] }
 0x3b0   : > { %v7262_v32 = vmax.f32 %v7230_v38, 0.0  ;;  %15136 = vmatprep.subr.bf16.mxu1 %v15135_v47  ;;  %v8134_v38 = vld [vmem:[#allocation11 + $0x118] sm:$0xff]  ;;  %v16438_v9 = vld [vmem:[#allocation2 + $0x250] sm:$0xff] }
 0x3b1   : > { %7296 = vst [vmem:[#allocation3 + $0x318] sm:$0xff] %v7263_v8  ;;  %13658 = vmatmul.mubr.f32.gmra.mrb[44].mxu1 %v16430_v39  ;;  %v18198_v63 = vld [vmem:[#allocation3 + $0x2af] sm:$0xff]  ;;  %v18200_v12 = vld [vmem:[#allocation3 + $0x2b7] sm:$0xff]  ;;  %v15211_v8 = vpack.c.bf16 %v8134_v38, %v8133_v27  ;;  %v8135_v39 = vld [vmem:[#allocation11 + $0x120] sm:$0xff] }
 0x3b2   : > { %7295 = vst [vmem:[#allocation3 + $0x310] sm:$0xff] %v7262_v32  ;;  %13921 = vmatprep.mubr.f32.mxu0 %v18198_v63  ;;  %13660 = vmatprep.mubr.f32.mxu1 %v16431_v15  ;;  %v16436_v32 = vld [vmem:[#allocation2 + $0x220] sm:$0xff]  ;;  %v8136_v15 = vld [vmem:[#allocation11 + $0x128] sm:$0xff]  ;;  %v8137_v27 = vld [vmem:[#allocation11 + $0x130] sm:$0xff] }
 0x3b3   : > { %13922 = vmatmul.mubr.f32.gmra.mrb[60].mxu0 %v18200_v12  ;;  %15138 = vmatpush3.bf16.msra.mxu1 %v15135_v47  ;;  %v16435_v47 = vld [vmem:[#allocation2 + $0x1f8] sm:$0xff] }
 0x3b4   : > { %15140 = vmatprep.subr.bf16.mxu1 %v15139_v58  ;;  %v8138_v38 = vld [vmem:[#allocation11 + $0x138] sm:$0xff] }
 0x3b5   : > { %13661 = vmatmul.mubr.f32.gmra.mrb[46].mxu1 %v16432_v54  ;;  %v18204_v6 = vld [vmem:[#allocation3 + $0x2df] sm:$0xff]  ;;  %v18206_v30 = vld [vmem:[#allocation3 + $0x2e7] sm:$0xff] }
 0x3b6   : > { %13924 = vmatprep.mubr.f32.mxu0 %v18204_v6  ;;  %13663 = vmatprep.mubr.f32.mxu1 %v16433_v22  ;;  %v16437_v54 = vld [vmem:[#allocation2 + $0x228] sm:$0xff] }
 0x3b7   : > { %13925 = vmatmul.mubr.f32.gmra.mrb[62].mxu0 %v18206_v30  ;;  %15142 = vmatpush3.bf16.msra.mxu1 %v15139_v58  ;;  %v15215_v58 = vpack.c.bf16 %v8136_v15, %v8135_v39  ;;  %v18217_v22 = vld [vmem:[#allocation3 + $0x48] sm:$0xff]  ;;  %v8142_v39 = vld [vmem:[#allocation11 + $0x158] sm:$0xff] }
 0x3b8   : > { %13959 = vmatprep.mubr.f32.mxu0 %v18210_v40  ;;  %v8144_v15 = vld [vmem:[#allocation11 + $0x168] sm:$0xff] }
 0x3b9   : > { %13664 = vmatmul.mubr.f32.gmra.mrb[48].mxu1 %v16435_v47  ;;  %v8139_v47 = vld [vmem:[#allocation11 + $0x140] sm:$0xff] }
 0x3ba   : > { %13666 = vmatprep.mubr.f32.mxu1 %v16436_v32  ;;  %v8140_v32 = vld [vmem:[#allocation11 + $0x148] sm:$0xff] }
 0x3bb   : > { %13960 = vmatmul.mubr.f32.vlgmr.msra.gmra.mrb[32].mxu0 %v18210_v40  ;;  %v15223_v23 = vpack.c.bf16 %v8140_v32, %v8139_v47  ;;  %v19027_v47 = vmax.f32 %v18058_v43, 0.0  ;;  %v16451_v32 = vld [vmem:[#allocation2 + $0xa9] sm:$0xff]  ;;  %v19031_v43 = vmax.f32 %v18090_v4, 0.0  ;;  %v19035_v4 = vmax.f32 %v18133_v52, 0.0 }
 0x3bc   : > { %13962 = vmatprep.mubr.f32.mxu0 %v7232_v14  ;;  %15210 = vmatpush3.bf16.msra.mxu0 %v18042_v46  ;;  %v15219_v14 = vpack.c.bf16 %v8138_v38, %v8137_v27  ;;  %v16440_v46 = vld [vmem:[#allocation2 + $0x280] sm:$0xff]  ;;  %v19021_v27 = vmax.f32 %v18000_v44, 0.0  ;;  %v19022_v38 = vmax.f32 %v17994_v26, 0.0  ;;  %v16448_v44 = vld [vmem:[#allocation2 + $0x71] sm:$0xff]  ;;  %v19039_v52 = vmax.f32 %v18177_v37, 0.0  ;;  %v8505_v37 = vld [vmem:[#allocation11 + $0x1a8] sm:$0xff] }
 0x3bd   : > { %13667 = vmatmul.mubr.f32.gmra.mrb[50].mxu1 %v16437_v54  ;;  %15212 = vmatprep.subr.bf16.mxu0 %v15211_v8  ;;  %v8146_v54 = vld [vmem:[#allocation11 + $0x178] sm:$0xff] }
 0x3be   : > { %13669 = vmatprep.mubr.f32.mxu1 %v16438_v9  ;;  %v16441_v9 = vld [vmem:[#allocation2 + $0x288] sm:$0xff]  ;;  %v16449_v26 = vld [vmem:[#allocation2 + $0x79] sm:$0xff] }
 0x3bf   : > { %13963 = vmatmul.mubr.f32.gmra.mrb[34].mxu0 %v18217_v22 }
 0x3c0   : > { %13965 = vmatprep.mubr.f32.mxu0 %v7234_v56  ;;  %15214 = vmatpush3.bf16.msra.mxu0 %v15211_v8  ;;  %v16442_v56 = vld [vmem:[#allocation2 + $0x2b0] sm:$0xff] }
 0x3c1   : > { %13670 = vmatmul.mubr.f32.gmra.mrb[52].mxu1 %v16439_v61  ;;  %15216 = vmatprep.subr.bf16.mxu0 %v15215_v58  ;;  %v8141_v8 = vld [vmem:[#allocation11 + $0x150] sm:$0xff]  ;;  %v19023_v61 = vmax.f32 %v18016_v41, 0.0  ;;  %v16450_v41 = vld [vmem:[#allocation2 + $0xa1] sm:$0xff] }
 0x3c2   : > { %13672 = vmatprep.mubr.f32.mxu1 %v16440_v46  ;;  %v19025_v46 = vmax.f32 %v18031_v51, 0.0  ;;  %v19028_v51 = vmax.f32 %v18054_v48, 0.0  ;;  %v19032_v48 = vmax.f32 %v18084_v3, 0.0  ;;  %v19036_v3 = vmax.f32 %v18123_v25, 0.0  ;;  %v8502_v25 = vld [vmem:[#allocation11 + $0x190] sm:$0xff] }
 0x3c3   : > { %13966 = vmatmul.mubr.f32.gmra.mrb[36].mxu0 %v7235_v10  ;;  %v15227_v10 = vpack.c.bf16 %v8142_v39, %v8141_v8  ;;  %v16455_v8 = vld [vmem:[#allocation2 + $0x109] sm:$0xff]  ;;  %v16456_v39 = vld [vmem:[#allocation2 + $0x131] sm:$0xff] }
 0x3c4   : > { %13968 = vmatprep.mubr.f32.mxu0 %v7236_v0  ;;  %15218 = vmatpush3.bf16.msra.mxu0 %v15215_v58  ;;  %v8143_v0 = vld [vmem:[#allocation11 + $0x160] sm:$0xff]  ;;  %v19020_v58 = vmax.f32 %v17978_v60, 0.0 }
 0x3c5   : > { %13673 = vmatmul.mubr.f32.gmra.mrb[54].mxu1 %v16441_v9  ;;  %15220 = vmatprep.subr.bf16.mxu0 %v15219_v14  ;;  %v19029_v9 = vmax.f32 %v18074_v36, 0.0  ;;  %v19033_v36 = vmax.f32 %v18111_v35, 0.0  ;;  %v19037_v35 = vmax.f32 %v18155_v7, 0.0  ;;  %v19040_v7 = vmax.f32 %v18167_v29, 0.0 }
 0x3c6   : > { %13675 = vmatprep.mubr.f32.mxu1 %v16442_v56  ;;  %v16454_v56 = vld [vmem:[#allocation2 + $0x101] sm:$0xff] }
 0x3c7   : > { %13969 = vmatmul.mubr.f32.gmra.mrb[38].mxu0 %v7237_v17  ;;  %v15231_v17 = vpack.c.bf16 %v8144_v15, %v8143_v0  ;;  %v16460_v0 = vld [vmem:[#allocation2 + $0x191] sm:$0xff]  ;;  %v16461_v15 = vld [vmem:[#allocation2 + $0x199] sm:$0xff] }
 0x3c8   : > { %13971 = vmatprep.mubr.f32.mxu0 %v7238_v31  ;;  %15222 = vmatpush3.bf16.msra.mxu0 %v15219_v14  ;;  %v8145_v31 = vld [vmem:[#allocation11 + $0x170] sm:$0xff]  ;;  %v19024_v14 = vmax.f32 %v18010_v49, 0.0 }
 0x3c9   : > { %13676 = vmatmul.mubr.f32.gmra.mrb[56].mxu1 %v16443_v2  ;;  %15224 = vmatprep.subr.bf16.mxu0 %v15223_v23  ;;  %v16452_v49 = vld [vmem:[#allocation2 + $0xd1] sm:$0xff]  ;;  %v16457_v2 = vld [vmem:[#allocation2 + $0x139] sm:$0xff] }
 0x3ca   : > { %13678 = vmatprep.mubr.f32.mxu1 %v16444_v50  ;;  %v16459_v50 = vld [vmem:[#allocation2 + $0x169] sm:$0xff] }
 0x3cb   : > { %13972 = vmatmul.mubr.f32.gmra.mrb[40].mxu0 %v7239_v24  ;;  %v15235_v24 = vpack.c.bf16 %v8146_v54, %v8145_v31  ;;  %v16464_v31 = vld [vmem:[#allocation2 + $0x1f1] sm:$0xff] }
 0x3cc   : > { %13974 = vmatprep.mubr.f32.mxu0 %v7240_v19  ;;  %15226 = vmatpush3.bf16.msra.mxu0 %v15223_v23  ;;  %v8501_v19 = vld [vmem:[#allocation11 + $0x188] sm:$0xff]  ;;  %v16453_v23 = vld [vmem:[#allocation2 + $0xd9] sm:$0xff] }
 0x3cd   : > { %13679 = vmatmul.mubr.f32.gmra.mrb[58].mxu1 %v16445_v62  ;;  %15228 = vmatprep.subr.bf16.mxu0 %v15227_v10  ;;  %v18244_v60 = vpack.c.bf16 %v8501_v19, %v8500_v34  ;;  %v16462_v62 = vld [vmem:[#allocation2 + $0x1c1] sm:$0xff]  ;;  %v8503_v54 = vld [vmem:[#allocation11 + $0x198] sm:$0xff]  ;;  %v16467_v19 = vld [vmem:[#allocation2 + $0x229] sm:$0xff] }
 0x3ce   : > { %13681 = vmatprep.mubr.f32.mxu1 %v16446_v28  ;;  %v8067_v28 = vld [vmem:[#allocation3 + $0x11] sm:$0xff]  ;;  %v18281_v34 = vld [vmem:[#allocation3 + $0x41] sm:$0xff] }
 0x3cf   : > { %13975 = vmatmul.mubr.f32.gmra.mrb[42].mxu0 %v19020_v58  ;;  %v8068_v58 = vld [vmem:[#allocation3 + $0x19] sm:$0xff] }
 0x3d0   : > { %13977 = vmatprep.mubr.f32.mxu0 %v19021_v27  ;;  %15230 = vmatpush3.bf16.msra.mxu0 %v15227_v10  ;;  %v16458_v10 = vld [vmem:[#allocation2 + $0x161] sm:$0xff]  ;;  %v16465_v27 = vld [vmem:[#allocation2 + $0x1f9] sm:$0xff] }
 0x3d1   : > { %13682 = vmatmul.mubr.f32.gmra.mrb[60].mxu1 %v16447_v45  ;;  %15232 = vmatprep.subr.bf16.mxu0 %v15231_v17  ;;  %v15243_v45 = vpack.c.bf16 %v8503_v54, %v8502_v25  ;;  %v8869_v25 = vld [vmem:[#allocation11 + $0x200] sm:$0xff]  ;;  %v8870_v54 = vld [vmem:[#allocation11 + $0x208] sm:$0xff] }
 0x3d2   : > { %13684 = vmatprep.mubr.f32.mxu1 %v18210_v40 }
 0x3d3   : > { %13978 = vmatmul.mubr.f32.gmra.mrb[44].mxu0 %v19022_v38  ;;  %v18285_v38 = vld [vmem:[#allocation3 + $0x49] sm:$0xff] }
 0x3d4   : > { %13980 = vmatprep.mubr.f32.mxu0 %v19023_v61  ;;  %15234 = vmatpush3.bf16.msra.mxu0 %v15231_v17  ;;  %v16463_v17 = vld [vmem:[#allocation2 + $0x1c9] sm:$0xff]  ;;  %v16468_v61 = vld [vmem:[#allocation2 + $0x251] sm:$0xff] }
 0x3d5   : > { %13685 = vmatmul.mubr.f32.gmra.mrb[62].mxu1 %v18210_v40  ;;  %15236 = vmatprep.subr.bf16.mxu0 %v15235_v24  ;;  %v19026_v40 = vmax.f32 %v18026_v42, 0.0  ;;  %v19030_v42 = vmax.f32 %v18068_v1, 0.0  ;;  %v19034_v1 = vmax.f32 %v18101_v16, 0.0  ;;  %v19038_v16 = vmax.f32 %v18145_v11, 0.0  ;;  %v16466_v11 = vld [vmem:[#allocation2 + $0x221] sm:$0xff] }
 0x3d6   : > { %13799 = vmatprep.mubr.f32.mxu1 %v16448_v44  ;;  %v8506_v44 = vld [vmem:[#allocation11 + $0x1b0] sm:$0xff] }
 0x3d7   : > { %13981 = vmatmul.mubr.f32.gmra.mrb[46].mxu0 %v19024_v14  ;;  %v8507_v14 = vld [vmem:[#allocation11 + $0x1b8] sm:$0xff] }
 0x3d8   : > { %13983 = vmatprep.mubr.f32.mxu0 %v19025_v46  ;;  %15238 = vmatpush3.bf16.msra.mxu0 %v15235_v24  ;;  %v8504_v24 = vld [vmem:[#allocation11 + $0x1a0] sm:$0xff]  ;;  %v18288_v46 = vld [vmem:[#allocation3 + $0x71] sm:$0xff] }
 0x3d9   : > { %13800 = vmatmul.mubr.f32.vlgmr.msra.gmra.mrb[32].mxu1 %v16449_v26  ;;  %15240 = vmatprep.subr.bf16.mxu0 %v18244_v60  ;;  %v15247_v29 = vpack.c.bf16 %v8505_v37, %v8504_v24  ;;  %v16469_v26 = vld [vmem:[#allocation2 + $0x259] sm:$0xff]  ;;  %v18330_v37 = vld [vmem:[#allocation3 + $0x1c1] sm:$0xff] }
 0x3da   : > { %13802 = vmatprep.mubr.f32.mxu1 %v16450_v41  ;;  %v18291_v41 = vld [vmem:[#allocation3 + $0x79] sm:$0xff] }
 0x3db   : > { %13984 = vmatmul.mubr.f32.gmra.mrb[48].mxu0 %v19026_v40  ;;  %v16470_v40 = vld [vmem:[#allocation2 + $0x281] sm:$0xff]  ;;  %v18327_v24 = vld [vmem:[#allocation3 + $0x199] sm:$0xff] }
 0x3dc   : > { %13986 = vmatprep.mubr.f32.mxu0 %v19027_v47  ;;  %v8508_v47 = vld [vmem:[#allocation11 + $0x1c0] sm:$0xff] }
 0x3dd   : > { %13803 = vmatmul.mubr.f32.gmra.mrb[34].mxu1 %v16451_v32  ;;  %v8509_v32 = vld [vmem:[#allocation11 + $0x1c8] sm:$0xff] }
 0x3de   : > { %13805 = vmatprep.mubr.f32.mxu1 %v16452_v49  ;;  %v18294_v49 = vld [vmem:[#allocation3 + $0xa1] sm:$0xff] }
 0x3df   : > { %13987 = vmatmul.mubr.f32.gmra.mrb[50].mxu0 %v19028_v51  ;;  %v16471_v51 = vld [vmem:[#allocation2 + $0x289] sm:$0xff] }
 0x3e0   : > { %13989 = vmatprep.mubr.f32.mxu0 %v19029_v9  ;;  %v15255_v9 = vpack.c.bf16 %v8509_v32, %v8508_v47  ;;  %v18357_v47 = vld [vmem:[#allocation3 + $0x289] sm:$0xff]  ;;  %v18360_v32 = vld [vmem:[#allocation3 + $0x2b1] sm:$0xff] }
 0x3e1   : > { %13806 = vmatmul.mubr.f32.gmra.mrb[36].mxu1 %v16453_v23  ;;  %v18297_v23 = vld [vmem:[#allocation3 + $0xa9] sm:$0xff] }
 0x3e2   : > { %13808 = vmatprep.mubr.f32.mxu1 %v16454_v56  ;;  %v16472_v56 = vld [vmem:[#allocation2 + $0x2b1] sm:$0xff] }
 0x3e3   : > { %13990 = vmatmul.mubr.f32.gmra.mrb[52].mxu0 %v19030_v42  ;;  %v8510_v42 = vld [vmem:[#allocation11 + $0x1d0] sm:$0xff] }
 0x3e4   : > { %13992 = vmatprep.mubr.f32.mxu0 %v19031_v43  ;;  %v8511_v43 = vld [vmem:[#allocation11 + $0x1d8] sm:$0xff] }
 0x3e5   : > { %13809 = vmatmul.mubr.f32.gmra.mrb[38].mxu1 %v16455_v8  ;;  %v18300_v8 = vld [vmem:[#allocation3 + $0xd1] sm:$0xff] }
 0x3e6   : > { %13811 = vmatprep.mubr.f32.mxu1 %v16456_v39  ;;  %v16473_v39 = vld [vmem:[#allocation2 + $0x2b9] sm:$0xff] }
 0x3e7   : > { %13993 = vmatmul.mubr.f32.gmra.mrb[54].mxu0 %v19032_v48  ;;  %v15259_v48 = vpack.c.bf16 %v8511_v43, %v8510_v42  ;;  %v8871_v42 = vld [vmem:[#allocation11 + $0x210] sm:$0xff]  ;;  %v8872_v43 = vld [vmem:[#allocation11 + $0x218] sm:$0xff] }
 0x3e8   : > { %13995 = vmatprep.mubr.f32.mxu0 %v19033_v36  ;;  %v18303_v36 = vld [vmem:[#allocation3 + $0xd9] sm:$0xff] }
 0x3e9   : > { %13812 = vmatmul.mubr.f32.gmra.mrb[40].mxu1 %v16457_v2  ;;  %v16474_v2 = vld [vmem:[#allocation2 + $0x2e1] sm:$0xff] }
 0x3ea   : > { %13814 = vmatprep.mubr.f32.mxu1 %v16458_v10  ;;  %v8512_v10 = vld [vmem:[#allocation11 + $0x1e0] sm:$0xff] }
 0x3eb   : > { %13996 = vmatmul.mubr.f32.gmra.mrb[56].mxu0 %v19034_v1  ;;  %v8513_v1 = vld [vmem:[#allocation11 + $0x1e8] sm:$0xff] }
 0x3ec   : > { %13998 = vmatprep.mubr.f32.mxu0 %v19035_v4  ;;  %v18306_v4 = vld [vmem:[#allocation3 + $0x101] sm:$0xff] }
 0x3ed   : > { %13815 = vmatmul.mubr.f32.gmra.mrb[42].mxu1 %v16459_v50  ;;  %v16475_v50 = vld [vmem:[#allocation2 + $0x2e9] sm:$0xff] }
 0x3ee   : > { %13817 = vmatprep.mubr.f32.mxu1 %v16460_v0  ;;  %v15263_v0 = vpack.c.bf16 %v8513_v1, %v8512_v10  ;;  %v8873_v10 = vld [vmem:[#allocation11 + $0x220] sm:$0xff]  ;;  %v8874_v1 = vld [vmem:[#allocation11 + $0x228] sm:$0xff] }
 0x3ef   : > { %13999 = vmatmul.mubr.f32.gmra.mrb[58].mxu0 %v19036_v3  ;;  %v18309_v3 = vld [vmem:[#allocation3 + $0x109] sm:$0xff] }
 0x3f0   : > { %14001 = vmatprep.mubr.f32.mxu0 %v19037_v35  ;;  %v16476_v35 = vld [vmem:[#allocation2 + $0x311] sm:$0xff] }
 0x3f1   : > { %13818 = vmatmul.mubr.f32.gmra.mrb[44].mxu1 %v16461_v15  ;;  %v8514_v15 = vld [vmem:[#allocation11 + $0x1f0] sm:$0xff] }
 0x3f2   : > { %13820 = vmatprep.mubr.f32.mxu1 %v16462_v62  ;;  %v8515_v62 = vld [vmem:[#allocation11 + $0x1f8] sm:$0xff] }
 0x3f3   : > { %14002 = vmatmul.mubr.f32.gmra.mrb[60].mxu0 %v19038_v16  ;;  %v18312_v16 = vld [vmem:[#allocation3 + $0x131] sm:$0xff] }
 0x3f4   : > { %14004 = vmatprep.mubr.f32.mxu0 %v19039_v52  ;;  %v16477_v52 = vld [vmem:[#allocation2 + $0x319] sm:$0xff] }
 0x3f5   : > { %13821 = vmatmul.mubr.f32.gmra.mrb[46].mxu1 %v16463_v17  ;;  %v15267_v17 = vpack.c.bf16 %v8515_v62, %v8514_v15  ;;  %v8875_v15 = vld [vmem:[#allocation11 + $0x230] sm:$0xff]  ;;  %v8876_v62 = vld [vmem:[#allocation11 + $0x238] sm:$0xff] }
 0x3f6   : > { %13823 = vmatprep.mubr.f32.mxu1 %v16464_v31  ;;  %v16478_v31 = vld [vmem:[#allocation2 + $0x341] sm:$0xff] }
 0x3f7   : > { %14005 = vmatmul.mubr.f32.gmra.mrb[62].mxu0 %v19040_v7  ;;  %v18318_v7 = vld [vmem:[#allocation3 + $0x161] sm:$0xff] }
 0x3f8   : > { %14039 = vmatprep.mubr.f32.mxu0 %v8067_v28  ;;  %v18315_v28 = vld [vmem:[#allocation3 + $0x139] sm:$0xff] }
 0x3f9   : > { %13824 = vmatmul.mubr.f32.gmra.mrb[48].mxu1 %v16465_v27  ;;  %v15271_v27 = vpack.c.bf16 %v8870_v54, %v8869_v25  ;;  %v8877_v25 = vld [vmem:[#allocation11 + $0x240] sm:$0xff]  ;;  %v8878_v54 = vld [vmem:[#allocation11 + $0x248] sm:$0xff] }
 0x3fa   : > { %13826 = vmatprep.mubr.f32.mxu1 %v16466_v11  ;;  %v18324_v11 = vld [vmem:[#allocation3 + $0x191] sm:$0xff] }
 0x3fb   : > { %14040 = vmatmul.mubr.f32.vlgmr.msra.gmra.mrb[32].mxu0 %v8068_v58  ;;  %v16479_v58 = vld [vmem:[#allocation2 + $0x349] sm:$0xff] }
 0x3fc   : > { %14042 = vmatprep.mubr.f32.mxu0 %v18281_v34  ;;  %15242 = vmatpush3.bf16.msra.mxu0 %v18244_v60  ;;  %v15251_v60 = vpack.c.bf16 %v8507_v14, %v8506_v44  ;;  %v18342_v44 = vld [vmem:[#allocation3 + $0x221] sm:$0xff]  ;;  %v18345_v14 = vld [vmem:[#allocation3 + $0x229] sm:$0xff] }
 0x3fd   : > { %13827 = vmatmul.mubr.f32.gmra.mrb[50].mxu1 %v16467_v19  ;;  %15244 = vmatprep.subr.bf16.mxu0 %v15243_v45  ;;  %v18333_v19 = vld [vmem:[#allocation3 + $0x1c9] sm:$0xff] }
 0x3fe   : > { %13829 = vmatprep.mubr.f32.mxu1 %v16468_v61  ;;  %v18339_v61 = vld [vmem:[#allocation3 + $0x1f9] sm:$0xff] }
 0x3ff   : > { %14043 = vmatmul.mubr.f32.gmra.mrb[34].mxu0 %v18285_v38 }
 0x400   : > { %14045 = vmatprep.mubr.f32.mxu0 %v18288_v46  ;;  %15246 = vmatpush3.bf16.msra.mxu0 %v15243_v45  ;;  %v18321_v45 = vld [vmem:[#allocation3 + $0x169] sm:$0xff] }
 0x401   : > { %13830 = vmatmul.mubr.f32.gmra.mrb[52].mxu1 %v16469_v26  ;;  %15248 = vmatprep.subr.bf16.mxu0 %v15247_v29  ;;  %v18348_v26 = vld [vmem:[#allocation3 + $0x251] sm:$0xff] }
 0x402   : > { %13832 = vmatprep.mubr.f32.mxu1 %v16470_v40  ;;  %v18354_v40 = vld [vmem:[#allocation3 + $0x281] sm:$0xff] }
 0x403   : > { %14046 = vmatmul.mubr.f32.gmra.mrb[36].mxu0 %v18291_v41 }
 0x404   : > { %14048 = vmatprep.mubr.f32.mxu0 %v18294_v49  ;;  %15250 = vmatpush3.bf16.msra.mxu0 %v15247_v29  ;;  %v18336_v29 = vld [vmem:[#allocation3 + $0x1f1] sm:$0xff] }
 0x405   : > { %13833 = vmatmul.mubr.f32.gmra.mrb[54].mxu1 %v16471_v51  ;;  %15252 = vmatprep.subr.bf16.mxu0 %v15251_v60  ;;  %v18363_v51 = vld [vmem:[#allocation3 + $0x2b9] sm:$0xff] }
 0x406   : > { %13835 = vmatprep.mubr.f32.mxu1 %v16472_v56  ;;  %v18369_v56 = vld [vmem:[#allocation3 + $0x2e9] sm:$0xff] }
 0x407   : > { %14049 = vmatmul.mubr.f32.gmra.mrb[38].mxu0 %v18297_v23 }
 0x408   : > { %14051 = vmatprep.mubr.f32.mxu0 %v18300_v8  ;;  %15254 = vmatpush3.bf16.msra.mxu0 %v15251_v60  ;;  %v18351_v60 = vld [vmem:[#allocation3 + $0x259] sm:$0xff] }
 0x409   : > { %13836 = vmatmul.mubr.f32.gmra.mrb[56].mxu1 %v16473_v39  ;;  %15256 = vmatprep.subr.bf16.mxu0 %v15255_v9  ;;  %v8436_v39 = vld [vmem:[#allocation3 + $0x3f] sm:$0xff] }
 0x40a   : > { %13838 = vmatprep.mubr.f32.mxu1 %v16474_v2  ;;  %v8437_v2 = vld [vmem:[#allocation3 + $0x47] sm:$0xff] }
 0x40b   : > { %14052 = vmatmul.mubr.f32.gmra.mrb[40].mxu0 %v18303_v36 }
 0x40c   : > { %14054 = vmatprep.mubr.f32.mxu0 %v18306_v4  ;;  %15258 = vmatpush3.bf16.msra.mxu0 %v15255_v9  ;;  %v18366_v9 = vld [vmem:[#allocation3 + $0x2e1] sm:$0xff] }
 0x40d   : > { %13839 = vmatmul.mubr.f32.gmra.mrb[58].mxu1 %v16475_v50  ;;  %15260 = vmatprep.subr.bf16.mxu0 %v15259_v48  ;;  %v18372_v50 = vld [vmem:[#allocation3 + $0x6f] sm:$0xff] }
 0x40e   : > { %13841 = vmatprep.mubr.f32.mxu1 %v16476_v35  ;;  %v18375_v35 = vld [vmem:[#allocation3 + $0x77] sm:$0xff] }
 0x40f   : > { %14055 = vmatmul.mubr.f32.gmra.mrb[42].mxu0 %v18309_v3 }
 0x410   : > { %14057 = vmatprep.mubr.f32.mxu0 %v18312_v16  ;;  %15262 = vmatpush3.bf16.msra.mxu0 %v15259_v48  ;;  %v15275_v48 = vpack.c.bf16 %v8872_v43, %v8871_v42  ;;  %v18387_v42 = vld [vmem:[#allocation3 + $0xd7] sm:$0xff] }
 0x411   : > { %13842 = vmatmul.mubr.f32.gmra.mrb[60].mxu1 %v16477_v52  ;;  %15264 = vmatprep.subr.bf16.mxu0 %v15263_v0  ;;  %v18378_v52 = vld [vmem:[#allocation3 + $0x9f] sm:$0xff]  ;;  %v8879_v43 = vld [vmem:[#allocation11 + $0x250] sm:$0xff] }
 0x412   : > { %13844 = vmatprep.mubr.f32.mxu1 %v16478_v31  ;;  %v18381_v31 = vld [vmem:[#allocation3 + $0xa7] sm:$0xff] }
 0x413   : > { %14058 = vmatmul.mubr.f32.gmra.mrb[44].mxu0 %v18315_v28 }
 0x414   : > { %14060 = vmatprep.mubr.f32.mxu0 %v18318_v7  ;;  %15266 = vmatpush3.bf16.msra.mxu0 %v15263_v0  ;;  %v15279_v0 = vpack.c.bf16 %v8874_v1, %v8873_v10  ;;  %v18393_v10 = vld [vmem:[#allocation3 + $0x107] sm:$0xff] }
 0x415   : > { %13845 = vmatmul.mubr.f32.gmra.mrb[62].mxu1 %v16479_v58  ;;  %15268 = vmatprep.subr.bf16.mxu0 %v15267_v17  ;;  %v18384_v58 = vld [vmem:[#allocation3 + $0xcf] sm:$0xff]  ;;  %19042 = vst [vmem:[#allocation22_spill] sm:$0xff] %v18393_v10  ;;  %v8881_v1 = vld [vmem:[#allocation11 + $0x260] sm:$0xff] }
 0x417   : > { %14061 = vmatmul.mubr.f32.gmra.mrb[46].mxu0 %v18321_v45 }
 0x418   : > { %14063 = vmatprep.mubr.f32.mxu0 %v18324_v11  ;;  %15270 = vmatpush3.bf16.msra.mxu0 %v15267_v17  ;;  %v15283_v17 = vpack.c.bf16 %v8876_v62, %v8875_v15  ;;  %v8882_v15 = vld [vmem:[#allocation11 + $0x268] sm:$0xff] }
 0x419   : > { %15272 = vmatprep.subr.bf16.mxu0 %v15271_v27  ;;  %v15295_v62 = vpack.c.bf16 %v8882_v15, %v8881_v1  ;;  %v18411_v15 = vld [vmem:[#allocation3 + $0x197] sm:$0xff] }
 0x41b   : > { %14064 = vmatmul.mubr.f32.gmra.mrb[48].mxu0 %v18327_v24 }
 0x41c   : > { %14066 = vmatprep.mubr.f32.mxu0 %v18330_v37 }
 0x41f   : > { %14067 = vmatmul.mubr.f32.gmra.mrb[50].mxu0 %v18333_v19 }
 0x420   : > { %14069 = vmatprep.mubr.f32.mxu0 %v18336_v29 }
 0x423   : > { %14070 = vmatmul.mubr.f32.gmra.mrb[52].mxu0 %v18339_v61 }
 0x424   : > { %14072 = vmatprep.mubr.f32.mxu0 %v18342_v44 }
 0x427   : > { %14073 = vmatmul.mubr.f32.gmra.mrb[54].mxu0 %v18345_v14 }
 0x428   : > { %14075 = vmatprep.mubr.f32.mxu0 %v18348_v26 }
 0x42b   : > { %14076 = vmatmul.mubr.f32.gmra.mrb[56].mxu0 %v18351_v60 }
 0x42c   : > { %14078 = vmatprep.mubr.f32.mxu0 %v18354_v40 }
 0x42f   : > { %14079 = vmatmul.mubr.f32.gmra.mrb[58].mxu0 %v18357_v47 }
 0x430   : > { %14081 = vmatprep.mubr.f32.mxu0 %v18360_v32 }
 0x433   : > { %14082 = vmatmul.mubr.f32.gmra.mrb[60].mxu0 %v18363_v51 }
 0x434   : > { %14084 = vmatprep.mubr.f32.mxu0 %v18366_v9 }
 0x437   : > { %14085 = vmatmul.mubr.f32.gmra.mrb[62].mxu0 %v18369_v56 }
 0x438   : > { %14119 = vmatprep.mubr.f32.mxu0 %v8436_v39  ;;  %v8880_v39 = vld [vmem:[#allocation11 + $0x258] sm:$0xff] }
 0x43b   : > { %14120 = vmatmul.mubr.f32.vlgmr.msra.gmra.mrb[32].mxu0 %v8437_v2  ;;  %v15291_v2 = vpack.c.bf16 %v8880_v39, %v8879_v43  ;;  %v18405_v39 = vld [vmem:[#allocation3 + $0x167] sm:$0xff] }
 0x43c   : > { %14122 = vmatprep.mubr.f32.mxu0 %v18372_v50  ;;  %15274 = vmatpush3.bf16.msra.mxu0 %v15271_v27  ;;  %v15287_v27 = vpack.c.bf16 %v8878_v54, %v8877_v25  ;;  %v18399_v25 = vld [vmem:[#allocation3 + $0x137] sm:$0xff] }
 0x43d   : > { %15276 = vmatprep.subr.bf16.mxu0 %v15275_v48  ;;  %v8883_v54 = vld [vmem:[#allocation11 + $0x270] sm:$0xff] }
 0x43f   : > { %14123 = vmatmul.mubr.f32.gmra.mrb[34].mxu0 %v18375_v35 }
 0x440   : > { %14125 = vmatprep.mubr.f32.mxu0 %v18378_v52  ;;  %15278 = vmatpush3.bf16.msra.mxu0 %v15275_v48  ;;  %v18390_v48 = vld [vmem:[#allocation3 + $0xff] sm:$0xff] }
 0x441   : > { %15280 = vmatprep.subr.bf16.mxu0 %v15279_v0  ;;  %19041 = vst [vmem:[#allocation21_spill] sm:$0xff] %v18390_v48 }
 0x443   : > { %14126 = vmatmul.mubr.f32.gmra.mrb[36].mxu0 %v18381_v31 }
 0x444   : > { %14128 = vmatprep.mubr.f32.mxu0 %v18384_v58  ;;  %15282 = vmatpush3.bf16.msra.mxu0 %v15279_v0  ;;  %v18396_v0 = vld [vmem:[#allocation3 + $0x12f] sm:$0xff] }
 0x445   : > { %15284 = vmatprep.subr.bf16.mxu0 %v15283_v17  ;;  %19043 = vst [vmem:[#allocation23_spill] sm:$0xff] %v18396_v0 }
 0x447   : > { %14129 = vmatmul.mubr.f32.gmra.mrb[38].mxu0 %v18387_v42 }
 0x448   : > { %14131 = vmatprep.mubr.f32.mxu0 %v18390_v48  ;;  %15286 = vmatpush3.bf16.msra.mxu0 %v15283_v17  ;;  %v8884_v48 = vld [vmem:[#allocation11 + $0x278] sm:$0xff] }
 0x449   : > { %15288 = vmatprep.subr.bf16.mxu0 %v15287_v27  ;;  %v18402_v17 = vld [vmem:[#allocation3 + $0x15f] sm:$0xff]  ;;  %v15299_v43 = vpack.c.bf16 %v8884_v48, %v8883_v54  ;;  %v18444_v48 = vld [vmem:[#allocation3 + $0xa8] sm:$0xff] }
 0x44a   : > { %v18450_v54 = vld [vmem:[#allocation3 + $0xd8] sm:$0xff] }
 0x44b   : > { %14132 = vmatmul.mubr.f32.gmra.mrb[40].mxu0 %v18393_v10  ;;  %v9238_v10 = vld [vmem:[#allocation11 + $0x280] sm:$0xff] }
 0x44c   : > { %14134 = vmatprep.mubr.f32.mxu0 %v18396_v0  ;;  %15290 = vmatpush3.bf16.msra.mxu0 %v15287_v27  ;;  %v9239_v0 = vld [vmem:[#allocation11 + $0x288] sm:$0xff] }
 0x44d   : > { %15292 = vmatprep.subr.bf16.mxu0 %v15291_v2  ;;  %v18408_v27 = vld [vmem:[#allocation3 + $0x18f] sm:$0xff]  ;;  %v15303_v1 = vpack.c.bf16 %v9239_v0, %v9238_v10 }
 0x44e   : > { %v9247_v10 = vld [vmem:[#allocation11 + $0x2c8] sm:$0xff]  ;;  %v18447_v0 = vld [vmem:[#allocation3 + $0xd0] sm:$0xff] }
 0x44f   : > { %14135 = vmatmul.mubr.f32.gmra.mrb[42].mxu0 %v18399_v25 }
 0x450   : > { %14137 = vmatprep.mubr.f32.mxu0 %v18402_v17  ;;  %15294 = vmatpush3.bf16.msra.mxu0 %v15291_v2  ;;  %v9246_v2 = vld [vmem:[#allocation11 + $0x2c0] sm:$0xff] }
 0x451   : > { %15296 = vmatprep.subr.bf16.mxu0 %v15295_v62 }
 0x453   : > { %14138 = vmatmul.mubr.f32.gmra.mrb[44].mxu0 %v18405_v39 }
 0x454   : > { %14140 = vmatprep.mubr.f32.mxu0 %v18408_v27  ;;  %15298 = vmatpush3.bf16.msra.mxu0 %v15295_v62  ;;  %v15319_v62 = vpack.c.bf16 %v9247_v10, %v9246_v2  ;;  %v9253_v2 = vld [vmem:[#allocation11 + $0x2f8] sm:$0xff] }
 0x455   : > { %15300 = vmatprep.subr.bf16.mxu0 %v15299_v43 }
 0x457   : > { %14141 = vmatmul.mubr.f32.gmra.mrb[46].mxu0 %v18411_v15 }
 0x458   : > { %14143 = vmatprep.mubr.f32.mxu0 %v18104_v21  ;;  %15302 = vmatpush3.bf16.msra.mxu0 %v15299_v43  ;;  %v9240_v21 = vld [vmem:[#allocation11 + $0x290] sm:$0xff] }
 0x459   : > { %15304 = vmatprep.subr.bf16.mxu0 %v15303_v1  ;;  %v9248_v43 = vld [vmem:[#allocation11 + $0x2d0] sm:$0xff] }
 0x45b   : > { %14144 = vmatmul.mubr.f32.gmra.mrb[48].mxu0 %v18106_v20  ;;  %v8805_v20 = vld [vmem:[#allocation3 + $0x40] sm:$0xff] }
 0x45c   : > { %14146 = vmatprep.mubr.f32.mxu0 %v18126_v53 }
 0x45f   : > { %14147 = vmatmul.mubr.f32.gmra.mrb[50].mxu0 %v18128_v13  ;;  %v18428_v13 = vld [vmem:[#allocation3 + $0x30f] sm:$0xff] }
 0x460   : > { %14149 = vmatprep.mubr.f32.mxu0 %v18148_v57  ;;  %v9242_v57 = vld [vmem:[#allocation11 + $0x2a0] sm:$0xff] }
 0x463   : > { %14150 = vmatmul.mubr.f32.gmra.mrb[52].mxu0 %v18150_v59  ;;  %v18431_v59 = vld [vmem:[#allocation3 + $0x317] sm:$0xff] }
 0x464   : > { %14152 = vmatprep.mubr.f32.mxu0 %v18170_v5  ;;  %v9243_v5 = vld [vmem:[#allocation11 + $0x2a8] sm:$0xff] }
 0x467   : > { %14153 = vmatmul.mubr.f32.gmra.mrb[54].mxu0 %v18172_v18  ;;  %v9241_v18 = vld [vmem:[#allocation11 + $0x298] sm:$0xff] }
 0x468   : > { %14155 = vmatprep.mubr.f32.mxu0 %v18189_v55  ;;  %v15307_v53 = vpack.c.bf16 %v9241_v18, %v9240_v21  ;;  %v15311_v55 = vpack.c.bf16 %v9243_v5, %v9242_v57  ;;  %v18453_v21 = vld [vmem:[#allocation3 + $0x100] sm:$0xff]  ;;  %v9251_v57 = vld [vmem:[#allocation11 + $0x2e8] sm:$0xff]  ;;  %v18459_v5 = vld [vmem:[#allocation3 + $0x130] sm:$0xff] }
 0x469   : > { %19044 = vst [vmem:[#allocation24_spill] sm:$0xff] %v18459_v5 }
 0x46b   : > { %14156 = vmatmul.mubr.f32.gmra.mrb[56].mxu0 %v18191_v33  ;;  %v18438_v33 = vld [vmem:[#allocation3 + $0x78] sm:$0xff] }
 0x46c   : > { %14158 = vmatprep.mubr.f32.mxu0 %v18198_v63  ;;  %v9244_v63 = vld [vmem:[#allocation11 + $0x2b0] sm:$0xff] }
 0x46f   : > { %14159 = vmatmul.mubr.f32.gmra.mrb[58].mxu0 %v18200_v12  ;;  %v18435_v12 = vld [vmem:[#allocation3 + $0x70] sm:$0xff] }
 0x470   : > { %14161 = vmatprep.mubr.f32.mxu0 %v18204_v6  ;;  %v9245_v6 = vld [vmem:[#allocation11 + $0x2b8] sm:$0xff] }
 0x473   : > { %14162 = vmatmul.mubr.f32.gmra.mrb[60].mxu0 %v18206_v30  ;;  %v18441_v30 = vld [vmem:[#allocation3 + $0xa0] sm:$0xff] }
 0x474   : > { %14164 = vmatprep.mubr.f32.mxu0 %v18428_v13 }
 0x477   : > { %14165 = vmatmul.mubr.f32.gmra.mrb[62].mxu0 %v18431_v59 }
 0x478   : > { %14199 = vmatprep.mubr.f32.mxu0 %v8805_v20  ;;  %v18456_v20 = vld [vmem:[#allocation3 + $0x108] sm:$0xff] }
 0x47b   : > { %14200 = vmatmul.mubr.f32.vlgmr.msra.gmra.mrb[32].mxu0 %v18217_v22  ;;  %v15315_v22 = vpack.c.bf16 %v9245_v6, %v9244_v63  ;;  %v18462_v63 = vld [vmem:[#allocation3 + $0x138] sm:$0xff]  ;;  %v9252_v6 = vld [vmem:[#allocation11 + $0x2f0] sm:$0xff] }
 0x47c   : > { %14202 = vmatprep.mubr.f32.mxu0 %v18435_v12  ;;  %15306 = vmatpush3.bf16.msra.mxu0 %v15303_v1  ;;  %v9249_v1 = vld [vmem:[#allocation11 + $0x2d8] sm:$0xff]  ;;  %v15331_v10 = vpack.c.bf16 %v9253_v2, %v9252_v6  ;;  %v18480_v6 = vld [vmem:[#allocation3 + $0x1c8] sm:$0xff]  ;;  %v18483_v2 = vld [vmem:[#allocation3 + $0x1f0] sm:$0xff] }
 0x47d   : > { %15308 = vmatprep.subr.bf16.mxu0 %v15307_v53  ;;  %v15323_v18 = vpack.c.bf16 %v9249_v1, %v9248_v43  ;;  %v18468_v43 = vld [vmem:[#allocation3 + $0x168] sm:$0xff]  ;;  %v9608_v1 = vld [vmem:[#allocation11 + $0x300] sm:$0xff]  ;;  %19050 = vst [vmem:[#allocation30_spill] sm:$0xff] %v18480_v6  ;;  %19051 = vst [vmem:[#allocation31_spill] sm:$0xff] %v18483_v2 }
 0x47e   : > { %19046 = vst [vmem:[#allocation26_spill] sm:$0xff] %v18468_v43 }
 0x47f   : > { %14203 = vmatmul.mubr.f32.gmra.mrb[34].mxu0 %v18438_v33 }
 0x480   : > { %14205 = vmatprep.mubr.f32.mxu0 %v18441_v30  ;;  %15310 = vmatpush3.bf16.msra.mxu0 %v15307_v53  ;;  %v9250_v53 = vld [vmem:[#allocation11 + $0x2e0] sm:$0xff] }
 0x481   : > { %15312 = vmatprep.subr.bf16.mxu0 %v15311_v55 }
 0x483   : > { %14206 = vmatmul.mubr.f32.gmra.mrb[36].mxu0 %v18444_v48 }
 0x484   : > { %14208 = vmatprep.mubr.f32.mxu0 %v18447_v0  ;;  %15314 = vmatpush3.bf16.msra.mxu0 %v15311_v55  ;;  %v15327_v55 = vpack.c.bf16 %v9251_v57, %v9250_v53  ;;  %v18474_v57 = vld [vmem:[#allocation3 + $0x198] sm:$0xff] }
 0x485   : > { %15316 = vmatprep.subr.bf16.mxu0 %v15315_v22  ;;  %19048 = vst [vmem:[#allocation28_spill] sm:$0xff] %v18474_v57 }
 0x487   : > { %14209 = vmatmul.mubr.f32.gmra.mrb[38].mxu0 %v18450_v54 }
 0x488   : > { %14211 = vmatprep.mubr.f32.mxu0 %v18453_v21  ;;  %15318 = vmatpush3.bf16.msra.mxu0 %v15315_v22  ;;  %v18465_v22 = vld [vmem:[#allocation3 + $0x160] sm:$0xff] }
 0x489   : > { %15320 = vmatprep.subr.bf16.mxu0 %v15319_v62  ;;  %19045 = vst [vmem:[#allocation25_spill] sm:$0xff] %v18465_v22 }
 0x48b   : > { %14212 = vmatmul.mubr.f32.gmra.mrb[40].mxu0 %v18456_v20 }
 0x48c   : > { %14214 = vmatprep.mubr.f32.mxu0 %v18459_v5  ;;  %15322 = vmatpush3.bf16.msra.mxu0 %v15319_v62  ;;  %v9609_v5 = vld [vmem:[#allocation11 + $0x308] sm:$0xff]  ;;  %v18471_v62 = vld [vmem:[#allocation3 + $0x190] sm:$0xff] }
 0x48d   : > { %15324 = vmatprep.subr.bf16.mxu0 %v15323_v18  ;;  %19047 = vst [vmem:[#allocation27_spill] sm:$0xff] %v18471_v62  ;;  %v15335_v53 = vpack.c.bf16 %v9609_v5, %v9608_v1  ;;  %v18489_v5 = vld [vmem:[#allocation3 + $0x220] sm:$0xff]  ;;  %v18492_v1 = vld [vmem:[#allocation3 + $0x228] sm:$0xff] }
 0x48e   : > { %19053 = vst [vmem:[#allocation33_spill] sm:$0xff] %v18489_v5  ;;  %19054 = vst [vmem:[#allocation34_spill] sm:$0xff] %v18492_v1 }
 0x48f   : > { %14215 = vmatmul.mubr.f32.gmra.mrb[42].mxu0 %v18462_v63 }
 0x490   : > { %14217 = vmatprep.mubr.f32.mxu0 %v18465_v22  ;;  %15326 = vmatpush3.bf16.msra.mxu0 %v15323_v18  ;;  %v18477_v18 = vld [vmem:[#allocation3 + $0x1c0] sm:$0xff]  ;;  %v9613_v22 = vld [vmem:[#allocation11 + $0x328] sm:$0xff] }
 0x491   : > { %15328 = vmatprep.subr.bf16.mxu0 %v15327_v55  ;;  %19049 = vst [vmem:[#allocation29_spill] sm:$0xff] %v18477_v18 }
 0x493   : > { %14218 = vmatmul.mubr.f32.gmra.mrb[44].mxu0 %v18468_v43  ;;  %v9612_v43 = vld [vmem:[#allocation11 + $0x320] sm:$0xff] }
 0x494   : > { %14220 = vmatprep.mubr.f32.mxu0 %v18471_v62  ;;  %15330 = vmatpush3.bf16.msra.mxu0 %v15327_v55  ;;  %v18486_v55 = vld [vmem:[#allocation3 + $0x1f8] sm:$0xff]  ;;  %v9610_v62 = vld [vmem:[#allocation11 + $0x310] sm:$0xff] }
 0x495   : > { %15332 = vmatprep.subr.bf16.mxu0 %v15331_v10  ;;  %19052 = vst [vmem:[#allocation32_spill] sm:$0xff] %v18486_v55 }
 0x497   : > { %14221 = vmatmul.mubr.f32.gmra.mrb[46].mxu0 %v18474_v57 }
 0x498   : > { %14223 = vmatprep.mubr.f32.mxu0 %v18477_v18  ;;  %15334 = vmatpush3.bf16.msra.mxu0 %v15331_v10  ;;  %v18495_v10 = vld [vmem:[#allocation3 + $0x250] sm:$0xff] }
 0x499   : > { %15336 = vmatprep.subr.bf16.mxu0 %v15335_v53  ;;  %19055 = vst [vmem:[#allocation35_spill] sm:$0xff] %v18495_v10 }
 0x49b   : > { %14224 = vmatmul.mubr.f32.gmra.mrb[48].mxu0 %v18480_v6  ;;  %v18498_v6 = vld [vmem:[#allocation3 + $0x258] sm:$0xff] }
 0x49c   : > { %14226 = vmatprep.mubr.f32.mxu0 %v18483_v2  ;;  %19056 = vst [vmem:[#allocation36_spill] sm:$0xff] %v18498_v6  ;;  %v18501_v2 = vld [vmem:[#allocation3 + $0x280] sm:$0xff] }
 0x49d   : > { %19057 = vst [vmem:[#allocation37_spill] sm:$0xff] %v18501_v2 }
 0x49f   : > { %14227 = vmatmul.mubr.f32.gmra.mrb[50].mxu0 %v18486_v55  ;;  %v18504_v55 = vld [vmem:[#allocation3 + $0x288] sm:$0xff] }
 0x4a0   : > { %14229 = vmatprep.mubr.f32.mxu0 %v18489_v5  ;;  %19058 = vst [vmem:[#allocation38_spill] sm:$0xff] %v18504_v55  ;;  %v18507_v5 = vld [vmem:[#allocation3 + $0x2b0] sm:$0xff] }
 0x4a1   : > { %19059 = vst [vmem:[#allocation39_spill] sm:$0xff] %v18507_v5 }
 0x4a3   : > { %14230 = vmatmul.mubr.f32.gmra.mrb[52].mxu0 %v18492_v1 }
 0x4a4   : > { %14232 = vmatprep.mubr.f32.mxu0 %v18495_v10  ;;  %v18514_v10 = vld [vmem:[#allocation3 + $0x2b8] sm:$0xff] }
 0x4a5   : > { %19062 = vst [vmem:[#allocation42_spill] sm:$0xff] %v18514_v10 }
 0x4a7   : > { %14233 = vmatmul.mubr.f32.gmra.mrb[54].mxu0 %v18498_v6  ;;  %v18517_v6 = vld [vmem:[#allocation3 + $0x2e0] sm:$0xff] }
 0x4a8   : > { %14235 = vmatprep.mubr.f32.mxu0 %v18501_v2  ;;  %19063 = vst [vmem:[#allocation43_spill] sm:$0xff] %v18517_v6 }
 0x4ab   : > { %14236 = vmatmul.mubr.f32.gmra.mrb[56].mxu0 %v18504_v55  ;;  %v18524_v55 = vld [vmem:[#allocation3 + $0x2e8] sm:$0xff] }
 0x4ac   : > { %v18509_v18 = vpop.f32.mrb[32].mxu1  ;;  %14238 = vmatprep.mubr.f32.mxu0 %v18507_v5  ;;  %19066 = vst [vmem:[#allocation46_spill] sm:$0xff] %v18524_v55 }
 0x4ad   : > { %19060 = vst [vmem:[#allocation40_spill] sm:$0xff] %v18509_v18  ;;  %v18512_v1 = vpop.f32.mrb[33].mxu1  ;;  %v18527_v18 = vld [vmem:[#allocation3 + $0x310] sm:$0xff] }
 0x4ae   : > { %19061 = vst [vmem:[#allocation41_spill] sm:$0xff] %v18512_v1  ;;  %19067 = vst [vmem:[#allocation47_spill] sm:$0xff] %v18527_v18 }
 0x4af   : > { %14239 = vmatmul.mubr.f32.gmra.mrb[58].mxu0 %v18514_v10  ;;  %v18534_v10 = vld [vmem:[#allocation3 + $0x318] sm:$0xff] }
 0x4b0   : > { %v18519_v57 = vpop.f32.mrb[34].mxu1  ;;  %14241 = vmatprep.mubr.f32.mxu0 %v18517_v6  ;;  %19070 = vst [vmem:[#allocation50_spill] sm:$0xff] %v18534_v10 }
 0x4b1   : > { %19064 = vst [vmem:[#allocation44_spill] sm:$0xff] %v18519_v57  ;;  %v18522_v2 = vpop.f32.mrb[35].mxu1  ;;  %v9611_v57 = vld [vmem:[#allocation11 + $0x318] sm:$0xff] }
 0x4b2   : > { %19065 = vst [vmem:[#allocation45_spill] sm:$0xff] %v18522_v2 }
 0x4b3   : > { %14242 = vmatmul.mubr.f32.gmra.mrb[60].mxu0 %v18524_v55  ;;  %v15339_v55 = vpack.c.bf16 %v9611_v57, %v9610_v62  ;;  %v9616_v57 = vld [vmem:[#allocation11 + $0x340] sm:$0xff] }
 0x4b4   : > { %v18529_v5 = vpop.f32.mrb[36].mxu1  ;;  %14244 = vmatprep.mubr.f32.mxu0 %v18527_v18  ;;  %v9614_v18 = vld [vmem:[#allocation11 + $0x330] sm:$0xff] }
 0x4b5   : > { %19068 = vst [vmem:[#allocation48_spill] sm:$0xff] %v18529_v5  ;;  %v18532_v1 = vpop.f32.mrb[37].mxu1 }
 0x4b6   : > { %19069 = vst [vmem:[#allocation49_spill] sm:$0xff] %v18532_v1 }
 0x4b7   : > { %14245 = vmatmul.mubr.f32.gmra.mrb[62].mxu0 %v18534_v10  ;;  %v15343_v10 = vpack.c.bf16 %v9613_v22, %v9612_v43  ;;  %v9618_v43 = vld [vmem:[#allocation11 + $0x350] sm:$0xff] }
 0x4b8   : > { %v18537_v6 = vpop.f32.mrb[38].mxu1  ;;  %14279 = vmatprep.mubr.f32.mxu0 %v18281_v34 }
 0x4b9   : > { %19071 = vst [vmem:[#allocation51_spill] sm:$0xff] %v18537_v6  ;;  %v18540_v2 = vpop.f32.mrb[39].mxu1  ;;  %v9615_v6 = vld [vmem:[#allocation11 + $0x338] sm:$0xff] }
 0x4bb   : > { %14280 = vmatmul.mubr.f32.vlgmr.msra.gmra.mrb[32].mxu0 %v18285_v38  ;;  %v15347_v38 = vpack.c.bf16 %v9615_v6, %v9614_v18  ;;  %v9620_v6 = vld [vmem:[#allocation11 + $0x360] sm:$0xff] }
 0x4bc   : > { %v18543_v5 = vpop.f32.mrb[40].mxu1  ;;  %14282 = vmatprep.mubr.f32.mxu0 %v18288_v46  ;;  %15338 = vmatpush3.bf16.msra.mxu0 %v15335_v53  ;;  %v9617_v46 = vld [vmem:[#allocation11 + $0x348] sm:$0xff] }
 0x4bd   : > { %v18546_v1 = vpop.f32.mrb[41].mxu1  ;;  %15340 = vmatprep.subr.bf16.mxu0 %v15339_v55 }
 0x4bf   : > { %14283 = vmatmul.mubr.f32.gmra.mrb[34].mxu0 %v18291_v41  ;;  %v15351_v41 = vpack.c.bf16 %v9617_v46, %v9616_v57  ;;  %v9622_v46 = vld [vmem:[#allocation11 + $0x370] sm:$0xff] }
 0x4c0   : > { %v18549_v34 = vpop.f32.mrb[42].mxu1  ;;  %14285 = vmatprep.mubr.f32.mxu0 %v18294_v49  ;;  %15342 = vmatpush3.bf16.msra.mxu0 %v15339_v55  ;;  %v9619_v49 = vld [vmem:[#allocation11 + $0x358] sm:$0xff] }
 0x4c1   : > { %v18552_v62 = vpop.f32.mrb[43].mxu1  ;;  %15344 = vmatprep.subr.bf16.mxu0 %v15343_v10 }
 0x4c3   : > { %14286 = vmatmul.mubr.f32.gmra.mrb[36].mxu0 %v18297_v23  ;;  %v15355_v23 = vpack.c.bf16 %v9619_v49, %v9618_v43  ;;  %v9977_v49 = vld [vmem:[#allocation11 + $0x380] sm:$0xff] }
 0x4c4   : > { %v18555_v53 = vpop.f32.mrb[44].mxu1  ;;  %14288 = vmatprep.mubr.f32.mxu0 %v18300_v8  ;;  %15346 = vmatpush3.bf16.msra.mxu0 %v15343_v10  ;;  %v9621_v8 = vld [vmem:[#allocation11 + $0x368] sm:$0xff] }
 0x4c5   : > { %v18558_v22 = vpop.f32.mrb[45].mxu1  ;;  %15348 = vmatprep.subr.bf16.mxu0 %v15347_v38 }
 0x4c7   : > { %14289 = vmatmul.mubr.f32.gmra.mrb[38].mxu0 %v18303_v36  ;;  %v15359_v36 = vpack.c.bf16 %v9621_v8, %v9620_v6 }
 0x4c8   : > { %v18561_v55 = vpop.f32.mrb[46].mxu1  ;;  %14291 = vmatprep.mubr.f32.mxu0 %v18306_v4  ;;  %15350 = vmatpush3.bf16.msra.mxu0 %v15347_v38  ;;  %v9623_v4 = vld [vmem:[#allocation11 + $0x378] sm:$0xff] }
 0x4c9   : > { %v18564_v18 = vpop.f32.mrb[47].mxu1  ;;  %15352 = vmatprep.subr.bf16.mxu0 %v15351_v41 }
 0x4cb   : > { %14292 = vmatmul.mubr.f32.gmra.mrb[40].mxu0 %v18309_v3  ;;  %v15363_v3 = vpack.c.bf16 %v9623_v4, %v9622_v46  ;;  %v9986_v46 = vld [vmem:[#allocation11 + $0x3c8] sm:$0xff]  ;;  %v19072_v4 = vld [vmem:[#allocation21_spill] sm:$0xff] }
 0x4cc   : > { %v18567_v10 = vpop.f32.mrb[48].mxu1  ;;  %14294 = vmatprep.mubr.f32.mxu0 %v18312_v16  ;;  %15354 = vmatpush3.bf16.msra.mxu0 %v15351_v41  ;;  %v9978_v16 = vld [vmem:[#allocation11 + $0x388] sm:$0xff] }
 0x4cd   : > { %v18570_v57 = vpop.f32.mrb[49].mxu1  ;;  %15356 = vmatprep.subr.bf16.mxu0 %v15355_v23 }
 0x4cf   : > { %14295 = vmatmul.mubr.f32.gmra.mrb[42].mxu0 %v18315_v28  ;;  %v15367_v28 = vpack.c.bf16 %v9978_v16, %v9977_v49  ;;  %v19073_v49 = vld [vmem:[#allocation22_spill] sm:$0xff]  ;;  %v19074_v16 = vld [vmem:[#allocation23_spill] sm:$0xff] }
 0x4d0   : > { %v18573_v38 = vpop.f32.mrb[50].mxu1  ;;  %14297 = vmatprep.mubr.f32.mxu0 %v18318_v7  ;;  %15358 = vmatpush3.bf16.msra.mxu0 %v15355_v23 }
 0x4d1   : > { %v18576_v43 = vpop.f32.mrb[51].mxu1  ;;  %15360 = vmatprep.subr.bf16.mxu0 %v15359_v36 }
 0x4d3   : > { %14298 = vmatmul.mubr.f32.gmra.mrb[44].mxu0 %v18321_v45 }
 0x4d4   : > { %v18579_v41 = vpop.f32.mrb[52].mxu1  ;;  %14300 = vmatprep.mubr.f32.mxu0 %v18324_v11  ;;  %15362 = vmatpush3.bf16.msra.mxu0 %v15359_v36 }
 0x4d5   : > { %v18582_v6 = vpop.f32.mrb[53].mxu1  ;;  %15364 = vmatprep.subr.bf16.mxu0 %v15363_v3 }
 0x4d7   : > { %14301 = vmatmul.mubr.f32.gmra.mrb[46].mxu0 %v18327_v24 }
 0x4d8   : > { %v18585_v7 = vpop.f32.mrb[54].mxu1  ;;  %14303 = vmatprep.mubr.f32.mxu0 %v18330_v37  ;;  %15366 = vmatpush3.bf16.msra.mxu0 %v15363_v3  ;;  %v9988_v3 = vld [vmem:[#allocation11 + $0x3d8] sm:$0xff] }
 0x4d9   : > { %v18588_v23 = vpop.f32.mrb[55].mxu1  ;;  %15368 = vmatprep.subr.bf16.mxu0 %v15367_v28 }
 0x4db   : > { %14304 = vmatmul.mubr.f32.gmra.mrb[48].mxu0 %v18333_v19 }
 0x4dc   : > { %v18591_v45 = vpop.f32.mrb[56].mxu1  ;;  %14306 = vmatprep.mubr.f32.mxu0 %v18336_v29 }
 0x4dd   : > { %v18594_v11 = vpop.f32.mrb[57].mxu1 }
 0x4df   : > { %14307 = vmatmul.mubr.f32.gmra.mrb[50].mxu0 %v18339_v61 }
 0x4e0   : > { %v18597_v8 = vpop.f32.mrb[58].mxu1  ;;  %14309 = vmatprep.mubr.f32.mxu0 %v18342_v44  ;;  %v18619_v44 = vld [vmem:[#allocation3 + $0x311] sm:$0xff] }
 0x4e1   : > { %v18600_v24 = vpop.f32.mrb[59].mxu1 }
 0x4e3   : > { %14310 = vmatmul.mubr.f32.gmra.mrb[52].mxu0 %v18345_v14  ;;  %v18622_v14 = vld [vmem:[#allocation3 + $0x319] sm:$0xff] }
 0x4e4   : > { %v18603_v37 = vpop.f32.mrb[60].mxu1  ;;  %14312 = vmatprep.mubr.f32.mxu0 %v18348_v26  ;;  %v9979_v26 = vld [vmem:[#allocation11 + $0x390] sm:$0xff] }
 0x4e5   : > { %v18606_v19 = vpop.f32.mrb[61].mxu1 }
 0x4e7   : > { %14313 = vmatmul.mubr.f32.gmra.mrb[54].mxu0 %v18351_v60  ;;  %v9980_v60 = vld [vmem:[#allocation11 + $0x398] sm:$0xff] }
 0x4e8   : > { %v18609_v29 = vpop.f32.mrb[62].mxu1  ;;  %14315 = vmatprep.mubr.f32.mxu0 %v18354_v40  ;;  %v15371_v40 = vpack.c.bf16 %v9980_v60, %v9979_v26  ;;  %v9991_v26 = vld [vmem:[#allocation11 + $0x3f0] sm:$0xff]  ;;  %v9992_v60 = vld [vmem:[#allocation11 + $0x3f8] sm:$0xff] }
 0x4e9   : > { %v18612_v61 = vpop.f32.mrb[63].mxu1 }
 0x4eb   : > { %14316 = vmatmul.mubr.f32.gmra.mrb[56].mxu0 %v18357_v47  ;;  %v9981_v47 = vld [vmem:[#allocation11 + $0x3a0] sm:$0xff] }
 0x4ec   : > { %14318 = vmatprep.mubr.f32.mxu0 %v18360_v32  ;;  %v9982_v32 = vld [vmem:[#allocation11 + $0x3a8] sm:$0xff] }
 0x4ef   : > { %14319 = vmatmul.mubr.f32.gmra.mrb[58].mxu0 %v18363_v51  ;;  %v15375_v51 = vpack.c.bf16 %v9982_v32, %v9981_v47  ;;  %v10346_v47 = vld [vmem:[#allocation11 + $0x400] sm:$0xff]  ;;  %v10347_v32 = vld [vmem:[#allocation11 + $0x408] sm:$0xff] }
 0x4f0   : > { %14321 = vmatprep.mubr.f32.mxu0 %v18366_v9  ;;  %v9983_v9 = vld [vmem:[#allocation11 + $0x3b0] sm:$0xff] }
 0x4f3   : > { %14322 = vmatmul.mubr.f32.gmra.mrb[60].mxu0 %v18369_v56  ;;  %v9984_v56 = vld [vmem:[#allocation11 + $0x3b8] sm:$0xff] }
 0x4f4   : > { %14324 = vmatprep.mubr.f32.mxu0 %v18619_v44  ;;  %v15379_v36 = vpack.c.bf16 %v9984_v56, %v9983_v9  ;;  %v9560_v9 = vld [vmem:[#allocation3 + $0x1ef] sm:$0xff]  ;;  %v9563_v56 = vld [vmem:[#allocation3 + $0x227] sm:$0xff] }
 0x4f7   : > { %14325 = vmatmul.mubr.f32.gmra.mrb[62].mxu0 %v18622_v14 }
 0x4f8   : > { %14359 = vmatprep.mubr.f32.mxu0 %v18372_v50  ;;  %v9985_v50 = vld [vmem:[#allocation11 + $0x3c0] sm:$0xff] }
 0x4fb   : > { %14360 = vmatmul.mubr.f32.vlgmr.msra.gmra.mrb[32].mxu0 %v18375_v35  ;;  %v15383_v35 = vpack.c.bf16 %v9986_v46, %v9985_v50  ;;  %v9566_v50 = vld [vmem:[#allocation3 + $0x27f] sm:$0xff]  ;;  %v9567_v46 = vld [vmem:[#allocation3 + $0x287] sm:$0xff] }
 0x4fc   : > { %14362 = vmatprep.mubr.f32.mxu0 %v18378_v52  ;;  %15370 = vmatpush3.bf16.msra.mxu0 %v15367_v28  ;;  %v9987_v52 = vld [vmem:[#allocation11 + $0x3d0] sm:$0xff]  ;;  %v9990_v28 = vld [vmem:[#allocation11 + $0x3e8] sm:$0xff] }
 0x4fd   : > { %15372 = vmatprep.subr.bf16.mxu0 %v15371_v40 }
 0x4ff   : > { %14363 = vmatmul.mubr.f32.gmra.mrb[34].mxu0 %v18381_v31  ;;  %v15387_v31 = vpack.c.bf16 %v9988_v3, %v9987_v52  ;;  %v9570_v52 = vld [vmem:[#allocation3 + $0x2df] sm:$0xff]  ;;  %v9571_v3 = vld [vmem:[#allocation3 + $0x2e7] sm:$0xff] }
 0x500   : > { %14365 = vmatprep.mubr.f32.mxu0 %v18384_v58  ;;  %15374 = vmatpush3.bf16.msra.mxu0 %v15371_v40  ;;  %v9989_v58 = vld [vmem:[#allocation11 + $0x3e0] sm:$0xff]  ;;  %v15395_v40 = vpack.c.bf16 %v9992_v60, %v9991_v26  ;;  %v10351_v26 = vld [vmem:[#allocation11 + $0x428] sm:$0xff]  ;;  %v10352_v60 = vld [vmem:[#allocation11 + $0x430] sm:$0xff] }
 0x501   : > { %15376 = vmatprep.subr.bf16.mxu0 %v15375_v51 }
 0x503   : > { %14366 = vmatmul.mubr.f32.gmra.mrb[36].mxu0 %v18387_v42  ;;  %v15391_v42 = vpack.c.bf16 %v9990_v28, %v9989_v58  ;;  %v10349_v58 = vld [vmem:[#allocation11 + $0x418] sm:$0xff] }
 0x504   : > { %14368 = vmatprep.mubr.f32.mxu0 %v19072_v4  ;;  %15378 = vmatpush3.bf16.msra.mxu0 %v15375_v51  ;;  %v9558_v51 = vld [vmem:[#allocation3 + $0x1bf] sm:$0xff]  ;;  %v9568_v4 = vld [vmem:[#allocation3 + $0x2af] sm:$0xff] }
 0x505   : > { %15380 = vmatprep.subr.bf16.mxu0 %v15379_v36 }
 0x507   : > { %14369 = vmatmul.mubr.f32.gmra.mrb[38].mxu0 %v19073_v49  ;;  %v9574_v49 = vld [vmem:[#allocation3 + $0x33f] sm:$0xff] }
 0x508   : > { %14371 = vmatprep.mubr.f32.mxu0 %v19074_v16  ;;  %15382 = vmatpush3.bf16.msra.mxu0 %v15379_v36  ;;  %v9564_v36 = vld [vmem:[#allocation3 + $0x24f] sm:$0xff]  ;;  %v9575_v16 = vld [vmem:[#allocation3 + $0x347] sm:$0xff] }
 0x509   : > { %15384 = vmatprep.subr.bf16.mxu0 %v15383_v35 }
 0x50b   : > { %14372 = vmatmul.mubr.f32.gmra.mrb[40].mxu0 %v18399_v25  ;;  %v15399_v25 = vpack.c.bf16 %v10347_v32, %v10346_v47  ;;  %v10355_v47 = vld [vmem:[#allocation11 + $0x448] sm:$0xff]  ;;  %v10357_v32 = vld [vmem:[#allocation11 + $0x458] sm:$0xff] }
 0x50c   : > { %14374 = vmatprep.mubr.f32.mxu0 %v18402_v17  ;;  %15386 = vmatpush3.bf16.msra.mxu0 %v15383_v35  ;;  %v9559_v17 = vld [vmem:[#allocation3 + $0x1c7] sm:$0xff]  ;;  %v9569_v35 = vld [vmem:[#allocation3 + $0x2b7] sm:$0xff] }
 0x50d   : > { %15388 = vmatprep.subr.bf16.mxu0 %v15387_v31 }
 0x50f   : > { %14375 = vmatmul.mubr.f32.gmra.mrb[42].mxu0 %v18405_v39  ;;  %v9561_v39 = vld [vmem:[#allocation3 + $0x1f7] sm:$0xff] }
 0x510   : > { %14377 = vmatprep.mubr.f32.mxu0 %v18408_v27  ;;  %15390 = vmatpush3.bf16.msra.mxu0 %v15387_v31  ;;  %v9562_v27 = vld [vmem:[#allocation3 + $0x21f] sm:$0xff]  ;;  %v10348_v31 = vld [vmem:[#allocation11 + $0x410] sm:$0xff] }
 0x511   : > { %15392 = vmatprep.subr.bf16.mxu0 %v15391_v42  ;;  %v15403_v28 = vpack.c.bf16 %v10349_v58, %v10348_v31  ;;  %v19091_v31 = vld [vmem:[#allocation42_spill] sm:$0xff]  ;;  %v19092_v58 = vld [vmem:[#allocation43_spill] sm:$0xff] }
 0x513   : > { %14378 = vmatmul.mubr.f32.gmra.mrb[44].mxu0 %v18411_v15  ;;  %v9565_v15 = vld [vmem:[#allocation3 + $0x257] sm:$0xff] }
 0x514   : > { %14380 = vmatprep.mubr.f32.mxu0 %v9558_v51  ;;  %15394 = vmatpush3.bf16.msra.mxu0 %v15391_v42  ;;  %v10350_v42 = vld [vmem:[#allocation11 + $0x420] sm:$0xff]  ;;  %v19075_v51 = vld [vmem:[#allocation24_spill] sm:$0xff] }
 0x515   : > { %15396 = vmatprep.subr.bf16.mxu0 %v15395_v40 }
 0x517   : > { %14381 = vmatmul.mubr.f32.gmra.mrb[46].mxu0 %v9559_v17  ;;  %v19076_v17 = vld [vmem:[#allocation25_spill] sm:$0xff] }
 0x518   : > { %14383 = vmatprep.mubr.f32.mxu0 %v9560_v9  ;;  %15398 = vmatpush3.bf16.msra.mxu0 %v15395_v40  ;;  %v10353_v40 = vld [vmem:[#allocation11 + $0x438] sm:$0xff] }
 0x519   : > { %15400 = vmatprep.subr.bf16.mxu0 %v15399_v25  ;;  %v10361_v9 = vld [vmem:[#allocation11 + $0x478] sm:$0xff] }
 0x51b   : > { %14384 = vmatmul.mubr.f32.gmra.mrb[48].mxu0 %v9561_v39  ;;  %v19077_v39 = vld [vmem:[#allocation26_spill] sm:$0xff] }
 0x51c   : > { %14386 = vmatprep.mubr.f32.mxu0 %v9562_v27  ;;  %v19078_v27 = vld [vmem:[#allocation27_spill] sm:$0xff] }
 0x51f   : > { %14387 = vmatmul.mubr.f32.gmra.mrb[50].mxu0 %v9563_v56  ;;  %v19079_v56 = vld [vmem:[#allocation28_spill] sm:$0xff] }
 0x520   : > { %14389 = vmatprep.mubr.f32.mxu0 %v9564_v36  ;;  %v19080_v36 = vld [vmem:[#allocation29_spill] sm:$0xff] }
 0x523   : > { %14390 = vmatmul.mubr.f32.gmra.mrb[52].mxu0 %v9565_v15  ;;  %v19082_v15 = vld [vmem:[#allocation31_spill] sm:$0xff] }
 0x524   : > { %14392 = vmatprep.mubr.f32.mxu0 %v9566_v50  ;;  %v19083_v50 = vld [vmem:[#allocation32_spill] sm:$0xff] }
 0x527   : > { %14393 = vmatmul.mubr.f32.gmra.mrb[54].mxu0 %v9567_v46  ;;  %v19084_v46 = vld [vmem:[#allocation33_spill] sm:$0xff] }
 0x528   : > { %14395 = vmatprep.mubr.f32.mxu0 %v9568_v4  ;;  %v19085_v4 = vld [vmem:[#allocation34_spill] sm:$0xff] }
 0x52b   : > { %14396 = vmatmul.mubr.f32.gmra.mrb[56].mxu0 %v9569_v35  ;;  %v19086_v35 = vld [vmem:[#allocation35_spill] sm:$0xff] }
 0x52c   : > { %14398 = vmatprep.mubr.f32.mxu0 %v9570_v52  ;;  %v19087_v52 = vld [vmem:[#allocation36_spill] sm:$0xff] }
 0x52f   : > { %14399 = vmatmul.mubr.f32.gmra.mrb[58].mxu0 %v9571_v3  ;;  %v19088_v3 = vld [vmem:[#allocation37_spill] sm:$0xff] }
 0x530   : > { %14401 = vmatprep.mubr.f32.mxu0 %v18428_v13  ;;  %v15407_v13 = vpack.c.bf16 %v10351_v26, %v10350_v42  ;;  %v19094_v42 = vld [vmem:[#allocation47_spill] sm:$0xff]  ;;  %v19095_v26 = vld [vmem:[#allocation50_spill] sm:$0xff] }
 0x533   : > { %14402 = vmatmul.mubr.f32.gmra.mrb[60].mxu0 %v18431_v59  ;;  %v15411_v59 = vpack.c.bf16 %v10353_v40, %v10352_v60  ;;  %v10282_v60 = vld [vmem:[#allocation3 + $0x71] sm:$0xff]  ;;  %v10283_v40 = vld [vmem:[#allocation3 + $0x79] sm:$0xff] }
 0x534   : > { %14404 = vmatprep.mubr.f32.mxu0 %v9574_v49  ;;  %v19089_v49 = vld [vmem:[#allocation38_spill] sm:$0xff] }
 0x537   : > { %14405 = vmatmul.mubr.f32.gmra.mrb[62].mxu0 %v9575_v16  ;;  %v19090_v16 = vld [vmem:[#allocation39_spill] sm:$0xff] }
 0x538   : > { %14439 = vmatprep.mubr.f32.mxu0 %v18435_v12  ;;  %v10354_v12 = vld [vmem:[#allocation11 + $0x440] sm:$0xff] }
 0x53b   : > { %14440 = vmatmul.mubr.f32.vlgmr.msra.gmra.mrb[32].mxu0 %v18438_v33  ;;  %v15415_v33 = vpack.c.bf16 %v10355_v47, %v10354_v12  ;;  %v10285_v12 = vld [vmem:[#allocation3 + $0xa9] sm:$0xff]  ;;  %v10286_v47 = vld [vmem:[#allocation3 + $0xd1] sm:$0xff] }
 0x53c   : > { %14442 = vmatprep.mubr.f32.mxu0 %v18441_v30  ;;  %15402 = vmatpush3.bf16.msra.mxu0 %v15399_v25  ;;  %v10356_v30 = vld [vmem:[#allocation11 + $0x450] sm:$0xff]  ;;  %v10359_v25 = vld [vmem:[#allocation11 + $0x468] sm:$0xff] }
 0x53d   : > { %15404 = vmatprep.subr.bf16.mxu0 %v15403_v28 }
 0x53f   : > { %14443 = vmatmul.mubr.f32.gmra.mrb[34].mxu0 %v18444_v48  ;;  %v15419_v48 = vpack.c.bf16 %v10357_v32, %v10356_v30  ;;  %v10288_v30 = vld [vmem:[#allocation3 + $0x101] sm:$0xff]  ;;  %v10289_v32 = vld [vmem:[#allocation3 + $0x109] sm:$0xff] }
 0x540   : > { %14445 = vmatprep.mubr.f32.mxu0 %v18447_v0  ;;  %15406 = vmatpush3.bf16.msra.mxu0 %v15403_v28  ;;  %v10358_v0 = vld [vmem:[#allocation11 + $0x460] sm:$0xff]  ;;  %v19093_v28 = vld [vmem:[#allocation46_spill] sm:$0xff] }
 0x541   : > { %15408 = vmatprep.subr.bf16.mxu0 %v15407_v13 }
 0x543   : > { %14446 = vmatmul.mubr.f32.gmra.mrb[36].mxu0 %v18450_v54  ;;  %v15423_v54 = vpack.c.bf16 %v10359_v25, %v10358_v0  ;;  %v10292_v0 = vld [vmem:[#allocation3 + $0x161] sm:$0xff]  ;;  %v10293_v25 = vld [vmem:[#allocation3 + $0x169] sm:$0xff] }
 0x544   : > { %14448 = vmatprep.mubr.f32.mxu0 %v18453_v21  ;;  %15410 = vmatpush3.bf16.msra.mxu0 %v15407_v13  ;;  %v10360_v21 = vld [vmem:[#allocation11 + $0x470] sm:$0xff]  ;;  %v16480_v13 = vld [vmem:[#allocation2] sm:$0xff] }
 0x545   : > { %15412 = vmatprep.subr.bf16.mxu0 %v15411_v59 }
 0x547   : > { %14449 = vmatmul.mubr.f32.gmra.mrb[38].mxu0 %v18456_v20  ;;  %v15427_v20 = vpack.c.bf16 %v10361_v9, %v10360_v21  ;;  %v10296_v21 = vld [vmem:[#allocation3 + $0x1c1] sm:$0xff]  ;;  %v10297_v9 = vld [vmem:[#allocation3 + $0x1c9] sm:$0xff] }
 0x548   : > { %14451 = vmatprep.mubr.f32.mxu0 %v19075_v51  ;;  %15414 = vmatpush3.bf16.msra.mxu0 %v15411_v59  ;;  %v10284_v59 = vld [vmem:[#allocation3 + $0xa1] sm:$0xff]  ;;  %v10290_v51 = vld [vmem:[#allocation3 + $0x131] sm:$0xff] }
 0x549   : > { %15416 = vmatprep.subr.bf16.mxu0 %v15415_v33 }
 0x54b   : > { %14452 = vmatmul.mubr.f32.gmra.mrb[40].mxu0 %v18462_v63  ;;  %v19081_v63 = vld [vmem:[#allocation30_spill] sm:$0xff] }
 0x54c   : > { %14454 = vmatprep.mubr.f32.mxu0 %v19076_v17  ;;  %15418 = vmatpush3.bf16.msra.mxu0 %v15415_v33  ;;  %v10287_v33 = vld [vmem:[#allocation3 + $0xd9] sm:$0xff]  ;;  %v10294_v17 = vld [vmem:[#allocation3 + $0x191] sm:$0xff] }
 0x54d   : > { %15420 = vmatprep.subr.bf16.mxu0 %v15419_v48 }
 0x54f   : > { %14455 = vmatmul.mubr.f32.gmra.mrb[42].mxu0 %v19077_v39  ;;  %v10298_v39 = vld [vmem:[#allocation3 + $0x1f1] sm:$0xff] }
 0x550   : > { %14457 = vmatprep.mubr.f32.mxu0 %v19078_v27  ;;  %15422 = vmatpush3.bf16.msra.mxu0 %v15419_v48  ;;  %v10291_v48 = vld [vmem:[#allocation3 + $0x139] sm:$0xff] }
 0x551   : > { %15424 = vmatprep.subr.bf16.mxu0 %v15423_v54  ;;  %v10299_v27 = vld [vmem:[#allocation3 + $0x1f9] sm:$0xff] }
 0x553   : > { %14458 = vmatmul.mubr.f32.gmra.mrb[44].mxu0 %v19079_v56  ;;  %v10301_v56 = vld [vmem:[#allocation3 + $0x229] sm:$0xff] }
 0x554   : > { %14460 = vmatprep.mubr.f32.mxu0 %v19080_v36  ;;  %15426 = vmatpush3.bf16.msra.mxu0 %v15423_v54  ;;  %v10295_v54 = vld [vmem:[#allocation3 + $0x199] sm:$0xff]  ;;  %v10302_v36 = vld [vmem:[#allocation3 + $0x251] sm:$0xff] }
 0x555   : > { %15428 = vmatprep.subr.bf16.mxu0 %v15427_v20 }
 0x557   : > { %14461 = vmatmul.mubr.f32.gmra.mrb[46].mxu0 %v19081_v63  ;;  %v10303_v63 = vld [vmem:[#allocation3 + $0x259] sm:$0xff] }
 0x558   : > { %14463 = vmatprep.mubr.f32.mxu0 %v19082_v15  ;;  %15430 = vmatpush3.bf16.msra.mxu0 %v15427_v20  ;;  %v10300_v20 = vld [vmem:[#allocation3 + $0x221] sm:$0xff] }
 0x559   : > { %v10304_v15 = vld [vmem:[#allocation3 + $0x281] sm:$0xff] }
 0x55b   : > { %14464 = vmatmul.mubr.f32.gmra.mrb[48].mxu0 %v19083_v50  ;;  %v10305_v50 = vld [vmem:[#allocation3 + $0x289] sm:$0xff] }
 0x55c   : > { %14466 = vmatprep.mubr.f32.mxu0 %v19084_v46  ;;  %v10306_v46 = vld [vmem:[#allocation3 + $0x2b1] sm:$0xff] }
 0x55f   : > { %14467 = vmatmul.mubr.f32.gmra.mrb[50].mxu0 %v19085_v4  ;;  %v10307_v4 = vld [vmem:[#allocation3 + $0x2b9] sm:$0xff] }
 0x560   : > { %14469 = vmatprep.mubr.f32.mxu0 %v19086_v35  ;;  %v10308_v35 = vld [vmem:[#allocation3 + $0x2e1] sm:$0xff] }
 0x563   : > { %14470 = vmatmul.mubr.f32.gmra.mrb[52].mxu0 %v19087_v52  ;;  %v10309_v52 = vld [vmem:[#allocation3 + $0x2e9] sm:$0xff] }
 0x564   : > { %14472 = vmatprep.mubr.f32.mxu0 %v19088_v3  ;;  %v10312_v3 = vld [vmem:[#allocation3 + $0x341] sm:$0xff] }
 0x567   : > { %14473 = vmatmul.mubr.f32.gmra.mrb[54].mxu0 %v19089_v49  ;;  %v10313_v49 = vld [vmem:[#allocation3 + $0x349] sm:$0xff] }
 0x568   : > { %14475 = vmatprep.mubr.f32.mxu0 %v19090_v16  ;;  %v18676_v16 = vld [vmem:[%s18948_s8] ss:$0 sm:$0xff] }
 0x56b   : > { %14476 = vmatmul.mubr.f32.gmra.mrb[56].mxu0 %v19091_v31  ;;  %v18681_v31 = vld [vmem:[%s18945_s5] ss:$0 sm:$0xff] }
 0x56c   : > { %14478 = vmatprep.mubr.f32.mxu0 %v19092_v58  ;;  %v19096_v58 = vld [vmem:[#allocation40_spill] sm:$0xff] }
 0x56f   : > { %14479 = vmatmul.mubr.f32.gmra.mrb[58].mxu0 %v19093_v28  ;;  %v10801_v28 = vmul.f32 %v19096_v58, %v18676_v16 }
 0x570   : > { %14481 = vmatprep.mubr.f32.mxu0 %v19094_v42 }
 0x573   : > { %14482 = vmatmul.mubr.f32.gmra.mrb[60].mxu0 %v19095_v26 }
 0x574   : > { %14484 = vmatprep.mubr.f32.mxu0 %v16480_v13 }
 0x577   : > { %14485 = vmatmul.mubr.f32.gmra.mrb[62].mxu0 %v16480_v13  ;;  %v18695_v13 = vld [vmem:[%s19098_s6] ss:$0 sm:$0xff] }
 0x578   : > { %14519 = vmatprep.mubr.f32.mxu0 %v10282_v60 }
 0x57b   : > { %14520 = vmatmul.mubr.f32.vlgmr.msra.gmra.mrb[32].mxu0 %v10283_v40 }
 0x57c   : > { %14522 = vmatprep.mubr.f32.mxu0 %v10284_v59 }
 0x57f   : > { %14523 = vmatmul.mubr.f32.gmra.mrb[34].mxu0 %v10285_v12 }
 0x580   : > { %14525 = vmatprep.mubr.f32.mxu0 %v10286_v47  ;;  %v19099_v47 = vld [vmem:[#allocation44_spill] sm:$0xff] }
 0x583   : > { %14526 = vmatmul.mubr.f32.gmra.mrb[36].mxu0 %v10287_v33  ;;  %v10803_v33 = vmul.f32 %v19099_v47, %v18676_v16  ;;  %v10806_v47 = vmul.f32 %v18676_v16, %v18540_v2  ;;  %v10809_v2 = vmul.f32 %v18543_v5, %v18676_v16 }
 0x584   : > { %14528 = vmatprep.mubr.f32.mxu0 %v10288_v30 }
 0x587   : > { %14529 = vmatmul.mubr.f32.gmra.mrb[38].mxu0 %v10289_v32 }
 0x588   : > { %14531 = vmatprep.mubr.f32.mxu0 %v10290_v51  ;;  %v19100_v51 = vld [vmem:[#allocation45_spill] sm:$0xff] }
 0x58b   : > { %14532 = vmatmul.mubr.f32.gmra.mrb[40].mxu0 %v10291_v48  ;;  %v10802_v48 = vmul.f32 %v18676_v16, %v19100_v51 }
 0x58c   : > { %14534 = vmatprep.mubr.f32.mxu0 %v10292_v0 }
 0x58f   : > { %14535 = vmatmul.mubr.f32.gmra.mrb[42].mxu0 %v10293_v25 }
 0x590   : > { %14537 = vmatprep.mubr.f32.mxu0 %v10294_v17 }
 0x593   : > { %14538 = vmatmul.mubr.f32.gmra.mrb[44].mxu0 %v10295_v54 }
 0x594   : > { %14540 = vmatprep.mubr.f32.mxu0 %v10296_v21 }
 0x597   : > { %14541 = vmatmul.mubr.f32.gmra.mrb[46].mxu0 %v10297_v9 }
 0x598   : > { %14543 = vmatprep.mubr.f32.mxu0 %v10298_v39 }
 0x59b   : > { %14544 = vmatmul.mubr.f32.gmra.mrb[48].mxu0 %v10299_v27 }
 0x59c   : > { %14546 = vmatprep.mubr.f32.mxu0 %v10300_v20  ;;  %v19101_v20 = vld [vmem:[#allocation48_spill] sm:$0xff] }
 0x59f   : > { %14547 = vmatmul.mubr.f32.gmra.mrb[50].mxu0 %v10301_v56  ;;  %v10805_v56 = vmul.f32 %v19101_v20, %v18676_v16 }
 0x5a0   : > { %14549 = vmatprep.mubr.f32.mxu0 %v10302_v36 }
 0x5a3   : > { %14550 = vmatmul.mubr.f32.gmra.mrb[52].mxu0 %v10303_v63 }
 0x5a4   : > { %14552 = vmatprep.mubr.f32.mxu0 %v10304_v15 }
 0x5a7   : > { %14553 = vmatmul.mubr.f32.gmra.mrb[54].mxu0 %v10305_v50  ;;  %v19102_v50 = vld [vmem:[#allocation49_spill] sm:$0xff] }
 0x5a8   : > { %14555 = vmatprep.mubr.f32.mxu0 %v10306_v46  ;;  %v10804_v46 = vmul.f32 %v18676_v16, %v19102_v50 }
 0x5ab   : > { %14556 = vmatmul.mubr.f32.gmra.mrb[56].mxu0 %v10307_v4 }
 0x5ac   : > { %14558 = vmatprep.mubr.f32.mxu0 %v10308_v35 }
 0x5af   : > { %14559 = vmatmul.mubr.f32.gmra.mrb[58].mxu0 %v10309_v52 }
 0x5b0   : > { %14561 = vmatprep.mubr.f32.mxu0 %v18619_v44  ;;  %v18688_v44 = vld [vmem:[%s18949_s9] ss:$0 sm:$0xff] }
 0x5b1   : > { %v10840_v12 = vadd.f32 %v18688_v44, %v10801_v28  ;;  %v10842_v27 = vadd.f32 %v18688_v44, %v10803_v33  ;;  %v10841_v15 = vadd.f32 %v18688_v44, %v10802_v48 }
 0x5b3   : > { %14562 = vmatmul.mubr.f32.gmra.mrb[60].mxu0 %v18622_v14  ;;  %v19097_v14 = vld [vmem:[#allocation41_spill] sm:$0xff] }
 0x5b4   : > { %14564 = vmatprep.mubr.f32.mxu0 %v10312_v3  ;;  %v10800_v42 = vmul.f32 %v18676_v16, %v19097_v14 }
 0x5b6   : > { %v10839_v32 = vadd.f32 %v18688_v44, %v10800_v42  ;;  %v10844_v42 = vadd.f32 %v18688_v44, %v10805_v56 }
 0x5b7   : > { %14565 = vmatmul.mubr.f32.gmra.mrb[62].mxu0 %v10313_v49 }
 0x64e   : > { %v14521_v26 = vpop.f32.mrb[32].mxu0 }
 0x64f   : > { %v10691_v60 = vmul.f32 %v14521_v26, %v18681_v31  ;;  %v10428_v40 = vpop.f32.mrb[33].mxu0  ;;  %v19103_v26 = vld [vmem:[#allocation51_spill] sm:$0xff] }
 0x650   : > { %v10690_v59 = vmul.f32 %v18681_v31, %v10428_v40 }
 0x651   : > { %v10730_v30 = vadd.f32 %v18695_v13, %v10691_v60  ;;  %v10807_v60 = vmul.f32 %v19103_v26, %v18676_v16 }
 0x652   : > { %v10729_v0 = vadd.f32 %v18695_v13, %v10690_v59  ;;  %v14524_v25 = vpop.f32.mrb[34].mxu0 }
 0x653   : > { %v10872_v17 = vadd.f32 %v10840_v12, %v10730_v30  ;;  %v10693_v54 = vmul.f32 %v14524_v25, %v18681_v31  ;;  %v10438_v21 = vpop.f32.mrb[35].mxu0  ;;  %v10843_v12 = vadd.f32 %v18688_v44, %v10804_v46 }
 0x654   : > { %v10871_v9 = vadd.f32 %v10839_v32, %v10729_v0  ;;  %v10692_v39 = vmul.f32 %v18681_v31, %v10438_v21 }
 0x655   : > { %v10904_v36 = vmax.f32 %v10872_v17, 0.0  ;;  %v10732_v63 = vadd.f32 %v18695_v13, %v10693_v54  ;;  %v10846_v54 = vadd.f32 %v18688_v44, %v10807_v60 }
 0x656   : > { %v10903_v4 = vmax.f32 %v10871_v9, 0.0  ;;  %v10731_v35 = vadd.f32 %v18695_v13, %v10692_v39  ;;  %v14527_v52 = vpop.f32.mrb[36].mxu0  ;;  %v10845_v39 = vadd.f32 %v18688_v44, %v10806_v47 }
 0x657   : > { %10936 = vst [vmem:[%s18719_s19 + $0x8] sm:$0xff] %v10904_v36  ;;  %v10874_v3 = vadd.f32 %v10842_v27, %v10732_v63  ;;  %v10695_v49 = vmul.f32 %v14527_v52, %v18681_v31  ;;  %v10448_v58 = vpop.f32.mrb[37].mxu0  ;;  %v10808_v27 = vmul.f32 %v18676_v16, %v18546_v1  ;;  %v10811_v1 = vmul.f32 %v18549_v34, %v18676_v16 }
 0x658   : > { %10935 = vst [vmem:[%s18719_s19] sm:$0xff] %v10903_v4  ;;  %v10873_v28 = vadd.f32 %v10841_v15, %v10731_v35  ;;  %v10694_v14 = vmul.f32 %v18681_v31, %v10448_v58  ;;  %v10848_v4 = vadd.f32 %v18688_v44, %v10809_v2 }
 0x659   : > { %v10906_v40 = vmax.f32 %v10874_v3, 0.0  ;;  %v10734_v59 = vadd.f32 %v18695_v13, %v10695_v49  ;;  %v10847_v3 = vadd.f32 %v18688_v44, %v10808_v27  ;;  %v10810_v49 = vmul.f32 %v18676_v16, %v18552_v62 }
 0x65a   : > { %v10905_v33 = vmax.f32 %v10873_v28, 0.0  ;;  %v10733_v30 = vadd.f32 %v18695_v13, %v10694_v14  ;;  %v14530_v32 = vpop.f32.mrb[38].mxu0  ;;  %v10813_v62 = vmul.f32 %v18555_v53, %v18676_v16  ;;  %v10814_v27 = vmul.f32 %v18676_v16, %v18564_v18 }
 0x65b   : > { %10938 = vst [vmem:[%s18719_s19 + $0x18] sm:$0xff] %v10906_v40  ;;  %v10876_v51 = vadd.f32 %v10844_v42, %v10734_v59  ;;  %v10697_v48 = vmul.f32 %v14530_v32, %v18681_v31  ;;  %v10458_v0 = vpop.f32.mrb[39].mxu0  ;;  %v10850_v59 = vadd.f32 %v18688_v44, %v10811_v1  ;;  %v10817_v18 = vmul.f32 %v18567_v10, %v18676_v16 }
 0x65c   : > { %10937 = vst [vmem:[%s18719_s19 + $0x10] sm:$0xff] %v10905_v33  ;;  %v10875_v25 = vadd.f32 %v10843_v12, %v10733_v30  ;;  %v10696_v17 = vmul.f32 %v18681_v31, %v10458_v0  ;;  %v10849_v33 = vadd.f32 %v18688_v44, %v10810_v49  ;;  %v10812_v30 = vmul.f32 %v18676_v16, %v18558_v22 }
 0x65d   : > { %v10908_v21 = vmax.f32 %v10876_v51, 0.0  ;;  %v10736_v9 = vadd.f32 %v18695_v13, %v10697_v48  ;;  %v10852_v2 = vadd.f32 %v18688_v44, %v10813_v62  ;;  %v10815_v22 = vmul.f32 %v18561_v55, %v18676_v16 }
 0x65e   : > { %v10907_v20 = vmax.f32 %v10875_v25, 0.0  ;;  %v10735_v56 = vadd.f32 %v18695_v13, %v10696_v17  ;;  %v14533_v36 = vpop.f32.mrb[40].mxu0  ;;  %v10818_v62 = vmul.f32 %v18676_v16, %v18576_v43  ;;  %v10821_v43 = vmul.f32 %v18579_v41, %v18676_v16 }
 0x65f   : > { %10940 = vst [vmem:[%s18719_s19 + $0x28] sm:$0xff] %v10908_v21  ;;  %v10878_v63 = vadd.f32 %v10846_v54, %v10736_v9  ;;  %v10699_v15 = vmul.f32 %v14533_v36, %v18681_v31  ;;  %v10468_v50 = vpop.f32.mrb[41].mxu0 }
 0x660   : > { %10939 = vst [vmem:[%s18719_s19 + $0x20] sm:$0xff] %v10907_v20  ;;  %v10877_v5 = vadd.f32 %v10845_v39, %v10735_v56  ;;  %v10698_v46 = vmul.f32 %v18681_v31, %v10468_v50  ;;  %v10851_v39 = vadd.f32 %v18688_v44, %v10812_v30 }
 0x661   : > { %v10910_v35 = vmax.f32 %v10878_v63, 0.0  ;;  %v10738_v52 = vadd.f32 %v18695_v13, %v10699_v15 }
 0x662   : > { %v10909_v58 = vmax.f32 %v10877_v5, 0.0  ;;  %v10737_v28 = vadd.f32 %v18695_v13, %v10698_v46  ;;  %v14536_v14 = vpop.f32.mrb[42].mxu0  ;;  %v10854_v46 = vadd.f32 %v18688_v44, %v10815_v22 }
 0x663   : > { %10942 = vst [vmem:[%s18719_s19 + $0x38] sm:$0xff] %v10910_v35  ;;  %v10880_v42 = vadd.f32 %v10848_v4, %v10738_v52  ;;  %v10701_v26 = vmul.f32 %v14536_v14, %v18681_v31  ;;  %v10478_v60 = vpop.f32.mrb[43].mxu0  ;;  %v10853_v35 = vadd.f32 %v18688_v44, %v10814_v27  ;;  %v10816_v52 = vmul.f32 %v18676_v16, %v18570_v57 }
 0x664   : > { %10941 = vst [vmem:[%s18719_s19 + $0x30] sm:$0xff] %v10909_v58  ;;  %v10879_v34 = vadd.f32 %v10847_v3, %v10737_v28  ;;  %v10700_v40 = vmul.f32 %v18681_v31, %v10478_v60  ;;  %v10856_v60 = vadd.f32 %v18688_v44, %v10817_v18  ;;  %v10819_v57 = vmul.f32 %v18573_v38, %v18676_v16 }
 0x665   : > { %v10912_v12 = vmax.f32 %v10880_v42, 0.0  ;;  %v10740_v47 = vadd.f32 %v18695_v13, %v10701_v26 }
 0x666   : > { %v10911_v32 = vmax.f32 %v10879_v34, 0.0  ;;  %v10739_v51 = vadd.f32 %v18695_v13, %v10700_v40  ;;  %v14539_v48 = vpop.f32.mrb[44].mxu0 }
 0x667   : > { %10944 = vst [vmem:[%s18719_s19 + $0x48] sm:$0xff] %v10912_v12  ;;  %v10882_v0 = vadd.f32 %v10850_v59, %v10740_v47  ;;  %v10703_v25 = vmul.f32 %v14539_v48, %v18681_v31  ;;  %v10488_v17 = vpop.f32.mrb[45].mxu0  ;;  %v10855_v59 = vadd.f32 %v18688_v44, %v10816_v52 }
 0x668   : > { %10943 = vst [vmem:[%s18719_s19 + $0x40] sm:$0xff] %v10911_v32  ;;  %v10881_v53 = vadd.f32 %v10849_v33, %v10739_v51  ;;  %v10702_v54 = vmul.f32 %v18681_v31, %v10488_v17 }
 0x669   : > { %v10914_v21 = vmax.f32 %v10882_v0, 0.0  ;;  %v10742_v9 = vadd.f32 %v18695_v13, %v10703_v25  ;;  %v10858_v0 = vadd.f32 %v18688_v44, %v10819_v57 }
 0x66a   : > { %v10913_v20 = vmax.f32 %v10881_v53, 0.0  ;;  %v10741_v56 = vadd.f32 %v18695_v13, %v10702_v54  ;;  %v14542_v36 = vpop.f32.mrb[46].mxu0  ;;  %v10857_v53 = vadd.f32 %v18688_v44, %v10818_v62  ;;  %v10820_v54 = vmul.f32 %v18676_v16, %v18582_v6 }
 0x66b   : > { %10946 = vst [vmem:[%s18719_s19 + $0x58] sm:$0xff] %v10914_v21  ;;  %v10884_v63 = vadd.f32 %v10852_v2, %v10742_v9  ;;  %v10705_v15 = vmul.f32 %v14542_v36, %v18681_v31  ;;  %v10498_v50 = vpop.f32.mrb[47].mxu0  ;;  %v10823_v6 = vmul.f32 %v18585_v7, %v18676_v16 }
 0x66c   : > { %10945 = vst [vmem:[%s18719_s19 + $0x50] sm:$0xff] %v10913_v20  ;;  %v10883_v55 = vadd.f32 %v10851_v39, %v10741_v56  ;;  %v10704_v5 = vmul.f32 %v18681_v31, %v10498_v50  ;;  %v10860_v56 = vadd.f32 %v18688_v44, %v10821_v43  ;;  %v10822_v50 = vmul.f32 %v18676_v16, %v18588_v23 }
 0x66d   : > { %v10916_v4 = vmax.f32 %v10884_v63, 0.0  ;;  %v10744_v1 = vadd.f32 %v18695_v13, %v10705_v15  ;;  %v10859_v15 = vadd.f32 %v18688_v44, %v10820_v54  ;;  %v10862_v52 = vadd.f32 %v18688_v44, %v10823_v6 }
 0x66e   : > { %v10915_v3 = vmax.f32 %v10883_v55, 0.0  ;;  %v10743_v49 = vadd.f32 %v18695_v13, %v10704_v5  ;;  %v14545_v58 = vpop.f32.mrb[48].mxu0  ;;  %v10825_v23 = vmul.f32 %v18591_v45, %v18676_v16  ;;  %v10828_v54 = vmul.f32 %v18676_v16, %v18606_v19 }
 0x66f   : > { %10948 = vst [vmem:[%s18719_s19 + $0x68] sm:$0xff] %v10916_v4  ;;  %v10886_v28 = vadd.f32 %v10854_v46, %v10744_v1  ;;  %v10707_v14 = vmul.f32 %v14545_v58, %v18681_v31  ;;  %v10508_v42 = vpop.f32.mrb[49].mxu0  ;;  %v10861_v58 = vadd.f32 %v18688_v44, %v10822_v50  ;;  %v10831_v19 = vmul.f32 %v18609_v29, %v18676_v16 }
 0x670   : > { %10947 = vst [vmem:[%s18719_s19 + $0x60] sm:$0xff] %v10915_v3  ;;  %v10885_v10 = vadd.f32 %v10853_v35, %v10743_v49  ;;  %v10706_v26 = vmul.f32 %v18681_v31, %v10508_v42 }
 0x671   : > { %v10918_v34 = vmax.f32 %v10886_v28, 0.0  ;;  %v10746_v40 = vadd.f32 %v18695_v13, %v10707_v14  ;;  %v10824_v28 = vmul.f32 %v18676_v16, %v18594_v11  ;;  %v10827_v11 = vmul.f32 %v18597_v8, %v18676_v16 }
 0x672   : > { %v10917_v12 = vmax.f32 %v10885_v10, 0.0  ;;  %v10745_v47 = vadd.f32 %v18695_v13, %v10706_v26  ;;  %v14548_v33 = vpop.f32.mrb[50].mxu0 }
 0x673   : > { %10950 = vst [vmem:[%s18719_s19 + $0x78] sm:$0xff] %v10918_v34  ;;  %v10888_v30 = vadd.f32 %v10856_v60, %v10746_v40  ;;  %v10709_v32 = vmul.f32 %v14548_v33, %v18681_v31  ;;  %v10518_v51 = vpop.f32.mrb[51].mxu0  ;;  %v10864_v40 = vadd.f32 %v18688_v44, %v10825_v23  ;;  %v10866_v43 = vadd.f32 %v18688_v44, %v10827_v11 }
 0x674   : > { %10949 = vst [vmem:[%s18719_s19 + $0x70] sm:$0xff] %v10917_v12  ;;  %v10887_v38 = vadd.f32 %v10855_v59, %v10745_v47  ;;  %v10708_v48 = vmul.f32 %v18681_v31, %v10518_v51  ;;  %v10863_v12 = vadd.f32 %v18688_v44, %v10824_v28  ;;  %v10826_v47 = vmul.f32 %v18676_v16, %v18600_v24 }
 0x675   : > { %v10920_v25 = vmax.f32 %v10888_v30, 0.0  ;;  %v10748_v17 = vadd.f32 %v18695_v13, %v10709_v32  ;;  %v10829_v24 = vmul.f32 %v18603_v37, %v18676_v16 }
 0x676   : > { %v10919_v2 = vmax.f32 %v10887_v38, 0.0  ;;  %v10747_v22 = vadd.f32 %v18695_v13, %v10708_v48  ;;  %v14551_v21 = vpop.f32.mrb[52].mxu0 }
 0x677   : > { %10952 = vst [vmem:[%s18719_s19 + $0x88] sm:$0xff] %v10920_v25  ;;  %v10890_v9 = vadd.f32 %v10858_v0, %v10748_v17  ;;  %v10711_v39 = vmul.f32 %v14551_v21, %v18681_v31  ;;  %v10528_v27 = vpop.f32.mrb[53].mxu0 }
 0x678   : > { %10951 = vst [vmem:[%s18719_s19 + $0x80] sm:$0xff] %v10919_v2  ;;  %v10889_v41 = vadd.f32 %v10857_v53, %v10747_v22  ;;  %v10710_v20 = vmul.f32 %v18681_v31, %v10528_v27  ;;  %v10865_v53 = vadd.f32 %v18688_v44, %v10826_v47 }
 0x679   : > { %v10922_v36 = vmax.f32 %v10890_v9, 0.0  ;;  %v10750_v63 = vadd.f32 %v18695_v13, %v10711_v39 }
 0x67a   : > { %v10921_v55 = vmax.f32 %v10889_v41, 0.0  ;;  %v10749_v5 = vadd.f32 %v18695_v13, %v10710_v20  ;;  %v14554_v46 = vpop.f32.mrb[54].mxu0  ;;  %v10868_v20 = vadd.f32 %v18688_v44, %v10829_v24 }
 0x67b   : > { %10954 = vst [vmem:[%s18719_s19 + $0x98] sm:$0xff] %v10922_v36  ;;  %v10892_v18 = vadd.f32 %v10860_v56, %v10750_v63  ;;  %v10713_v4 = vmul.f32 %v14554_v46, %v18681_v31  ;;  %v10538_v1 = vpop.f32.mrb[55].mxu0  ;;  %v10867_v36 = vadd.f32 %v18688_v44, %v10828_v54  ;;  %v10830_v63 = vmul.f32 %v18676_v16, %v18612_v61 }
 0x67c   : > { %10953 = vst [vmem:[%s18719_s19 + $0x90] sm:$0xff] %v10921_v55  ;;  %v10891_v7 = vadd.f32 %v10859_v15, %v10749_v5  ;;  %v10712_v35 = vmul.f32 %v18681_v31, %v10538_v1  ;;  %v10870_v1 = vadd.f32 %v18688_v44, %v10831_v19 }
 0x67d   : > { %v10924_v3 = vmax.f32 %v10892_v18, 0.0  ;;  %v10752_v49 = vadd.f32 %v18695_v13, %v10713_v4 }
 0x67e   : > { %v10923_v14 = vmax.f32 %v10891_v7, 0.0  ;;  %v10751_v42 = vadd.f32 %v18695_v13, %v10712_v35  ;;  %v14557_v10 = vpop.f32.mrb[56].mxu0  ;;  %v10869_v7 = vadd.f32 %v18688_v44, %v10830_v63 }
 0x67f   : > { %10956 = vst [vmem:[%s18719_s19 + $0xa8] sm:$0xff] %v10924_v3  ;;  %v10894_v26 = vadd.f32 %v10862_v52, %v10752_v49  ;;  %v10715_v60 = vmul.f32 %v14557_v10, %v18681_v31  ;;  %v10548_v57 = vpop.f32.mrb[57].mxu0 }
 0x680   : > { %10955 = vst [vmem:[%s18719_s19 + $0xa0] sm:$0xff] %v10923_v14  ;;  %v10893_v45 = vadd.f32 %v10861_v58, %v10751_v42  ;;  %v10714_v34 = vmul.f32 %v18681_v31, %v10548_v57 }
 0x681   : > { %v10926_v59 = vmax.f32 %v10894_v26, 0.0  ;;  %v10754_v62 = vadd.f32 %v18695_v13, %v10715_v60 }
 0x682   : > { %v10925_v33 = vmax.f32 %v10893_v45, 0.0  ;;  %v10753_v30 = vadd.f32 %v18695_v13, %v10714_v34  ;;  %v14560_v32 = vpop.f32.mrb[58].mxu0 }
 0x683   : > { %10958 = vst [vmem:[%s18719_s19 + $0xb8] sm:$0xff] %v10926_v59  ;;  %v10896_v51 = vadd.f32 %v10864_v40, %v10754_v62  ;;  %v10717_v38 = vmul.f32 %v14560_v32, %v18681_v31  ;;  %v10558_v48 = vpop.f32.mrb[59].mxu0 }
 0x684   : > { %10957 = vst [vmem:[%s18719_s19 + $0xb0] sm:$0xff] %v10925_v33  ;;  %v10895_v8 = vadd.f32 %v10863_v12, %v10753_v30  ;;  %v10716_v0 = vmul.f32 %v18681_v31, %v10558_v48 }
 0x685   : > { %v10928_v25 = vmax.f32 %v10896_v51, 0.0  ;;  %v10756_v17 = vadd.f32 %v18695_v13, %v10717_v38 }
 0x686   : > { %v10927_v2 = vmax.f32 %v10895_v8, 0.0  ;;  %v10755_v22 = vadd.f32 %v18695_v13, %v10716_v0  ;;  %v14563_v21 = vpop.f32.mrb[60].mxu0 }
 0x687   : > { %10960 = vst [vmem:[%s18719_s19 + $0xc8] sm:$0xff] %v10928_v25  ;;  %v10898_v9 = vadd.f32 %v10866_v43, %v10756_v17  ;;  %v10719_v39 = vmul.f32 %v14563_v21, %v18681_v31  ;;  %v10568_v27 = vpop.f32.mrb[61].mxu0 }
 0x688   : > { %10959 = vst [vmem:[%s18719_s19 + $0xc0] sm:$0xff] %v10927_v2  ;;  %v10897_v37 = vadd.f32 %v10865_v53, %v10755_v22  ;;  %v10718_v41 = vmul.f32 %v18681_v31, %v10568_v27 }
 0x689   : > { %v10930_v56 = vmax.f32 %v10898_v9, 0.0  ;;  %v10758_v6 = vadd.f32 %v18695_v13, %v10719_v39 }
 0x68a   : > { %v10929_v15 = vmax.f32 %v10897_v37, 0.0  ;;  %v10757_v50 = vadd.f32 %v18695_v13, %v10718_v41  ;;  %v14566_v55 = vpop.f32.mrb[62].mxu0 }
 0x68b   : > { %10962 = vst [vmem:[%s18719_s19 + $0xd8] sm:$0xff] %v10930_v56  ;;  %v10900_v5 = vadd.f32 %v10868_v20, %v10758_v6  ;;  %v10721_v29 = vmul.f32 %v14566_v55, %v18681_v31  ;;  %v10578_v46 = vpop.f32.mrb[63].mxu0 }
 0x68c   : > { %10961 = vst [vmem:[%s18719_s19 + $0xd0] sm:$0xff] %v10929_v15  ;;  %v10899_v18 = vadd.f32 %v10867_v36, %v10757_v50  ;;  %v10720_v4 = vmul.f32 %v18681_v31, %v10578_v46 }
 0x68d   : > { %v10932_v61 = vmax.f32 %v10900_v5, 0.0  ;;  %v10760_v16 = vadd.f32 %v18695_v13, %v10721_v29 }
 0x68e   : > { %v10931_v35 = vmax.f32 %v10899_v18, 0.0  ;;  %v10759_v52 = vadd.f32 %v18695_v13, %v10720_v4 }
 0x68f   : > { %10964 = vst [vmem:[%s18719_s19 + $0xe8] sm:$0xff] %v10932_v61  ;;  %v10902_v23 = vadd.f32 %v10870_v1, %v10760_v16 }
 0x690   : > { %10963 = vst [vmem:[%s18719_s19 + $0xe0] sm:$0xff] %v10931_v35  ;;  %v10901_v31 = vadd.f32 %v10869_v7, %v10759_v52 }
 0x691   : > { %v10934_v3 = vmax.f32 %v10902_v23, 0.0 }
 0x692   : > { %v10933_v44 = vmax.f32 %v10901_v31, 0.0 }
 0x693   : > { %10966 = vst [vmem:[%s18719_s19 + $0xf8] sm:$0xff] %v10934_v3 }
 0x694   : > { %10965 = vst [vmem:[%s18719_s19 + $0xf0] sm:$0xff] %v10933_v44 }
 0x695   : > { %16608 = shalt.err (!%p16605_p4)
}
 0x696   : > { %s16609_s27 = scalar_lea.hbm %s18892_s26, 4096  ;;  %s16613_s19 = scalar_lea.hbm %s19104_s29, 8192 }
 0x697   : > { %p16610_p9 = scmp.ne.s32.totalorder %s18892_s26, %s16609_s27  ;;  %p16614_p8 = scmp.lt.u32.totalorder %s18892_s26, %s19104_s29 }
 0x698   : > { %p16615_p13 = scmp.lt.u32.totalorder %s16613_s19, %s16609_s27  ;;  %p16617_p10 = scmp.lt.u32.totalorder %s16609_s27, %s18892_s26 }
 0x699   : > { %p16611_p0 = pnand %p16610_p9, %p16890_p5 }
 0x69a   : > { %p16616_p6 = por %p16615_p13, %p16614_p8 }
 0x69b   : > { %p16612_p11 = pneg %p16611_p0 }
 0x69c   : > { %p16618_p3 = por %p16617_p10, %p16616_p6 }
 0x69e   : > { %p16619_p7 = pnand %p16618_p3, %p16612_p11 }
 0x6a0   : > { %16622 = shalt.err (!%p16619_p7)
}
 0x6a1   : > { %s16679_s11 = smov 128   ;;  %s16680_s24 = smov 8  }
 0x6a2   : > { %16229 = dma.vmem_to_hbm [thread:$0]  (%p16890_p5), %s18894_s21, 4096, %s18892_s26, %s10968_s17, %s16679_s11, %s16679_s11, %s16680_s24  }
 0x6a3 PF: > { %s19105_s12 = sld [smem:[#allocation19_spill]]  ;;  %s19106_s18 = sld [smem:[#allocation20_spill]] }
 0x6a4   : > { %p19108_p1 = scmp.ge.s32.totalorder %s16669_s16, 2 }
 0x6a9   : > { %s10996_s28 = sand.u32 1, %s19105_s12   ;;  %p19107_p12 = scmp.ne.s32.totalorder %s19106_s18, 0 }
 0x6aa   : > { %s10997_s27 = scalar_lea.sflag [#allocation8], %s10996_s28 }
 0x6ab   : > { %p16246_p2 = pnand %p19108_p1, %p19107_p12 }
 0x6ad   : > { %16652 = dma.done.wait (!%p16246_p2), %s10997_s27, 4096  }
 0x6ae   : > { %16654 = vsyncadd (!%p16246_p2), %s10997_s27, 4294963200  ;;  %s19109_s23 = smov %s16886_s13  ;;  %p25_p4 = scmp.ge.s32.totalorder %s16876_s22, 4  }
 0x6af   : > { %s19110_s13 = smov %s16661_s14  ;;  %s19111_s14 = smov %s16665_s15 }
 0x6b0   : > { %s19112_s15 = smov %s19109_s23  ;;  %s19113_s16 = smov %s16876_s22 }
 0x6b1   :  { %27 = sbr.rel (!%p25_p4) target bundleno = 10 (0xa), region = 121 }
 0x6b8   :  { %11002 = vsyncpa [#allocation7], 1 }
 0x6b9   :  { %11004 = vsyncpa [#allocation7 + $0x1], 1 }
 0x6ba   :  { %11005 = vsyncpa [#allocation10], 1 }
 0x6bb   :  { %11006 = vsyncpa [#allocation13], 1 }
 0x6bc   :  { %11007 = vsyncpa [#allocation8], 1 }
 0x6bd   :  { %11009 = vsyncpa [#allocation8 + $0x1], 1 }

</bundles_post_ra>
